<compile_context>
chip_gen: v7x
topology: tpu7x:2x2x1
jax: 0.10.0
libtpu: 0.0.40
codegen_flags: <defaults>
</compile_context>

<pallas_src>
import numpy as np
import jax
import jax.numpy as jnp
from jax.experimental import pallas as pl
from jax.experimental.pallas import tpu as pltpu


_OFF = 8     # W offset of the image interior inside the padded VMEM scratches (aligned)
_XTRA = 16   # extra scratch width; the 1-px-padded image occupies W-columns [_OFF-1, W+_OFF]


def _im2col(padded, H, W, C):
    """padded: (Nb, H+2, W+_XTRA, C) bf16 with the image interior at W-cols [_OFF, _OFF+W).

    Returns the (Nb*H*W, 9*C) bf16 im2col matrix, column-block order (dy, dx, c),
    built fully in registers (no narrow masked scratch stores, no VMEM round trip).
    """
    Nb = padded.shape[0]
    base = _OFF - 1
    cols = []
    for dy in range(3):
        rows = padded[:, dy:dy + H]                          # leading-axis slice: cheap
        for dx in range(3):
            # TODO(synk): dx = 0 / 2 starts are sublane-misaligned; replace with a
            # pltpu.roll(..., axis=-2) XLU shift once packed-bf16 sublane rotates are
            # confirmed to lower on all target chips.
            sl = rows[:, :, base + dx:base + dx + W, :]      # (Nb, H, W, C)
            cols.append(sl.reshape(Nb * H * W, C))
    return jnp.concatenate(cols, axis=-1)                    # (M, 9*C), in registers


def _double_conv_kernel(x_ref, w1_ref, b1_ref, w2_ref, b2_ref, o_ref,
                        xpad_ref, mid_ref):
    # x_ref   : (Nb, H, W, Cin)            bf16  un-padded input block
    # w1_ref  : (9*Cin, Cout)              bf16  conv1 taps, row order (dy, dx, cin)
    # b1_ref  : (1, Cout)                  f32
    # w2_ref  : (9*Cout, Cout)             bf16  conv2 taps, row order (dy, dx, c)
    # b2_ref  : (1, Cout)                  f32
    # o_ref   : (Nb, H, W, Cout)           f32
    # xpad_ref: (Nb, H+2, W+_XTRA, Cin)    bf16  padded-input scratch (interior at col 8)
    # mid_ref : (Nb, H+2, W+_XTRA, Cout)   bf16  padded conv1-output scratch
    Nb, H, W, Cin = x_ref.shape
    Cout = o_ref.shape[3]
    Wp = W + _XTRA

    # Zero only the 1-pixel border the convs actually read, with full-row / 8-wide
    # aligned stores.  Done every step: the scratch persists across grid steps, but the
    # batch axis is "parallel" and may be sharded across TensorCores (v7x), so a
    # program_id()==0 guard is not safe in general.
    # TODO(synk): guard with pl.when(pl.program_id(0) == 0) on single-TC chips (v5e/v6e).
    for ref, c in ((xpad_ref, Cin), (mid_ref, Cout)):
        zrow = jnp.zeros((Nb, 1, Wp, c), jnp.bfloat16)
        ref[:, 0:1, :, :] = zrow
        ref[:, H + 1:H + 2, :, :] = zrow
        zcol = jnp.zeros((Nb, H, 8, c), jnp.bfloat16)
        ref[:, 1:H + 1, 0:8, :] = zcol                       # covers left pad col _OFF-1
        ref[:, 1:H + 1, W + 8:Wp, :] = zcol                  # covers right pad col W+_OFF

    # ---- conv1: pad into scratch (aligned interior store), im2col (K = 9*Cin),
    #      one MXU matmul with f32 accumulation, bias, ReLU ----
    xpad_ref[:, 1:H + 1, _OFF:_OFF + W, :] = x_ref[...]
    patch1 = _im2col(xpad_ref[...], H, W, Cin)               # (M, 9*Cin) bf16
    y1 = jnp.dot(patch1, w1_ref[...], preferred_element_type=jnp.float32)
    y1 = jnp.maximum(y1 + b1_ref[...], 0.0)

    # ---- conv2: same, reading from the padded intermediate ----
    mid_ref[:, 1:H + 1, _OFF:_OFF + W, :] = (
        y1.reshape(Nb, H, W, Cout).astype(jnp.bfloat16))
    patch2 = _im2col(mid_ref[...], H, W, Cout)               # (M, 9*Cout) bf16
    y2 = jnp.dot(patch2, w2_ref[...], preferred_element_type=jnp.float32)
    y2 = jnp.maximum(y2 + b2_ref[...], 0.0)

    # TODO(synk): switch to a lane-dense (Nb, H, W*Cout) output block (last dim multiple
    # of 128) once the sublane->lane merging reshape of the matmul result is confirmed
    # to lower; it removes the lane-masked stores and shrinks the f32 result footprint.
    o_ref[...] = y2.reshape(Nb, H, W, Cout).astype(o_ref.dtype)


def _pick_block_n(n, h, w, cin, cout, vmem_budget=4 << 20):
    """Images per grid step: batch enough to amortize the ~0.35us fixed per-step cost,
    stay well inside VMEM, and keep >= 2 grid steps when there is plenty of work so
    both v7x TensorCores get a share under dimension_semantics=("parallel",)."""
    per_image = (
        2 * h * w * cin * 2                            # double-buffered bf16 input block
        + 2 * h * w * cout * 4                         # double-buffered f32 output block
        + (h + 2) * (w + _XTRA) * (cin + cout) * 2     # xpad + mid scratches (bf16)
        + h * w * 9 * (cin + cout) * 2                 # in-register im2col patches (spill bound)
    )
    bn = int(max(1, min(n, vmem_budget // max(per_image, 1))))
    if n >= 4:
        bn = min(bn, n // 2)
    while n % bn:
        bn -= 1
    return bn


def double_conv_nhwc(x_nhwc, w1_oihw, b1, w2_oihw, b2, block_n=None):
    """x_nhwc: (N, H, W, Cin) f32; weights in PyTorch OIHW layout.  Returns NHWC f32."""
    N, H, W, Cin = x_nhwc.shape
    Cout = w1_oihw.shape[0]
    if block_n is None:
        block_n = _pick_block_n(N, H, W, Cin, Cout)
    assert N % block_n == 0, (N, block_n)

    # Glue: bf16 input (halves the input DMA; the kernel computes on bf16 anyway); no
    # wrapper-side spatial pad -- padding happens inside the kernel's VMEM scratch.
    x_bf16 = x_nhwc.astype(jnp.bfloat16)
    # Repack weights as (9*C, Cout) bf16 matrices with row order (dy, dx, c) to match
    # the kernel's im2col column order.
    w1_mat = jnp.transpose(w1_oihw, (2, 3, 1, 0)).reshape(9 * Cin, Cout).astype(jnp.bfloat16)
    w2_mat = jnp.transpose(w2_oihw, (2, 3, 1, 0)).reshape(9 * Cout, Cout).astype(jnp.bfloat16)

    return pl.pallas_call(
        _double_conv_kernel,
        out_shape=jax.ShapeDtypeStruct((N, H, W, Cout), jnp.float32),
        grid_spec=pltpu.PrefetchScalarGridSpec(
            num_scalar_prefetch=0,
            grid=(N // block_n,),
            in_specs=[
                pl.BlockSpec((block_n, H, W, Cin), lambda n: (n, 0, 0, 0)),
                pl.BlockSpec((9 * Cin, Cout), lambda n: (0, 0)),
                pl.BlockSpec((1, Cout), lambda n: (0, 0)),
                pl.BlockSpec((9 * Cout, Cout), lambda n: (0, 0)),
                pl.BlockSpec((1, Cout), lambda n: (0, 0)),
            ],
            out_specs=pl.BlockSpec((block_n, H, W, Cout), lambda n: (n, 0, 0, 0)),
            scratch_shapes=[
                pltpu.VMEM((block_n, H + 2, W + _XTRA, Cin), jnp.bfloat16),
                pltpu.VMEM((block_n, H + 2, W + _XTRA, Cout), jnp.bfloat16),
            ],
        ),
        compiler_params=pltpu.CompilerParams(
            dimension_semantics=("parallel",),
            vmem_limit_bytes=32 * 1024 * 1024,
        ),
    )(x_bf16, w1_mat,
      b1.reshape(1, Cout).astype(jnp.float32),
      w2_mat,
      b2.reshape(1, Cout).astype(jnp.float32))


def double_conv_nchw(x_nchw, w1, b1, w2, b2):
    """Matches DoubleConv.forward on NCHW input (PyTorch convention)."""
    x_nhwc = jnp.transpose(x_nchw, (0, 2, 3, 1))
    y_nhwc = double_conv_nhwc(x_nhwc, w1, b1, w2, b2)
    return jnp.transpose(y_nhwc, (0, 3, 1, 2))


def _ref_double_conv_nchw(x, w1, b1, w2, b2):
    dn = ('NCHW', 'OIHW', 'NCHW')
    y = jax.lax.conv_general_dilated(x, w1, (1, 1), ((1, 1), (1, 1)),
                                     dimension_numbers=dn)
    y = jnp.maximum(y + b1[None, :, None, None], 0.0)
    y = jax.lax.conv_general_dilated(y, w2, (1, 1), ((1, 1), (1, 1)),
                                     dimension_numbers=dn)
    y = jnp.maximum(y + b2[None, :, None, None], 0.0)
    return y


if __name__ == "__main__":
    N, in_ch, out_ch, H, W = 2, 4, 8, 16, 16

    key = jax.random.PRNGKey(0)
    kx, kw1, kb1, kw2, kb2 = jax.random.split(key, 5)

    x = jax.random.normal(kx, (N, in_ch, H, W), dtype=jnp.float32)

    # Deterministic parameter init (PyTorch-style uniform bounds), OIHW weights.
    bound1 = 1.0 / np.sqrt(in_ch * 9)
    w1 = jax.random.uniform(kw1, (out_ch, in_ch, 3, 3), jnp.float32,
                            minval=-bound1, maxval=bound1)
    b1 = jax.random.uniform(kb1, (out_ch,), jnp.float32,
                            minval=-bound1, maxval=bound1)
    bound2 = 1.0 / np.sqrt(out_ch * 9)
    w2 = jax.random.uniform(kw2, (out_ch, out_ch, 3, 3), jnp.float32,
                            minval=-bound2, maxval=bound2)
    b2 = jax.random.uniform(kb2, (out_ch,), jnp.float32,
                            minval=-bound2, maxval=bound2)

    out = jax.block_until_ready(double_conv_nchw(x, w1, b1, w2, b2))
    ref = jax.block_until_ready(_ref_double_conv_nchw(x, w1, b1, w2, b2))

    # bf16 matmul operands / bf16 input with f32 accumulation: looser tolerance than pure f32.
    np.testing.assert_allclose(np.asarray(out), np.asarray(ref),
                               rtol=2e-2, atol=2e-2)

    print("KERNEL_OK")
</pallas_src>

<mosaic_0001>
module attributes {stable_mosaic.version = 11 : i64} {
  func.func @_double_conv_kernel(%arg0: i32, %arg1: memref<2x16x16x4xbf16, #tpu.memory_space<vmem>>, %arg2: memref<36x8xbf16, #tpu.memory_space<vmem>>, %arg3: memref<1x8xf32, #tpu.memory_space<vmem>>, %arg4: memref<72x8xbf16, #tpu.memory_space<vmem>>, %arg5: memref<1x8xf32, #tpu.memory_space<vmem>>, %arg6: memref<2x16x16x8xf32, #tpu.memory_space<vmem>>, %arg7: memref<2x18x32x4xbf16, #tpu.memory_space<vmem>>, %arg8: memref<2x18x32x8xbf16, #tpu.memory_space<vmem>>) attributes {dimension_semantics = [#tpu.dimension_semantics<parallel>], iteration_bounds = array<i64: 1>, scalar_prefetch = 0 : i64, scratch_operands = 2 : i64, tpu.core_type = #tpu.core_type<tc>, window_params = [{transform_indices = @transform_0, window_bounds = array<i64: 2, 16, 16, 4>}, {pipeline_mode = #tpu.pipeline_mode<synchronous>, transform_indices = @transform_1, window_bounds = array<i64: 36, 8>}, {pipeline_mode = #tpu.pipeline_mode<synchronous>, transform_indices = @transform_2, window_bounds = array<i64: 1, 8>}, {pipeline_mode = #tpu.pipeline_mode<synchronous>, transform_indices = @transform_3, window_bounds = array<i64: 72, 8>}, {pipeline_mode = #tpu.pipeline_mode<synchronous>, transform_indices = @transform_4, window_bounds = array<i64: 1, 8>}, {transform_indices = @transform_5, window_bounds = array<i64: 2, 16, 16, 8>}]} {
    %cst = arith.constant 0.000000e+00 : bf16
    %0 = vector.broadcast %cst : bf16 to vector<2x1x32x4xbf16>
    %c0 = arith.constant 0 : index
    %c0_0 = arith.constant 0 : index
    %c0_1 = arith.constant 0 : index
    %c0_2 = arith.constant 0 : index
    %1 = vector.load %arg7[%c0, %c0_0, %c0_1, %c0_2] : memref<2x18x32x4xbf16, #tpu.memory_space<vmem>>, vector<2x1x32x4xbf16>
    tpu.vector_store %arg7[%c0, %c0_0, %c0_1, %c0_2], %0 {strides = array<i32>} : memref<2x18x32x4xbf16, #tpu.memory_space<vmem>>, vector<2x1x32x4xbf16>,
    %c0_3 = arith.constant 0 : index
    %c17 = arith.constant 17 : index
    %c0_4 = arith.constant 0 : index
    %c0_5 = arith.constant 0 : index
    %2 = vector.load %arg7[%c0_3, %c17, %c0_4, %c0_5] : memref<2x18x32x4xbf16, #tpu.memory_space<vmem>>, vector<2x1x32x4xbf16>
    tpu.vector_store %arg7[%c0_3, %c17, %c0_4, %c0_5], %0 {strides = array<i32>} : memref<2x18x32x4xbf16, #tpu.memory_space<vmem>>, vector<2x1x32x4xbf16>,
    %cst_6 = arith.constant 0.000000e+00 : bf16
    %3 = vector.broadcast %cst_6 : bf16 to vector<2x16x8x4xbf16>
    %c0_7 = arith.constant 0 : index
    %c1 = arith.constant 1 : index
    %c0_8 = arith.constant 0 : index
    %c0_9 = arith.constant 0 : index
    %4 = vector.load %arg7[%c0_7, %c1, %c0_8, %c0_9] : memref<2x18x32x4xbf16, #tpu.memory_space<vmem>>, vector<2x16x8x4xbf16>
    tpu.vector_store %arg7[%c0_7, %c1, %c0_8, %c0_9], %3 {strides = array<i32>} : memref<2x18x32x4xbf16, #tpu.memory_space<vmem>>, vector<2x16x8x4xbf16>,
    %c0_10 = arith.constant 0 : index
    %c1_11 = arith.constant 1 : index
    %c24 = arith.constant 24 : index
    %c0_12 = arith.constant 0 : index
    %5 = vector.load %arg7[%c0_10, %c1_11, %c24, %c0_12] : memref<2x18x32x4xbf16, #tpu.memory_space<vmem>>, vector<2x16x8x4xbf16>
    tpu.vector_store %arg7[%c0_10, %c1_11, %c24, %c0_12], %3 {strides = array<i32>} : memref<2x18x32x4xbf16, #tpu.memory_space<vmem>>, vector<2x16x8x4xbf16>,
    %cst_13 = arith.constant 0.000000e+00 : bf16
    %6 = vector.broadcast %cst_13 : bf16 to vector<2x1x32x8xbf16>
    %c0_14 = arith.constant 0 : index
    %c0_15 = arith.constant 0 : index
    %c0_16 = arith.constant 0 : index
    %c0_17 = arith.constant 0 : index
    %7 = vector.load %arg8[%c0_14, %c0_15, %c0_16, %c0_17] : memref<2x18x32x8xbf16, #tpu.memory_space<vmem>>, vector<2x1x32x8xbf16>
    tpu.vector_store %arg8[%c0_14, %c0_15, %c0_16, %c0_17], %6 {strides = array<i32>} : memref<2x18x32x8xbf16, #tpu.memory_space<vmem>>, vector<2x1x32x8xbf16>,
    %c0_18 = arith.constant 0 : index
    %c17_19 = arith.constant 17 : index
    %c0_20 = arith.constant 0 : index
    %c0_21 = arith.constant 0 : index
    %8 = vector.load %arg8[%c0_18, %c17_19, %c0_20, %c0_21] : memref<2x18x32x8xbf16, #tpu.memory_space<vmem>>, vector<2x1x32x8xbf16>
    tpu.vector_store %arg8[%c0_18, %c17_19, %c0_20, %c0_21], %6 {strides = array<i32>} : memref<2x18x32x8xbf16, #tpu.memory_space<vmem>>, vector<2x1x32x8xbf16>,
    %cst_22 = arith.constant 0.000000e+00 : bf16
    %9 = vector.broadcast %cst_22 : bf16 to vector<2x16x8x8xbf16>
    %c0_23 = arith.constant 0 : index
    %c1_24 = arith.constant 1 : index
    %c0_25 = arith.constant 0 : index
    %c0_26 = arith.constant 0 : index
    %10 = vector.load %arg8[%c0_23, %c1_24, %c0_25, %c0_26] : memref<2x18x32x8xbf16, #tpu.memory_space<vmem>>, vector<2x16x8x8xbf16>
    tpu.vector_store %arg8[%c0_23, %c1_24, %c0_25, %c0_26], %9 {strides = array<i32>} : memref<2x18x32x8xbf16, #tpu.memory_space<vmem>>, vector<2x16x8x8xbf16>,
    %c0_27 = arith.constant 0 : index
    %c1_28 = arith.constant 1 : index
    %c24_29 = arith.constant 24 : index
    %c0_30 = arith.constant 0 : index
    %11 = vector.load %arg8[%c0_27, %c1_28, %c24_29, %c0_30] : memref<2x18x32x8xbf16, #tpu.memory_space<vmem>>, vector<2x16x8x8xbf16>
    tpu.vector_store %arg8[%c0_27, %c1_28, %c24_29, %c0_30], %9 {strides = array<i32>} : memref<2x18x32x8xbf16, #tpu.memory_space<vmem>>, vector<2x16x8x8xbf16>,
    %c0_31 = arith.constant 0 : index
    %c0_32 = arith.constant 0 : index
    %c0_33 = arith.constant 0 : index
    %c0_34 = arith.constant 0 : index
    %12 = vector.load %arg1[%c0_31, %c0_32, %c0_33, %c0_34] : memref<2x16x16x4xbf16, #tpu.memory_space<vmem>>, vector<2x16x16x4xbf16>
    %c0_35 = arith.constant 0 : index
    %c1_36 = arith.constant 1 : index
    %c8 = arith.constant 8 : index
    %c0_37 = arith.constant 0 : index
    %13 = vector.load %arg7[%c0_35, %c1_36, %c8, %c0_37] : memref<2x18x32x4xbf16, #tpu.memory_space<vmem>>, vector<2x16x16x4xbf16>
    tpu.vector_store %arg7[%c0_35, %c1_36, %c8, %c0_37], %12 {strides = array<i32>} : memref<2x18x32x4xbf16, #tpu.memory_space<vmem>>, vector<2x16x16x4xbf16>,
    %c0_38 = arith.constant 0 : index
    %c0_39 = arith.constant 0 : index
    %c0_40 = arith.constant 0 : index
    %c0_41 = arith.constant 0 : index
    %14 = vector.load %arg7[%c0_38, %c0_39, %c0_40, %c0_41] : memref<2x18x32x4xbf16, #tpu.memory_space<vmem>>, vector<2x18x32x4xbf16>
    %15 = vector.extract_strided_slice %14 {offsets = [0, 0, 0, 0], sizes = [2, 16, 32, 4], strides = [1, 1, 1, 1]} : vector<2x18x32x4xbf16> to vector<2x16x32x4xbf16>
    %16 = vector.extract_strided_slice %15 {offsets = [0, 0, 7, 0], sizes = [2, 16, 16, 4], strides = [1, 1, 1, 1]} : vector<2x16x32x4xbf16> to vector<2x16x16x4xbf16>
    %17 = vector.shape_cast %16 : vector<2x16x16x4xbf16> to vector<512x4xbf16>
    %18 = vector.extract_strided_slice %15 {offsets = [0, 0, 8, 0], sizes = [2, 16, 16, 4], strides = [1, 1, 1, 1]} : vector<2x16x32x4xbf16> to vector<2x16x16x4xbf16>
    %19 = vector.shape_cast %18 : vector<2x16x16x4xbf16> to vector<512x4xbf16>
    %20 = vector.extract_strided_slice %15 {offsets = [0, 0, 9, 0], sizes = [2, 16, 16, 4], strides = [1, 1, 1, 1]} : vector<2x16x32x4xbf16> to vector<2x16x16x4xbf16>
    %21 = vector.shape_cast %20 : vector<2x16x16x4xbf16> to vector<512x4xbf16>
    %22 = vector.extract_strided_slice %14 {offsets = [0, 1, 0, 0], sizes = [2, 16, 32, 4], strides = [1, 1, 1, 1]} : vector<2x18x32x4xbf16> to vector<2x16x32x4xbf16>
    %23 = vector.extract_strided_slice %22 {offsets = [0, 0, 7, 0], sizes = [2, 16, 16, 4], strides = [1, 1, 1, 1]} : vector<2x16x32x4xbf16> to vector<2x16x16x4xbf16>
    %24 = vector.shape_cast %23 : vector<2x16x16x4xbf16> to vector<512x4xbf16>
    %25 = vector.extract_strided_slice %22 {offsets = [0, 0, 8, 0], sizes = [2, 16, 16, 4], strides = [1, 1, 1, 1]} : vector<2x16x32x4xbf16> to vector<2x16x16x4xbf16>
    %26 = vector.shape_cast %25 : vector<2x16x16x4xbf16> to vector<512x4xbf16>
    %27 = vector.extract_strided_slice %22 {offsets = [0, 0, 9, 0], sizes = [2, 16, 16, 4], strides = [1, 1, 1, 1]} : vector<2x16x32x4xbf16> to vector<2x16x16x4xbf16>
    %28 = vector.shape_cast %27 : vector<2x16x16x4xbf16> to vector<512x4xbf16>
    %29 = vector.extract_strided_slice %14 {offsets = [0, 2, 0, 0], sizes = [2, 16, 32, 4], strides = [1, 1, 1, 1]} : vector<2x18x32x4xbf16> to vector<2x16x32x4xbf16>
    %30 = vector.extract_strided_slice %29 {offsets = [0, 0, 7, 0], sizes = [2, 16, 16, 4], strides = [1, 1, 1, 1]} : vector<2x16x32x4xbf16> to vector<2x16x16x4xbf16>
    %31 = vector.shape_cast %30 : vector<2x16x16x4xbf16> to vector<512x4xbf16>
    %32 = vector.extract_strided_slice %29 {offsets = [0, 0, 8, 0], sizes = [2, 16, 16, 4], strides = [1, 1, 1, 1]} : vector<2x16x32x4xbf16> to vector<2x16x16x4xbf16>
    %33 = vector.shape_cast %32 : vector<2x16x16x4xbf16> to vector<512x4xbf16>
    %34 = vector.extract_strided_slice %29 {offsets = [0, 0, 9, 0], sizes = [2, 16, 16, 4], strides = [1, 1, 1, 1]} : vector<2x16x32x4xbf16> to vector<2x16x16x4xbf16>
    %35 = vector.shape_cast %34 : vector<2x16x16x4xbf16> to vector<512x4xbf16>
    %36 = tpu.concatenate %17, %19, %21, %24, %26, %28, %31, %33, %35 in 1 : vector<512x4xbf16>, vector<512x4xbf16>, vector<512x4xbf16>, vector<512x4xbf16>, vector<512x4xbf16>, vector<512x4xbf16>, vector<512x4xbf16>, vector<512x4xbf16>, vector<512x4xbf16> -> vector<512x36xbf16>
    %c0_42 = arith.constant 0 : index
    %c0_43 = arith.constant 0 : index
    %37 = vector.load %arg2[%c0_42, %c0_43] : memref<36x8xbf16, #tpu.memory_space<vmem>>, vector<36x8xbf16>
    %cst_44 = arith.constant dense<0.000000e+00> : vector<512x8xf32>
    %38 = tpu.matmul %36, %37, %cst_44 {dimension_numbers = #tpu.dot_dimension_numbers<[1], [0], [0], [1], [0, 0, 1, 1], [], []>} : vector<512x36xbf16>, vector<36x8xbf16>, vector<512x8xf32> -> vector<512x8xf32>
    %c0_45 = arith.constant 0 : index
    %c0_46 = arith.constant 0 : index
    %39 = vector.load %arg3[%c0_45, %c0_46] : memref<1x8xf32, #tpu.memory_space<vmem>>, vector<1x8xf32>
    %40 = vector.broadcast %39 : vector<1x8xf32> to vector<512x8xf32>
    %41 = arith.addf %38, %40 : vector<512x8xf32>
    %cst_47 = arith.constant 0.000000e+00 : f32
    %42 = vector.broadcast %cst_47 : f32 to vector<512x8xf32>
    %43 = arith.maximumf %41, %42 : vector<512x8xf32>
    %44 = vector.shape_cast %43 : vector<512x8xf32> to vector<2x16x16x8xf32>
    %45 = arith.truncf %44 : vector<2x16x16x8xf32> to vector<2x16x16x8xbf16>
    %c0_48 = arith.constant 0 : index
    %c1_49 = arith.constant 1 : index
    %c8_50 = arith.constant 8 : index
    %c0_51 = arith.constant 0 : index
    %46 = vector.load %arg8[%c0_48, %c1_49, %c8_50, %c0_51] : memref<2x18x32x8xbf16, #tpu.memory_space<vmem>>, vector<2x16x16x8xbf16>
    tpu.vector_store %arg8[%c0_48, %c1_49, %c8_50, %c0_51], %45 {strides = array<i32>} : memref<2x18x32x8xbf16, #tpu.memory_space<vmem>>, vector<2x16x16x8xbf16>,
    %c0_52 = arith.constant 0 : index
    %c0_53 = arith.constant 0 : index
    %c0_54 = arith.constant 0 : index
    %c0_55 = arith.constant 0 : index
    %47 = vector.load %arg8[%c0_52, %c0_53, %c0_54, %c0_55] : memref<2x18x32x8xbf16, #tpu.memory_space<vmem>>, vector<2x18x32x8xbf16>
    %48 = vector.extract_strided_slice %47 {offsets = [0, 0, 0, 0], sizes = [2, 16, 32, 8], strides = [1, 1, 1, 1]} : vector<2x18x32x8xbf16> to vector<2x16x32x8xbf16>
    %49 = vector.extract_strided_slice %48 {offsets = [0, 0, 7, 0], sizes = [2, 16, 16, 8], strides = [1, 1, 1, 1]} : vector<2x16x32x8xbf16> to vector<2x16x16x8xbf16>
    %50 = vector.shape_cast %49 : vector<2x16x16x8xbf16> to vector<512x8xbf16>
    %51 = vector.extract_strided_slice %48 {offsets = [0, 0, 8, 0], sizes = [2, 16, 16, 8], strides = [1, 1, 1, 1]} : vector<2x16x32x8xbf16> to vector<2x16x16x8xbf16>
    %52 = vector.shape_cast %51 : vector<2x16x16x8xbf16> to vector<512x8xbf16>
    %53 = vector.extract_strided_slice %48 {offsets = [0, 0, 9, 0], sizes = [2, 16, 16, 8], strides = [1, 1, 1, 1]} : vector<2x16x32x8xbf16> to vector<2x16x16x8xbf16>
    %54 = vector.shape_cast %53 : vector<2x16x16x8xbf16> to vector<512x8xbf16>
    %55 = vector.extract_strided_slice %47 {offsets = [0, 1, 0, 0], sizes = [2, 16, 32, 8], strides = [1, 1, 1, 1]} : vector<2x18x32x8xbf16> to vector<2x16x32x8xbf16>
    %56 = vector.extract_strided_slice %55 {offsets = [0, 0, 7, 0], sizes = [2, 16, 16, 8], strides = [1, 1, 1, 1]} : vector<2x16x32x8xbf16> to vector<2x16x16x8xbf16>
    %57 = vector.shape_cast %56 : vector<2x16x16x8xbf16> to vector<512x8xbf16>
    %58 = vector.extract_strided_slice %55 {offsets = [0, 0, 8, 0], sizes = [2, 16, 16, 8], strides = [1, 1, 1, 1]} : vector<2x16x32x8xbf16> to vector<2x16x16x8xbf16>
    %59 = vector.shape_cast %58 : vector<2x16x16x8xbf16> to vector<512x8xbf16>
    %60 = vector.extract_strided_slice %55 {offsets = [0, 0, 9, 0], sizes = [2, 16, 16, 8], strides = [1, 1, 1, 1]} : vector<2x16x32x8xbf16> to vector<2x16x16x8xbf16>
    %61 = vector.shape_cast %60 : vector<2x16x16x8xbf16> to vector<512x8xbf16>
    %62 = vector.extract_strided_slice %47 {offsets = [0, 2, 0, 0], sizes = [2, 16, 32, 8], strides = [1, 1, 1, 1]} : vector<2x18x32x8xbf16> to vector<2x16x32x8xbf16>
    %63 = vector.extract_strided_slice %62 {offsets = [0, 0, 7, 0], sizes = [2, 16, 16, 8], strides = [1, 1, 1, 1]} : vector<2x16x32x8xbf16> to vector<2x16x16x8xbf16>
    %64 = vector.shape_cast %63 : vector<2x16x16x8xbf16> to vector<512x8xbf16>
    %65 = vector.extract_strided_slice %62 {offsets = [0, 0, 8, 0], sizes = [2, 16, 16, 8], strides = [1, 1, 1, 1]} : vector<2x16x32x8xbf16> to vector<2x16x16x8xbf16>
    %66 = vector.shape_cast %65 : vector<2x16x16x8xbf16> to vector<512x8xbf16>
    %67 = vector.extract_strided_slice %62 {offsets = [0, 0, 9, 0], sizes = [2, 16, 16, 8], strides = [1, 1, 1, 1]} : vector<2x16x32x8xbf16> to vector<2x16x16x8xbf16>
    %68 = vector.shape_cast %67 : vector<2x16x16x8xbf16> to vector<512x8xbf16>
    %69 = tpu.concatenate %50, %52, %54, %57, %59, %61, %64, %66, %68 in 1 : vector<512x8xbf16>, vector<512x8xbf16>, vector<512x8xbf16>, vector<512x8xbf16>, vector<512x8xbf16>, vector<512x8xbf16>, vector<512x8xbf16>, vector<512x8xbf16>, vector<512x8xbf16> -> vector<512x72xbf16>
    %c0_56 = arith.constant 0 : index
    %c0_57 = arith.constant 0 : index
    %70 = vector.load %arg4[%c0_56, %c0_57] : memref<72x8xbf16, #tpu.memory_space<vmem>>, vector<72x8xbf16>
    %cst_58 = arith.constant dense<0.000000e+00> : vector<512x8xf32>
    %71 = tpu.matmul %69, %70, %cst_58 {dimension_numbers = #tpu.dot_dimension_numbers<[1], [0], [0], [1], [0, 0, 1, 1], [], []>} : vector<512x72xbf16>, vector<72x8xbf16>, vector<512x8xf32> -> vector<512x8xf32>
    %c0_59 = arith.constant 0 : index
    %c0_60 = arith.constant 0 : index
    %72 = vector.load %arg5[%c0_59, %c0_60] : memref<1x8xf32, #tpu.memory_space<vmem>>, vector<1x8xf32>
    %73 = vector.broadcast %72 : vector<1x8xf32> to vector<512x8xf32>
    %74 = arith.addf %71, %73 : vector<512x8xf32>
    %cst_61 = arith.constant 0.000000e+00 : f32
    %75 = vector.broadcast %cst_61 : f32 to vector<512x8xf32>
    %76 = arith.maximumf %74, %75 : vector<512x8xf32>
    %77 = vector.shape_cast %76 : vector<512x8xf32> to vector<2x16x16x8xf32>
    %c0_62 = arith.constant 0 : index
    %c0_63 = arith.constant 0 : index
    %c0_64 = arith.constant 0 : index
    %c0_65 = arith.constant 0 : index
    %78 = vector.load %arg6[%c0_62, %c0_63, %c0_64, %c0_65] : memref<2x16x16x8xf32, #tpu.memory_space<vmem>>, vector<2x16x16x8xf32>
    tpu.vector_store %arg6[%c0_62, %c0_63, %c0_64, %c0_65], %77 {strides = array<i32>} : memref<2x16x16x8xf32, #tpu.memory_space<vmem>>, vector<2x16x16x8xf32>,
    return
  }
  func.func @transform_0(%arg0: i32) -> (i32, i32, i32, i32) {
    %c0_i32 = arith.constant 0 : i32
    %c0_i32_0 = arith.constant 0 : i32
    %c0_i32_1 = arith.constant 0 : i32
    %c0_i32_2 = arith.constant 0 : i32
    return %arg0, %c0_i32, %c0_i32_0, %c0_i32_1 : i32, i32, i32, i32
  }
  func.func @transform_1(%arg0: i32) -> (i32, i32) {
    %c0_i32 = arith.constant 0 : i32
    %c0_i32_0 = arith.constant 0 : i32
    %c0_i32_1 = arith.constant 0 : i32
    return %c0_i32, %c0_i32_0 : i32, i32
  }
  func.func @transform_2(%arg0: i32) -> (i32, i32) {
    %c0_i32 = arith.constant 0 : i32
    %c0_i32_0 = arith.constant 0 : i32
    %c0_i32_1 = arith.constant 0 : i32
    return %c0_i32, %c0_i32_0 : i32, i32
  }
  func.func @transform_3(%arg0: i32) -> (i32, i32) {
    %c0_i32 = arith.constant 0 : i32
    %c0_i32_0 = arith.constant 0 : i32
    %c0_i32_1 = arith.constant 0 : i32
    return %c0_i32, %c0_i32_0 : i32, i32
  }
  func.func @transform_4(%arg0: i32) -> (i32, i32) {
    %c0_i32 = arith.constant 0 : i32
    %c0_i32_0 = arith.constant 0 : i32
    %c0_i32_1 = arith.constant 0 : i32
    return %c0_i32, %c0_i32_0 : i32, i32
  }
  func.func @transform_5(%arg0: i32) -> (i32, i32, i32, i32) {
    %c0_i32 = arith.constant 0 : i32
    %c0_i32_0 = arith.constant 0 : i32
    %c0_i32_1 = arith.constant 0 : i32
    %c0_i32_2 = arith.constant 0 : i32
    return %arg0, %c0_i32, %c0_i32_0, %c0_i32_1 : i32, i32, i32, i32
  }
}

</mosaic_0001>

<bundles_post_ra>
// kernel: tpu_custom_call.1
= control target key start
LH: loop header
LB: loop body
LE: loop exit
PB: predicated region body
PF: predicated region fallthrough
CT: control target
= control target key end

     0   :  { %vm21_vm0 = vcmask 31744   ;;  %vm32_vm1 = vcmask 27648   ;;  %v12311_v0 = vmov 0   ;;  %vm65_vm2 = vcmask 31748   ;;  %s6534_s17 = smov 4   ;;  %s6537_s26 = smov 16   ;;  %s12301_s0 = inlined_call_operand.vmem [shape: bf16[2,16,16,4], index: 0, kind: input, shape index: {}]   ;;  %s12302_s1 = inlined_call_operand.vmem [shape: bf16[36,8], index: 1, kind: input, shape index: {}]   ;;  %s12303_s2 = inlined_call_operand.vmem [shape: f32[1,8], index: 2, kind: input, shape index: {}]   ;;  %s12304_s3 = inlined_call_operand.vmem [shape: bf16[72,8], index: 3, kind: input, shape index: {}]   ;;  %s12305_s4 = inlined_call_operand.vmem [shape: f32[1,8], index: 4, kind: input, shape index: {}]   ;;  %s12306_s5 = inlined_call_operand.vmem [shape: f32[2,16,16,8], index: 5, kind: output, shape index: {}]  }
   0x1   :  { %22 = vst.msk [vmem:[#allocation2] sm:$0xff] %vm21_vm0, %v12311_v0  ;;  %23 = vst.msk [vmem:[#allocation2 + $0x8] sm:$0xff] %vm21_vm0, %v12311_v0  ;;  %v6459_v1 = vld [vmem:[%s12301_s0 + $0x8] ss:$0 sps:$4 sm:$0xff]   ;;  %v6460_v2 = vld [vmem:[%s12301_s0 + $0xc] ss:$0 sps:$4 sm:$0xff]  }
   0x2   :  { %24 = vst.msk [vmem:[#allocation2 + $0x120] sm:$0xff] %vm21_vm0, %v12311_v0  ;;  %25 = vst.msk [vmem:[#allocation2 + $0x128] sm:$0xff] %vm21_vm0, %v12311_v0  ;;  %v6461_v3 = vld [vmem:[%s12301_s0] ss:$0 sps:$4 sm:$0xff]   ;;  %v6462_v4 = vld [vmem:[%s12301_s0 + $0x4] ss:$0 sps:$4 sm:$0xff]  }
   0x3   :  { %27 = vst.msk [vmem:[#allocation2 + $0x110] sm:$0xff] %vm21_vm0, %v12311_v0  ;;  %28 = vst.msk [vmem:[#allocation2 + $0x118] sm:$0xff] %vm21_vm0, %v12311_v0  ;;  %v6463_v5 = vld [vmem:[%s12301_s0 + $0x10] ss:$0 sps:$4 sm:$0xff]   ;;  %v6464_v6 = vld [vmem:[%s12301_s0 + $0x14] ss:$0 sps:$4 sm:$0xff]  }
   0x4   :  { %29 = vst.msk [vmem:[#allocation2 + $0x230] sm:$0xff] %vm21_vm0, %v12311_v0  ;;  %30 = vst.msk [vmem:[#allocation2 + $0x238] sm:$0xff] %vm21_vm0, %v12311_v0  ;;  %v6465_v7 = vld [vmem:[%s12301_s0 + $0x18] ss:$0 sps:$4 sm:$0xff]   ;;  %v6466_v8 = vld [vmem:[%s12301_s0 + $0x1c] ss:$0 sps:$4 sm:$0xff]  }
   0x5   :  { %34 = vst.msk [vmem:[#allocation2 + $0x20] sm:$0xf] %vm32_vm1, %v12311_v0  ;;  %33 = vst.msk [vmem:[#allocation2 + $0x10] sm:$0xf] %vm32_vm1, %v12311_v0  ;;  %v6467_v9 = vld [vmem:[%s12301_s0 + $0x20] ss:$0 sps:$4 sm:$0xff]  }
   0x6   :  { %35 = vst.msk [vmem:[#allocation2 + $0x30] sm:$0xf] %vm32_vm1, %v12311_v0  ;;  %36 = vst.msk [vmem:[#allocation2 + $0x40] sm:$0xf] %vm32_vm1, %v12311_v0  ;;  %v6468_v10 = vld [vmem:[%s12301_s0 + $0x24] ss:$0 sps:$4 sm:$0xff]  }
   0x7   :  { %37 = vst.msk [vmem:[#allocation2 + $0x50] sm:$0xf] %vm32_vm1, %v12311_v0  ;;  %38 = vst.msk [vmem:[#allocation2 + $0x60] sm:$0xf] %vm32_vm1, %v12311_v0  ;;  %vm1240_vm3 = vcmask 1043456   ;;  %vm98_vm6 = vcmask 64512  }
   0x8   :  { %39 = vst.msk [vmem:[#allocation2 + $0x70] sm:$0xf] %vm32_vm1, %v12311_v0  ;;  %40 = vst.msk [vmem:[#allocation2 + $0x80] sm:$0xf] %vm32_vm1, %v12311_v0  ;;  %v6756_v11 = vld [vmem:[#allocation2] sm:$0xff]  ;;  %v6758_v12 = vld [vmem:[#allocation2 + $0x8] sm:$0xff] }
   0x9   :  { %41 = vst.msk [vmem:[#allocation2 + $0x90] sm:$0xf] %vm32_vm1, %v12311_v0  ;;  %42 = vst.msk [vmem:[#allocation2 + $0xa0] sm:$0xf] %vm32_vm1, %v12311_v0  ;;  %v12310_v13 = vshrl.u32 %v6758_v12, 16  ;;  %v12309_v14 = vshll.u32 %v6758_v12, 16 }
   0xa   :  { %43 = vst.msk [vmem:[#allocation2 + $0xb0] sm:$0xf] %vm32_vm1, %v12311_v0  ;;  %44 = vst.msk [vmem:[#allocation2 + $0xc0] sm:$0xf] %vm32_vm1, %v12311_v0  ;;  %v1241_v15 = vrot.slane %v6756_v11, 4  ;;  %v1242_v16 = vrot.slane %v6758_v12, 4 }
   0xb   :  { %45 = vst.msk [vmem:[#allocation2 + $0xd0] sm:$0xf] %vm32_vm1, %v12311_v0  ;;  %46 = vst.msk [vmem:[#allocation2 + $0xe0] sm:$0xf] %vm32_vm1, %v12311_v0  ;;  %v12308_v17 = vshrl.u32 %v6756_v11, 16  ;;  %v12307_v18 = vshll.u32 %v6756_v11, 16 }
   0xc   :  { %47 = vst.msk [vmem:[#allocation2 + $0xf0] sm:$0xf] %vm32_vm1, %v12311_v0  ;;  %48 = vst.msk [vmem:[#allocation2 + $0x100] sm:$0xf] %vm32_vm1, %v12311_v0  ;;  %v6469_v19 = vld [vmem:[%s12301_s0 + $0x28] ss:$0 sps:$4 sm:$0xff]   ;;  %v1243_v21 = vsel %vm1240_vm3, %v1241_v15, %v1242_v16 }
   0xd   :  { %49 = vst.msk [vmem:[#allocation2 + $0x130] sm:$0xf] %vm32_vm1, %v12311_v0  ;;  %50 = vst.msk [vmem:[#allocation2 + $0x140] sm:$0xf] %vm32_vm1, %v12311_v0  ;;  %v6470_v20 = vld [vmem:[%s12301_s0 + $0x2c] ss:$0 sps:$4 sm:$0xff]   ;;  %1678 = vrot.lane.b32.xlu0 %v1243_v21, %s6534_s17 }
   0xe   :  { %51 = vst.msk [vmem:[#allocation2 + $0x150] sm:$0xf] %vm32_vm1, %v12311_v0  ;;  %52 = vst.msk [vmem:[#allocation2 + $0x160] sm:$0xf] %vm32_vm1, %v12311_v0  ;;  %v6783_v24 = vrot.slane %v12310_v13, 4  ;;  %v6787_v25 = vrot.slane %v12309_v14, 5 }
   0xf   :  { %53 = vst.msk [vmem:[#allocation2 + $0x170] sm:$0xf] %vm32_vm1, %v12311_v0  ;;  %54 = vst.msk [vmem:[#allocation2 + $0x180] sm:$0xf] %vm32_vm1, %v12311_v0  ;;  %v6471_v33 = vld [vmem:[%s12301_s0 + $0x30] ss:$0 sps:$4 sm:$0xff]  }
  0x10   :  { %55 = vst.msk [vmem:[#allocation2 + $0x190] sm:$0xf] %vm32_vm1, %v12311_v0  ;;  %56 = vst.msk [vmem:[#allocation2 + $0x1a0] sm:$0xf] %vm32_vm1, %v12311_v0  ;;  %v6805_v34 = vld [vmem:[#allocation2 + $0x120] sm:$0xff]  ;;  %v6867_v58 = vrot.slane %v12308_v17, 4 }
  0x11   :  { %57 = vst.msk [vmem:[#allocation2 + $0x1b0] sm:$0xf] %vm32_vm1, %v12311_v0  ;;  %58 = vst.msk [vmem:[#allocation2 + $0x1c0] sm:$0xf] %vm32_vm1, %v12311_v0  ;;  %v6472_v38 = vld [vmem:[%s12301_s0 + $0x34] ss:$0 sps:$4 sm:$0xff]  }
  0x12   :  { %59 = vst.msk [vmem:[#allocation2 + $0x1d0] sm:$0xf] %vm32_vm1, %v12311_v0  ;;  %60 = vst.msk [vmem:[#allocation2 + $0x1e0] sm:$0xf] %vm32_vm1, %v12311_v0  ;;  %v6473_v48 = vld [vmem:[%s12301_s0 + $0x38] ss:$0 sps:$4 sm:$0xff]  }
  0x13   :  { %61 = vst.msk [vmem:[#allocation2 + $0x1f0] sm:$0xf] %vm32_vm1, %v12311_v0  ;;  %62 = vst.msk [vmem:[#allocation2 + $0x200] sm:$0xf] %vm32_vm1, %v12311_v0  ;;  %v6474_v52 = vld [vmem:[%s12301_s0 + $0x3c] ss:$0 sps:$4 sm:$0xff]  }
  0x14   :  { %63 = vst.msk [vmem:[#allocation2 + $0x210] sm:$0xf] %vm32_vm1, %v12311_v0  ;;  %64 = vst.msk [vmem:[#allocation2 + $0x220] sm:$0xf] %vm32_vm1, %v12311_v0  ;;  %v6475_v54 = vld [vmem:[%s12301_s0 + $0x40] ss:$0 sps:$4 sm:$0xff]  }
  0x15   :  { %67 = vst.msk [vmem:[#allocation2 + $0x28] sm:$0xf0] %vm65_vm2, %v12311_v0  ;;  %66 = vst.msk [vmem:[#allocation2 + $0x18] sm:$0xf0] %vm65_vm2, %v12311_v0  ;;  %v6476_v55 = vld [vmem:[%s12301_s0 + $0x44] ss:$0 sps:$4 sm:$0xff]  }
  0x16   :  { %68 = vst.msk [vmem:[#allocation2 + $0x38] sm:$0xf0] %vm65_vm2, %v12311_v0  ;;  %69 = vst.msk [vmem:[#allocation2 + $0x48] sm:$0xf0] %vm65_vm2, %v12311_v0  ;;  %v6871_v59 = vrot.slane %v12307_v18, 5  ;;  %v6918_v16 = vld [vmem:[#allocation2 + $0x128] sm:$0xff] }
  0x17   :  { %70 = vst.msk [vmem:[#allocation2 + $0x58] sm:$0xf0] %vm65_vm2, %v12311_v0  ;;  %71 = vst.msk [vmem:[#allocation2 + $0x68] sm:$0xf0] %vm65_vm2, %v12311_v0  ;;  %v6477_v63 = vld [vmem:[%s12301_s0 + $0x48] ss:$0 sps:$4 sm:$0xff]  }
  0x18   :  { %72 = vst.msk [vmem:[#allocation2 + $0x78] sm:$0xf0] %vm65_vm2, %v12311_v0  ;;  %73 = vst.msk [vmem:[#allocation2 + $0x88] sm:$0xf0] %vm65_vm2, %v12311_v0  ;;  %v6482_v15 = vld [vmem:[%s12301_s0 + $0x5c] ss:$0 sps:$4 sm:$0xff]  }
  0x19   :  { %74 = vst.msk [vmem:[#allocation2 + $0x98] sm:$0xf0] %vm65_vm2, %v12311_v0  ;;  %75 = vst.msk [vmem:[#allocation2 + $0xa8] sm:$0xf0] %vm65_vm2, %v12311_v0  ;;  %v6492_v13 = vld [vmem:[%s12301_s0 + $0x8c] ss:$0 sps:$4 sm:$0xff]  }
  0x1a   :  { %76 = vst.msk [vmem:[#allocation2 + $0xb8] sm:$0xf0] %vm65_vm2, %v12311_v0  ;;  %77 = vst.msk [vmem:[#allocation2 + $0xc8] sm:$0xf0] %vm65_vm2, %v12311_v0  ;;  %vm1337_vm4 = vsmask.f32 3328 }
  0x1b   :  { %78 = vst.msk [vmem:[#allocation2 + $0xd8] sm:$0xf0] %vm65_vm2, %v12311_v0  ;;  %79 = vst.msk [vmem:[#allocation2 + $0xe8] sm:$0xf0] %vm65_vm2, %v12311_v0  ;;  %vm631_vm5 = vsmask.f32 4352 }
  0x1c   :  { %80 = vst.msk [vmem:[#allocation2 + $0xf8] sm:$0xf0] %vm65_vm2, %v12311_v0  ;;  %81 = vst.msk [vmem:[#allocation2 + $0x108] sm:$0xf0] %vm65_vm2, %v12311_v0  ;;  %s6538_s27 = smov 20   ;;  %s6539_s9 = smov 24  }
  0x1d   :  { %82 = vst.msk [vmem:[#allocation2 + $0x138] sm:$0xf0] %vm65_vm2, %v12311_v0  ;;  %83 = vst.msk [vmem:[#allocation2 + $0x148] sm:$0xf0] %vm65_vm2, %v12311_v0  ;;  %vm2832_vm7 = vcmask 1041408   ;;  %s6540_s10 = smov 28  }
  0x1e   :  { %84 = vst.msk [vmem:[#allocation2 + $0x158] sm:$0xf0] %vm65_vm2, %v12311_v0  ;;  %85 = vst.msk [vmem:[#allocation2 + $0x168] sm:$0xf0] %vm65_vm2, %v12311_v0  ;;  %vm2350_vm8 = vcmask 97280   ;;  %vm2415_vm9 = vcmask 130048  }
  0x1f   :  { %86 = vst.msk [vmem:[#allocation2 + $0x178] sm:$0xf0] %vm65_vm2, %v12311_v0  ;;  %87 = vst.msk [vmem:[#allocation2 + $0x188] sm:$0xf0] %vm65_vm2, %v12311_v0  ;;  %vm2480_vm10 = vcmask 162816   ;;  %vm2545_vm11 = vcmask 195584  }
  0x20   :  { %88 = vst.msk [vmem:[#allocation2 + $0x198] sm:$0xf0] %vm65_vm2, %v12311_v0  ;;  %89 = vst.msk [vmem:[#allocation2 + $0x1a8] sm:$0xf0] %vm65_vm2, %v12311_v0  ;;  %vm2610_vm12 = vcmask 228352   ;;  %vm2675_vm13 = vcmask 261120  }
  0x21   :  { %90 = vst.msk [vmem:[#allocation2 + $0x1b8] sm:$0xf0] %vm65_vm2, %v12311_v0  ;;  %91 = vst.msk [vmem:[#allocation2 + $0x1c8] sm:$0xf0] %vm65_vm2, %v12311_v0  ;;  %vm2767_vm14 = vcmask 293888   ;;  %vm109_vm15 = vcmask 60416  }
  0x22   :  { %92 = vst.msk [vmem:[#allocation2 + $0x1d8] sm:$0xf0] %vm65_vm2, %v12311_v0  ;;  %93 = vst.msk [vmem:[#allocation2 + $0x1e8] sm:$0xf0] %vm65_vm2, %v12311_v0  ;;  %s6542_s16 = smov 40   ;;  %s6543_s20 = smov 48  }
  0x23   :  { %94 = vst.msk [vmem:[#allocation2 + $0x1f8] sm:$0xf0] %vm65_vm2, %v12311_v0  ;;  %95 = vst.msk [vmem:[#allocation2 + $0x208] sm:$0xf0] %vm65_vm2, %v12311_v0  ;;  %s6544_s22 = smov 56   ;;  %s6545_s25 = smov 64  }
  0x24   :  { %96 = vst.msk [vmem:[#allocation2 + $0x218] sm:$0xf0] %vm65_vm2, %v12311_v0  ;;  %97 = vst.msk [vmem:[#allocation2 + $0x228] sm:$0xf0] %vm65_vm2, %v12311_v0 }
  0x25   :  { %497 = vst.msk [vmem:[#allocation2 + $0x20] sm:$0xf0] %vm65_vm2, %v6459_v1  ;;  %495 = vst.msk [vmem:[#allocation2 + $0x10] sm:$0xf0] %vm65_vm2, %v6461_v3  ;;  %v6478_v1 = vld [vmem:[%s12301_s0 + $0x4c] ss:$0 sps:$4 sm:$0xff]  }
  0x26   :  { %498 = vst.msk [vmem:[#allocation2 + $0x28] sm:$0xf] %vm32_vm1, %v6460_v2  ;;  %496 = vst.msk [vmem:[#allocation2 + $0x18] sm:$0xf] %vm32_vm1, %v6462_v4  ;;  %v6479_v4 = vld [vmem:[%s12301_s0 + $0x50] ss:$0 sps:$4 sm:$0xff]  }
  0x27   :  { %499 = vst.msk [vmem:[#allocation2 + $0x30] sm:$0xf0] %vm65_vm2, %v6463_v5  ;;  %12834 = vst [vmem:[#allocation4_spill] sm:$0xff] %v6756_v11  ;;  %v6480_v5 = vld [vmem:[%s12301_s0 + $0x54] ss:$0 sps:$4 sm:$0xff]  }
  0x28   :  { %500 = vst.msk [vmem:[#allocation2 + $0x38] sm:$0xf] %vm32_vm1, %v6464_v6  ;;  %12835 = vst [vmem:[#allocation5_spill] sm:$0xff] %v6758_v12  ;;  %v12865_v12 = vrot.slane %v6918_v16, 4 }
  0x29   :  { %501 = vst.msk [vmem:[#allocation2 + $0x40] sm:$0xf0] %vm65_vm2, %v6465_v7  ;;  %503 = vst.msk [vmem:[#allocation2 + $0x50] sm:$0xf0] %vm65_vm2, %v6467_v9 }
  0x2a   :  { %502 = vst.msk [vmem:[#allocation2 + $0x48] sm:$0xf] %vm32_vm1, %v6466_v8  ;;  %504 = vst.msk [vmem:[#allocation2 + $0x58] sm:$0xf] %vm32_vm1, %v6468_v10  ;;  %v6481_v10 = vld [vmem:[%s12301_s0 + $0x58] ss:$0 sps:$4 sm:$0xff]  }
  0x2b   :  { %505 = vst.msk [vmem:[#allocation2 + $0x60] sm:$0xf0] %vm65_vm2, %v6469_v19  ;;  %12841 = vst [vmem:[#allocation11_spill] sm:$0xff] %v6805_v34 }
  0x2c   :  { %v6777_v22 = vld [vmem:[#allocation2 + $0x20] sm:$0xff]  ;;  %v6792_v28 = vld [vmem:[#allocation2 + $0x10] sm:$0xff]  ;;  %506 = vst.msk [vmem:[#allocation2 + $0x68] sm:$0xf] %vm32_vm1, %v6470_v20  ;;  %508 = vst.msk [vmem:[#allocation2 + $0x78] sm:$0xf] %vm32_vm1, %v6472_v38 }
  0x2d   :  { %12836 = vst [vmem:[#allocation6_spill] sm:$0xff] %v6777_v22  ;;  %v6779_v23 = vld [vmem:[#allocation2 + $0x28] sm:$0xff]  ;;  %v1247_v26 = vrot.slane %v6777_v22, 4  ;;  %12838 = vst [vmem:[#allocation8_spill] sm:$0xff] %v6792_v28  ;;  %v6794_v29 = vld [vmem:[#allocation2 + $0x18] sm:$0xff]  ;;  %v1244_v30 = vrot.slane %v6792_v28, 4 }
  0x2e   :  { %12837 = vst [vmem:[#allocation7_spill] sm:$0xff] %v6779_v23  ;;  %v1248_v27 = vrot.slane %v6779_v23, 4  ;;  %12839 = vst [vmem:[#allocation9_spill] sm:$0xff] %v6794_v29  ;;  %v1245_v31 = vrot.slane %v6794_v29, 4  ;;  %v6800_v32 = vld [vmem:[#allocation2 + $0x30] sm:$0xff]  ;;  %v12314_v6 = vshrl.u32 %v6792_v28, 16 }
  0x2f   :  { %12840 = vst [vmem:[#allocation10_spill] sm:$0xff] %v6800_v32  ;;  %v6810_v36 = vld [vmem:[#allocation2 + $0x38] sm:$0xff]  ;;  %v1250_v37 = vrot.slane %v6800_v32, 4  ;;  %507 = vst.msk [vmem:[#allocation2 + $0x70] sm:$0xf0] %vm65_vm2, %v6471_v33 }
  0x30   :  { %v6808_v35 = vsel %vm1240_vm3, %v1247_v26, %v1248_v27  ;;  %12843 = vst [vmem:[#allocation13_spill] sm:$0xff] %v6810_v36  ;;  %v6819_v39 = vsel %vm1240_vm3, %v1244_v30, %v1245_v31  ;;  %v1251_v40 = vrot.slane %v6810_v36, 4  ;;  %v6822_v41 = vld [vmem:[#allocation2 + $0x40] sm:$0xff]  ;;  %v6832_v46 = vld [vmem:[#allocation2 + $0x50] sm:$0xff]  ;;  %509 = vst.msk [vmem:[#allocation2 + $0x80] sm:$0xf0] %vm65_vm2, %v6473_v48 }
  0x31   :  { %12842 = vst [vmem:[#allocation12_spill] sm:$0xff] %v6808_v35  ;;  %1682 = vrot.lane.b32.xlu1 %v6808_v35, %s6534_s17  ;;  %12844 = vst [vmem:[#allocation14_spill] sm:$0xff] %v6819_v39  ;;  %v6824_v42 = vld [vmem:[#allocation2 + $0x48] sm:$0xff]  ;;  %1680 = vrot.lane.b32.xlu0 %v6819_v39, %s6534_s17  ;;  %v1253_v44 = vrot.slane %v6822_v41, 4  ;;  %v6834_v47 = vld [vmem:[#allocation2 + $0x58] sm:$0xff]  ;;  %v1256_v50 = vrot.slane %v6832_v46, 4 }
  0x32   :  { %12845 = vst [vmem:[#allocation15_spill] sm:$0xff] %v6822_v41  ;;  %12846 = vst [vmem:[#allocation16_spill] sm:$0xff] %v6824_v42  ;;  %v1254_v45 = vrot.slane %v6824_v42, 4  ;;  %v6841_v49 = vsel %vm1240_vm3, %v1250_v37, %v1251_v40  ;;  %v1257_v51 = vrot.slane %v6834_v47, 4  ;;  %v6860_v56 = vld [vmem:[#allocation2 + $0x60] sm:$0xff]  ;;  %v12313_v40 = vshll.u32 %v6792_v28, 16 }
  0x33   :  { %12847 = vst [vmem:[#allocation17_spill] sm:$0xff] %v6832_v46  ;;  %12848 = vst [vmem:[#allocation18_spill] sm:$0xff] %v6834_v47  ;;  %v6862_v57 = vld [vmem:[#allocation2 + $0x68] sm:$0xff]  ;;  %v1259_v61 = vrot.slane %v6860_v56, 4  ;;  %v6903_v7 = vld [vmem:[#allocation2 + $0x78] sm:$0xff] }
  0x34   :  { %12849 = vst [vmem:[#allocation19_spill] sm:$0xff] %v6841_v49  ;;  %v6849_v53 = vsel %vm1240_vm3, %v1253_v44, %v1254_v45  ;;  %12851 = vst [vmem:[#allocation21_spill] sm:$0xff] %v6860_v56  ;;  %v6876_v60 = vsel %vm1240_vm3, %v1256_v50, %v1257_v51  ;;  %v1260_v62 = vrot.slane %v6862_v57, 4  ;;  %v1263_v9 = vrot.slane %v6903_v7, 4  ;;  %v6483_v30 = vld [vmem:[%s12301_s0 + $0x60] ss:$0 sps:$4 sm:$0xff]  }
  0x35   :  { %12850 = vst [vmem:[#allocation20_spill] sm:$0xff] %v6849_v53  ;;  %1684 = vrot.lane.b32.xlu1 %v6841_v49, %s6534_s17  ;;  %12852 = vst [vmem:[#allocation22_spill] sm:$0xff] %v6862_v57  ;;  %1686 = vrot.lane.b32.xlu0 %v6849_v53, %s6534_s17  ;;  %v6484_v31 = vld [vmem:[%s12301_s0 + $0x64] ss:$0 sps:$4 sm:$0xff]   ;;  %v6485_v48 = vld [vmem:[%s12301_s0 + $0x68] ss:$0 sps:$4 sm:$0xff]  }
  0x36   :  { %510 = vst.msk [vmem:[#allocation2 + $0x88] sm:$0xf] %vm32_vm1, %v6474_v52  ;;  %12853 = vst [vmem:[#allocation23_spill] sm:$0xff] %v6876_v60  ;;  %v6889_v2 = vsel %vm1240_vm3, %v1259_v61, %v1260_v62  ;;  %v6891_v3 = vld [vmem:[#allocation2 + $0x70] sm:$0xff]  ;;  %v6486_v52 = vld [vmem:[%s12301_s0 + $0x6c] ss:$0 sps:$4 sm:$0xff]  }
  0x37   :  { %511 = vst.msk [vmem:[#allocation2 + $0x90] sm:$0xf0] %vm65_vm2, %v6475_v54  ;;  %12854 = vst [vmem:[#allocation24_spill] sm:$0xff] %v6889_v2  ;;  %v1262_v8 = vrot.slane %v6891_v3, 4  ;;  %v6920_v19 = vld [vmem:[#allocation2 + $0x80] sm:$0xff]  ;;  %v12316_v54 = vshrl.u32 %v6794_v29, 16 }
  0x38   :  { %512 = vst.msk [vmem:[#allocation2 + $0x98] sm:$0xf] %vm32_vm1, %v6476_v55  ;;  %514 = vst.msk [vmem:[#allocation2 + $0xa8] sm:$0xf] %vm32_vm1, %v6478_v1  ;;  %v1265_v27 = vrot.slane %v6920_v19, 4 }
  0x39   :  { %513 = vst.msk [vmem:[#allocation2 + $0xa0] sm:$0xf0] %vm65_vm2, %v6477_v63  ;;  %1688 = vrot.lane.b32.xlu1 %v6876_v60, %s6534_s17  ;;  %1690 = vrot.lane.b32.xlu0 %v6889_v2, %s6534_s17  ;;  %515 = vst.msk [vmem:[#allocation2 + $0xb0] sm:$0xf0] %vm65_vm2, %v6479_v4  ;;  %v6924_v21 = vsel %vm1240_vm3, %v1262_v8, %v1263_v9  ;;  %v6487_v63 = vld [vmem:[%s12301_s0 + $0x70] ss:$0 sps:$4 sm:$0xff]  }
  0x3a   :  { %516 = vst.msk [vmem:[#allocation2 + $0xb8] sm:$0xf] %vm32_vm1, %v6480_v5  ;;  %12855 = vst [vmem:[#allocation25_spill] sm:$0xff] %v6918_v16  ;;  %v6488_v8 = vld [vmem:[%s12301_s0 + $0x74] ss:$0 sps:$4 sm:$0xff]   ;;  %v12315_v9 = vshll.u32 %v6794_v29, 16 }
  0x3b   :  { %12856 = vst [vmem:[#allocation26_spill] sm:$0xff] %v6924_v21  ;;  %517 = vst.msk [vmem:[#allocation2 + $0xc0] sm:$0xf0] %vm65_vm2, %v6481_v10 }
  0x3c   :  { %518 = vst.msk [vmem:[#allocation2 + $0xc8] sm:$0xf] %vm32_vm1, %v6482_v15  ;;  %520 = vst.msk [vmem:[#allocation2 + $0xd8] sm:$0xf] %vm32_vm1, %v6484_v31 }
  0x3d   :  { %v6926_v26 = vld [vmem:[#allocation2 + $0x88] sm:$0xff]  ;;  %1692 = vrot.lane.b32.xlu1 %v6924_v21, %s6534_s17  ;;  %519 = vst.msk [vmem:[#allocation2 + $0xd0] sm:$0xf0] %vm65_vm2, %v6483_v30  ;;  %521 = vst.msk [vmem:[#allocation2 + $0xe0] sm:$0xf0] %vm65_vm2, %v6485_v48 }
  0x3e   :  { %v1266_v33 = vrot.slane %v6926_v26, 4  ;;  %v6940_v37 = vld [vmem:[#allocation2 + $0x90] sm:$0xff]  ;;  %522 = vst.msk [vmem:[#allocation2 + $0xe8] sm:$0xf] %vm32_vm1, %v6486_v52  ;;  %524 = vst.msk [vmem:[#allocation2 + $0xf8] sm:$0xf] %vm32_vm1, %v6488_v8 }
  0x3f   :  { %v6942_v38 = vld [vmem:[#allocation2 + $0x98] sm:$0xff]  ;;  %v1268_v44 = vrot.slane %v6940_v37, 4  ;;  %v6966_v61 = vld [vmem:[#allocation2 + $0xa8] sm:$0xff]  ;;  %523 = vst.msk [vmem:[#allocation2 + $0xf0] sm:$0xf0] %vm65_vm2, %v6487_v63 }
  0x40   :  { %v1269_v45 = vrot.slane %v6942_v38, 4  ;;  %v6953_v50 = vsel %vm1240_vm3, %v1265_v27, %v1266_v33  ;;  %v6955_v51 = vld [vmem:[#allocation2 + $0xa0] sm:$0xff]  ;;  %v1272_v1 = vrot.slane %v6966_v61, 4  ;;  %v6976_v4 = vld [vmem:[#allocation2 + $0xb0] sm:$0xff]  ;;  %530 = vst.msk [vmem:[#allocation2 + $0x148] sm:$0xf] %vm32_vm1, %v6492_v13 }
  0x41   :  { %12857 = vst [vmem:[#allocation27_spill] sm:$0xff] %v6953_v50  ;;  %1694 = vrot.lane.b32.xlu0 %v6953_v50, %s6534_s17  ;;  %v1271_v62 = vrot.slane %v6955_v51, 4  ;;  %v6978_v5 = vld [vmem:[#allocation2 + $0xb8] sm:$0xff]  ;;  %v1274_v10 = vrot.slane %v6976_v4, 4  ;;  %v6489_v33 = vld [vmem:[%s12301_s0 + $0x80] ss:$0 sps:$4 sm:$0xff]  }
  0x42   :  { %v6964_v55 = vsel %vm1240_vm3, %v1268_v44, %v1269_v45  ;;  %v1275_v15 = vrot.slane %v6978_v5, 4  ;;  %v6991_v30 = vld [vmem:[#allocation2 + $0xc0] sm:$0xff]  ;;  %v7001_v44 = vrot.slane %v12314_v6, 4  ;;  %v7005_v45 = vrot.slane %v12313_v40, 5  ;;  %527 = vst.msk [vmem:[#allocation2 + $0x130] sm:$0xf0] %vm65_vm2, %v6489_v33 }
  0x43   :  { %12858 = vst [vmem:[#allocation28_spill] sm:$0xff] %v6964_v55  ;;  %1696 = vrot.lane.b32.xlu1 %v6964_v55, %s6534_s17  ;;  %v6989_v27 = vsel %vm1240_vm3, %v1271_v62, %v1272_v1  ;;  %v6993_v31 = vld [vmem:[#allocation2 + $0xc8] sm:$0xff]  ;;  %v1277_v52 = vrot.slane %v6991_v30, 4  ;;  %v6490_v63 = vld [vmem:[%s12301_s0 + $0x84] ss:$0 sps:$4 sm:$0xff]   ;;  %v7021_v8 = vld [vmem:[#allocation2 + $0xd8] sm:$0xff] }
  0x44   :  { %12859 = vst [vmem:[#allocation29_spill] sm:$0xff] %v6989_v27  ;;  %v7010_v48 = vsel %vm1240_vm3, %v1274_v10, %v1275_v15  ;;  %v1278_v62 = vrot.slane %v6993_v31, 4  ;;  %v7019_v1 = vld [vmem:[#allocation2 + $0xd0] sm:$0xff]  ;;  %v7026_v10 = vrot.slane %v12316_v54, 4  ;;  %v7030_v15 = vrot.slane %v12315_v9, 5  ;;  %v7044_v0 = vld [vmem:[#allocation2 + $0xe0] sm:$0xff] }
  0x45   :  { %1698 = vrot.lane.b32.xlu0 %v6989_v27, %s6534_s17  ;;  %12860 = vst [vmem:[#allocation30_spill] sm:$0xff] %v7010_v48  ;;  %v1280_v17 = vrot.slane %v7019_v1, 4  ;;  %v1281_v14 = vrot.slane %v7021_v8, 4  ;;  %528 = vst.msk [vmem:[#allocation2 + $0x138] sm:$0xf] %vm32_vm1, %v6490_v63  ;;  %v1283_v63 = vrot.slane %v7044_v0, 4 }
  0x46   :  { %v7033_v18 = vsel %vm1240_vm3, %v1277_v52, %v1278_v62  ;;  %v6491_v33 = vld [vmem:[%s12301_s0 + $0x88] ss:$0 sps:$4 sm:$0xff]   ;;  %v6493_v6 = vld [vmem:[%s12301_s0 + $0x90] ss:$0 sps:$4 sm:$0xff]   ;;  %v6494_v9 = vld [vmem:[%s12301_s0 + $0x94] ss:$0 sps:$4 sm:$0xff]  }
  0x47   :  { %1700 = vrot.lane.b32.xlu1 %v7010_v48, %s6534_s17  ;;  %12861 = vst [vmem:[#allocation31_spill] sm:$0xff] %v7033_v18  ;;  %v7050_v52 = vsel %vm1240_vm3, %v1280_v17, %v1281_v14  ;;  %v7052_v62 = vld [vmem:[#allocation2 + $0xe8] sm:$0xff]  ;;  %529 = vst.msk [vmem:[#allocation2 + $0x140] sm:$0xf0] %vm65_vm2, %v6491_v33  ;;  %v7066_v17 = vld [vmem:[#allocation2 + $0xf0] sm:$0xff] }
  0x48   :  { %12862 = vst [vmem:[#allocation32_spill] sm:$0xff] %v7050_v52  ;;  %v1284_v14 = vrot.slane %v7052_v62, 4  ;;  %v7068_v54 = vld [vmem:[#allocation2 + $0xf8] sm:$0xff]  ;;  %v1286_v33 = vrot.slane %v7066_v17, 4  ;;  %531 = vst.msk [vmem:[#allocation2 + $0x150] sm:$0xf0] %vm65_vm2, %v6493_v6 }
  0x49   :  { %1702 = vrot.lane.b32.xlu0 %v7033_v18, %s6534_s17  ;;  %532 = vst.msk [vmem:[#allocation2 + $0x158] sm:$0xf] %vm32_vm1, %v6494_v9  ;;  %v6495_v13 = vld [vmem:[%s12301_s0 + $0x98] ss:$0 sps:$4 sm:$0xff]   ;;  %v6496_v40 = vld [vmem:[%s12301_s0 + $0x9c] ss:$0 sps:$4 sm:$0xff]  }
  0x4a   :  { %v7080_v43 = vsel %vm1240_vm3, %v1283_v63, %v1284_v14  ;;  %v1287_v20 = vrot.slane %v7068_v54, 4  ;;  %v7086_v6 = vld [vmem:[#allocation2 + $0x130] sm:$0xff]  ;;  %533 = vst.msk [vmem:[#allocation2 + $0x160] sm:$0xf0] %vm65_vm2, %v6495_v13  ;;  %v6497_v9 = vld [vmem:[%s12301_s0 + $0xa0] ss:$0 sps:$4 sm:$0xff]  }
  0x4b   :  { %1704 = vrot.lane.b32.xlu1 %v7050_v52, %s6534_s17  ;;  %12863 = vst [vmem:[#allocation33_spill] sm:$0xff] %v7080_v43  ;;  %534 = vst.msk [vmem:[#allocation2 + $0x168] sm:$0xf] %vm32_vm1, %v6496_v40  ;;  %v6498_v63 = vld [vmem:[%s12301_s0 + $0xa4] ss:$0 sps:$4 sm:$0xff]   ;;  %v1292_v18 = vrot.slane %v7086_v6, 4 }
  0x4c   :  { %v7098_v11 = vsel %vm1240_vm3, %v1286_v33, %v1287_v20  ;;  %v7105_v40 = vld [vmem:[#allocation2 + $0x138] sm:$0xff]  ;;  %535 = vst.msk [vmem:[#allocation2 + $0x170] sm:$0xf0] %vm65_vm2, %v6497_v9  ;;  %v6499_v20 = vld [vmem:[%s12301_s0 + $0xa8] ss:$0 sps:$4 sm:$0xff]   ;;  %v12868_v9 = vshll.u32 %v6777_v22, 16 }
  0x4d   :  { %1706 = vrot.lane.b32.xlu0 %v7080_v43, %s6534_s17  ;;  %12864 = vst [vmem:[#allocation34_spill] sm:$0xff] %v7098_v11  ;;  %v12866_v43 = vrot.slane %v6805_v34, 4  ;;  %v1293_v27 = vrot.slane %v7105_v40, 4  ;;  %536 = vst.msk [vmem:[#allocation2 + $0x178] sm:$0xf] %vm32_vm1, %v6498_v63  ;;  %v7122_v14 = vld [vmem:[#allocation2 + $0x148] sm:$0xff] }
  0x4e   :  { %v7120_v33 = vld [vmem:[#allocation2 + $0x140] sm:$0xff]  ;;  %v7130_v63 = vrot.slane %v12868_v9, 5  ;;  %537 = vst.msk [vmem:[#allocation2 + $0x180] sm:$0xf0] %vm65_vm2, %v6499_v20  ;;  %v12871_v20 = vshll.u32 %v6779_v23, 16 }
  0x4f   :  { %v1291_v13 = vsel %vm1240_vm3, %v12866_v43, %v12865_v12  ;;  %1708 = vrot.lane.b32.xlu1 %v7098_v11, %s6534_s17  ;;  %v6500_v12 = vld [vmem:[%s12301_s0 + $0xac] ss:$0 sps:$4 sm:$0xff]   ;;  %v12867_v11 = vshrl.u32 %v6777_v22, 16  ;;  %v7134_v50 = vsel %vm1240_vm3, %v1292_v18, %v1293_v27  ;;  %v1295_v48 = vrot.slane %v7120_v33, 4  ;;  %v7143_v2 = vld [vmem:[#allocation2 + $0x150] sm:$0xff] }
  0x50   :  { %12869 = vst [vmem:[#allocation35_spill] sm:$0xff] %v7134_v50  ;;  %v1296_v43 = vrot.slane %v7122_v14, 4  ;;  %538 = vst.msk [vmem:[#allocation2 + $0x188] sm:$0xf] %vm32_vm1, %v6500_v12  ;;  %v7145_v9 = vld [vmem:[#allocation2 + $0x158] sm:$0xff]  ;;  %v12870_v27 = vshrl.u32 %v6779_v23, 16 }
  0x51   :  { %v7126_v52 = vrot.slane %v12867_v11, 4  ;;  %1710 = vrot.lane.b32.xlu0 %v1291_v13, %s6534_s17  ;;  %v6501_v11 = vld [vmem:[%s12301_s0 + $0xb0] ss:$0 sps:$4 sm:$0xff]   ;;  %v6502_v18 = vld [vmem:[%s12301_s0 + $0xb4] ss:$0 sps:$4 sm:$0xff]   ;;  %v7156_v55 = vrot.slane %v12871_v20, 5 }
  0x52   :  { %v7152_v13 = vrot.slane %v12870_v27, 4  ;;  %v7161_v12 = vsel %vm1240_vm3, %v1295_v48, %v1296_v43  ;;  %v1298_v53 = vrot.slane %v7143_v2, 4  ;;  %v1299_v21 = vrot.slane %v7145_v9, 4  ;;  %539 = vst.msk [vmem:[#allocation2 + $0x190] sm:$0xf0] %vm65_vm2, %v6501_v11  ;;  %v7166_v35 = vld [vmem:[#allocation2 + $0x160] sm:$0xff] }
  0x53   :  { %1712 = vrot.lane.b32.xlu1 %v7134_v50, %s6534_s17  ;;  %12872 = vst [vmem:[#allocation36_spill] sm:$0xff] %v7161_v12  ;;  %v7168_v27 = vld [vmem:[#allocation2 + $0x168] sm:$0xff]  ;;  %540 = vst.msk [vmem:[#allocation2 + $0x198] sm:$0xf] %vm32_vm1, %v6502_v18  ;;  %v6503_v20 = vld [vmem:[%s12301_s0 + $0xb8] ss:$0 sps:$4 sm:$0xff]  }
  0x54   :  { %v7179_v43 = vsel %vm1240_vm3, %v1298_v53, %v1299_v21  ;;  %v1301_v11 = vrot.slane %v7166_v35, 4  ;;  %v1302_v60 = vrot.slane %v7168_v27, 4  ;;  %v6504_v18 = vld [vmem:[%s12301_s0 + $0xbc] ss:$0 sps:$4 sm:$0xff]   ;;  %v7186_v49 = vld [vmem:[#allocation2 + $0x170] sm:$0xff]  ;;  %v12878_v22 = vshll.u32 %v6800_v32, 16 }
  0x55   :  { %1714 = vrot.lane.b32.xlu0 %v7161_v12, %s6534_s17  ;;  %12873 = vst [vmem:[#allocation37_spill] sm:$0xff] %v7179_v43  ;;  %v7188_v39 = vld [vmem:[#allocation2 + $0x178] sm:$0xff]  ;;  %541 = vst.msk [vmem:[#allocation2 + $0x1a0] sm:$0xf0] %vm65_vm2, %v6503_v20  ;;  %v1304_v21 = vrot.slane %v7186_v49, 4  ;;  %v7207_v48 = vld [vmem:[#allocation2 + $0x180] sm:$0xff] }
  0x56   :  { %v7196_v53 = vsel %vm1240_vm3, %v1301_v11, %v1302_v60  ;;  %v1305_v12 = vrot.slane %v7188_v39, 4  ;;  %542 = vst.msk [vmem:[#allocation2 + $0x1a8] sm:$0xf] %vm32_vm1, %v6504_v18  ;;  %v6505_v20 = vld [vmem:[%s12301_s0 + $0xc0] ss:$0 sps:$4 sm:$0xff]   ;;  %12875 = vst [vmem:[#allocation39_spill] sm:$0xff] %v7207_v48 }
  0x57   :  { %1716 = vrot.lane.b32.xlu1 %v7179_v43, %s6534_s17  ;;  %12874 = vst [vmem:[#allocation38_spill] sm:$0xff] %v7196_v53  ;;  %v6506_v50 = vld [vmem:[%s12301_s0 + $0xc4] ss:$0 sps:$4 sm:$0xff]   ;;  %v7209_v43 = vld [vmem:[#allocation2 + $0x188] sm:$0xff]  ;;  %v12877_v60 = vshrl.u32 %v6800_v32, 16  ;;  %v7217_v18 = vrot.slane %v12878_v22, 5 }
  0x58   :  { %12876 = vst [vmem:[#allocation40_spill] sm:$0xff] %v7209_v43  ;;  %v7222_v28 = vsel %vm1240_vm3, %v1304_v21, %v1305_v12  ;;  %v1307_v29 = vrot.slane %v7207_v48, 4  ;;  %v1308_v23 = vrot.slane %v7209_v43, 4  ;;  %543 = vst.msk [vmem:[#allocation2 + $0x1b0] sm:$0xf0] %vm65_vm2, %v6505_v20  ;;  %v12881_v12 = vshrl.u32 %v6810_v36, 16 }
  0x59   :  { %v7213_v11 = vrot.slane %v12877_v60, 4  ;;  %1718 = vrot.lane.b32.xlu0 %v7196_v53, %s6534_s17  ;;  %12879 = vst [vmem:[#allocation41_spill] sm:$0xff] %v7222_v28  ;;  %544 = vst.msk [vmem:[#allocation2 + $0x1b8] sm:$0xf] %vm32_vm1, %v6506_v50  ;;  %v6507_v60 = vld [vmem:[%s12301_s0 + $0xc8] ss:$0 sps:$4 sm:$0xff]  }
  0x5a   :  { %v7231_v22 = vld [vmem:[#allocation2 + $0x190] sm:$0xff]  ;;  %v6508_v53 = vld [vmem:[%s12301_s0 + $0xcc] ss:$0 sps:$4 sm:$0xff]   ;;  %v7238_v21 = vrot.slane %v12881_v12, 4  ;;  %v7243_v20 = vsel %vm1240_vm3, %v1307_v29, %v1308_v23  ;;  %v7245_v50 = vld [vmem:[#allocation2 + $0x198] sm:$0xff]  ;;  %v12884_v23 = vshll.u32 %v6810_v36, 16 }
  0x5b   :  { %12880 = vst [vmem:[#allocation42_spill] sm:$0xff] %v7231_v22  ;;  %1720 = vrot.lane.b32.xlu1 %v7222_v28, %s6534_s17  ;;  %12882 = vst [vmem:[#allocation43_spill] sm:$0xff] %v7243_v20  ;;  %v1310_v32 = vrot.slane %v7231_v22, 4  ;;  %v6509_v43 = vld [vmem:[%s12301_s0 + $0xd0] ss:$0 sps:$4 sm:$0xff]   ;;  %v1311_v48 = vrot.slane %v7245_v50, 4 }
  0x5c   :  { %12883 = vst [vmem:[#allocation44_spill] sm:$0xff] %v7245_v50  ;;  %545 = vst.msk [vmem:[#allocation2 + $0x1c0] sm:$0xf0] %vm65_vm2, %v6507_v60  ;;  %v6510_v12 = vld [vmem:[%s12301_s0 + $0xd4] ss:$0 sps:$4 sm:$0xff]   ;;  %v1363_v29 = vrot.slane %v12884_v23, 5  ;;  %v1343_v50 = vor.u32 %v6787_v25, %v6783_v24  ;;  %v1350_v24 = vor.u32 %v7030_v15, %v7026_v10 }
  0x5d   :  { %546 = vst.msk [vmem:[#allocation2 + $0x1c8] sm:$0xf] %vm32_vm1, %v6508_v53  ;;  %1722 = vrot.lane.b32.xlu0 %v7243_v20, %s6534_s17  ;;  %v7261_v28 = vld [vmem:[#allocation2 + $0x1a0] sm:$0xff]  ;;  %v6511_v60 = vld [vmem:[%s12301_s0 + $0xd8] ss:$0 sps:$4 sm:$0xff]   ;;  %v1340_v53 = vor.u32 %v6871_v59, %v6867_v58  ;;  %v12381_v36 = vshrl.u32 %v6822_v41, 16  ;;  %v7273_v23 = vsel %vm1240_vm3, %v1310_v32, %v1311_v48  ;;  %v1347_v58 = vor.u32 %v7005_v45, %v7001_v44 }
  0x5e   :  { %547 = vst.msk [vmem:[#allocation2 + $0x1d0] sm:$0xf0] %vm65_vm2, %v6509_v43  ;;  %12885 = vst [vmem:[#allocation45_spill] sm:$0xff] %v7273_v23  ;;  %v7275_v20 = vld [vmem:[#allocation2 + $0x1a8] sm:$0xff]  ;;  %v1313_v22 = vrot.slane %v7261_v28, 4  ;;  %v1354_v59 = vor.u32 %v7130_v63, %v7126_v52  ;;  %v1357_v44 = vor.u32 %v7156_v55, %v7152_v13  ;;  %v1364_v52 = vor.u32 %v1363_v29, %v7238_v21 }
  0x5f   :  { %12886 = vst [vmem:[#allocation46_spill] sm:$0xff] %v7275_v20  ;;  %548 = vst.msk [vmem:[#allocation2 + $0x1d8] sm:$0xf] %vm32_vm1, %v6510_v12  ;;  %v6512_v43 = vld [vmem:[%s12301_s0 + $0xdc] ss:$0 sps:$4 sm:$0xff]   ;;  %1724 = vrot.lane.b32.xlu1 %v7273_v23, %s6534_s17  ;;  %v1314_v25 = vrot.slane %v7275_v20, 4  ;;  %v1361_v12 = vor.u32 %v7217_v18, %v7213_v11 }
  0x60   :  { %549 = vst.msk [vmem:[#allocation2 + $0x1e0] sm:$0xf0] %vm65_vm2, %v6511_v60  ;;  %v6513_v32 = vld [vmem:[%s12301_s0 + $0xe0] ss:$0 sps:$4 sm:$0xff]   ;;  %v7298_v10 = vld [vmem:[#allocation2 + $0x1b0] sm:$0xff]  ;;  %v7300_v15 = vld [vmem:[#allocation2 + $0x1b8] sm:$0xff] }
  0x61   :  { %12887 = vst [vmem:[#allocation47_spill] sm:$0xff] %v7298_v10  ;;  %12888 = vst [vmem:[#allocation48_spill] sm:$0xff] %v7300_v15  ;;  %v6514_v48 = vld [vmem:[%s12301_s0 + $0xe4] ss:$0 sps:$4 sm:$0xff]   ;;  %v7312_v13 = vsel %vm1240_vm3, %v1313_v22, %v1314_v25  ;;  %v1316_v60 = vrot.slane %v7298_v10, 4  ;;  %v1366_v22 = vrot.slane %v12381_v36, 4  ;;  %v7359_v36 = vsel %vm1337_vm4, %v1361_v12, %v1364_v52 }
  0x62   :  { %550 = vst.msk [vmem:[#allocation2 + $0x1e8] sm:$0xf] %vm32_vm1, %v6512_v43  ;;  %12889 = vst [vmem:[#allocation49_spill] sm:$0xff] %v7312_v13  ;;  %v1317_v43 = vrot.slane %v7300_v15, 4  ;;  %1726 = vrot.lane.b32.xlu0 %v7312_v13, %s6534_s17  ;;  %v6515_v11 = vld [vmem:[%s12301_s0 + $0xe8] ss:$0 sps:$4 sm:$0xff]  }
  0x63   :  { %551 = vst.msk [vmem:[#allocation2 + $0x1f0] sm:$0xf0] %vm65_vm2, %v6513_v32  ;;  %v7319_v45 = vld [vmem:[#allocation2 + $0x1c0] sm:$0xff]  ;;  %v6516_v18 = vld [vmem:[%s12301_s0 + $0xec] ss:$0 sps:$4 sm:$0xff]   ;;  %v7337_v32 = vsel %vm1337_vm4, %v1340_v53, %v1343_v50  ;;  %v7353_v53 = vsel %vm1337_vm4, %v1347_v58, %v1350_v24  ;;  %12896 = vst [vmem:[#allocation56_spill] sm:$0xff] %v7359_v36 }
  0x64   :  { %12890 = vst [vmem:[#allocation50_spill] sm:$0xff] %v7319_v45  ;;  %552 = vst.msk [vmem:[#allocation2 + $0x1f8] sm:$0xf] %vm32_vm1, %v6514_v48  ;;  %v7331_v21 = vsel %vm1240_vm3, %v1316_v60, %v1317_v43  ;;  %v7333_v29 = vld [vmem:[#allocation2 + $0x1c8] sm:$0xff]  ;;  %v1319_v25 = vrot.slane %v7319_v45, 4  ;;  %v7356_v43 = vsel %vm1337_vm4, %v1354_v59, %v1357_v44  ;;  %v12898_v63 = vshll.u32 %v6822_v41, 16 }
  0x65   :  { %12891 = vst [vmem:[#allocation51_spill] sm:$0xff] %v7331_v21  ;;  %12892 = vst [vmem:[#allocation52_spill] sm:$0xff] %v7333_v29  ;;  %1728 = vrot.lane.b32.xlu1 %v7331_v21, %s6534_s17  ;;  %v1320_v48 = vrot.slane %v7333_v29, 4  ;;  %v7342_v55 = vld [vmem:[#allocation2 + $0x1d0] sm:$0xff]  ;;  %v12899_v21 = vshrl.u32 %v6824_v42, 16  ;;  %v12900_v29 = vshll.u32 %v6824_v42, 16 }
  0x66   :  { %12893 = vst [vmem:[#allocation53_spill] sm:$0xff] %v7342_v55  ;;  %553 = vst.msk [vmem:[#allocation2 + $0x200] sm:$0xf0] %vm65_vm2, %v6515_v11  ;;  %v6517_v60 = vld [vmem:[%s12301_s0 + $0xf0] ss:$0 sps:$4 sm:$0xff]   ;;  %v7361_v11 = vld [vmem:[#allocation2 + $0x1d8] sm:$0xff] }
  0x67   :  { %554 = vst.msk [vmem:[#allocation2 + $0x208] sm:$0xf] %vm32_vm1, %v6516_v18  ;;  %v6518_v50 = vld [vmem:[%s12301_s0 + $0xf4] ss:$0 sps:$4 sm:$0xff]   ;;  %12894 = vst [vmem:[#allocation54_spill] sm:$0xff] %v7353_v53  ;;  %v1322_v18 = vrot.slane %v7342_v55, 4  ;;  %v7371_v24 = vsel %vm1240_vm3, %v1319_v25, %v1320_v48 }
  0x68   :  { %12895 = vst [vmem:[#allocation55_spill] sm:$0xff] %v7356_v43  ;;  %12897 = vst [vmem:[#allocation57_spill] sm:$0xff] %v7361_v11  ;;  %v1367_v13 = vrot.slane %v12898_v63, 5  ;;  %v1369_v23 = vrot.slane %v12899_v21, 4  ;;  %v1370_v58 = vrot.slane %v12900_v29, 5  ;;  %v1323_v59 = vrot.slane %v7361_v11, 4  ;;  %1730 = vrot.lane.b32.xlu0 %v7371_v24, %s6534_s17 }
  0x69   :  { %12901 = vst [vmem:[#allocation58_spill] sm:$0xff] %v7371_v24  ;;  %v7374_v44 = vld [vmem:[#allocation2 + $0x1e0] sm:$0xff]  ;;  %555 = vst.msk [vmem:[#allocation2 + $0x210] sm:$0xf0] %vm65_vm2, %v6517_v60  ;;  %v12396_v12 = vshrl.u32 %v6832_v46, 16  ;;  %v7382_v63 = vld [vmem:[#allocation2 + $0x1e8] sm:$0xff] }
  0x6a   :  { %12902 = vst [vmem:[#allocation59_spill] sm:$0xff] %v7374_v44  ;;  %556 = vst.msk [vmem:[#allocation2 + $0x218] sm:$0xf] %vm32_vm1, %v6518_v50  ;;  %v1325_v21 = vrot.slane %v7374_v44, 4  ;;  %v1368_v29 = vor.u32 %v1367_v13, %v1366_v22  ;;  %v1371_v25 = vor.u32 %v1370_v58, %v1369_v23  ;;  %v12403_v48 = vshrl.u32 %v6834_v47, 16  ;;  %v7390_v50 = vld [vmem:[#allocation2 + $0x1f0] sm:$0xff] }
  0x6b   :  { %12903 = vst [vmem:[#allocation60_spill] sm:$0xff] %v7382_v63  ;;  %v7387_v42 = vsel %vm1240_vm3, %v1322_v18, %v1323_v59  ;;  %v1326_v60 = vrot.slane %v7382_v63, 4  ;;  %12905 = vst [vmem:[#allocation62_spill] sm:$0xff] %v7390_v50  ;;  %v1373_v24 = vrot.slane %v12396_v12, 4  ;;  %v6519_v41 = vld [vmem:[%s12301_s0 + $0x78] ss:$0 sps:$4 sm:$0xff]  }
  0x6c   :  { %12904 = vst [vmem:[#allocation61_spill] sm:$0xff] %v7387_v42  ;;  %1732 = vrot.lane.b32.xlu1 %v7387_v42, %s6534_s17  ;;  %v7400_v23 = vld [vmem:[#allocation2 + $0x1f8] sm:$0xff]  ;;  %v1328_v13 = vrot.slane %v7390_v50, 4  ;;  %v7404_v22 = vsel %vm1337_vm4, %v1368_v29, %v1371_v25  ;;  %v12908_v18 = vshll.u32 %v6832_v46, 16  ;;  %v1376_v59 = vrot.slane %v12403_v48, 4 }
  0x6d   :  { %12906 = vst [vmem:[#allocation63_spill] sm:$0xff] %v7400_v23  ;;  %12907 = vst [vmem:[#allocation64_spill] sm:$0xff] %v7404_v22  ;;  %v6520_v12 = vld [vmem:[%s12301_s0 + $0x7c] ss:$0 sps:$4 sm:$0xff]   ;;  %v7414_v52 = vsel %vm1240_vm3, %v1325_v21, %v1326_v60  ;;  %v1329_v42 = vrot.slane %v7400_v23, 4  ;;  %v12910_v50 = vshll.u32 %v6834_v47, 16 }
  0x6e   :  { %v1374_v58 = vrot.slane %v12908_v18, 5  ;;  %12909 = vst [vmem:[#allocation65_spill] sm:$0xff] %v7414_v52  ;;  %525 = vst.msk [vmem:[#allocation2 + $0x100] sm:$0xf0] %vm65_vm2, %v6519_v41  ;;  %1734 = vrot.lane.b32.xlu0 %v7414_v52, %s6534_s17  ;;  %v7423_v25 = vld [vmem:[#allocation2 + $0x200] sm:$0xff]  ;;  %v7425_v18 = vld [vmem:[#allocation2 + $0x208] sm:$0xff] }
  0x6f   :  { %v1377_v63 = vrot.slane %v12910_v50, 5  ;;  %12911 = vst [vmem:[#allocation66_spill] sm:$0xff] %v7423_v25  ;;  %12912 = vst [vmem:[#allocation67_spill] sm:$0xff] %v7425_v18  ;;  %v12416_v21 = vshll.u32 %v6860_v56, 16  ;;  %v7432_v50 = vsel %vm1240_vm3, %v1328_v13, %v1329_v42  ;;  %v1331_v41 = vrot.slane %v7423_v25, 4 }
  0x70   :  { %v1375_v48 = vor.u32 %v1374_v58, %v1373_v24  ;;  %526 = vst.msk [vmem:[#allocation2 + $0x108] sm:$0xf] %vm32_vm1, %v6520_v12  ;;  %12913 = vst [vmem:[#allocation68_spill] sm:$0xff] %v7432_v50  ;;  %v1332_v29 = vrot.slane %v7425_v18, 4  ;;  %1736 = vrot.lane.b32.xlu1 %v7432_v50, %s6534_s17  ;;  %v7438_v24 = vld [vmem:[#allocation2 + $0x210] sm:$0xff]  ;;  %v12916_v60 = vshrl.u32 %v6860_v56, 16 }
  0x71   :  { %v1378_v52 = vor.u32 %v1377_v63, %v1376_v59  ;;  %12914 = vst [vmem:[#allocation69_spill] sm:$0xff] %v7438_v24  ;;  %v7440_v58 = vld [vmem:[#allocation2 + $0x218] sm:$0xff]  ;;  %v1381_v12 = vrot.slane %v12416_v21, 5  ;;  %v12917_v42 = vshrl.u32 %v6862_v57, 16  ;;  %v12918_v47 = vshll.u32 %v6862_v57, 16 }
  0x72   :  { %12915 = vst [vmem:[#allocation70_spill] sm:$0xff] %v7440_v58  ;;  %v1380_v46 = vrot.slane %v12916_v60, 4  ;;  %v7451_v63 = vsel %vm1240_vm3, %v1331_v41, %v1332_v29  ;;  %v1334_v59 = vrot.slane %v7438_v24, 4  ;;  %v1335_v50 = vrot.slane %v7440_v58, 4 }
  0x73   :  { %v1383_v13 = vrot.slane %v12917_v42, 4  ;;  %v1384_v18 = vrot.slane %v12918_v47, 5  ;;  %12919 = vst [vmem:[#allocation71_spill] sm:$0xff] %v7451_v63  ;;  %v7456_v25 = vsel %vm1337_vm4, %v1375_v48, %v1378_v52  ;;  %1738 = vrot.lane.b32.xlu0 %v7451_v63, %s6534_s17  ;;  %v12423_v42 = vshrl.u32 %v6891_v3, 16 }
  0x74   :  { %12920 = vst [vmem:[#allocation72_spill] sm:$0xff] %v7456_v25  ;;  %v1382_v60 = vor.u32 %v1381_v12, %v1380_v46  ;;  %v12421_v57 = vshll.u32 %v6891_v3, 16  ;;  %v7463_v47 = vsel %vm1240_vm3, %v1334_v59, %v1335_v50  ;;  %v12422_v29 = vshrl.u32 %v6903_v7, 16 }
  0x75   :  { %v1385_v21 = vor.u32 %v1384_v18, %v1383_v13  ;;  %12921 = vst [vmem:[#allocation73_spill] sm:$0xff] %v7463_v47  ;;  %v12424_v41 = vshll.u32 %v6903_v7, 16  ;;  %v12436_v56 = vshrl.u32 %v6920_v19, 16  ;;  %1740 = vrot.lane.b32.xlu1 %v7463_v47, %s6534_s17  ;;  %v1387_v46 = vrot.slane %v12423_v42, 4  ;;  %s6535_s17 = smov 8  }
  0x76   :  { %v1388_v48 = vrot.slane %v12421_v57, 5  ;;  %v12429_v18 = vshll.u32 %v6920_v19, 16  ;;  %v1390_v50 = vrot.slane %v12422_v29, 4  ;;  %v12431_v13 = vshrl.u32 %v6926_v26, 16 }
  0x77   :  { %v7471_v52 = vsel %vm1337_vm4, %v1382_v60, %v1385_v21  ;;  %v1391_v12 = vrot.slane %v12424_v41, 5  ;;  %v12430_v59 = vshll.u32 %v6926_v26, 16  ;;  %1742 = vrot.lane.b32.xlu0 %v7337_v32, %s6535_s17  ;;  %v1394_v60 = vrot.slane %v12436_v56, 4 }
  0x78   :  { %12922 = vst [vmem:[#allocation74_spill] sm:$0xff] %v7471_v52  ;;  %v1389_v21 = vor.u32 %v1388_v48, %v1387_v46  ;;  %v1395_v57 = vrot.slane %v12429_v18, 5  ;;  %v12432_v29 = vshrl.u32 %v6940_v37, 16  ;;  %v1397_v41 = vrot.slane %v12431_v13, 4 }
  0x79   :  { %v1392_v42 = vor.u32 %v1391_v12, %v1390_v50  ;;  %v1398_v63 = vrot.slane %v12430_v59, 5  ;;  %v12433_v47 = vshll.u32 %v6940_v37, 16  ;;  %1744 = vrot.lane.b32.xlu1 %v7353_v53, %s6535_s17  ;;  %v12434_v46 = vshrl.u32 %v6942_v38, 16 }
  0x7a   :  { %v1396_v32 = vor.u32 %v1395_v57, %v1394_v60  ;;  %v12435_v48 = vshll.u32 %v6942_v38, 16  ;;  %v1401_v18 = vrot.slane %v12432_v29, 4  ;;  %v12437_v13 = vshrl.u32 %v6955_v51, 16 }
  0x7b   :  { %v7503_v50 = vsel %vm1337_vm4, %v1389_v21, %v1392_v42  ;;  %v1399_v12 = vor.u32 %v1398_v63, %v1397_v41  ;;  %v1402_v59 = vrot.slane %v12433_v47, 5  ;;  %1746 = vrot.lane.b32.xlu0 %v7356_v43, %s6535_s17  ;;  %v1404_v57 = vrot.slane %v12434_v46, 4  ;;  %v6521_v46 = vld [vmem:[%s12301_s0 + $0xf8] ss:$0 sps:$4 sm:$0xff]  }
  0x7c   :  { %12923 = vst [vmem:[#allocation75_spill] sm:$0xff] %v7503_v50  ;;  %v1405_v60 = vrot.slane %v12435_v48, 5  ;;  %v12443_v29 = vshll.u32 %v6955_v51, 16  ;;  %v12442_v42 = vshrl.u32 %v6966_v61, 16  ;;  %v12441_v21 = vshll.u32 %v6966_v61, 16 }
  0x7d   :  { %v7517_v63 = vsel %vm1337_vm4, %v1396_v32, %v1399_v12  ;;  %v1403_v41 = vor.u32 %v1402_v59, %v1401_v18  ;;  %v1408_v47 = vrot.slane %v12437_v13, 4  ;;  %v6522_v48 = vld [vmem:[%s12301_s0 + $0xfc] ss:$0 sps:$4 sm:$0xff]   ;;  %1748 = vrot.lane.b32.xlu1 %v7359_v36, %s6535_s17  ;;  %v12448_v32 = vshrl.u32 %v6976_v4, 16  ;;  %557 = vst.msk [vmem:[#allocation2 + $0x220] sm:$0xf0] %vm65_vm2, %v6521_v46 }
  0x7e   :  { %12924 = vst [vmem:[#allocation76_spill] sm:$0xff] %v7517_v63  ;;  %v1406_v56 = vor.u32 %v1405_v60, %v1404_v57  ;;  %v1409_v18 = vrot.slane %v12443_v29, 5  ;;  %v1411_v59 = vrot.slane %v12442_v42, 4  ;;  %v1412_v12 = vrot.slane %v12441_v21, 5  ;;  %558 = vst.msk [vmem:[#allocation2 + $0x228] sm:$0xf] %vm32_vm1, %v6522_v48 }
  0x7f   :  { %v12447_v13 = vshll.u32 %v6976_v4, 16  ;;  %v12446_v43 = vshrl.u32 %v6978_v5, 16  ;;  %1750 = vrot.lane.b32.xlu0 %v7404_v22, %s6535_s17  ;;  %v1415_v21 = vrot.slane %v12448_v32, 4  ;;  %v12451_v42 = vshrl.u32 %v6991_v30, 16  ;;  %s6536_s0 = smov 12  }
  0x80   :  { %v7545_v57 = vsel %vm1337_vm4, %v1403_v41, %v1406_v56  ;;  %v1410_v60 = vor.u32 %v1409_v18, %v1408_v47  ;;  %v1413_v29 = vor.u32 %v1412_v12, %v1411_v59  ;;  %v12926_v48 = vshll.u32 %v6978_v5, 16 }
  0x81   :  { %12925 = vst [vmem:[#allocation77_spill] sm:$0xff] %v7545_v57  ;;  %v1416_v53 = vrot.slane %v12447_v13, 5  ;;  %v1418_v46 = vrot.slane %v12446_v43, 4  ;;  %1752 = vrot.lane.b32.xlu1 %v7456_v25, %s6535_s17  ;;  %v12454_v56 = vshll.u32 %v6991_v30, 16  ;;  %v12453_v47 = vshrl.u32 %v6993_v31, 16 }
  0x82   :  { %v1419_v36 = vrot.slane %v12926_v48, 5  ;;  %v12452_v41 = vshll.u32 %v6993_v31, 16  ;;  %v1422_v18 = vrot.slane %v12451_v42, 4  ;;  %v7564_v59 = vsel %vm1337_vm4, %v1410_v60, %v1413_v29 }
  0x83   :  { %12927 = vst [vmem:[#allocation78_spill] sm:$0xff] %v7564_v59  ;;  %v1417_v12 = vor.u32 %v1416_v53, %v1415_v21  ;;  %v12455_v13 = vshrl.u32 %v7019_v1, 16  ;;  %1754 = vrot.lane.b32.xlu0 %v7471_v52, %s6535_s17  ;;  %v1423_v48 = vrot.slane %v12454_v56, 5  ;;  %v1425_v32 = vrot.slane %v12453_v47, 4 }
  0x84   :  { %v1420_v43 = vor.u32 %v1419_v36, %v1418_v46  ;;  %v1426_v22 = vrot.slane %v12452_v41, 5  ;;  %v12458_v42 = vshll.u32 %v7019_v1, 16  ;;  %v12456_v36 = vshrl.u32 %v7021_v8, 16 }
  0x85   :  { %v12457_v53 = vshll.u32 %v7021_v8, 16  ;;  %v1429_v21 = vrot.slane %v12455_v13, 4  ;;  %1756 = vrot.lane.b32.xlu1 %v7503_v50, %s6535_s17  ;;  %v1424_v60 = vor.u32 %v1423_v48, %v1422_v18  ;;  %v12463_v47 = vshrl.u32 %v7044_v0, 16 }
  0x86   :  { %v7577_v29 = vsel %vm1337_vm4, %v1417_v12, %v1420_v43  ;;  %v1427_v46 = vor.u32 %v1426_v22, %v1425_v32  ;;  %v1430_v41 = vrot.slane %v12458_v42, 5  ;;  %v1432_v43 = vrot.slane %v12456_v36, 4 }
  0x87   :  { %12928 = vst [vmem:[#allocation79_spill] sm:$0xff] %v7577_v29  ;;  %v1433_v12 = vrot.slane %v12457_v53, 5  ;;  %v12462_v56 = vshll.u32 %v7044_v0, 16  ;;  %v12461_v13 = vshrl.u32 %v7052_v62, 16  ;;  %1758 = vrot.lane.b32.xlu0 %v7517_v63, %s6535_s17  ;;  %v12464_v18 = vshll.u32 %v7052_v62, 16 }
  0x88   :  { %v7597_v22 = vsel %vm1337_vm4, %v1424_v60, %v1427_v46  ;;  %v1431_v32 = vor.u32 %v1430_v41, %v1429_v21  ;;  %v1436_v48 = vrot.slane %v12463_v47, 4  ;;  %v12467_v52 = vshrl.u32 %v7066_v17, 16 }
  0x89   :  { %12929 = vst [vmem:[#allocation80_spill] sm:$0xff] %v7597_v22  ;;  %v1434_v36 = vor.u32 %v1433_v12, %v1432_v43  ;;  %v1437_v53 = vrot.slane %v12462_v56, 5  ;;  %v1439_v42 = vrot.slane %v12461_v13, 4  ;;  %1760 = vrot.lane.b32.xlu1 %v7545_v57, %s6535_s17  ;;  %v1440_v41 = vrot.slane %v12464_v18, 5 }
  0x8a   :  { %v12469_v21 = vshll.u32 %v7066_v17, 16  ;;  %v12468_v60 = vshrl.u32 %v7068_v54, 16  ;;  %v12470_v46 = vshll.u32 %v7068_v54, 16  ;;  %v1443_v13 = vrot.slane %v12467_v52, 4 }
  0x8b   :  { %v7615_v43 = vsel %vm1337_vm4, %v1431_v32, %v1434_v36  ;;  %v1438_v12 = vor.u32 %v1437_v53, %v1436_v48  ;;  %v12475_v56 = vshrl.u32 %v6805_v34, 16  ;;  %1762 = vrot.lane.b32.xlu0 %v7564_v59, %s6535_s17  ;;  %v1441_v47 = vor.u32 %v1440_v41, %v1439_v42 }
  0x8c   :  { %12930 = vst [vmem:[#allocation81_spill] sm:$0xff] %v7615_v43  ;;  %v1444_v18 = vrot.slane %v12469_v21, 5  ;;  %v1446_v63 = vrot.slane %v12468_v60, 4  ;;  %v1447_v36 = vrot.slane %v12470_v46, 5  ;;  %v12478_v53 = vshll.u32 %v6805_v34, 16 }
  0x8d   :  { %v12477_v32 = vshrl.u32 %v6918_v16, 16  ;;  %v12476_v48 = vshll.u32 %v6918_v16, 16  ;;  %v1450_v52 = vrot.slane %v12475_v56, 4  ;;  %1764 = vrot.lane.b32.xlu1 %v7577_v29, %s6535_s17  ;;  %v7636_v42 = vsel %vm1337_vm4, %v1438_v12, %v1441_v47 }
  0x8e   :  { %12931 = vst [vmem:[#allocation82_spill] sm:$0xff] %v7636_v42  ;;  %v1445_v41 = vor.u32 %v1444_v18, %v1443_v13  ;;  %v1448_v60 = vor.u32 %v1447_v36, %v1446_v63  ;;  %v12479_v21 = vshrl.u32 %v7086_v6, 16  ;;  %v1451_v46 = vrot.slane %v12478_v53, 5 }
  0x8f   :  { %v1453_v59 = vrot.slane %v12477_v32, 4  ;;  %v1454_v57 = vrot.slane %v12476_v48, 5  ;;  %v12480_v56 = vshll.u32 %v7086_v6, 16  ;;  %1766 = vrot.lane.b32.xlu0 %v7597_v22, %s6535_s17  ;;  %v12481_v13 = vshrl.u32 %v7105_v40, 16  ;;  %v12937_v22 = vld [vmem:[#allocation40_spill] sm:$0xff] }
  0x90   :  { %v7649_v47 = vsel %vm1337_vm4, %v1445_v41, %v1448_v60  ;;  %v12482_v63 = vshll.u32 %v7105_v40, 16  ;;  %v1457_v18 = vrot.slane %v12479_v21, 4  ;;  %v1452_v12 = vor.u32 %v1451_v46, %v1450_v52 }
  0x91   :  { %12932 = vst [vmem:[#allocation83_spill] sm:$0xff] %v7649_v47  ;;  %v1455_v36 = vor.u32 %v1454_v57, %v1453_v59  ;;  %v1458_v48 = vrot.slane %v12480_v56, 5  ;;  %v12487_v32 = vshrl.u32 %v7120_v33, 16  ;;  %1768 = vrot.lane.b32.xlu1 %v7615_v43, %s6535_s17  ;;  %v1460_v60 = vrot.slane %v12481_v13, 4 }
  0x92   :  { %v1461_v41 = vrot.slane %v12482_v63, 5  ;;  %v12486_v53 = vshll.u32 %v7120_v33, 16  ;;  %v12485_v21 = vshrl.u32 %v7122_v14, 16  ;;  %v12488_v59 = vshll.u32 %v7122_v14, 16 }
  0x93   :  { %v1456_v52 = vsel %vm1337_vm4, %v1452_v12, %v1455_v36  ;;  %v1459_v57 = vor.u32 %v1458_v48, %v1457_v18  ;;  %v1464_v46 = vrot.slane %v12487_v32, 4  ;;  %1770 = vrot.lane.b32.xlu0 %v7636_v42, %s6535_s17  ;;  %v12496_v16 = vshrl.u32 %v7143_v2, 16 }
  0x94   :  { %v1462_v56 = vor.u32 %v1461_v41, %v1460_v60  ;;  %v1465_v13 = vrot.slane %v12486_v53, 5  ;;  %v1467_v63 = vrot.slane %v12485_v21, 4  ;;  %v1468_v48 = vrot.slane %v12488_v59, 5 }
  0x95   :  { %v12493_v18 = vshll.u32 %v7143_v2, 16  ;;  %v12494_v12 = vshrl.u32 %v7145_v9, 16  ;;  %v12495_v36 = vshll.u32 %v7145_v9, 16  ;;  %1772 = vrot.lane.b32.xlu1 %v7649_v47, %s6535_s17  ;;  %v1471_v21 = vrot.slane %v12496_v16, 4 }
  0x96   :  { %v7685_v60 = vsel %vm1337_vm4, %v1459_v57, %v1462_v56  ;;  %v1466_v41 = vor.u32 %v1465_v13, %v1464_v46  ;;  %v12497_v53 = vshrl.u32 %v7166_v35, 16  ;;  %v1469_v32 = vor.u32 %v1468_v48, %v1467_v63 }
  0x97   :  { %12933 = vst [vmem:[#allocation84_spill] sm:$0xff] %v7685_v60  ;;  %v1472_v59 = vrot.slane %v12493_v18, 5  ;;  %v1474_v34 = vrot.slane %v12494_v12, 4  ;;  %v1475_v42 = vrot.slane %v12495_v36, 5  ;;  %1774 = vrot.lane.b32.xlu0 %v1456_v52, %s6535_s17  ;;  %v12500_v56 = vshll.u32 %v7166_v35, 16 }
  0x98   :  { %v12499_v13 = vshrl.u32 %v7168_v27, 16  ;;  %v12498_v57 = vshll.u32 %v7168_v27, 16  ;;  %v1478_v63 = vrot.slane %v12497_v53, 4  ;;  %v7703_v46 = vsel %vm1337_vm4, %v1466_v41, %v1469_v32 }
  0x99   :  { %12934 = vst [vmem:[#allocation85_spill] sm:$0xff] %v7703_v46  ;;  %v1473_v48 = vor.u32 %v1472_v59, %v1471_v21  ;;  %v1476_v18 = vor.u32 %v1475_v42, %v1474_v34  ;;  %v12504_v12 = vshrl.u32 %v7186_v49, 16  ;;  %1776 = vrot.lane.b32.xlu1 %v7685_v60, %s6535_s17  ;;  %v1479_v52 = vrot.slane %v12500_v56, 5 }
  0x9a   :  { %v1481_v36 = vrot.slane %v12499_v13, 4  ;;  %v1482_v16 = vrot.slane %v12498_v57, 5  ;;  %v12507_v53 = vshll.u32 %v7186_v49, 16  ;;  %v12505_v34 = vshrl.u32 %v7188_v39, 16  ;;  %v12936_v13 = vld [vmem:[#allocation39_spill] sm:$0xff] }
  0x9b   :  { %v7716_v32 = vsel %vm1337_vm4, %v1473_v48, %v1476_v18  ;;  %v12506_v21 = vshll.u32 %v7188_v39, 16  ;;  %v1485_v42 = vrot.slane %v12504_v12, 4  ;;  %1778 = vrot.lane.b32.xlu0 %v7703_v46, %s6535_s17  ;;  %v1480_v59 = vor.u32 %v1479_v52, %v1478_v63  ;;  %v12939_v46 = vld [vmem:[#allocation42_spill] sm:$0xff] }
  0x9c   :  { %12935 = vst [vmem:[#allocation86_spill] sm:$0xff] %v7716_v32  ;;  %v1483_v41 = vor.u32 %v1482_v16, %v1481_v36  ;;  %v1486_v57 = vrot.slane %v12507_v53, 5  ;;  %v12514_v56 = vshrl.u32 %v12936_v13, 16  ;;  %v1488_v18 = vrot.slane %v12505_v34, 4 }
  0x9d   :  { %v1489_v48 = vrot.slane %v12506_v21, 5  ;;  %v12512_v60 = vshll.u32 %v12936_v13, 16  ;;  %v12513_v12 = vshrl.u32 %v12937_v22, 16  ;;  %1780 = vrot.lane.b32.xlu1 %v7716_v32, %s6535_s17  ;;  %v12517_v63 = vshll.u32 %v12937_v22, 16 }
  0x9e   :  { %v7736_v16 = vsel %vm1337_vm4, %v1480_v59, %v1483_v41  ;;  %v1487_v36 = vor.u32 %v1486_v57, %v1485_v42  ;;  %v1492_v52 = vrot.slane %v12514_v56, 4  ;;  %v12520_v47 = vshrl.u32 %v12939_v46, 16  ;;  %v12940_v59 = vld [vmem:[#allocation44_spill] sm:$0xff] }
  0x9f   :  { %12938 = vst [vmem:[#allocation39_spill] sm:$0xff] %v7736_v16  ;;  %v1490_v34 = vor.u32 %v1489_v48, %v1488_v18  ;;  %v1493_v21 = vrot.slane %v12512_v60, 5  ;;  %v1495_v53 = vrot.slane %v12513_v12, 4  ;;  %1782 = vrot.lane.b32.xlu0 %v7736_v16, %s6535_s17  ;;  %v1496_v57 = vrot.slane %v12517_v63, 5 }
  0xa0   :  { %v12521_v42 = vshll.u32 %v12939_v46, 16  ;;  %v12523_v41 = vshrl.u32 %v12940_v59, 16  ;;  %v12522_v18 = vshll.u32 %v12940_v59, 16  ;;  %v1499_v12 = vrot.slane %v12520_v47, 4 }
  0xa1   :  { %v7754_v48 = vsel %vm1337_vm4, %v1487_v36, %v1490_v34  ;;  %v1494_v60 = vor.u32 %v1493_v21, %v1492_v52  ;;  %v12528_v56 = vshrl.u32 %v7261_v28, 16  ;;  %v1497_v16 = vor.u32 %v1496_v57, %v1495_v53 }
  0xa2   :  { %12941 = vst [vmem:[#allocation40_spill] sm:$0xff] %v7754_v48  ;;  %1784 = vrot.lane.b32.xlu1 %v7754_v48, %s6535_s17  ;;  %v1500_v63 = vrot.slane %v12521_v42, 5  ;;  %v1502_v32 = vrot.slane %v12523_v41, 4  ;;  %v1503_v34 = vrot.slane %v12522_v18, 5  ;;  %v12533_v21 = vshll.u32 %v7261_v28, 16 }
  0xa3   :  { %v12531_v36 = vshrl.u32 %v7275_v20, 16  ;;  %v12529_v52 = vshll.u32 %v7275_v20, 16  ;;  %v1506_v47 = vrot.slane %v12528_v56, 4  ;;  %v7773_v53 = vsel %vm1337_vm4, %v1494_v60, %v1497_v16  ;;  %v7786_v56 = vpop.permute.xlu0 %1678 }
  0xa4   :  { %12942 = vst [vmem:[#allocation42_spill] sm:$0xff] %v7773_v53  ;;  %v1501_v57 = vor.u32 %v1500_v63, %v1499_v12  ;;  %v1504_v42 = vor.u32 %v1503_v34, %v1502_v32  ;;  %1786 = vrot.lane.b32.xlu0 %v7773_v53, %s6535_s17  ;;  %v1507_v18 = vrot.slane %v12533_v21, 5  ;;  %12944 = vst [vmem:[#allocation87_spill] sm:$0xff] %v7786_v56  ;;  %v12530_v32 = vshrl.u32 %v7298_v10, 16 }
  0xa5   :  { %v1509_v41 = vrot.slane %v12531_v36, 4  ;;  %v1510_v48 = vrot.slane %v12529_v52, 5  ;;  %v12532_v16 = vshll.u32 %v7298_v10, 16  ;;  %v12536_v63 = vshrl.u32 %v7300_v15, 16  ;;  %v12948_v36 = vld [vmem:[#allocation52_spill] sm:$0xff] }
  0xa6   :  { %v7784_v43 = vsel %vm1337_vm4, %v1501_v57, %v1504_v42  ;;  %v1508_v12 = vor.u32 %v1507_v18, %v1506_v47  ;;  %v12537_v34 = vshll.u32 %v7300_v15, 16  ;;  %v1513_v42 = vrot.slane %v12530_v32, 4 }
  0xa7   :  { %12943 = vst [vmem:[#allocation44_spill] sm:$0xff] %v7784_v43  ;;  %1788 = vrot.lane.b32.xlu1 %v7784_v43, %s6535_s17  ;;  %v1511_v60 = vor.u32 %v1510_v48, %v1509_v41  ;;  %v1514_v57 = vrot.slane %v12532_v16, 5  ;;  %v7802_v41 = vpop.permute.xlu1 %1682  ;;  %v1516_v18 = vrot.slane %v12536_v63, 4  ;;  %v12540_v16 = vshrl.u32 %v12948_v36, 16 }
  0xa8   :  { %12946 = vst [vmem:[#allocation89_spill] sm:$0xff] %v7802_v41  ;;  %v1517_v48 = vrot.slane %v12537_v34, 5  ;;  %v12541_v21 = vshll.u32 %v12948_v36, 16  ;;  %v12949_v41 = vshrl.u32 %v7319_v45, 16  ;;  %vm142_vm1 = vcmask 64516  }
  0xa9   :  { %v7795_v52 = vsel %vm1337_vm4, %v1508_v12, %v1511_v60  ;;  %v12542_v12 = vshll.u32 %v7319_v45, 16  ;;  %v7811_v60 = vpop.permute.xlu0 %1680  ;;  %v1515_v32 = vor.u32 %v1514_v57, %v1513_v42  ;;  %v1523_v63 = vrot.slane %v12540_v16, 4  ;;  %v12980_v45 = vld [vmem:[#allocation67_spill] sm:$0xff] }
  0xaa   :  { %12945 = vst [vmem:[#allocation88_spill] sm:$0xff] %v7795_v52  ;;  %1790 = vrot.lane.b32.xlu0 %v7795_v52, %s6535_s17  ;;  %12947 = vst [vmem:[#allocation90_spill] sm:$0xff] %v7811_v60  ;;  %v1518_v47 = vor.u32 %v1517_v48, %v1516_v18  ;;  %v1520_v56 = vrot.slane %v12949_v41, 4  ;;  %v1524_v34 = vrot.slane %v12541_v21, 5  ;;  %v12545_v18 = vshrl.u32 %v7342_v55, 16 }
  0xab   :  { %v1521_v52 = vrot.slane %v12542_v12, 5  ;;  %v7823_v53 = vpop.permute.xlu1 %1684  ;;  %v12546_v48 = vshll.u32 %v7342_v55, 16  ;;  %v12547_v21 = vshrl.u32 %v7361_v11, 16  ;;  %v12548_v12 = vshll.u32 %v7361_v11, 16 }
  0xac   :  { %12950 = vst [vmem:[#allocation91_spill] sm:$0xff] %v7823_v53  ;;  %v7826_v42 = vsel %vm1337_vm4, %v1515_v32, %v1518_v47  ;;  %v1525_v41 = vor.u32 %v1524_v34, %v1523_v63  ;;  %vm5362_vm2 = vcmask 392192  }
  0xad   :  { %12951 = vst [vmem:[#allocation92_spill] sm:$0xff] %v7826_v42  ;;  %v1522_v57 = vor.u32 %v1521_v52, %v1520_v56  ;;  %v7828_v60 = vpop.permute.xlu0 %1686  ;;  %1792 = vrot.lane.b32.xlu1 %v7826_v42, %s6535_s17  ;;  %v1527_v56 = vrot.slane %v12545_v18, 4  ;;  %v1528_v52 = vrot.slane %v12546_v48, 5  ;;  %v1530_v34 = vrot.slane %v12547_v21, 4 }
  0xae   :  { %12952 = vst [vmem:[#allocation93_spill] sm:$0xff] %v7828_v60  ;;  %v1531_v47 = vrot.slane %v12548_v12, 5  ;;  %v12956_v60 = vld [vmem:[#allocation60_spill] sm:$0xff] }
  0xaf   :  { %v7835_v16 = vsel %vm1337_vm4, %v1522_v57, %v1525_v41  ;;  %v7839_v32 = vpop.permute.xlu1 %1688  ;;  %v12549_v57 = vshrl.u32 %v7374_v44, 16  ;;  %v1529_v41 = vor.u32 %v1528_v52, %v1527_v56  ;;  %v12555_v53 = vshrl.u32 %v12956_v60, 16 }
  0xb0   :  { %12953 = vst [vmem:[#allocation94_spill] sm:$0xff] %v7835_v16  ;;  %12954 = vst [vmem:[#allocation95_spill] sm:$0xff] %v7839_v32  ;;  %1794 = vrot.lane.b32.xlu0 %v7835_v16, %s6535_s17  ;;  %v12552_v32 = vshll.u32 %v7374_v44, 16  ;;  %v1532_v16 = vor.u32 %v1531_v47, %v1530_v34  ;;  %v12560_v18 = vshll.u32 %v12956_v60, 16  ;;  %v12977_v60 = vld [vmem:[#allocation66_spill] sm:$0xff] }
  0xb1   :  { %v7847_v63 = vpop.permute.xlu0 %1690  ;;  %v1534_v48 = vrot.slane %v12549_v57, 4  ;;  %v1537_v12 = vrot.slane %v12555_v53, 4  ;;  %v12960_v57 = vld [vmem:[#allocation7_spill] sm:$0xff]  ;;  %v12963_v53 = vld [vmem:[#allocation9_spill] sm:$0xff]  ;;  %v12585_v44 = vshrl.u32 %v12977_v60, 16 }
  0xb2   :  { %12955 = vst [vmem:[#allocation96_spill] sm:$0xff] %v7847_v63  ;;  %v1535_v21 = vrot.slane %v12552_v32, 5  ;;  %v7866_v56 = vsel %vm1337_vm4, %v1529_v41, %v1532_v16  ;;  %v1538_v52 = vrot.slane %v12560_v18, 5  ;;  %v12964_v29 = vshrl.u32 %v12963_v53, 16  ;;  %v12965_v41 = vld [vmem:[#allocation62_spill] sm:$0xff] }
  0xb3   :  { %v7859_v63 = vpop.permute.xlu1 %1692  ;;  %12958 = vst [vmem:[#allocation98_spill] sm:$0xff] %v7866_v56  ;;  %1796 = vrot.lane.b32.xlu1 %v7866_v56, %s6535_s17  ;;  %v12573_v18 = vshll.u32 %v12965_v41, 16  ;;  %v12971_v56 = vshrl.u32 %v12965_v41, 16  ;;  %v12981_v55 = vshll.u32 %v12960_v57, 16 }
  0xb4   :  { %12957 = vst [vmem:[#allocation97_spill] sm:$0xff] %v7859_v63  ;;  %v1536_v34 = vor.u32 %v1535_v21, %v1534_v48  ;;  %v12961_v63 = vshrl.u32 %v12960_v57, 16  ;;  %v1539_v32 = vor.u32 %v1538_v52, %v1537_v12  ;;  %v7882_v16 = vrot.slane %v12964_v29, 3 }
  0xb5   :  { %v7872_v47 = vpop.permute.xlu0 %1694  ;;  %v12966_v21 = vshll.u32 %v12963_v53, 16  ;;  %v1541_v53 = vrot.slane %v12971_v56, 4 }
  0xb6   :  { %12959 = vst [vmem:[#allocation99_spill] sm:$0xff] %v7872_v47  ;;  %v7876_v42 = vrot.slane %v12961_v63, 3  ;;  %v12967_v47 = vld [vmem:[#allocation8_spill] sm:$0xff]  ;;  %v7896_v12 = vsel %vm1337_vm4, %v1536_v34, %v1539_v32  ;;  %v12974_v32 = vld [vmem:[#allocation10_spill] sm:$0xff] }
  0xb7   :  { %v7878_v43 = vpop.permute.xlu1 %1696  ;;  %v7889_v48 = vrot.slane %v12966_v21, 4  ;;  %v12968_v63 = vshrl.u32 %v12967_v47, 16  ;;  %12969 = vst [vmem:[#allocation9_spill] sm:$0xff] %v7896_v12  ;;  %v12970_v52 = vshll.u32 %v12967_v47, 16  ;;  %1798 = vrot.lane.b32.xlu0 %v7896_v12, %s6535_s17  ;;  %v1542_v21 = vrot.slane %v12573_v18, 5 }
  0xb8   :  { %12962 = vst [vmem:[#allocation7_spill] sm:$0xff] %v7878_v43  ;;  %v12975_v34 = vshrl.u32 %v12974_v32, 16  ;;  %v12976_v47 = vshll.u32 %v7400_v23, 16  ;;  %v12586_v12 = vshll.u32 %v12977_v60, 16  ;;  %v12979_v56 = vshll.u32 %v12974_v32, 16 }
  0xb9   :  { %v7893_v25 = vrot.slane %v12968_v63, 3  ;;  %v655_v50 = vrot.slane %v12970_v52, 4  ;;  %v12972_v63 = vshrl.u32 %v7400_v23, 16  ;;  %v7909_v36 = vpop.permute.xlu0 %1698  ;;  %v1543_v41 = vor.u32 %v1542_v21, %v1541_v53 }
  0xba   :  { %12973 = vst [vmem:[#allocation8_spill] sm:$0xff] %v7909_v36  ;;  %v686_v29 = vrot.slane %v12975_v34, 3  ;;  %v1545_v52 = vrot.slane %v12976_v47, 5  ;;  %v689_v18 = vrot.slane %v12979_v56, 4  ;;  %v12589_v36 = vshll.u32 %v12980_v45, 16 }
  0xbb   :  { %v1544_v43 = vrot.slane %v12972_v63, 4  ;;  %v7917_v11 = vpop.permute.xlu1 %1700  ;;  %v12588_v63 = vshrl.u32 %v12980_v45, 16  ;;  %v7925_v34 = vrot.slane %v12981_v55, 4  ;;  %v1548_v47 = vrot.slane %v12585_v44, 4  ;;  %v12991_v45 = vld [vmem:[#allocation15_spill] sm:$0xff] }
  0xbc   :  { %12978 = vst [vmem:[#allocation10_spill] sm:$0xff] %v7917_v11  ;;  %v1549_v15 = vrot.slane %v12586_v12, 5  ;;  %v12982_v11 = vld [vmem:[#allocation13_spill] sm:$0xff]  ;;  %v1552_v55 = vrot.slane %v12589_v36, 5  ;;  %v656_v36 = vor.u32 %v655_v50, %v7893_v25  ;;  %v12993_v20 = vshll.u32 %v12991_v45, 16 }
  0xbd   :  { %v1546_v23 = vor.u32 %v1545_v52, %v1544_v43  ;;  %v12983_v10 = vshrl.u32 %v12982_v11, 16  ;;  %v12984_v53 = vshll.u32 %v12982_v11, 16  ;;  %v1551_v56 = vrot.slane %v12588_v63, 4  ;;  %v7939_v57 = vpop.permute.xlu0 %1702  ;;  %v12986_v43 = vld [vmem:[#allocation6_spill] sm:$0xff] }
  0xbe   :  { %12985 = vst [vmem:[#allocation13_spill] sm:$0xff] %v7939_v57  ;;  %v12987_v52 = vshrl.u32 %v12986_v43, 16  ;;  %v12988_v12 = vshll.u32 %v12986_v43, 16  ;;  %v1550_v11 = vor.u32 %v1549_v15, %v1548_v47  ;;  %v664_v63 = vor.u32 %v7889_v48, %v7882_v16  ;;  %v12996_v48 = vld [vmem:[#allocation16_spill] sm:$0xff] }
  0xbf   :  { %v694_v32 = vrot.slane %v12983_v10, 3  ;;  %v697_v21 = vrot.slane %v12984_v53, 4  ;;  %v7950_v10 = vsel %vm1337_vm4, %v1543_v41, %v1546_v23  ;;  %v7952_v53 = vpop.permute.xlu1 %1704  ;;  %v690_v57 = vor.u32 %v689_v18, %v686_v29 }
  0xc0   :  { %v7943_v44 = vrot.slane %v12987_v52, 3  ;;  %v7947_v60 = vrot.slane %v12988_v12, 4  ;;  %12989 = vst [vmem:[#allocation6_spill] sm:$0xff] %v7950_v10  ;;  %12990 = vst [vmem:[#allocation100_spill] sm:$0xff] %v7952_v53  ;;  %1800 = vrot.lane.b32.xlu1 %v7950_v10, %s6535_s17  ;;  %v1553_v52 = vor.u32 %v1552_v55, %v1551_v56  ;;  %v12992_v43 = vshrl.u32 %v12991_v45, 16  ;;  %v12999_v55 = vld [vmem:[#allocation17_spill] sm:$0xff] }
  0xc1   :  { %v706_v23 = vrot.slane %v12993_v20, 4  ;;  %v12593_v15 = vshrl.u32 %v7438_v24, 16  ;;  %v12596_v41 = vshll.u32 %v7438_v24, 16  ;;  %v698_v47 = vor.u32 %v697_v21, %v694_v32  ;;  %v7970_v18 = vpop.permute.xlu0 %1706  ;;  %v13004_v53 = vld [vmem:[#allocation18_spill] sm:$0xff] }
  0xc2   :  { %v703_v12 = vrot.slane %v12992_v43, 3  ;;  %v7966_v16 = vsel %vm1337_vm4, %v1550_v11, %v1553_v52  ;;  %v12601_v25 = vshrl.u32 %v7440_v58, 16  ;;  %12995 = vst [vmem:[#allocation101_spill] sm:$0xff] %v7970_v18  ;;  %v12997_v29 = vshrl.u32 %v12996_v48, 16 }
  0xc3   :  { %12994 = vst [vmem:[#allocation15_spill] sm:$0xff] %v7966_v16  ;;  %v12998_v45 = vshll.u32 %v12996_v48, 16  ;;  %1802 = vrot.lane.b32.xlu0 %v7966_v16, %s6535_s17  ;;  %v1555_v32 = vrot.slane %v12593_v15, 4  ;;  %v1556_v21 = vrot.slane %v12596_v41, 5  ;;  %v13000_v11 = vshrl.u32 %v12999_v55, 16  ;;  %v7990_v18 = vpop.permute.xlu1 %1708 }
  0xc4   :  { %v711_v56 = vrot.slane %v12997_v29, 3  ;;  %v13001_v43 = vshll.u32 %v12999_v55, 16  ;;  %v1558_v29 = vrot.slane %v12601_v25, 4  ;;  %v13002_v48 = vshll.u32 %v7440_v58, 16  ;;  %13003 = vst [vmem:[#allocation16_spill] sm:$0xff] %v7990_v18 }
  0xc5   :  { %v714_v20 = vrot.slane %v12998_v45, 4  ;;  %v720_v52 = vrot.slane %v13000_v11, 3  ;;  %v13005_v15 = vshrl.u32 %v13004_v53, 16  ;;  %v13006_v41 = vshll.u32 %v13004_v53, 16  ;;  %v8003_v25 = vpop.permute.xlu0 %1710  ;;  %v13009_v53 = vld [vmem:[#allocation21_spill] sm:$0xff] }
  0xc6   :  { %v723_v50 = vrot.slane %v13001_v43, 4  ;;  %v1559_v45 = vrot.slane %v13002_v48, 5  ;;  %v1557_v24 = vor.u32 %v1556_v21, %v1555_v32  ;;  %v681_v55 = vor.u32 %v7925_v34, %v7876_v42  ;;  %13008 = vst [vmem:[#allocation18_spill] sm:$0xff] %v8003_v25 }
  0xc7   :  { %v728_v16 = vrot.slane %v13005_v15, 3  ;;  %v731_v10 = vrot.slane %v13006_v41, 4  ;;  %v673_v11 = vor.u32 %v7947_v60, %v7943_v44  ;;  %v8001_v43 = vsel %vm631_vm5, %v656_v36, %v664_v63  ;;  %v13012_v60 = vld [vmem:[#allocation22_spill] sm:$0xff] }
  0xc8   :  { %13007 = vst [vmem:[#allocation17_spill] sm:$0xff] %v8001_v43  ;;  %v1560_v48 = vor.u32 %v1559_v45, %v1558_v29  ;;  %v8006_v18 = vsel %vm631_vm5, %v690_v57, %v698_v47  ;;  %v707_v15 = vor.u32 %v706_v23, %v703_v12  ;;  %v715_v58 = vor.u32 %v714_v20, %v711_v56  ;;  %v8019_v57 = vpop.permute.xlu1 %1712 }
  0xc9   :  { %v13010_v41 = vshrl.u32 %v13009_v53, 16  ;;  %1806 = vrot.lane.b32.xlu0 %v8001_v43, %s6536_s0  ;;  %v724_v42 = vor.u32 %v723_v50, %v720_v52  ;;  %v13011_v44 = vshll.u32 %v13009_v53, 16  ;;  %v13013_v63 = vshrl.u32 %v13012_v60, 16  ;;  %13015 = vst [vmem:[#allocation22_spill] sm:$0xff] %v8019_v57 }
  0xca   :  { %v8017_v21 = vsel %vm1337_vm4, %v1557_v24, %v1560_v48  ;;  %v732_v12 = vor.u32 %v731_v10, %v728_v16  ;;  %v13016_v23 = vshll.u32 %v13012_v60, 16  ;;  %v13017_v50 = vshrl.u32 %v6891_v3, 16 }
  0xcb   :  { %v737_v32 = vrot.slane %v13010_v41, 3  ;;  %v740_v36 = vrot.slane %v13011_v44, 4  ;;  %v745_v34 = vrot.slane %v13013_v63, 3  ;;  %13014 = vst [vmem:[#allocation21_spill] sm:$0xff] %v8017_v21  ;;  %1804 = vrot.lane.b32.xlu1 %v8017_v21, %s6535_s17  ;;  %v13018_v20 = vshll.u32 %v6891_v3, 16  ;;  %v8037_v44 = vpop.permute.xlu0 %1714  ;;  %v13178_v21 = vld [vmem:[#allocation14_spill] sm:$0xff] }
  0xcc   :  { %v748_v47 = vrot.slane %v13016_v23, 4  ;;  %v754_v56 = vrot.slane %v13017_v50, 3  ;;  %v13019_v29 = vshrl.u32 %v6903_v7, 16  ;;  %v13020_v24 = vshll.u32 %v6903_v7, 16  ;;  %13023 = vst [vmem:[#allocation102_spill] sm:$0xff] %v8037_v44 }
  0xcd   :  { %v757_v52 = vrot.slane %v13018_v20, 4  ;;  %v13021_v10 = vshrl.u32 %v6920_v19, 16  ;;  %v13022_v53 = vshll.u32 %v6920_v19, 16  ;;  %v13024_v60 = vshrl.u32 %v6926_v26, 16  ;;  %1810 = vrot.lane.b32.xlu0 %v8006_v18, %s6536_s0 }
  0xce   :  { %v762_v45 = vrot.slane %v13019_v29, 3  ;;  %v765_v48 = vrot.slane %v13020_v24, 4  ;;  %v13025_v3 = vshll.u32 %v6926_v26, 16  ;;  %v13026_v7 = vshrl.u32 %v6940_v37, 16  ;;  %v8056_v26 = vpop.permute.xlu1 %1716 }
  0xcf   :  { %v771_v16 = vrot.slane %v13021_v10, 3  ;;  %v774_v41 = vrot.slane %v13022_v53, 4  ;;  %v779_v63 = vrot.slane %v13024_v60, 3  ;;  %v13027_v20 = vshll.u32 %v6940_v37, 16  ;;  %13030 = vst [vmem:[#allocation103_spill] sm:$0xff] %v8056_v26 }
  0xd0   :  { %v782_v23 = vrot.slane %v13025_v3, 4  ;;  %v788_v50 = vrot.slane %v13026_v7, 3  ;;  %v8050_v19 = vsel %vm631_vm5, %v673_v11, %v681_v55  ;;  %v13028_v24 = vshrl.u32 %v6942_v38, 16 }
  0xd1   :  { %v791_v29 = vrot.slane %v13027_v20, 4  ;;  %v13029_v53 = vshll.u32 %v6942_v38, 16  ;;  %v8059_v3 = vsel %vm631_vm5, %v707_v15, %v715_v58  ;;  %v741_v44 = vor.u32 %v740_v36, %v737_v32  ;;  %1808 = vrot.lane.b32.xlu1 %v8050_v19, %s6536_s0  ;;  %v8066_v20 = vpop.permute.xlu0 %1718 }
  0xd2   :  { %v796_v10 = vrot.slane %v13028_v24, 3  ;;  %v8064_v37 = vsel %vm631_vm5, %v724_v42, %v732_v12  ;;  %v749_v55 = vor.u32 %v748_v47, %v745_v34  ;;  %v758_v11 = vor.u32 %v757_v52, %v754_v56  ;;  %13031 = vst [vmem:[#allocation104_spill] sm:$0xff] %v8066_v20  ;;  %v8078_v47 = vpop.permute.xlu1 %1720 }
  0xd3   :  { %v799_v60 = vrot.slane %v13029_v53, 4  ;;  %v766_v7 = vor.u32 %v765_v48, %v762_v45  ;;  %v775_v24 = vor.u32 %v774_v41, %v771_v16  ;;  %v783_v38 = vor.u32 %v782_v23, %v779_v63  ;;  %1814 = vrot.lane.b32.xlu0 %v8064_v37, %s6536_s0  ;;  %13036 = vst [vmem:[#allocation105_spill] sm:$0xff] %v8078_v47 }
  0xd4   :  { %v792_v53 = vor.u32 %v791_v29, %v788_v50  ;;  %v13032_v26 = vshrl.u32 %v6955_v51, 16  ;;  %v13033_v15 = vshll.u32 %v6955_v51, 16  ;;  %v13034_v42 = vshrl.u32 %v6966_v61, 16 }
  0xd5   :  { %v800_v58 = vor.u32 %v799_v60, %v796_v10  ;;  %v13035_v34 = vshll.u32 %v6966_v61, 16  ;;  %1812 = vrot.lane.b32.xlu1 %v8059_v3, %s6536_s0  ;;  %v13037_v56 = vshrl.u32 %v6976_v4, 16  ;;  %v13038_v45 = vshll.u32 %v6976_v4, 16  ;;  %v8097_v60 = vpop.permute.xlu0 %1722 }
  0xd6   :  { %v805_v57 = vrot.slane %v13032_v26, 3  ;;  %v808_v32 = vrot.slane %v13033_v15, 4  ;;  %v813_v36 = vrot.slane %v13034_v42, 3  ;;  %v13039_v51 = vshrl.u32 %v6978_v5, 16  ;;  %13043 = vst [vmem:[#allocation106_spill] sm:$0xff] %v8097_v60 }
  0xd7   :  { %v816_v12 = vrot.slane %v13035_v34, 4  ;;  %v822_v52 = vrot.slane %v13037_v56, 3  ;;  %v825_v48 = vrot.slane %v13038_v45, 4  ;;  %v13040_v41 = vshll.u32 %v6978_v5, 16  ;;  %v8114_v56 = vpop.permute.xlu1 %1724 }
  0xd8   :  { %v830_v16 = vrot.slane %v13039_v51, 3  ;;  %v8091_v61 = vsel %vm631_vm5, %v758_v11, %v766_v7  ;;  %v13041_v23 = vshrl.u32 %v7019_v1, 16  ;;  %v13042_v29 = vshll.u32 %v7019_v1, 16  ;;  %13046 = vst [vmem:[#allocation107_spill] sm:$0xff] %v8114_v56 }
  0xd9   :  { %v833_v63 = vrot.slane %v13040_v41, 4  ;;  %v8100_v4 = vsel %vm631_vm5, %v741_v44, %v749_v55  ;;  %1818 = vrot.lane.b32.xlu0 %v8091_v61, %s6536_s0  ;;  %v13044_v5 = vshrl.u32 %v7021_v8, 16  ;;  %v13045_v11 = vshll.u32 %v7021_v8, 16 }
  0xda   :  { %v856_v50 = vrot.slane %v13041_v23, 3  ;;  %v859_v10 = vrot.slane %v13042_v29, 4  ;;  %v8109_v15 = vsel %vm631_vm5, %v775_v24, %v783_v38  ;;  %v8112_v1 = vsel %vm631_vm5, %v792_v53, %v800_v58  ;;  %1816 = vrot.lane.b32.xlu1 %v8100_v4, %s6536_s0  ;;  %v8136_v29 = vpop.permute.xlu0 %1726 }
  0xdb   :  { %v864_v26 = vrot.slane %v13044_v5, 3  ;;  %v867_v7 = vrot.slane %v13045_v11, 4  ;;  %v809_v42 = vor.u32 %v808_v32, %v805_v57  ;;  %v817_v34 = vor.u32 %v816_v12, %v813_v36  ;;  %13055 = vst [vmem:[#allocation108_spill] sm:$0xff] %v8136_v29 }
  0xdc   :  { %v826_v44 = vor.u32 %v825_v48, %v822_v52  ;;  %v834_v55 = vor.u32 %v833_v63, %v830_v16  ;;  %v13047_v45 = vshrl.u32 %v6991_v30, 16  ;;  %v13048_v41 = vshll.u32 %v6991_v30, 16 }
  0xdd   :  { %v13049_v8 = vshrl.u32 %v6993_v31, 16  ;;  %v13050_v38 = vshll.u32 %v6993_v31, 16  ;;  %v860_v53 = vor.u32 %v859_v10, %v856_v50  ;;  %v13051_v58 = vshrl.u32 %v7044_v0, 16  ;;  %1822 = vrot.lane.b32.xlu0 %v8112_v1, %s6536_s0 }
  0xde   :  { %v839_v51 = vrot.slane %v13047_v45, 3  ;;  %v842_v23 = vrot.slane %v13048_v41, 4  ;;  %v868_v36 = vor.u32 %v867_v7, %v864_v26  ;;  %v13052_v12 = vshll.u32 %v7044_v0, 16  ;;  %1820 = vrot.lane.b32.xlu1 %v8109_v15, %s6536_s0 }
  0xdf   :  { %v847_v24 = vrot.slane %v13049_v8, 3  ;;  %v850_v57 = vrot.slane %v13050_v38, 4  ;;  %v873_v32 = vrot.slane %v13051_v58, 3  ;;  %v13053_v30 = vshrl.u32 %v7052_v62, 16 }
  0xe0   :  { %v876_v52 = vrot.slane %v13052_v12, 4  ;;  %v13054_v16 = vshll.u32 %v7052_v62, 16  ;;  %v13056_v31 = vshrl.u32 %v7066_v17, 16  ;;  %v13057_v10 = vshll.u32 %v7066_v17, 16 }
  0xe1   :  { %v881_v48 = vrot.slane %v13053_v30, 3  ;;  %v13058_v0 = vshrl.u32 %v7068_v54, 16  ;;  %v13059_v11 = vshll.u32 %v7068_v54, 16  ;;  %v13060_v62 = vshrl.u32 %v7086_v6, 16  ;;  %v8156_v30 = vpop.permute.xlu1 %1728 }
  0xe2   :  { %v884_v63 = vrot.slane %v13054_v16, 4  ;;  %v890_v50 = vrot.slane %v13056_v31, 3  ;;  %v893_v5 = vrot.slane %v13057_v10, 4  ;;  %v13061_v41 = vshll.u32 %v7086_v6, 16  ;;  %13064 = vst [vmem:[#allocation109_spill] sm:$0xff] %v8156_v30 }
  0xe3   :  { %v898_v26 = vrot.slane %v13058_v0, 3  ;;  %v901_v7 = vrot.slane %v13059_v11, 4  ;;  %v924_v45 = vrot.slane %v13060_v62, 3  ;;  %v13062_v38 = vshrl.u32 %v7105_v40, 16 }
  0xe4   :  { %v927_v8 = vrot.slane %v13061_v41, 4  ;;  %v13063_v17 = vshll.u32 %v7105_v40, 16  ;;  %v8159_v54 = vsel %vm631_vm5, %v809_v42, %v817_v34  ;;  %v8162_v16 = vsel %vm631_vm5, %v826_v44, %v834_v55  ;;  %v8177_v44 = vpop.permute.xlu0 %1730 }
  0xe5   :  { %v932_v58 = vrot.slane %v13062_v38, 3  ;;  %v843_v31 = vor.u32 %v842_v23, %v839_v51  ;;  %v851_v10 = vor.u32 %v850_v57, %v847_v24  ;;  %v8165_v0 = vsel %vm631_vm5, %v860_v53, %v868_v36  ;;  %1826 = vrot.lane.b32.xlu0 %v8162_v16, %s6536_s0  ;;  %13068 = vst [vmem:[#allocation111_spill] sm:$0xff] %v8177_v44 }
  0xe6   :  { %v935_v12 = vrot.slane %v13063_v17, 4  ;;  %13065 = vst [vmem:[#allocation110_spill] sm:$0xff] %v8165_v0  ;;  %v877_v6 = vor.u32 %v876_v52, %v873_v32  ;;  %v885_v11 = vor.u32 %v884_v63, %v881_v48  ;;  %v894_v40 = vor.u32 %v893_v5, %v890_v50  ;;  %1824 = vrot.lane.b32.xlu1 %v8159_v54, %s6536_s0 }
  0xe7   :  { %v902_v62 = vor.u32 %v901_v7, %v898_v26  ;;  %v13066_v41 = vshrl.u32 %v7120_v33, 16  ;;  %v13067_v42 = vshll.u32 %v7120_v33, 16  ;;  %v928_v55 = vor.u32 %v927_v8, %v924_v45  ;;  %v8197_v26 = vpop.permute.xlu1 %1732 }
  0xe8   :  { %v936_v51 = vor.u32 %v935_v12, %v932_v58  ;;  %v13069_v23 = vshrl.u32 %v7122_v14, 16  ;;  %v13070_v57 = vshll.u32 %v7122_v14, 16  ;;  %v13071_v32 = vshrl.u32 %v7143_v2, 16  ;;  %13075 = vst [vmem:[#allocation112_spill] sm:$0xff] %v8197_v26 }
  0xe9   :  { %v8171_v38 = vrot.slane %v13066_v41, 3  ;;  %v8175_v34 = vrot.slane %v13067_v42, 4  ;;  %v13072_v36 = vshll.u32 %v7143_v2, 16  ;;  %v13073_v48 = vshrl.u32 %v7145_v9, 16  ;;  %1830 = vrot.lane.b32.xlu0 %v8165_v0, %s6536_s0  ;;  %v8220_v41 = vpop.permute.xlu0 %1734 }
  0xea   :  { %v8183_v24 = vrot.slane %v13069_v23, 3  ;;  %v8187_v53 = vrot.slane %v13070_v57, 4  ;;  %v958_v33 = vrot.slane %v13071_v32, 3  ;;  %v13074_v50 = vshll.u32 %v7145_v9, 16  ;;  %13080 = vst [vmem:[#allocation113_spill] sm:$0xff] %v8220_v41 }
  0xeb   :  { %v961_v52 = vrot.slane %v13072_v36, 4  ;;  %v966_v63 = vrot.slane %v13073_v48, 3  ;;  %v13076_v14 = vshrl.u32 %v7166_v35, 16  ;;  %v13077_v45 = vshll.u32 %v7166_v35, 16 }
  0xec   :  { %v969_v5 = vrot.slane %v13074_v50, 4  ;;  %v13078_v2 = vshrl.u32 %v7168_v27, 16  ;;  %v13079_v9 = vshll.u32 %v7168_v27, 16  ;;  %v8218_v12 = vsel %vm631_vm5, %v843_v31, %v851_v10  ;;  %v8232_v27 = vld [vmem:[#allocation2 + $0x100] sm:$0xff] }
  0xed   :  { %v8203_v7 = vrot.slane %v13076_v14, 3  ;;  %v8207_v8 = vrot.slane %v13077_v45, 4  ;;  %v8223_v42 = vsel %vm631_vm5, %v877_v6, %v885_v11  ;;  %v8226_v35 = vsel %vm631_vm5, %v894_v40, %v902_v62  ;;  %1828 = vrot.lane.b32.xlu1 %v8218_v12, %s6536_s0  ;;  %v8239_v11 = vld [vmem:[#allocation2 + $0x108] sm:$0xff]  ;;  %v8241_v40 = vpop.permute.xlu1 %1736  ;;  %v8260_v50 = vpop.permute.xlu0 %1738 }
  0xee   :  { %v8211_v58 = vrot.slane %v13078_v2, 3  ;;  %v8215_v17 = vrot.slane %v13079_v9, 4  ;;  %13081 = vst [vmem:[#allocation114_spill] sm:$0xff] %v8223_v42  ;;  %13082 = vst [vmem:[#allocation115_spill] sm:$0xff] %v8226_v35  ;;  %v945_v23 = vor.u32 %v8175_v34, %v8171_v38  ;;  %v8235_v57 = vsel %vm631_vm5, %v928_v55, %v936_v51  ;;  %1834 = vrot.lane.b32.xlu0 %v8226_v35, %s6536_s0 }
  0xef   :  { %13083 = vst [vmem:[#allocation116_spill] sm:$0xff] %v8235_v57  ;;  %v953_v31 = vor.u32 %v8187_v53, %v8183_v24  ;;  %v962_v10 = vor.u32 %v961_v52, %v958_v33  ;;  %v970_v6 = vor.u32 %v969_v5, %v966_v63  ;;  %13084 = vst [vmem:[#allocation117_spill] sm:$0xff] %v8241_v40  ;;  %v13085_v34 = vshrl.u32 %v7186_v49, 16 }
  0xf0   :  { %v979_v62 = vor.u32 %v8207_v8, %v8203_v7  ;;  %v987_v38 = vor.u32 %v8215_v17, %v8211_v58  ;;  %v13086_v51 = vshll.u32 %v7186_v49, 16  ;;  %v13087_v53 = vshrl.u32 %v7188_v39, 16  ;;  %13090 = vst [vmem:[#allocation118_spill] sm:$0xff] %v8260_v50 }
  0xf1   :  { %v992_v55 = vrot.slane %v13085_v34, 3  ;;  %v13088_v33 = vshll.u32 %v7188_v39, 16  ;;  %v13089_v52 = vshrl.u32 %v12936_v13, 16  ;;  %v12605_v63 = vshrl.u32 %v8232_v27, 16  ;;  %1832 = vrot.lane.b32.xlu1 %v8223_v42, %s6536_s0 }
  0xf2   :  { %v995_v24 = vrot.slane %v13086_v51, 4  ;;  %v1000_v32 = vrot.slane %v13087_v53, 3  ;;  %v13091_v5 = vshll.u32 %v12936_v13, 16  ;;  %v12604_v14 = vshll.u32 %v8232_v27, 16  ;;  %v8277_v13 = vpop.permute.xlu1 %1740  ;;  %1838 = vrot.lane.b32.xlu0 %v8235_v57, %s6536_s0 }
  0xf3   :  { %v1003_v36 = vrot.slane %v13088_v33, 4  ;;  %v1009_v48 = vrot.slane %v13089_v52, 3  ;;  %v12606_v7 = vshrl.u32 %v8239_v11, 16  ;;  %v12607_v39 = vshll.u32 %v8239_v11, 16  ;;  %13095 = vst [vmem:[#allocation119_spill] sm:$0xff] %v8277_v13 }
  0xf4   :  { %v1012_v49 = vrot.slane %v13091_v5, 4  ;;  %v13092_v45 = vshrl.u32 %v12937_v22, 16  ;;  %v13093_v2 = vshll.u32 %v12937_v22, 16  ;;  %v1565_v9 = vrot.slane %v12605_v63, 3 }
  0xf5   :  { %v13094_v17 = vshrl.u32 %v12939_v46, 16  ;;  %v1568_v51 = vrot.slane %v12604_v14, 4  ;;  %v1573_v53 = vrot.slane %v12606_v7, 3  ;;  %v1576_v33 = vrot.slane %v12607_v39, 4  ;;  %v8296_v7 = vpop.permute.xlu0 %1742 }
  0xf6   :  { %v1017_v8 = vrot.slane %v13092_v45, 3  ;;  %v1020_v58 = vrot.slane %v13093_v2, 4  ;;  %v13096_v22 = vshll.u32 %v12939_v46, 16  ;;  %v8290_v5 = vsel %vm631_vm5, %v962_v10, %v970_v6  ;;  %v8302_v6 = vpop.permute.xlu1 %1744 }
  0xf7   :  { %v1026_v34 = vrot.slane %v13094_v17, 3  ;;  %v996_v45 = vor.u32 %v995_v24, %v992_v55  ;;  %v13097_v2 = vshrl.u32 %v12940_v59, 16  ;;  %v13098_v14 = vshll.u32 %v12940_v59, 16  ;;  %13100 = vst [vmem:[#allocation120_spill] sm:$0xff] %v8302_v6  ;;  %1842 = vrot.lane.b32.xlu0 %v8290_v5, %s6536_s0 }
  0xf8   :  { %v1029_v52 = vrot.slane %v13096_v22, 4  ;;  %v1004_v13 = vor.u32 %v1003_v36, %v1000_v32  ;;  %v1013_v39 = vor.u32 %v1012_v49, %v1009_v48  ;;  %v1569_v50 = vor.u32 %v1568_v51, %v1565_v9  ;;  %v13102_v32 = vld [vmem:[#allocation46_spill] sm:$0xff] }
  0xf9   :  { %v1034_v17 = vrot.slane %v13097_v2, 3  ;;  %v1037_v63 = vrot.slane %v13098_v14, 4  ;;  %v1577_v40 = vor.u32 %v1576_v33, %v1573_v53  ;;  %v1021_v41 = vor.u32 %v1020_v58, %v1017_v8  ;;  %v8327_v58 = vpop.permute.xlu0 %1746 }
  0xfa   :  { %v1030_v26 = vor.u32 %v1029_v52, %v1026_v34  ;;  %v13099_v22 = vshrl.u32 %v7261_v28, 16  ;;  %v13101_v59 = vshll.u32 %v7261_v28, 16  ;;  %v13103_v36 = vshrl.u32 %v13102_v32, 16  ;;  %13108 = vst [vmem:[#allocation46_spill] sm:$0xff] %v8327_v58  ;;  %v13109_v34 = vld [vmem:[#allocation48_spill] sm:$0xff] }
  0xfb   :  { %v1038_v46 = vor.u32 %v1037_v63, %v1034_v17  ;;  %v8305_v55 = vsel %vm631_vm5, %v1569_v50, %v1577_v40  ;;  %v13104_v49 = vshll.u32 %v13102_v32, 16  ;;  %v13105_v40 = vld [vmem:[#allocation47_spill] sm:$0xff]  ;;  %v8330_v9 = vsel %vm631_vm5, %v945_v23, %v953_v31  ;;  %v8348_v23 = vpop.permute.xlu1 %1748 }
  0xfc   :  { %v8300_v10 = vrot.slane %v13099_v22, 3  ;;  %v8309_v24 = vrot.slane %v13101_v59, 4  ;;  %v8313_v48 = vrot.slane %v13103_v36, 3  ;;  %1836 = vrot.lane.b32.xlu1 %v8305_v55, %s6536_s0  ;;  %v13106_v50 = vshrl.u32 %v13105_v40, 16  ;;  %13114 = vst [vmem:[#allocation121_spill] sm:$0xff] %v8348_v23 }
  0xfd   :  { %v8317_v63 = vrot.slane %v13104_v49, 4  ;;  %v13107_v28 = vshll.u32 %v13105_v40, 16  ;;  %v13110_v51 = vshrl.u32 %v13109_v34, 16  ;;  %v13111_v33 = vshll.u32 %v13109_v34, 16  ;;  %v8370_v40 = vpop.permute.xlu0 %1750  ;;  %v13124_v34 = vld [vmem:[#allocation59_spill] sm:$0xff] }
  0xfe   :  { %v1060_v14 = vrot.slane %v13106_v50, 3  ;;  %v8337_v2 = vsel %vm631_vm5, %v979_v62, %v987_v38  ;;  %v8340_v17 = vsel %vm631_vm5, %v996_v45, %v1004_v13  ;;  %v8343_v22 = vsel %vm631_vm5, %v1013_v39, %v1021_v41  ;;  %v13115_v62 = vld [vmem:[#allocation53_spill] sm:$0xff]  ;;  %v13118_v45 = vld [vmem:[#allocation50_spill] sm:$0xff] }
  0xff   :  { %v1063_v8 = vrot.slane %v13107_v28, 4  ;;  %v1068_v53 = vrot.slane %v13110_v51, 3  ;;  %v1071_v52 = vrot.slane %v13111_v33, 4  ;;  %13112 = vst [vmem:[#allocation47_spill] sm:$0xff] %v8343_v22  ;;  %v8346_v59 = vsel %vm631_vm5, %v1030_v26, %v1038_v46  ;;  %1846 = vrot.lane.b32.xlu0 %v8340_v17, %s6536_s0  ;;  %13123 = vst [vmem:[#allocation53_spill] sm:$0xff] %v8370_v40  ;;  %v8384_v30 = vpop.permute.xlu1 %1752  ;;  %v13244_v40 = vld [vmem:[#allocation64_spill] sm:$0xff] }
 0x100   :  { %13113 = vst [vmem:[#allocation48_spill] sm:$0xff] %v8346_v59  ;;  %v1047_v31 = vor.u32 %v8309_v24, %v8300_v10  ;;  %v1055_v32 = vor.u32 %v8317_v63, %v8313_v48  ;;  %v13116_v38 = vshrl.u32 %v13115_v62, 16  ;;  %v13117_v41 = vshll.u32 %v13115_v62, 16  ;;  %1840 = vrot.lane.b32.xlu1 %v8330_v9, %s6536_s0  ;;  %v13120_v10 = vld [vmem:[#allocation57_spill] sm:$0xff]  ;;  %13131 = vst [vmem:[#allocation50_spill] sm:$0xff] %v8384_v30 }
 0x101   :  { %v1064_v26 = vor.u32 %v1063_v8, %v1060_v14  ;;  %v13119_v46 = vshrl.u32 %v13118_v45, 16  ;;  %v13121_v24 = vshrl.u32 %v13120_v10, 16  ;;  %v13122_v49 = vshll.u32 %v13120_v10, 16 }
 0x102   :  { %v1094_v13 = vrot.slane %v13116_v38, 3  ;;  %v1097_v39 = vrot.slane %v13117_v41, 4  ;;  %v1072_v50 = vor.u32 %v1071_v52, %v1068_v53  ;;  %v13125_v51 = vshrl.u32 %v13124_v34, 16  ;;  %v13132_v53 = vld [vmem:[#allocation52_spill] sm:$0xff] }
 0x103   :  { %v8364_v36 = vrot.slane %v13119_v46, 3  ;;  %v1102_v48 = vrot.slane %v13121_v24, 3  ;;  %v1105_v63 = vrot.slane %v13122_v49, 4  ;;  %v13126_v62 = vshll.u32 %v13124_v34, 16  ;;  %v13128_v46 = vld [vmem:[#allocation60_spill] sm:$0xff]  ;;  %1850 = vrot.lane.b32.xlu0 %v8346_v59, %s6536_s0  ;;  %v13134_v34 = vld [vmem:[#allocation62_spill] sm:$0xff]  ;;  %v8419_v20 = vpop.permute.xlu1 %1756 }
 0x104   :  { %v1098_v28 = vor.u32 %v1097_v39, %v1094_v13  ;;  %v1111_v33 = vrot.slane %v13125_v51, 3  ;;  %v13127_v8 = vshll.u32 %v13118_v45, 16  ;;  %v13129_v24 = vshrl.u32 %v13128_v46, 16  ;;  %1844 = vrot.lane.b32.xlu1 %v8337_v2, %s6536_s0  ;;  %13150 = vst [vmem:[#allocation62_spill] sm:$0xff] %v8419_v20  ;;  %v13221_v20 = vld [vmem:[#allocation49_spill] sm:$0xff]  ;;  %v13259_v59 = vld [vmem:[#allocation80_spill] sm:$0xff] }
 0x105   :  { %v1114_v14 = vrot.slane %v13126_v62, 4  ;;  %v1106_v41 = vor.u32 %v1105_v63, %v1102_v48  ;;  %v13130_v10 = vshll.u32 %v13128_v46, 16  ;;  %v13133_v52 = vshrl.u32 %v13132_v53, 16  ;;  %v13138_v46 = vld [vmem:[#allocation63_spill] sm:$0xff] }
 0x106   :  { %v8378_v38 = vrot.slane %v13127_v8, 4  ;;  %v1119_v44 = vrot.slane %v13129_v24, 3  ;;  %v13135_v45 = vshrl.u32 %v13134_v34, 16  ;;  %v13136_v48 = vshll.u32 %v13134_v34, 16 }
 0x107   :  { %v1122_v49 = vrot.slane %v13130_v10, 4  ;;  %v1085_v13 = vrot.slane %v13133_v52, 3  ;;  %v1115_v39 = vor.u32 %v1114_v14, %v1111_v33  ;;  %v8397_v62 = vsel %vm631_vm5, %v1098_v28, %v1106_v41  ;;  %v8403_v52 = vpop.permute.xlu0 %1754 }
 0x108   :  { %v1128_v51 = vrot.slane %v13135_v45, 3  ;;  %v1131_v63 = vrot.slane %v13136_v48, 4  ;;  %13137 = vst [vmem:[#allocation57_spill] sm:$0xff] %v8397_v62  ;;  %v13139_v24 = vshrl.u32 %v13138_v46, 16  ;;  %v13140_v33 = vshll.u32 %v13138_v46, 16  ;;  %13141 = vst [vmem:[#allocation59_spill] sm:$0xff] %v8403_v52  ;;  %1848 = vrot.lane.b32.xlu1 %v8343_v22, %s6536_s0 }
 0x109   :  { %v1123_v8 = vor.u32 %v1122_v49, %v1119_v44  ;;  %v8406_v45 = vsel %vm631_vm5, %v1064_v26, %v1072_v50  ;;  %v13143_v48 = vld [vmem:[#allocation66_spill] sm:$0xff]  ;;  %v13147_v49 = vld [vmem:[#allocation67_spill] sm:$0xff]  ;;  %v13151_v26 = vshll.u32 %v13132_v53, 16  ;;  %v13172_v57 = vshll.u32 %v8232_v27, 16 }
 0x10a   :  { %v1136_v10 = vrot.slane %v13139_v24, 3  ;;  %v1139_v14 = vrot.slane %v13140_v33, 4  ;;  %13142 = vst [vmem:[#allocation60_spill] sm:$0xff] %v8406_v45  ;;  %v1132_v34 = vor.u32 %v1131_v63, %v1128_v51  ;;  %v13144_v29 = vshrl.u32 %v13143_v48, 16  ;;  %1854 = vrot.lane.b32.xlu0 %v8406_v45, %s6536_s0 }
 0x10b   :  { %v13145_v60 = vshll.u32 %v13143_v48, 16  ;;  %v8413_v44 = vsel %vm631_vm5, %v1115_v39, %v1123_v8  ;;  %v13148_v24 = vshrl.u32 %v13147_v49, 16  ;;  %v13149_v33 = vshll.u32 %v13147_v49, 16  ;;  %v13156_v48 = vld [vmem:[#allocation70_spill] sm:$0xff] }
 0x10c   :  { %v1145_v56 = vrot.slane %v13144_v29, 3  ;;  %13146 = vst [vmem:[#allocation52_spill] sm:$0xff] %v8413_v44  ;;  %v1140_v41 = vor.u32 %v1139_v14, %v1136_v10  ;;  %v1088_v50 = vrot.slane %v13151_v26, 4  ;;  %v13157_v53 = vshrl.u32 %v13156_v48, 16 }
 0x10d   :  { %v1148_v28 = vrot.slane %v13145_v60, 4  ;;  %v1153_v46 = vrot.slane %v13148_v24, 3  ;;  %v1156_v47 = vrot.slane %v13149_v33, 4  ;;  %v13152_v60 = vld [vmem:[#allocation69_spill] sm:$0xff]  ;;  %v8438_v24 = vpop.permute.xlu0 %1758  ;;  %v8440_v33 = vld [vmem:[#allocation2 + $0x220] sm:$0xff]  ;;  %v8443_v26 = vsel %vm631_vm5, %v1047_v31, %v1055_v32  ;;  %v8466_v31 = vpop.permute.xlu1 %1760 }
 0x10e   :  { %v13153_v29 = vshrl.u32 %v13152_v60, 16  ;;  %v13154_v63 = vshll.u32 %v13152_v60, 16  ;;  %v8432_v10 = vsel %vm631_vm5, %v1132_v34, %v1140_v41  ;;  %v1170_v49 = vrot.slane %v13157_v53, 3  ;;  %13159 = vst [vmem:[#allocation66_spill] sm:$0xff] %v8438_v24  ;;  %13160 = vst [vmem:[#allocation67_spill] sm:$0xff] %v8440_v33  ;;  %1858 = vrot.lane.b32.xlu0 %v8397_v62, %s6536_s0  ;;  %1852 = vrot.lane.b32.xlu1 %v8443_v26, %s6536_s0  ;;  %v13220_v24 = vld [vmem:[#allocation61_spill] sm:$0xff] }
 0x10f   :  { %v1149_v51 = vor.u32 %v1148_v28, %v1145_v56  ;;  %13155 = vst [vmem:[#allocation63_spill] sm:$0xff] %v8432_v10  ;;  %v1157_v14 = vor.u32 %v1156_v47, %v1153_v46  ;;  %v13158_v56 = vshll.u32 %v13156_v48, 16  ;;  %13161 = vst [vmem:[#allocation69_spill] sm:$0xff] %v8443_v26  ;;  %v13163_v34 = vmov 0   ;;  %v8464_v47 = vld [vmem:[#allocation2 + $0x228] sm:$0xff]  ;;  %v13225_v62 = vld [vmem:[#allocation58_spill] sm:$0xff] }
 0x110   :  { %v1162_v39 = vrot.slane %v13153_v29, 3  ;;  %v1165_v8 = vrot.slane %v13154_v63, 4  ;;  %99 = vst.msk [vmem:[#allocation3] sm:$0xff] %vm98_vm6, %v13163_v34  ;;  %100 = vst.msk [vmem:[#allocation3 + $0x8] sm:$0xff] %vm98_vm6, %v13163_v34  ;;  %v1081_v32 = vor.u32 %v8378_v38, %v8364_v36  ;;  %v1089_v41 = vor.u32 %v1088_v50, %v1085_v13  ;;  %v13255_v26 = vld [vmem:[#allocation78_spill] sm:$0xff] }
 0x111   :  { %v1173_v28 = vrot.slane %v13158_v56, 4  ;;  %v8446_v60 = vsel %vm631_vm5, %v1149_v51, %v1157_v14  ;;  %101 = vst.msk [vmem:[#allocation3 + $0x120] sm:$0xff] %vm98_vm6, %v13163_v34  ;;  %102 = vst.msk [vmem:[#allocation3 + $0x128] sm:$0xff] %vm98_vm6, %v13163_v34  ;;  %v12608_v29 = vshrl.u32 %v8440_v33, 16  ;;  %v8475_v63 = vpop.permute.xlu0 %1762  ;;  %v12611_v14 = vshll.u32 %v8440_v33, 16  ;;  %v8488_v13 = vpop.permute.xlu1 %1764 }
 0x112   :  { %13162 = vst [vmem:[#allocation70_spill] sm:$0xff] %v8446_v60  ;;  %104 = vst.msk [vmem:[#allocation3 + $0x110] sm:$0xff] %vm98_vm6, %v13163_v34  ;;  %v1166_v46 = vor.u32 %v1165_v8, %v1162_v39  ;;  %v12612_v48 = vshrl.u32 %v8464_v47, 16  ;;  %v12613_v53 = vshll.u32 %v8464_v47, 16  ;;  %v8481_v36 = vsel %vm631_vm5, %v1081_v32, %v1089_v41  ;;  %1862 = vrot.lane.b32.xlu0 %v8432_v10, %s6536_s0 }
 0x113   :  { %105 = vst.msk [vmem:[#allocation3 + $0x118] sm:$0xff] %vm98_vm6, %v13163_v34  ;;  %106 = vst.msk [vmem:[#allocation3 + $0x230] sm:$0xff] %vm98_vm6, %v13163_v34  ;;  %v1174_v51 = vor.u32 %v1173_v28, %v1170_v49  ;;  %1856 = vrot.lane.b32.xlu1 %v8481_v36, %s6536_s0  ;;  %v1582_v50 = vrot.slane %v12608_v29, 3  ;;  %v1600_v8 = vrot.slane %v8232_v27, 4  ;;  %v1601_v49 = vrot.slane %v8239_v11, 4 }
 0x114   :  { %107 = vst.msk [vmem:[#allocation3 + $0x238] sm:$0xff] %vm98_vm6, %v13163_v34  ;;  %13164 = vst [vmem:[#allocation122_spill] sm:$0xff] %v8464_v47  ;;  %v1603_v56 = vrot.slane %v8440_v33, 4  ;;  %v1585_v28 = vrot.slane %v12611_v14, 4  ;;  %v1590_v32 = vrot.slane %v12612_v48, 3  ;;  %v1593_v41 = vrot.slane %v12613_v53, 4 }
 0x115   :  { %13165 = vst [vmem:[#allocation123_spill] sm:$0xff] %v8466_v31  ;;  %13166 = vst [vmem:[#allocation124_spill] sm:$0xff] %v8475_v63  ;;  %v8484_v38 = vsel %vm631_vm5, %v1166_v46, %v1174_v51  ;;  %v8494_v39 = vpop.permute.xlu0 %1766  ;;  %v1604_v46 = vrot.slane %v8464_v47, 4  ;;  %v8507_v51 = vsel %vm1240_vm3, %v1600_v8, %v1601_v49  ;;  %v13171_v29 = vshrl.u32 %v8232_v27, 16  ;;  %v8524_v27 = vpop.permute.xlu1 %1768  ;;  %v13207_v33 = vld [vmem:[#allocation37_spill] sm:$0xff] }
 0x116   :  { %13167 = vst [vmem:[#allocation125_spill] sm:$0xff] %v8481_v36  ;;  %13168 = vst [vmem:[#allocation126_spill] sm:$0xff] %v8484_v38  ;;  %v1607_v25 = vrot.slane %v13172_v57, 5  ;;  %1866 = vrot.lane.b32.xlu0 %v8484_v38, %s6536_s0  ;;  %v13175_v53 = vshll.u32 %v8239_v11, 16  ;;  %v1594_v49 = vor.u32 %v1593_v41, %v1590_v32  ;;  %v13188_v32 = vld [vmem:[#allocation20_spill] sm:$0xff] }
 0x117   :  { %13169 = vst [vmem:[#allocation127_spill] sm:$0xff] %v8488_v13  ;;  %13170 = vst [vmem:[#allocation128_spill] sm:$0xff] %v8494_v39  ;;  %v1606_v34 = vrot.slane %v13171_v29, 4  ;;  %v13173_v39 = vshrl.u32 %v8239_v11, 16  ;;  %v8518_v48 = vsel %vm1240_vm3, %v1603_v56, %v1604_v46  ;;  %1860 = vrot.lane.b32.xlu1 %v8413_v44, %s6536_s0  ;;  %v1586_v29 = vor.u32 %v1585_v28, %v1582_v50  ;;  %v13187_v28 = vld [vmem:[#allocation26_spill] sm:$0xff]  ;;  %v13189_v41 = vld [vmem:[#allocation28_spill] sm:$0xff] }
 0x118   :  { %13174 = vst [vmem:[#allocation129_spill] sm:$0xff] %v8518_v48  ;;  %v1610_v13 = vrot.slane %v13175_v53, 5  ;;  %13176 = vst [vmem:[#allocation130_spill] sm:$0xff] %v8524_v27  ;;  %v13202_v27 = vld [vmem:[#allocation31_spill] sm:$0xff] }
 0x119   :  { %v1609_v14 = vrot.slane %v13173_v39, 4  ;;  %v1608_v8 = vor.u32 %v1607_v25, %v1606_v34  ;;  %v8526_v57 = vpop.permute.xlu0 %1770  ;;  %v8536_v11 = vsel %vm631_vm5, %v1586_v29, %v1594_v49  ;;  %v13180_v25 = vld [vmem:[#allocation19_spill] sm:$0xff]  ;;  %v8540_v34 = vpop.permute.xlu1 %1772  ;;  %v13192_v29 = vld [vmem:[#allocation24_spill] sm:$0xff]  ;;  %v13193_v49 = vld [vmem:[#allocation30_spill] sm:$0xff] }
 0x11a   :  { %13177 = vst [vmem:[#allocation131_spill] sm:$0xff] %v8526_v57  ;;  %1870 = vrot.lane.b32.xlu0 %v13178_v21, %s6537_s26  ;;  %13179 = vst [vmem:[#allocation14_spill] sm:$0xff] %v8536_v11  ;;  %v13183_v21 = vld [vmem:[#allocation23_spill] sm:$0xff] }
 0x11b   :  { %v1611_v39 = vor.u32 %v1610_v13, %v1609_v14  ;;  %1864 = vrot.lane.b32.xlu1 %v8446_v60, %s6536_s0  ;;  %13181 = vst [vmem:[#allocation19_spill] sm:$0xff] %v8540_v34  ;;  %v13184_v14 = vld [vmem:[#allocation12_spill] sm:$0xff]  ;;  %v13216_v60 = vld [vmem:[#allocation51_spill] sm:$0xff] }
 0x11d   :  { %v8531_v56 = vsel %vm1337_vm4, %v1608_v8, %v1611_v39  ;;  %v8542_v53 = vpop.permute.xlu0 %1774  ;;  %v8550_v13 = vpop.permute.xlu1 %1776  ;;  %v13194_v39 = vld [vmem:[#allocation27_spill] sm:$0xff] }
 0x11e   :  { %1874 = vrot.lane.b32.xlu0 %v13180_v25, %s6537_s26  ;;  %13182 = vst [vmem:[#allocation132_spill] sm:$0xff] %v8542_v53  ;;  %13185 = vst [vmem:[#allocation23_spill] sm:$0xff] %v8550_v13  ;;  %v13197_v53 = vld [vmem:[#allocation32_spill] sm:$0xff] }
 0x11f   :  { %1868 = vrot.lane.b32.xlu1 %v8536_v11, %s6536_s0 }
 0x121   :  { %v8552_v50 = vpop.permute.xlu0 %1778  ;;  %v8560_v46 = vpop.permute.xlu1 %1780 }
 0x122   :  { %1878 = vrot.lane.b32.xlu0 %v13183_v21, %s6537_s26  ;;  %13186 = vst [vmem:[#allocation12_spill] sm:$0xff] %v8552_v50  ;;  %13190 = vst [vmem:[#allocation26_spill] sm:$0xff] %v8560_v46  ;;  %v13198_v46 = vld [vmem:[#allocation29_spill] sm:$0xff] }
 0x123   :  { %1872 = vrot.lane.b32.xlu1 %v13184_v14, %s6537_s26 }
 0x125   :  { %v8562_v8 = vpop.permute.xlu0 %1782  ;;  %v8570_v50 = vpop.permute.xlu1 %1784 }
 0x126   :  { %1882 = vrot.lane.b32.xlu0 %v13187_v28, %s6537_s26  ;;  %13191 = vst [vmem:[#allocation20_spill] sm:$0xff] %v8562_v8  ;;  %13195 = vst [vmem:[#allocation28_spill] sm:$0xff] %v8570_v50  ;;  %v13199_v8 = vld [vmem:[#allocation34_spill] sm:$0xff]  ;;  %v13203_v50 = vld [vmem:[#allocation35_spill] sm:$0xff] }
 0x127   :  { %1876 = vrot.lane.b32.xlu1 %v13188_v32, %s6537_s26 }
 0x129   :  { %v8572_v13 = vpop.permute.xlu0 %1786  ;;  %v8580_v34 = vpop.permute.xlu1 %1788 }
 0x12a   :  { %1886 = vrot.lane.b32.xlu0 %v13189_v41, %s6537_s26  ;;  %13196 = vst [vmem:[#allocation24_spill] sm:$0xff] %v8572_v13  ;;  %13200 = vst [vmem:[#allocation30_spill] sm:$0xff] %v8580_v34  ;;  %v13204_v13 = vld [vmem:[#allocation33_spill] sm:$0xff] }
 0x12b   :  { %1880 = vrot.lane.b32.xlu1 %v13192_v29, %s6537_s26 }
 0x12d   :  { %v8582_v57 = vpop.permute.xlu0 %1790  ;;  %v8590_v11 = vpop.permute.xlu1 %1792 }
 0x12e   :  { %1890 = vrot.lane.b32.xlu0 %v13193_v49, %s6537_s26  ;;  %13201 = vst [vmem:[#allocation27_spill] sm:$0xff] %v8582_v57  ;;  %13205 = vst [vmem:[#allocation32_spill] sm:$0xff] %v8590_v11  ;;  %v13208_v57 = vld [vmem:[#allocation41_spill] sm:$0xff] }
 0x12f   :  { %1884 = vrot.lane.b32.xlu1 %v13194_v39, %s6537_s26  ;;  %v13212_v11 = vld [vmem:[#allocation45_spill] sm:$0xff] }
 0x131   :  { %v8592_v47 = vpop.permute.xlu0 %1794  ;;  %v8600_v34 = vpop.permute.xlu1 %1796 }
 0x132   :  { %1894 = vrot.lane.b32.xlu0 %v13197_v53, %s6537_s26  ;;  %13206 = vst [vmem:[#allocation29_spill] sm:$0xff] %v8592_v47  ;;  %13209 = vst [vmem:[#allocation34_spill] sm:$0xff] %v8600_v34  ;;  %v13213_v47 = vld [vmem:[#allocation38_spill] sm:$0xff]  ;;  %v13217_v34 = vld [vmem:[#allocation43_spill] sm:$0xff] }
 0x133   :  { %1888 = vrot.lane.b32.xlu1 %v13198_v46, %s6537_s26 }
 0x135   :  { %v8602_v38 = vpop.permute.xlu0 %1798  ;;  %v8610_v63 = vpop.permute.xlu1 %1800 }
 0x136   :  { %1898 = vrot.lane.b32.xlu0 %v13199_v8, %s6537_s26  ;;  %13210 = vst [vmem:[#allocation31_spill] sm:$0xff] %v8602_v38  ;;  %13214 = vst [vmem:[#allocation35_spill] sm:$0xff] %v8610_v63 }
 0x137   :  { %1892 = vrot.lane.b32.xlu1 %v13202_v27, %s6537_s26 }
 0x139   :  { %v8612_v31 = vpop.permute.xlu0 %1802 }
 0x13a   :  { %1902 = vrot.lane.b32.xlu0 %v13203_v50, %s6537_s26  ;;  %v13211_v50 = vld [vmem:[#allocation36_spill] sm:$0xff]  ;;  %13215 = vst [vmem:[#allocation33_spill] sm:$0xff] %v8612_v31 }
 0x13b   :  { %1896 = vrot.lane.b32.xlu1 %v13204_v13, %s6537_s26  ;;  %v13224_v31 = vld [vmem:[#allocation68_spill] sm:$0xff] }
 0x13d   :  { %v8618_v38 = vpop.permute.xlu0 %1806  ;;  %v8620_v10 = vpop.permute.xlu1 %1804 }
 0x13e   :  { %1906 = vrot.lane.b32.xlu0 %v13207_v33, %s6537_s26  ;;  %13218 = vst [vmem:[#allocation37_spill] sm:$0xff] %v8618_v38  ;;  %13219 = vst [vmem:[#allocation36_spill] sm:$0xff] %v8620_v10  ;;  %v13228_v10 = vld [vmem:[#allocation73_spill] sm:$0xff] }
 0x13f   :  { %1900 = vrot.lane.b32.xlu1 %v8507_v51, %s6537_s26 }
 0x141   :  { %v8626_v44 = vpop.permute.xlu0 %1810 }
 0x142   :  { %1910 = vrot.lane.b32.xlu0 %v13208_v57, %s6537_s26  ;;  %13222 = vst [vmem:[#allocation38_spill] sm:$0xff] %v8626_v44  ;;  %v13274_v57 = vld [vmem:[#allocation39_spill] sm:$0xff] }
 0x143   :  { %1904 = vrot.lane.b32.xlu1 %v13211_v50, %s6537_s26  ;;  %v8628_v63 = vpop.permute.xlu1 %1808 }
 0x144   :  { %13223 = vst [vmem:[#allocation133_spill] sm:$0xff] %v8628_v63  ;;  %v13263_v63 = vld [vmem:[#allocation82_spill] sm:$0xff] }
 0x145   :  { %v8634_v52 = vpop.permute.xlu0 %1814 }
 0x146   :  { %1914 = vrot.lane.b32.xlu0 %v13212_v11, %s6537_s26  ;;  %13226 = vst [vmem:[#allocation134_spill] sm:$0xff] %v8634_v52 }
 0x147   :  { %1908 = vrot.lane.b32.xlu1 %v13213_v47, %s6537_s26  ;;  %v8636_v30 = vpop.permute.xlu1 %1812 }
 0x148   :  { %13227 = vst [vmem:[#allocation135_spill] sm:$0xff] %v8636_v30 }
 0x14a   :  { %1918 = vrot.lane.b32.xlu0 %v13216_v60, %s6537_s26 }
 0x14b   :  { %1912 = vrot.lane.b32.xlu1 %v13217_v34, %s6537_s26  ;;  %v8642_v60 = vpop.permute.xlu0 %1818 }
 0x14c   :  { %13230 = vst [vmem:[#allocation136_spill] sm:$0xff] %v8642_v60  ;;  %v8644_v36 = vpop.permute.xlu1 %1816 }
 0x14d   :  { %13231 = vst [vmem:[#allocation137_spill] sm:$0xff] %v8644_v36  ;;  %v13239_v36 = vld [vmem:[#allocation72_spill] sm:$0xff] }
 0x14e   :  { %1922 = vrot.lane.b32.xlu0 %v13220_v24, %s6537_s26  ;;  %v13229_v24 = vld [vmem:[#allocation65_spill] sm:$0xff] }
 0x14f   :  { %1916 = vrot.lane.b32.xlu1 %v13221_v20, %s6537_s26  ;;  %v8650_v52 = vpop.permute.xlu0 %1822 }
 0x150   :  { %v8652_v45 = vpop.permute.xlu1 %1820 }
 0x151   :  { %13235 = vst [vmem:[#allocation138_spill] sm:$0xff] %v8652_v45  ;;  %v13243_v45 = vld [vmem:[#allocation75_spill] sm:$0xff] }
 0x152   :  { %1926 = vrot.lane.b32.xlu0 %v13224_v31, %s6537_s26  ;;  %v13232_v31 = vld [vmem:[#allocation54_spill] sm:$0xff] }
 0x153   :  { %1920 = vrot.lane.b32.xlu1 %v13225_v62, %s6537_s26  ;;  %v13233_v62 = vld [vmem:[#allocation71_spill] sm:$0xff]  ;;  %13234 = vst [vmem:[#allocation54_spill] sm:$0xff] %v8650_v52 }
 0x156   :  { %1930 = vrot.lane.b32.xlu0 %v13228_v10, %s6537_s26  ;;  %v13236_v10 = vld [vmem:[#allocation56_spill] sm:$0xff] }
 0x157   :  { %1924 = vrot.lane.b32.xlu1 %v13229_v24, %s6537_s26  ;;  %v8658_v24 = vpop.permute.xlu0 %1826 }
 0x158   :  { %13237 = vst [vmem:[#allocation56_spill] sm:$0xff] %v8658_v24  ;;  %v8660_v60 = vpop.permute.xlu1 %1824  ;;  %v13246_v24 = vld [vmem:[#allocation77_spill] sm:$0xff] }
 0x159   :  { %13238 = vst [vmem:[#allocation139_spill] sm:$0xff] %v8660_v60  ;;  %v13247_v60 = vld [vmem:[#allocation74_spill] sm:$0xff] }
 0x15a   :  { %1934 = vrot.lane.b32.xlu0 %v13232_v31, %s6538_s27  ;;  %v13240_v31 = vld [vmem:[#allocation55_spill] sm:$0xff] }
 0x15b   :  { %1928 = vrot.lane.b32.xlu1 %v13233_v62, %s6537_s26  ;;  %v8666_v62 = vpop.permute.xlu0 %1830 }
 0x15c   :  { %13241 = vst [vmem:[#allocation72_spill] sm:$0xff] %v8666_v62  ;;  %v13250_v62 = vld [vmem:[#allocation79_spill] sm:$0xff] }
 0x15e   :  { %1938 = vrot.lane.b32.xlu0 %v13236_v10, %s6538_s27 }
 0x15f   :  { %1932 = vrot.lane.b32.xlu1 %v8518_v48, %s6537_s26  ;;  %v8668_v52 = vpop.permute.xlu1 %1828 }
 0x160   :  { %13242 = vst [vmem:[#allocation55_spill] sm:$0xff] %v8668_v52  ;;  %v8674_v48 = vpop.permute.xlu0 %1834  ;;  %v13251_v52 = vld [vmem:[#allocation76_spill] sm:$0xff] }
 0x161   :  { %13245 = vst [vmem:[#allocation75_spill] sm:$0xff] %v8674_v48  ;;  %v13254_v48 = vld [vmem:[#allocation81_spill] sm:$0xff] }
 0x162   :  { %1942 = vrot.lane.b32.xlu0 %v13239_v36, %s6538_s27 }
 0x163   :  { %1936 = vrot.lane.b32.xlu1 %v13240_v31, %s6538_s27  ;;  %v8680_v30 = vpop.permute.xlu1 %1832 }
 0x164   :  { %13248 = vst [vmem:[#allocation64_spill] sm:$0xff] %v8680_v30  ;;  %v8682_v23 = vpop.permute.xlu0 %1838 }
 0x165   :  { %13249 = vst [vmem:[#allocation77_spill] sm:$0xff] %v8682_v23  ;;  %v13258_v23 = vld [vmem:[#allocation83_spill] sm:$0xff] }
 0x166   :  { %1946 = vrot.lane.b32.xlu0 %v13243_v45, %s6538_s27 }
 0x167   :  { %1940 = vrot.lane.b32.xlu1 %v13244_v40, %s6538_s27 }
 0x169   :  { %v8688_v20 = vpop.permute.xlu0 %1842 }
 0x16a   :  { %1950 = vrot.lane.b32.xlu0 %v13246_v24, %s6538_s27  ;;  %13252 = vst [vmem:[#allocation74_spill] sm:$0xff] %v8688_v20 }
 0x16b   :  { %1944 = vrot.lane.b32.xlu1 %v13247_v60, %s6538_s27 }
 0x16e   :  { %1954 = vrot.lane.b32.xlu0 %v13250_v62, %s6538_s27  ;;  %v8690_v11 = vpop.permute.xlu1 %1836 }
 0x16f   :  { %1948 = vrot.lane.b32.xlu1 %v13251_v52, %s6538_s27  ;;  %13253 = vst [vmem:[#allocation79_spill] sm:$0xff] %v8690_v11  ;;  %v13262_v11 = vld [vmem:[#allocation84_spill] sm:$0xff] }
 0x171   :  { %v8696_v44 = vpop.permute.xlu0 %1846 }
 0x172   :  { %1958 = vrot.lane.b32.xlu0 %v13254_v48, %s6538_s27  ;;  %13256 = vst [vmem:[#allocation76_spill] sm:$0xff] %v8696_v44  ;;  %v8698_v30 = vpop.permute.xlu1 %1840 }
 0x173   :  { %1952 = vrot.lane.b32.xlu1 %v13255_v26, %s6538_s27  ;;  %13257 = vst [vmem:[#allocation81_spill] sm:$0xff] %v8698_v30  ;;  %v13266_v30 = vld [vmem:[#allocation86_spill] sm:$0xff] }
 0x175   :  { %v8704_v58 = vpop.permute.xlu0 %1850 }
 0x176   :  { %1962 = vrot.lane.b32.xlu0 %v13258_v23, %s6538_s27  ;;  %13260 = vst [vmem:[#allocation78_spill] sm:$0xff] %v8704_v58  ;;  %v8706_v20 = vpop.permute.xlu1 %1844 }
 0x177   :  { %1956 = vrot.lane.b32.xlu1 %v13259_v59, %s6538_s27  ;;  %13261 = vst [vmem:[#allocation83_spill] sm:$0xff] %v8706_v20  ;;  %v13269_v20 = vld [vmem:[#allocation40_spill] sm:$0xff] }
 0x17a   :  { %1966 = vrot.lane.b32.xlu0 %v13262_v11, %s6538_s27  ;;  %v8714_v44 = vpop.permute.xlu1 %1848  ;;  %v13270_v11 = vld [vmem:[#allocation85_spill] sm:$0xff] }
 0x17b   :  { %1960 = vrot.lane.b32.xlu1 %v13263_v63, %s6538_s27  ;;  %13265 = vst [vmem:[#allocation84_spill] sm:$0xff] %v8714_v44  ;;  %v13273_v44 = vld [vmem:[#allocation44_spill] sm:$0xff] }
 0x17c   :  { %v8712_v6 = vpop.permute.xlu0 %1854 }
 0x17d   :  { %13264 = vst [vmem:[#allocation80_spill] sm:$0xff] %v8712_v6 }
 0x17e   :  { %1970 = vrot.lane.b32.xlu0 %v13266_v30, %s6538_s27 }
 0x17f   :  { %1964 = vrot.lane.b32.xlu1 %v8531_v56, %s6538_s27 }
 0x180   :  { %v8720_v43 = vpop.permute.xlu0 %1858  ;;  %v8722_v58 = vpop.permute.xlu1 %1852 }
 0x181   :  { %13267 = vst [vmem:[#allocation82_spill] sm:$0xff] %v8720_v43  ;;  %13268 = vst [vmem:[#allocation86_spill] sm:$0xff] %v8722_v58  ;;  %v13277_v58 = vld [vmem:[#allocation92_spill] sm:$0xff] }
 0x182   :  { %1974 = vrot.lane.b32.xlu0 %v13269_v20, %s6538_s27  ;;  %v13278_v20 = vld [vmem:[#allocation42_spill] sm:$0xff] }
 0x183   :  { %1968 = vrot.lane.b32.xlu1 %v13270_v11, %s6538_s27 }
 0x184   :  { %v8728_v34 = vpop.permute.xlu0 %1862 }
 0x185   :  { %13271 = vst [vmem:[#allocation85_spill] sm:$0xff] %v8728_v34  ;;  %v8730_v6 = vpop.permute.xlu1 %1856 }
 0x186   :  { %13272 = vst [vmem:[#allocation140_spill] sm:$0xff] %v8730_v6  ;;  %1978 = vrot.lane.b32.xlu0 %v13273_v44, %s6538_s27  ;;  %v6523_v6 = vld [vmem:[%s12302_s1] sm:$0xff]   ;;  %v13281_v44 = vld [vmem:[#allocation98_spill] sm:$0xff] }
 0x187   :  { %1972 = vrot.lane.b32.xlu1 %v13274_v57, %s6538_s27  ;;  %6300 = vmatprep.subr.bf16.mxu0 %v6523_v6 }
 0x188   :  { %v8736_v22 = vpop.permute.xlu0 %1866  ;;  %6301 = vmatpush3.bf16.msra.mxu0 %v6523_v6  ;;  %v6525_v6 = vld [vmem:[%s12302_s1 + $0x10] ss:$0 sps:$4 sm:$0x33]  }
 0x189   :  { %13275 = vst [vmem:[#allocation39_spill] sm:$0xff] %v8736_v22  ;;  %v8738_v43 = vpop.permute.xlu1 %1860  ;;  %v13282_v22 = vld [vmem:[#allocation88_spill] sm:$0xff] }
 0x18a   :  { %13276 = vst [vmem:[#allocation141_spill] sm:$0xff] %v8738_v43  ;;  %1982 = vrot.lane.b32.xlu0 %v13277_v58, %s6538_s27 }
 0x18b   :  { %1976 = vrot.lane.b32.xlu1 %v13278_v20, %s6538_s27  ;;  %v13285_v20 = vld [vmem:[#allocation6_spill] sm:$0xff] }
 0x18c   :  { %v8744_v38 = vpop.permute.xlu0 %1870 }
 0x18d   :  { %13279 = vst [vmem:[#allocation142_spill] sm:$0xff] %v8744_v38  ;;  %v8746_v34 = vpop.permute.xlu1 %1864  ;;  %v13286_v38 = vld [vmem:[#allocation94_spill] sm:$0xff] }
 0x18e   :  { %13280 = vst [vmem:[#allocation143_spill] sm:$0xff] %v8746_v34  ;;  %1986 = vrot.lane.b32.xlu0 %v13281_v44, %s6538_s27  ;;  %v6524_v34 = vld [vmem:[%s12302_s1 + $0x8] sm:$0xff]   ;;  %s6541_s1 = smov 32  }
 0x18f   :  { %1980 = vrot.lane.b32.xlu1 %v13282_v22, %s6538_s27  ;;  %6302 = vmatprep.subr.bf16.mxu0 %v6524_v34 }
 0x190   :  { %v8755_v43 = vpop.permute.xlu0 %1874  ;;  %6303 = vmatpush3.bf16.msra.mxu0 %v6524_v34 }
 0x191   :  { %13283 = vst [vmem:[#allocation144_spill] sm:$0xff] %v8755_v43  ;;  %v8757_v58 = vpop.permute.xlu1 %1868  ;;  %6444 = vmatprep.subr.msk.bf16.mxu0 %vm2832_vm7, %v6525_v6 }
 0x192   :  { %13284 = vst [vmem:[#allocation145_spill] sm:$0xff] %v8757_v58  ;;  %1990 = vrot.lane.b32.xlu0 %v13285_v20, %s6538_s27  ;;  %v13289_v58 = vld [vmem:[#allocation9_spill] sm:$0xff]  ;;  %v2834_v20 = vsel %vm2832_vm7, %v6525_v6, 0  ;;  %vm5427_vm7 = vcmask 457728  }
 0x193   :  { %1984 = vrot.lane.b32.xlu1 %v13286_v38, %s6538_s27 }
 0x194   :  { %v8766_v44 = vpop.permute.xlu0 %1878  ;;  %6305 = vmatpush3.bf16.msra.mxu0 %v2834_v20 }
 0x195   :  { %13287 = vst [vmem:[#allocation146_spill] sm:$0xff] %v8766_v44  ;;  %v8768_v22 = vpop.permute.xlu1 %1872  ;;  %v13290_v44 = vld [vmem:[#allocation15_spill] sm:$0xff] }
 0x196   :  { %13288 = vst [vmem:[#allocation147_spill] sm:$0xff] %v8768_v22  ;;  %1998 = vrot.lane.b32.xlu0 %v8050_v19, %s6539_s9 }
 0x197   :  { %1988 = vrot.lane.b32.xlu1 %v13289_v58, %s6538_s27 }
 0x198   :  { %v8777_v38 = vpop.permute.xlu0 %1882 }
 0x199   :  { %v8779_v34 = vpop.permute.xlu1 %1876 }
 0x19a   :  { %2062 = vrot.lane.b32.xlu0 %v13184_v14, %s6540_s10 }
 0x19b   :  { %1992 = vrot.lane.b32.xlu1 %v13290_v44, %s6538_s27 }
 0x19c   :  { %v8785_v43 = vpop.permute.xlu0 %1886 }
 0x19d   :  { %v8787_v22 = vpop.permute.xlu1 %1880 }
 0x19e   :  { %2126 = vrot.lane.b32.xlu0 %v13240_v31, %s6541_s1 }
 0x19f   :  { %2000 = vrot.lane.b32.xlu1 %v8006_v18, %s6539_s9 }
 0x1a0   :  { %v8793_v20 = vpop.permute.xlu0 %1890 }
 0x1a1   :  { %13291 = vst [vmem:[#allocation9_spill] sm:$0xff] %v8793_v20  ;;  %v8795_v6 = vpop.permute.xlu1 %1884 }
 0x1a2   :  { %2002 = vrot.lane.b32.xlu0 %v8059_v3, %s6539_s9 }
 0x1a3   :  { %2064 = vrot.lane.b32.xlu1 %v13180_v25, %s6540_s10 }
 0x1a4   :  { %v8801_v14 = vpop.permute.xlu0 %1894 }
 0x1a5   :  { %13292 = vst [vmem:[#allocation148_spill] sm:$0xff] %v8801_v14  ;;  %v8803_v44 = vpop.permute.xlu1 %1888 }
 0x1a6   :  { %2066 = vrot.lane.b32.xlu0 %v13188_v32, %s6540_s10 }
 0x1a7   :  { %2128 = vrot.lane.b32.xlu1 %v13236_v10, %s6541_s1 }
 0x1a8   :  { %v8809_v31 = vpop.permute.xlu0 %1898 }
 0x1a9   :  { %13293 = vst [vmem:[#allocation149_spill] sm:$0xff] %v8809_v31  ;;  %v8811_v20 = vpop.permute.xlu1 %1892 }
 0x1aa   :  { %2130 = vrot.lane.b32.xlu0 %v13244_v40, %s6541_s1 }
 0x1ab   :  { %2004 = vrot.lane.b32.xlu1 %v8064_v37, %s6539_s9 }
 0x1ac   :  { %v8817_v25 = vpop.permute.xlu0 %1902 }
 0x1ad   :  { %13294 = vst [vmem:[#allocation150_spill] sm:$0xff] %v8817_v25  ;;  %v8819_v14 = vpop.permute.xlu1 %1896 }
 0x1ae   :  { %13295 = vst [vmem:[#allocation151_spill] sm:$0xff] %v8819_v14  ;;  %2006 = vrot.lane.b32.xlu0 %v8100_v4, %s6539_s9 }
 0x1af   :  { %2068 = vrot.lane.b32.xlu1 %v13183_v21, %s6540_s10 }
 0x1b0   :  { %v8825_v10 = vpop.permute.xlu0 %1906 }
 0x1b1   :  { %13296 = vst [vmem:[#allocation152_spill] sm:$0xff] %v8825_v10  ;;  %v8827_v32 = vpop.permute.xlu1 %1900 }
 0x1b2   :  { %13297 = vst [vmem:[#allocation153_spill] sm:$0xff] %v8827_v32  ;;  %2070 = vrot.lane.b32.xlu0 %v13192_v29, %s6540_s10 }
 0x1b3   :  { %2132 = vrot.lane.b32.xlu1 %v13239_v36, %s6541_s1 }
 0x1b4   :  { %v8833_v40 = vpop.permute.xlu0 %1910 }
 0x1b5   :  { %13298 = vst [vmem:[#allocation154_spill] sm:$0xff] %v8833_v40  ;;  %v8835_v25 = vpop.permute.xlu1 %1904 }
 0x1b6   :  { %13299 = vst [vmem:[#allocation155_spill] sm:$0xff] %v8835_v25  ;;  %2134 = vrot.lane.b32.xlu0 %v13247_v60, %s6541_s1 }
 0x1b7   :  { %2008 = vrot.lane.b32.xlu1 %v8091_v61, %s6539_s9 }
 0x1b8   :  { %v8841_v21 = vpop.permute.xlu0 %1914 }
 0x1b9   :  { %13300 = vst [vmem:[#allocation156_spill] sm:$0xff] %v8841_v21  ;;  %v8843_v10 = vpop.permute.xlu1 %1908 }
 0x1ba   :  { %13301 = vst [vmem:[#allocation157_spill] sm:$0xff] %v8843_v10  ;;  %2010 = vrot.lane.b32.xlu0 %v8109_v15, %s6539_s9 }
 0x1bb   :  { %2072 = vrot.lane.b32.xlu1 %v13187_v28, %s6540_s10 }
 0x1bc   :  { %v8849_v36 = vpop.permute.xlu0 %1918 }
 0x1bd   :  { %13302 = vst [vmem:[#allocation158_spill] sm:$0xff] %v8849_v36  ;;  %v8851_v29 = vpop.permute.xlu1 %1912 }
 0x1be   :  { %13303 = vst [vmem:[#allocation159_spill] sm:$0xff] %v8851_v29  ;;  %2074 = vrot.lane.b32.xlu0 %v13194_v39, %s6540_s10 }
 0x1bf   :  { %2136 = vrot.lane.b32.xlu1 %v13243_v45, %s6541_s1 }
 0x1c0   :  { %v8857_v60 = vpop.permute.xlu0 %1922 }
 0x1c1   :  { %13304 = vst [vmem:[#allocation160_spill] sm:$0xff] %v8857_v60  ;;  %v8859_v21 = vpop.permute.xlu1 %1916 }
 0x1c2   :  { %13305 = vst [vmem:[#allocation161_spill] sm:$0xff] %v8859_v21  ;;  %2138 = vrot.lane.b32.xlu0 %v13251_v52, %s6541_s1 }
 0x1c3   :  { %2012 = vrot.lane.b32.xlu1 %v8112_v1, %s6539_s9 }
 0x1c4   :  { %v8865_v28 = vpop.permute.xlu0 %1926 }
 0x1c5   :  { %13306 = vst [vmem:[#allocation162_spill] sm:$0xff] %v8865_v28  ;;  %v8867_v36 = vpop.permute.xlu1 %1920 }
 0x1c6   :  { %13307 = vst [vmem:[#allocation163_spill] sm:$0xff] %v8867_v36  ;;  %2014 = vrot.lane.b32.xlu0 %v8159_v54, %s6539_s9 }
 0x1c7   :  { %2076 = vrot.lane.b32.xlu1 %v13189_v41, %s6540_s10 }
 0x1c8   :  { %v8873_v45 = vpop.permute.xlu0 %1930 }
 0x1c9   :  { %13308 = vst [vmem:[#allocation164_spill] sm:$0xff] %v8873_v45  ;;  %v8875_v39 = vpop.permute.xlu1 %1924 }
 0x1ca   :  { %13309 = vst [vmem:[#allocation165_spill] sm:$0xff] %v8875_v39  ;;  %2078 = vrot.lane.b32.xlu0 %v13198_v46, %s6540_s10  ;;  %v594_v39 = vld [vmem:[#allocation2 + $0x118] sm:$0xff] }
 0x1cb   :  { %2140 = vrot.lane.b32.xlu1 %v13246_v24, %s6541_s1  ;;  %v1629_v21 = vshrl.u32 %v594_v39, 16  ;;  %v1632_v29 = vshll.u32 %v594_v39, 16 }
 0x1cc   :  { %v8881_v52 = vpop.permute.xlu0 %1934 }
 0x1cd   :  { %v8883_v28 = vpop.permute.xlu1 %1928  ;;  %v1634_v32 = vrot.slane %v1632_v29, 4 }
 0x1ce   :  { %13310 = vst [vmem:[#allocation166_spill] sm:$0xff] %v8883_v28  ;;  %2142 = vrot.lane.b32.xlu0 %v13255_v26, %s6541_s1 }
 0x1cf   :  { %2016 = vrot.lane.b32.xlu1 %v8162_v16, %s6539_s9 }
 0x1d0   :  { %v8889_v41 = vpop.permute.xlu0 %1938 }
 0x1d1   :  { %v8891_v45 = vpop.permute.xlu1 %1932 }
 0x1d2   :  { %13311 = vst [vmem:[#allocation167_spill] sm:$0xff] %v8891_v45  ;;  %2018 = vrot.lane.b32.xlu0 %v8218_v12, %s6539_s9 }
 0x1d3   :  { %2080 = vrot.lane.b32.xlu1 %v13193_v49, %s6540_s10 }
 0x1d4   :  { %v8897_v24 = vpop.permute.xlu0 %1942 }
 0x1d5   :  { %v8899_v46 = vpop.permute.xlu1 %1936 }
 0x1d6   :  { %2082 = vrot.lane.b32.xlu0 %v13202_v27, %s6540_s10  ;;  %v593_v27 = vld [vmem:[#allocation2 + $0x110] sm:$0xff] }
 0x1d7   :  { %2144 = vrot.lane.b32.xlu1 %v13250_v62, %s6541_s1  ;;  %v1624_v36 = vshll.u32 %v593_v27, 16 }
 0x1d8   :  { %v8905_v26 = vpop.permute.xlu0 %1946 }
 0x1d9   :  { %v8907_v28 = vpop.permute.xlu1 %1940  ;;  %v1626_v25 = vrot.slane %v1624_v36, 4 }
 0x1da   :  { %2146 = vrot.lane.b32.xlu0 %v13259_v59, %s6541_s1  ;;  %v1621_v59 = vshrl.u32 %v593_v27, 16 }
 0x1db   :  { %2020 = vrot.lane.b32.xlu1 %v8165_v0, %s6539_s9 }
 0x1dc   :  { %v8913_v49 = vpop.permute.xlu0 %1950 }
 0x1dd   :  { %v8915_v45 = vpop.permute.xlu1 %1944 }
 0x1de   :  { %2022 = vrot.lane.b32.xlu0 %v8223_v42, %s6539_s9 }
 0x1df   :  { %2084 = vrot.lane.b32.xlu1 %v13197_v53, %s6540_s10  ;;  %v1623_v53 = vrot.slane %v1621_v59, 3 }
 0x1e0   :  { %v8921_v62 = vpop.permute.xlu0 %1954 }
 0x1e1   :  { %v8923_v60 = vpop.permute.xlu1 %1948  ;;  %v1627_v14 = vor.u32 %v1626_v25, %v1623_v53  ;;  %v1667_v25 = vrot.slane %v1629_v21, 4 }
 0x1e2   :  { %2086 = vrot.lane.b32.xlu0 %v13204_v13, %s6540_s10  ;;  %v1631_v13 = vrot.slane %v1629_v21, 3 }
 0x1e3   :  { %2148 = vrot.lane.b32.xlu1 %v13254_v48, %s6541_s1 }
 0x1e4   :  { %v8929_v40 = vpop.permute.xlu0 %1958  ;;  %v1635_v42 = vor.u32 %v1634_v32, %v1631_v13  ;;  %v1668_v32 = vrot.slane %v1632_v29, 5 }
 0x1e5   :  { %13312 = vst [vmem:[#allocation168_spill] sm:$0xff] %v8929_v40  ;;  %v8931_v10 = vpop.permute.xlu1 %1952  ;;  %v1659_v40 = vrot.slane %v594_v39, 4 }
 0x1e6   :  { %2150 = vrot.lane.b32.xlu0 %v13263_v63, %s6541_s1 }
 0x1e7   :  { %2024 = vrot.lane.b32.xlu1 %v8226_v35, %s6539_s9  ;;  %v1636_v35 = vsel %vm631_vm5, %v1627_v14, %v1635_v42  ;;  %v1669_v14 = vor.u32 %v1668_v32, %v1667_v25 }
 0x1e8   :  { %v8937_v31 = vpop.permute.xlu0 %1962 }
 0x1e9   :  { %13313 = vst [vmem:[#allocation169_spill] sm:$0xff] %v8937_v31  ;;  %v8939_v48 = vpop.permute.xlu1 %1956  ;;  %v1658_v31 = vrot.slane %v593_v27, 4 }
 0x1ea   :  { %13314 = vst [vmem:[#allocation170_spill] sm:$0xff] %v8939_v48  ;;  %2026 = vrot.lane.b32.xlu0 %v8305_v55, %s6539_s9  ;;  %v1664_v48 = vrot.slane %v1621_v59, 4 }
 0x1eb   :  { %2088 = vrot.lane.b32.xlu1 %v13199_v8, %s6540_s10  ;;  %v1665_v8 = vrot.slane %v1624_v36, 5 }
 0x1ec   :  { %v8945_v63 = vpop.permute.xlu0 %1966 }
 0x1ed   :  { %v8947_v0 = vpop.permute.xlu1 %1960  ;;  %v1666_v42 = vor.u32 %v1665_v8, %v1664_v48  ;;  %v13318_v48 = vld [vmem:[#allocation4_spill] sm:$0xff] }
 0x1ee   :  { %2090 = vrot.lane.b32.xlu0 %v8507_v51, %s6540_s10  ;;  %v1660_v51 = vsel %vm1240_vm3, %v1658_v31, %v1659_v40  ;;  %v13315_v40 = vld [vmem:[#allocation5_spill] sm:$0xff]  ;;  %v13319_v8 = vshrl.u32 %v13318_v48, 16 }
 0x1ef   :  { %2152 = vrot.lane.b32.xlu1 %v13258_v23, %s6541_s1  ;;  %v1670_v21 = vsel %vm1337_vm4, %v1666_v42, %v1669_v14  ;;  %v13316_v29 = vshrl.u32 %v13315_v40, 16  ;;  %v13317_v59 = vshll.u32 %v13315_v40, 16 }
 0x1f0   :  { %v8954_v55 = vpop.permute.xlu0 %1970  ;;  %v635_v25 = vrot.slane %v13319_v8, 3 }
 0x1f1   :  { %v8956_v53 = vpop.permute.xlu1 %1964  ;;  %v643_v27 = vrot.slane %v13316_v29, 3  ;;  %v646_v13 = vrot.slane %v13317_v59, 4 }
 0x1f2   :  { %2154 = vrot.lane.b32.xlu0 %v8531_v56, %s6541_s1 }
 0x1f3   :  { %2028 = vrot.lane.b32.xlu1 %v1636_v35, %s6539_s9 }
 0x1f4   :  { %v8962_v23 = vpop.permute.xlu0 %1974 }
 0x1f5   :  { %v8964_v39 = vpop.permute.xlu1 %1968 }
 0x1f6   :  { %2030 = vrot.lane.b32.xlu0 %v8330_v9, %s6539_s9 }
 0x1f7   :  { %2092 = vrot.lane.b32.xlu1 %v1660_v51, %s6540_s10 }
 0x1f8   :  { %v8970_v36 = vpop.permute.xlu0 %1978 }
 0x1f9   :  { %v8972_v56 = vpop.permute.xlu1 %1972 }
 0x1fa   :  { %2094 = vrot.lane.b32.xlu0 %v13211_v50, %s6540_s10  ;;  %v13320_v50 = vshll.u32 %v13318_v48, 16 }
 0x1fb   :  { %2156 = vrot.lane.b32.xlu1 %v1670_v21, %s6541_s1 }
 0x1fc   :  { %v8977_v35 = vpop.permute.xlu0 %1982  ;;  %v638_v32 = vrot.slane %v13320_v50, 4 }
 0x1fd   :  { %v8979_v31 = vpop.permute.xlu1 %1976 }
 0x1fe   :  { %2158 = vrot.lane.b32.xlu0 %v13270_v11, %s6541_s1  ;;  %v647_v11 = vor.u32 %v646_v13, %v643_v27  ;;  %v639_v14 = vor.u32 %v638_v32, %v635_v25  ;;  %v13322_v27 = vld [vmem:[#allocation87_spill] sm:$0xff]  ;;  %v13324_v25 = vld [vmem:[#allocation142_spill] sm:$0xff] }
 0x1ff   :  { %2032 = vrot.lane.b32.xlu1 %v8290_v5, %s6539_s9 }
 0x200   :  { %v8993_v51 = vpop.permute.xlu0 %1986  ;;  %v648_v29 = vsel %vm631_vm5, %v639_v14, %v647_v11  ;;  %v13327_v14 = vld [vmem:[#allocation41_spill] sm:$0xff] }
 0x201   :  { %v8995_v42 = vpop.permute.xlu1 %1980  ;;  %v2192_v13 = vsel %vm21_vm0, %v648_v29, %v13322_v27 }
 0x202   :  { %2034 = vrot.lane.b32.xlu0 %v8337_v2, %s6539_s9 }
 0x203   :  { %2096 = vrot.lane.b32.xlu1 %v13207_v33, %s6540_s10  ;;  %v2287_v33 = vsel %vm98_vm6, %v2192_v13, %v8296_v7  ;;  %v13326_v7 = vld [vmem:[#allocation47_spill] sm:$0xff] }
 0x204   :  { %v9001_v21 = vpop.permute.xlu0 %1990 }
 0x205   :  { %13321 = vst [vmem:[#allocation5_spill] sm:$0xff] %v9001_v21  ;;  %v9003_v40 = vpop.permute.xlu1 %1984  ;;  %v13340_v21 = vld [vmem:[#allocation144_spill] sm:$0xff] }
 0x206   :  { %2098 = vrot.lane.b32.xlu0 %v13213_v47, %s6540_s10  ;;  %v13323_v47 = vld [vmem:[#allocation37_spill] sm:$0xff] }
 0x207   :  { %2160 = vrot.lane.b32.xlu1 %v13266_v30, %s6541_s1  ;;  %v2352_v30 = vsel %vm2350_vm8, %v2287_v33, %v13323_v47  ;;  %v13328_v47 = vld [vmem:[#allocation43_spill] sm:$0xff] }
 0x208   :  { %v1999_v59 = vpop.permute.xlu0 %1998  ;;  %v2417_v50 = vsel %vm2415_vm9, %v2352_v30, %v13324_v25  ;;  %v13330_v30 = vld [vmem:[#allocation17_spill] sm:$0xff] }
 0x209   :  { %v9010_v48 = vpop.permute.xlu1 %1988 }
 0x20a   :  { %2162 = vrot.lane.b32.xlu0 %v13274_v57, %s6541_s1  ;;  %v2482_v57 = vsel %vm2480_vm10, %v2417_v50, %v8881_v52  ;;  %v13329_v52 = vld [vmem:[#allocation90_spill] sm:$0xff]  ;;  %v13332_v50 = vld [vmem:[#allocation120_spill] sm:$0xff] }
 0x20b   :  { %2036 = vrot.lane.b32.xlu1 %v8340_v17, %s6539_s9  ;;  %v2547_v11 = vsel %vm2545_vm11, %v2482_v57, %v1999_v59  ;;  %v2195_v25 = vsel %vm21_vm0, %v13330_v30, %v13329_v52  ;;  %v13331_v59 = vld [vmem:[#allocation40_spill] sm:$0xff]  ;;  %v13336_v52 = vld [vmem:[#allocation42_spill] sm:$0xff] }
 0x20c   :  { %v2063_v8 = vpop.permute.xlu0 %2062  ;;  %v2289_v57 = vsel %vm98_vm6, %v2195_v25, %v13332_v50  ;;  %v13337_v30 = vld [vmem:[#allocation46_spill] sm:$0xff]  ;;  %v13338_v50 = vld [vmem:[#allocation48_spill] sm:$0xff] }
 0x20d   :  { %v9024_v32 = vpop.permute.xlu1 %1992  ;;  %v2612_v29 = vsel %vm2610_vm12, %v2547_v11, %v2063_v8  ;;  %v13333_v11 = vld [vmem:[#allocation133_spill] sm:$0xff] }
 0x20e   :  { %13325 = vst [vmem:[#allocation4_spill] sm:$0xff] %v9024_v32  ;;  %2038 = vrot.lane.b32.xlu0 %v13326_v7, %s6539_s9 }
 0x20f   :  { %2100 = vrot.lane.b32.xlu1 %v13327_v14, %s6540_s10  ;;  %v2354_v14 = vsel %vm2350_vm8, %v2289_v57, %v13333_v11  ;;  %v13339_v57 = vld [vmem:[#allocation38_spill] sm:$0xff] }
 0x210   :  { %v2127_v27 = vpop.permute.xlu0 %2126 }
 0x211   :  { %v2001_v13 = vpop.permute.xlu1 %2000  ;;  %v2677_v33 = vsel %vm2675_vm13, %v2612_v29, %v2127_v27  ;;  %v13334_v27 = vld [vmem:[#allocation89_spill] sm:$0xff] }
 0x212   :  { %2102 = vrot.lane.b32.xlu0 %v13328_v47, %s6540_s10  ;;  %6306 = vmatprep.mubr.msk.bf16.mxu0 %vm2767_vm14, %v2677_v33  ;;  %v2198_v47 = vsel %vm21_vm0, %v8050_v19, %v13334_v27  ;;  %v13335_v33 = vld [vmem:[#allocation147_spill] sm:$0xff] }
 0x213   :  { %2164 = vrot.lane.b32.xlu1 %v13331_v59, %s6541_s1  ;;  %v2419_v32 = vsel %vm2415_vm9, %v2354_v14, %v13335_v33  ;;  %v2291_v59 = vsel %vm98_vm6, %v2198_v47, %v13337_v30 }
 0x214   :  { %v2003_v8 = vpop.permute.xlu0 %2002  ;;  %v2484_v25 = vsel %vm2480_vm10, %v2419_v32, %v8899_v46  ;;  %v2356_v11 = vsel %vm2350_vm8, %v2291_v59, %v13339_v57  ;;  %v13341_v32 = vld [vmem:[#allocation69_spill] sm:$0xff]  ;;  %v13344_v57 = vld [vmem:[#allocation91_spill] sm:$0xff] }
 0x215   :  { %v2065_v29 = vpop.permute.xlu1 %2064  ;;  %v2549_v19 = vsel %vm2545_vm11, %v2484_v25, %v2001_v13  ;;  %v2421_v14 = vsel %vm2415_vm9, %v2356_v11, %v13340_v21  ;;  %v13342_v59 = vld [vmem:[#allocation45_spill] sm:$0xff]  ;;  %v13345_v11 = vld [vmem:[#allocation44_spill] sm:$0xff] }
 0x216   :  { %2166 = vrot.lane.b32.xlu0 %v13336_v52, %s6541_s1  ;;  %v2614_v33 = vsel %vm2610_vm12, %v2549_v19, %v2065_v29  ;;  %v2486_v47 = vsel %vm2480_vm10, %v2421_v14, %v8889_v41  ;;  %v13343_v41 = vld [vmem:[#allocation49_spill] sm:$0xff] }
 0x217   :  { %2040 = vrot.lane.b32.xlu1 %v13338_v50, %s6539_s9  ;;  %v2551_v30 = vsel %vm2545_vm11, %v2486_v47, %v2003_v8  ;;  %v2201_v8 = vsel %vm21_vm0, %v8006_v18, %v13344_v57  ;;  %v13346_v19 = vld [vmem:[#allocation121_spill] sm:$0xff]  ;;  %v13349_v18 = vld [vmem:[#allocation88_spill] sm:$0xff]  ;;  %v13352_v57 = vld [vmem:[#allocation134_spill] sm:$0xff] }
 0x218   :  { %v2067_v27 = vpop.permute.xlu0 %2066  ;;  %v2293_v14 = vsel %vm98_vm6, %v2201_v8, %v13346_v19  ;;  %v13353_v19 = vld [vmem:[#allocation146_spill] sm:$0xff] }
 0x219   :  { %v2129_v52 = vpop.permute.xlu1 %2128  ;;  %v2616_v21 = vsel %vm2610_vm12, %v2551_v30, %v2067_v27 }
 0x21a   :  { %v2679_v46 = vsel %vm2675_vm13, %v2614_v33, %v2129_v52  ;;  %2042 = vrot.lane.b32.xlu0 %v13341_v32, %s6539_s9  ;;  %v13347_v33 = vld [vmem:[#allocation135_spill] sm:$0xff] }
 0x21b   :  { %2104 = vrot.lane.b32.xlu1 %v13342_v59, %s6540_s10  ;;  %6307 = vmatmul.mubr.msk.bf16.vlgmr.msra.gmra.mrb[0].mxu0 %vm2767_vm14, %v2679_v46  ;;  %v2358_v52 = vsel %vm2350_vm8, %v2293_v14, %v13347_v33  ;;  %v13348_v46 = vld [vmem:[#allocation93_spill] sm:$0xff] }
 0x21c   :  { %v2131_v13 = vpop.permute.xlu0 %2130  ;;  %v2204_v30 = vsel %vm21_vm0, %v8059_v3, %v13348_v46  ;;  %v2423_v59 = vsel %vm2415_vm9, %v2358_v52, %v8779_v34  ;;  %v13354_v46 = vld [vmem:[#allocation125_spill] sm:$0xff] }
 0x21d   :  { %v2005_v29 = vpop.permute.xlu1 %2004  ;;  %v2681_v25 = vsel %vm2675_vm13, %v2616_v21, %v2131_v13  ;;  %v13350_v21 = vld [vmem:[#allocation53_spill] sm:$0xff] }
 0x21e   :  { %2106 = vrot.lane.b32.xlu0 %v13343_v41, %s6540_s10  ;;  %6310 = vmatprep.mubr.msk.bf16.mxu0 %vm2767_vm14, %v2681_v25  ;;  %v2295_v13 = vsel %vm98_vm6, %v2204_v30, %v13350_v21  ;;  %v2488_v25 = vsel %vm2480_vm10, %v2423_v59, %v8907_v28  ;;  %v13351_v41 = vld [vmem:[#allocation60_spill] sm:$0xff]  ;;  %v13355_v59 = vld [vmem:[#allocation51_spill] sm:$0xff] }
 0x21f   :  { %2168 = vrot.lane.b32.xlu1 %v13345_v11, %s6541_s1  ;;  %v2360_v8 = vsel %vm2350_vm8, %v2295_v13, %v13352_v57  ;;  %v2553_v3 = vsel %vm2545_vm11, %v2488_v25, %v2005_v29  ;;  %v13357_v13 = vld [vmem:[#allocation95_spill] sm:$0xff]  ;;  %v13358_v25 = vld [vmem:[#allocation92_spill] sm:$0xff]  ;;  %v13359_v57 = vld [vmem:[#allocation50_spill] sm:$0xff] }
 0x220   :  { %v2007_v27 = vpop.permute.xlu0 %2006  ;;  %v2425_v34 = vsel %vm2415_vm9, %v2360_v8, %v13353_v19 }
 0x221   :  { %v2069_v47 = vpop.permute.xlu1 %2068  ;;  %v2490_v52 = vsel %vm2480_vm10, %v2425_v34, %v8897_v24  ;;  %v13356_v24 = vld [vmem:[#allocation58_spill] sm:$0xff] }
 0x222   :  { %2170 = vrot.lane.b32.xlu0 %v13349_v18, %s6541_s1  ;;  %v2618_v14 = vsel %vm2610_vm12, %v2553_v3, %v2069_v47  ;;  %v2555_v30 = vsel %vm2545_vm11, %v2490_v52, %v2007_v27  ;;  %v2207_v27 = vsel %vm21_vm0, %v8064_v37, %v13357_v13  ;;  %v13362_v37 = vld [vmem:[#allocation94_spill] sm:$0xff] }
 0x223   :  { %2044 = vrot.lane.b32.xlu1 %v13351_v41, %s6539_s9  ;;  %v2297_v8 = vsel %vm98_vm6, %v2207_v27, %v13359_v57  ;;  %v13366_v57 = vld [vmem:[#allocation52_spill] sm:$0xff] }
 0x224   :  { %v2071_v11 = vpop.permute.xlu0 %2070 }
 0x225   :  { %v2133_v33 = vpop.permute.xlu1 %2132  ;;  %v2620_v29 = vsel %vm2610_vm12, %v2555_v30, %v2071_v11  ;;  %v13360_v11 = vld [vmem:[#allocation137_spill] sm:$0xff] }
 0x226   :  { %v2683_v28 = vsel %vm2675_vm13, %v2618_v14, %v2133_v33  ;;  %2046 = vrot.lane.b32.xlu0 %v13354_v46, %s6539_s9  ;;  %v2362_v19 = vsel %vm2350_vm8, %v2297_v8, %v13360_v11  ;;  %v13361_v14 = vld [vmem:[#allocation96_spill] sm:$0xff]  ;;  %v13367_v11 = vld [vmem:[#allocation61_spill] sm:$0xff] }
 0x227   :  { %2108 = vrot.lane.b32.xlu1 %v13355_v59, %s6540_s10  ;;  %6311 = vmatmul.mubr.msk.bf16.gmra.mrb[4].mxu0 %vm2767_vm14, %v2683_v28  ;;  %v2210_v33 = vsel %vm21_vm0, %v8100_v4, %v13361_v14  ;;  %v2427_v52 = vsel %vm2415_vm9, %v2362_v19, %v8787_v22  ;;  %v13363_v28 = vld [vmem:[#allocation59_spill] sm:$0xff]  ;;  %v13369_v14 = vld [vmem:[#allocation97_spill] sm:$0xff] }
 0x228   :  { %v2135_v18 = vpop.permute.xlu0 %2134  ;;  %v2299_v30 = vsel %vm98_vm6, %v2210_v33, %v13363_v28  ;;  %v2492_v59 = vsel %vm2480_vm10, %v2427_v52, %v8915_v45  ;;  %v13370_v33 = vld [vmem:[#allocation98_spill] sm:$0xff] }
 0x229   :  { %v2009_v47 = vpop.permute.xlu1 %2008  ;;  %v2685_v21 = vsel %vm2675_vm13, %v2620_v29, %v2135_v18  ;;  %v13364_v29 = vld [vmem:[#allocation57_spill] sm:$0xff]  ;;  %v13365_v18 = vld [vmem:[#allocation136_spill] sm:$0xff]  ;;  %v13371_v52 = vld [vmem:[#allocation62_spill] sm:$0xff] }
 0x22a   :  { %2110 = vrot.lane.b32.xlu0 %v13356_v24, %s6540_s10  ;;  %6314 = vmatprep.mubr.msk.bf16.mxu0 %vm2767_vm14, %v2685_v21  ;;  %v2364_v21 = vsel %vm2350_vm8, %v2299_v30, %v13365_v18  ;;  %v2557_v4 = vsel %vm2545_vm11, %v2492_v59, %v2009_v47  ;;  %v13372_v30 = vld [vmem:[#allocation138_spill] sm:$0xff] }
 0x22b   :  { %2172 = vrot.lane.b32.xlu1 %v13358_v25, %s6541_s1  ;;  %v2429_v22 = vsel %vm2415_vm9, %v2364_v21, %v8777_v38  ;;  %v13373_v21 = vld [vmem:[#allocation99_spill] sm:$0xff] }
 0x22c   :  { %v2011_v3 = vpop.permute.xlu0 %2010  ;;  %v2494_v25 = vsel %vm2480_vm10, %v2429_v22, %v8905_v26  ;;  %v13368_v26 = vld [vmem:[#allocation65_spill] sm:$0xff] }
 0x22d   :  { %v2073_v34 = vpop.permute.xlu1 %2072  ;;  %v2559_v8 = vsel %vm2545_vm11, %v2494_v25, %v2011_v3  ;;  %v2213_v3 = vsel %vm21_vm0, %v8091_v61, %v13369_v14  ;;  %v13374_v61 = vld [vmem:[#allocation66_spill] sm:$0xff] }
 0x22e   :  { %2174 = vrot.lane.b32.xlu0 %v13362_v37, %s6541_s1  ;;  %v2622_v13 = vsel %vm2610_vm12, %v2557_v4, %v2073_v34  ;;  %v2301_v37 = vsel %vm98_vm6, %v2213_v3, %v13371_v52  ;;  %v2216_v4 = vsel %vm21_vm0, %v8109_v15, %v13373_v21  ;;  %v13376_v25 = vld [vmem:[#allocation54_spill] sm:$0xff]  ;;  %v13380_v52 = vld [vmem:[#allocation7_spill] sm:$0xff] }
 0x22f   :  { %2048 = vrot.lane.b32.xlu1 %v13364_v29, %s6539_s9  ;;  %v2366_v59 = vsel %vm2350_vm8, %v2301_v37, %v13372_v30  ;;  %v2303_v22 = vsel %vm98_vm6, %v2216_v4, %v13374_v61  ;;  %v2219_v37 = vsel %vm21_vm0, %v8112_v1, %v13380_v52  ;;  %v9213_v30 = vld [vmem:[#allocation2 + $0x238] sm:$0xff]  ;;  %v13383_v4 = vld [vmem:[#allocation8_spill] sm:$0xff] }
 0x230   :  { %v2075_v24 = vpop.permute.xlu0 %2074  ;;  %v13384_v61 = vld [vmem:[#allocation139_spill] sm:$0xff] }
 0x231   :  { %v2137_v27 = vpop.permute.xlu1 %2136  ;;  %v2624_v38 = vsel %vm2610_vm12, %v2559_v8, %v2075_v24  ;;  %v2431_v24 = vsel %vm2415_vm9, %v2366_v59, %v8795_v6  ;;  %v13382_v59 = vld [vmem:[#allocation123_spill] sm:$0xff] }
 0x232   :  { %v2687_v45 = vsel %vm2675_vm13, %v2622_v13, %v2137_v27  ;;  %2050 = vrot.lane.b32.xlu0 %v13366_v57, %s6539_s9  ;;  %v2496_v13 = vsel %vm2480_vm10, %v2431_v24, %v8923_v60  ;;  %v13375_v27 = vld [vmem:[#allocation63_spill] sm:$0xff]  ;;  %v2222_v24 = vsel %vm21_vm0, %v8159_v54, %v13383_v4  ;;  %v1649_v54 = vshll.u32 %v9213_v30, 16 }
 0x233   :  { %2112 = vrot.lane.b32.xlu1 %v13367_v11, %s6540_s10  ;;  %6315 = vmatmul.mubr.msk.bf16.gmra.mrb[8].mxu0 %vm2767_vm14, %v2687_v45  ;;  %v2368_v45 = vsel %vm2350_vm8, %v2303_v22, %v13376_v25 }
 0x234   :  { %v2139_v47 = vpop.permute.xlu0 %2138  ;;  %v2433_v6 = vsel %vm2415_vm9, %v2368_v45, %v8785_v43  ;;  %v13385_v45 = vld [vmem:[#allocation124_spill] sm:$0xff] }
 0x235   :  { %v2013_v19 = vpop.permute.xlu1 %2012  ;;  %v2689_v34 = vsel %vm2675_vm13, %v2624_v38, %v2139_v47  ;;  %v2498_v38 = vsel %vm2480_vm10, %v2433_v6, %v8913_v49  ;;  %v13377_v47 = vld [vmem:[#allocation70_spill] sm:$0xff]  ;;  %v13379_v49 = vld [vmem:[#allocation71_spill] sm:$0xff] }
 0x236   :  { %2114 = vrot.lane.b32.xlu0 %v13368_v26, %s6540_s10  ;;  %6318 = vmatprep.mubr.msk.bf16.mxu0 %vm2767_vm14, %v2689_v34  ;;  %v2561_v15 = vsel %vm2545_vm11, %v2496_v13, %v2013_v19  ;;  %v13378_v26 = vld [vmem:[#allocation68_spill] sm:$0xff]  ;;  %v13386_v6 = vld [vmem:[#allocation15_spill] sm:$0xff] }
 0x237   :  { %2176 = vrot.lane.b32.xlu1 %v13370_v33, %s6541_s1  ;;  %v9206_v33 = vld [vmem:[#allocation2 + $0x230] sm:$0xff] }
 0x238   :  { %v2015_v28 = vpop.permute.xlu0 %2014  ;;  %v1638_v25 = vshrl.u32 %v9206_v33, 16  ;;  %v1641_v1 = vshll.u32 %v9206_v33, 16 }
 0x239   :  { %v2077_v18 = vpop.permute.xlu1 %2076  ;;  %v2563_v34 = vsel %vm2545_vm11, %v2498_v38, %v2015_v28  ;;  %v13381_v28 = vld [vmem:[#allocation6_spill] sm:$0xff] }
 0x23a   :  { %2178 = vrot.lane.b32.xlu0 %v13289_v58, %s6541_s1  ;;  %v2626_v58 = vsel %vm2610_vm12, %v2561_v15, %v2077_v18  ;;  %v2305_v18 = vsel %vm98_vm6, %v2219_v37, %v13382_v59  ;;  %v2307_v15 = vsel %vm98_vm6, %v2222_v24, %v13385_v45  ;;  %v13392_v37 = vld [vmem:[#allocation122_spill] sm:$0xff]  ;;  %v13395_v24 = vld [vmem:[#allocation9_spill] sm:$0xff]  ;;  %v1640_v45 = vrot.slane %v1638_v25, 3 }
 0x23b   :  { %2052 = vrot.lane.b32.xlu1 %v13375_v27, %s6539_s9  ;;  %v2370_v22 = vsel %vm2350_vm8, %v2305_v18, %v13384_v61  ;;  %v13394_v18 = vshll.u32 %v13392_v37, 16 }
 0x23c   :  { %v2079_v8 = vpop.permute.xlu0 %2078 }
 0x23d   :  { %v2141_v11 = vpop.permute.xlu1 %2140  ;;  %v2628_v43 = vsel %vm2610_vm12, %v2563_v34, %v2079_v8  ;;  %v2435_v8 = vsel %vm2415_vm9, %v2370_v22, %v8803_v44  ;;  %v13388_v34 = vld [vmem:[#allocation126_spill] sm:$0xff]  ;;  %v1617_v4 = vrot.slane %v13394_v18, 5 }
 0x23e   :  { %v2691_v60 = vsel %vm2675_vm13, %v2626_v58, %v2141_v11  ;;  %2054 = vrot.lane.b32.xlu0 %v13377_v47, %s6539_s9  ;;  %v1646_v58 = vshrl.u32 %v9213_v30, 16  ;;  %v13387_v11 = vld [vmem:[#allocation56_spill] sm:$0xff] }
 0x23f   :  { %2116 = vrot.lane.b32.xlu1 %v13378_v26, %s6540_s10  ;;  %6319 = vmatmul.mubr.msk.bf16.gmra.mrb[12].mxu0 %vm2767_vm14, %v2691_v60  ;;  %v2372_v38 = vsel %vm2350_vm8, %v2307_v15, %v13387_v11  ;;  %v2500_v60 = vsel %vm2480_vm10, %v2435_v8, %v8931_v10  ;;  %v13389_v26 = vld [vmem:[#allocation67_spill] sm:$0xff]  ;;  %v1643_v15 = vrot.slane %v1641_v1, 4 }
 0x240   :  { %v2143_v19 = vpop.permute.xlu0 %2142  ;;  %v2437_v10 = vsel %vm2415_vm9, %v2372_v38, %v13395_v24  ;;  %v1648_v11 = vrot.slane %v1646_v58, 3  ;;  %v13399_v24 = vld [vmem:[#allocation10_spill] sm:$0xff] }
 0x241   :  { %v2017_v14 = vpop.permute.xlu1 %2016  ;;  %v2693_v3 = vsel %vm2675_vm13, %v2628_v43, %v2143_v19  ;;  %v13390_v43 = vshrl.u32 %v13389_v26, 16  ;;  %v1644_v18 = vor.u32 %v1643_v15, %v1640_v45  ;;  %v13403_v15 = vld [vmem:[#allocation55_spill] sm:$0xff] }
 0x242   :  { %2118 = vrot.lane.b32.xlu0 %v13379_v49, %s6540_s10  ;;  %6322 = vmatprep.mubr.msk.bf16.mxu0 %vm2767_vm14, %v2693_v3  ;;  %v2565_v44 = vsel %vm2545_vm11, %v2500_v60, %v2017_v14  ;;  %v13391_v49 = vshll.u32 %v13389_v26, 16  ;;  %v2502_v14 = vsel %vm2480_vm10, %v2437_v10, %v8921_v62  ;;  %v1651_v60 = vrot.slane %v1649_v54, 4 }
 0x243   :  { %2180 = vrot.lane.b32.xlu1 %v13381_v28, %s6541_s1  ;;  %v1613_v19 = vrot.slane %v13390_v43, 4  ;;  %v13393_v28 = vshrl.u32 %v13392_v37, 16  ;;  %v13397_v43 = vld [vmem:[#allocation73_spill] sm:$0xff]  ;;  %v2225_v10 = vsel %vm21_vm0, %v8162_v16, %v13399_v24  ;;  %v1675_v24 = vrot.slane %v1649_v54, 5 }
 0x244   :  { %v2019_v21 = vpop.permute.xlu0 %2018  ;;  %v1614_v52 = vrot.slane %v13391_v49, 5 }
 0x245   :  { %v2081_v13 = vpop.permute.xlu1 %2080  ;;  %v1616_v59 = vrot.slane %v13393_v28, 4  ;;  %v2567_v26 = vsel %vm2545_vm11, %v2502_v14, %v2019_v21  ;;  %v13398_v28 = vld [vmem:[#allocation14_spill] sm:$0xff]  ;;  %v1652_v21 = vor.u32 %v1651_v60, %v1648_v11  ;;  %v13405_v60 = vld [vmem:[#allocation129_spill] sm:$0xff] }
 0x246   :  { %2182 = vrot.lane.b32.xlu0 %v13386_v6, %s6541_s1  ;;  %v2630_v61 = vsel %vm2610_vm12, %v2565_v44, %v2081_v13  ;;  %v13396_v6 = vld [vmem:[#allocation21_spill] sm:$0xff]  ;;  %v1615_v44 = vor.u32 %v1614_v52, %v1613_v19  ;;  %v13401_v52 = vld [vmem:[#allocation127_spill] sm:$0xff] }
 0x247   :  { %2056 = vrot.lane.b32.xlu1 %v13388_v34, %s6539_s9  ;;  %v1618_v49 = vor.u32 %v1617_v4, %v1616_v59  ;;  %v2309_v59 = vsel %vm98_vm6, %v2225_v10, %v13401_v52 }
 0x248   :  { %v2083_v3 = vpop.permute.xlu0 %2082  ;;  %v2374_v14 = vsel %vm2350_vm8, %v2309_v59, %v13403_v15  ;;  %v13411_v15 = vld [vmem:[#allocation130_spill] sm:$0xff] }
 0x249   :  { %v2145_v22 = vpop.permute.xlu1 %2144  ;;  %v2632_v13 = vsel %vm2610_vm12, %v2567_v26, %v2083_v3  ;;  %v13400_v3 = vld [vmem:[#allocation13_spill] sm:$0xff]  ;;  %v1619_v4 = vsel %vm1337_vm4, %v1615_v44, %v1618_v49  ;;  %v2439_v11 = vsel %vm2415_vm9, %v2374_v14, %v8811_v20  ;;  %v13406_v26 = vld [vmem:[#allocation170_spill] sm:$0xff]  ;;  %v1671_v44 = vrot.slane %v1638_v25, 4 }
 0x24a   :  { %v2695_v8 = vsel %vm2675_vm13, %v2630_v61, %v2145_v22  ;;  %1994 = vrot.lane.b32.xlu0 %v13396_v6, %s6538_s27  ;;  %v2228_v19 = vsel %vm21_vm0, %v8218_v12, %v13400_v3  ;;  %v13402_v22 = vld [vmem:[#allocation128_spill] sm:$0xff]  ;;  %v1653_v12 = vsel %vm631_vm5, %v1644_v18, %v1652_v21  ;;  %v1674_v20 = vrot.slane %v1646_v58, 4 }
 0x24b   :  { %2120 = vrot.lane.b32.xlu1 %v13397_v43, %s6540_s10  ;;  %6323 = vmatmul.mubr.msk.bf16.gmra.mrb[16].mxu0 %vm2767_vm14, %v2695_v8  ;;  %v2311_v45 = vsel %vm98_vm6, %v2228_v19, %v13402_v22  ;;  %v13404_v8 = vld [vmem:[#allocation72_spill] sm:$0xff]  ;;  %v2504_v43 = vsel %vm2480_vm10, %v2439_v11, %v13406_v26  ;;  %v13414_v26 = vld [vmem:[#allocation114_spill] sm:$0xff] }
 0x24c   :  { %v2147_v38 = vpop.permute.xlu0 %2146  ;;  %v13407_v18 = vld [vmem:[#allocation148_spill] sm:$0xff] }
 0x24d   :  { %v2021_v62 = vpop.permute.xlu1 %2020  ;;  %v2697_v37 = vsel %vm2675_vm13, %v2632_v13, %v2147_v38  ;;  %v1661_v13 = vrot.slane %v9206_v33, 4  ;;  %v1662_v38 = vrot.slane %v9213_v30, 4  ;;  %v13408_v19 = vld [vmem:[#allocation168_spill] sm:$0xff] }
 0x24e   :  { %2058 = vrot.lane.b32.xlu0 %v13398_v28, %s6539_s9  ;;  %6326 = vmatprep.mubr.msk.bf16.mxu0 %vm2767_vm14, %v2697_v37  ;;  %v2569_v49 = vsel %vm2545_vm11, %v2504_v43, %v2021_v62  ;;  %v1672_v28 = vrot.slane %v1641_v1, 5  ;;  %v1676_v62 = vor.u32 %v1675_v24, %v1674_v20  ;;  %v13419_v24 = vld [vmem:[#allocation25_spill] sm:$0xff] }
 0x24f   :  { %2184 = vrot.lane.b32.xlu1 %v13396_v6, %s6541_s1  ;;  %v2376_v6 = vsel %vm2350_vm8, %v2311_v45, %v13404_v8  ;;  %v1663_v1 = vsel %vm1240_vm3, %v1661_v13, %v1662_v38  ;;  %v13409_v45 = vld [vmem:[#allocation100_spill] sm:$0xff]  ;;  %v13415_v13 = vld [vmem:[#allocation11_spill] sm:$0xff] }
 0x250   :  { %v2023_v61 = vpop.permute.xlu0 %2022  ;;  %v2441_v21 = vsel %vm2415_vm9, %v2376_v6, %v13407_v18  ;;  %v1673_v54 = vor.u32 %v1672_v28, %v1671_v44  ;;  %v13412_v6 = vld [vmem:[#allocation64_spill] sm:$0xff]  ;;  %v13416_v38 = vshrl.u32 %v13415_v13, 16  ;;  %v13418_v28 = vld [vmem:[#allocation151_spill] sm:$0xff]  ;;  %v13420_v18 = vshrl.u32 %v13419_v24, 16 }
 0x251   :  { %v2085_v16 = vpop.permute.xlu1 %2084  ;;  %v2506_v52 = vsel %vm2480_vm10, %v2441_v21, %v13408_v19  ;;  %v13422_v19 = vld [vmem:[#allocation131_spill] sm:$0xff] }
 0x252   :  { %2122 = vrot.lane.b32.xlu0 %v13405_v60, %s6540_s10  ;;  %v2634_v10 = vsel %vm2610_vm12, %v2569_v49, %v2085_v16  ;;  %v2571_v30 = vsel %vm2545_vm11, %v2506_v52, %v2023_v61  ;;  %v1677_v16 = vsel %vm1337_vm4, %v1673_v54, %v1676_v62  ;;  %v13413_v60 = vld [vmem:[#allocation101_spill] sm:$0xff]  ;;  %v907_v44 = vrot.slane %v13416_v38, 3  ;;  %v13428_v38 = vld [vmem:[#allocation19_spill] sm:$0xff] }
 0x253   :  { %1996 = vrot.lane.b32.xlu1 %v1619_v4, %s6538_s27  ;;  %v2234_v43 = vsel %vm21_vm0, %v13414_v26, %v13413_v60  ;;  %v13417_v49 = vshll.u32 %v13415_v13, 16  ;;  %v915_v21 = vrot.slane %v13420_v18, 3  ;;  %v13424_v54 = vld [vmem:[#allocation149_spill] sm:$0xff]  ;;  %v13427_v26 = vld [vmem:[#allocation115_spill] sm:$0xff] }
 0x254   :  { %v2087_v37 = vpop.permute.xlu0 %2086  ;;  %v2315_v52 = vsel %vm98_vm6, %v2234_v43, %v13422_v19  ;;  %v13431_v18 = vld [vmem:[#allocation153_spill] sm:$0xff] }
 0x255   :  { %v2149_v3 = vpop.permute.xlu1 %2148  ;;  %v2636_v25 = vsel %vm2610_vm12, %v2571_v30, %v2087_v37  ;;  %v910_v37 = vrot.slane %v13417_v49, 4  ;;  %v13423_v30 = vld [vmem:[#allocation75_spill] sm:$0xff] }
 0x256   :  { %v2699_v33 = vsel %vm2675_vm13, %v2634_v10, %v2149_v3  ;;  %2186 = vrot.lane.b32.xlu0 %v1619_v4, %s6541_s1  ;;  %v13410_v4 = vld [vmem:[#allocation110_spill] sm:$0xff]  ;;  %v13421_v10 = vshll.u32 %v13419_v24, 16  ;;  %v13429_v49 = vld [vmem:[#allocation79_spill] sm:$0xff] }
 0x257   :  { %2060 = vrot.lane.b32.xlu1 %v1653_v12, %s6539_s9  ;;  %6327 = vmatmul.mubr.msk.bf16.gmra.mrb[20].mxu0 %vm2767_vm14, %v2699_v33  ;;  %v2231_v61 = vsel %vm21_vm0, %v13410_v4, %v13409_v45  ;;  %v13425_v4 = vld [vmem:[#allocation169_spill] sm:$0xff] }
 0x258   :  { %v2151_v58 = vpop.permute.xlu0 %2150  ;;  %v2313_v14 = vsel %vm98_vm6, %v2231_v61, %v13411_v15  ;;  %v918_v3 = vrot.slane %v13421_v10, 4  ;;  %v13432_v10 = vld [vmem:[#allocation132_spill] sm:$0xff] }
 0x259   :  { %v2025_v59 = vpop.permute.xlu1 %2024  ;;  %v2701_v22 = vsel %vm2675_vm13, %v2636_v25, %v2151_v58  ;;  %v2378_v11 = vsel %vm2350_vm8, %v2313_v14, %v13412_v6  ;;  %v2380_v25 = vsel %vm2350_vm8, %v2315_v52, %v13423_v30  ;;  %v13433_v52 = vld [vmem:[#allocation77_spill] sm:$0xff] }
 0x25a   :  { %6330 = vmatprep.mubr.msk.bf16.mxu0 %vm2767_vm14, %v2701_v22  ;;  %v2443_v20 = vsel %vm2415_vm9, %v2378_v11, %v13418_v28  ;;  %v2445_v62 = vsel %vm2415_vm9, %v2380_v25, %v13424_v54  ;;  %v919_v14 = vor.u32 %v918_v3, %v915_v21 }
 0x25b   :  { %2124 = vrot.lane.b32.xlu1 %v1663_v1, %s6540_s10  ;;  %v2508_v33 = vsel %vm2480_vm10, %v2443_v20, %v8947_v0  ;;  %v2510_v61 = vsel %vm2480_vm10, %v2445_v62, %v13425_v4  ;;  %v911_v0 = vor.u32 %v910_v37, %v907_v44  ;;  %v13430_v20 = vld [vmem:[#allocation18_spill] sm:$0xff] }
 0x25c   :  { %v2027_v8 = vpop.permute.xlu0 %2026  ;;  %v2573_v1 = vsel %vm2545_vm11, %v2508_v33, %v2025_v59 }
 0x25d   :  { %v2089_v12 = vpop.permute.xlu1 %2088  ;;  %v920_v13 = vsel %vm631_vm5, %v911_v0, %v919_v14  ;;  %v13435_v14 = vld [vmem:[#allocation22_spill] sm:$0xff] }
 0x25e   :  { %v2638_v22 = vsel %vm2610_vm12, %v2573_v1, %v2089_v12  ;;  %v13426_v12 = vld [vmem:[#allocation16_spill] sm:$0xff]  ;;  %v2240_v24 = vsel %vm21_vm0, %v920_v13, %v13430_v20  ;;  %v13434_v1 = vld [vmem:[#allocation150_spill] sm:$0xff] }
 0x25f   :  { %2188 = vrot.lane.b32.xlu1 %v1677_v16, %s6541_s1  ;;  %v2575_v16 = vsel %vm2545_vm11, %v2510_v61, %v2027_v8  ;;  %v2237_v43 = vsel %vm21_vm0, %v13427_v26, %v13426_v12  ;;  %v2319_v3 = vsel %vm98_vm6, %v2240_v24, %v13432_v10  ;;  %v13439_v12 = vld [vmem:[#allocation81_spill] sm:$0xff]  ;;  %v13440_v13 = vld [vmem:[#allocation102_spill] sm:$0xff]  ;;  %v13444_v10 = vld [vmem:[#allocation152_spill] sm:$0xff] }
 0x260   :  { %v2091_v58 = vpop.permute.xlu0 %2090  ;;  %v2317_v44 = vsel %vm98_vm6, %v2237_v43, %v13428_v38  ;;  %v2384_v33 = vsel %vm2350_vm8, %v2319_v3, %v13433_v52  ;;  %v2246_v38 = vsel %vm21_vm0, %v8330_v9, %v13440_v13  ;;  %v13443_v20 = vld [vmem:[#allocation74_spill] sm:$0xff] }
 0x261   :  { %v2153_v45 = vpop.permute.xlu1 %2152  ;;  %v2640_v59 = vsel %vm2610_vm12, %v2575_v16, %v2091_v58  ;;  %v2382_v37 = vsel %vm2350_vm8, %v2317_v44, %v13429_v49  ;;  %v2449_v58 = vsel %vm2415_vm9, %v2384_v33, %v13434_v1  ;;  %v13436_v16 = vld [vmem:[#allocation116_spill] sm:$0xff]  ;;  %v13441_v44 = vld [vmem:[#allocation155_spill] sm:$0xff] }
 0x262   :  { %v2703_v15 = vsel %vm2675_vm13, %v2638_v22, %v2153_v45  ;;  %v2447_v21 = vsel %vm2415_vm9, %v2382_v37, %v13431_v18  ;;  %v2514_v22 = vsel %vm2480_vm10, %v2449_v58, %v8945_v63  ;;  %v9382_v63 = vsel %vm21_vm0, %v13436_v16, %v13435_v14  ;;  %v13442_v49 = vld [vmem:[#allocation12_spill] sm:$0xff]  ;;  %v9541_v58 = vld [vmem:[#allocation3 + $0x8] sm:$0xff]  ;;  %v13447_v14 = vld [vmem:[#allocation83_spill] sm:$0xff] }
 0x263   :  { %6331 = vmatmul.mubr.msk.bf16.gmra.mrb[24].mxu0 %vm2767_vm14, %v2703_v15  ;;  %v2512_v19 = vsel %vm2480_vm10, %v2447_v21, %v8956_v53  ;;  %v2323_v37 = vsel %vm98_vm6, %v2246_v38, %v13442_v49  ;;  %v9539_v1 = vld [vmem:[#allocation3] sm:$0xff] }
 0x264   :  { %v2155_v6 = vpop.permute.xlu0 %2154  ;;  %v2388_v24 = vsel %vm2350_vm8, %v2323_v37, %v13443_v20 }
 0x265   :  { %v2029_v11 = vpop.permute.xlu1 %2028  ;;  %v2705_v60 = vsel %vm2675_vm13, %v2640_v59, %v2155_v6  ;;  %v13437_v59 = vmov 0   ;;  %v13438_v6 = vld [vmem:[#allocation23_spill] sm:$0xff]  ;;  %v2453_v3 = vsel %vm2415_vm9, %v2388_v24, %v13444_v10 }
 0x266   :  { %6334 = vmatprep.mubr.msk.bf16.mxu0 %vm2767_vm14, %v2705_v60  ;;  %v2577_v30 = vsel %vm2545_vm11, %v2512_v19, %v2029_v11  ;;  %110 = vst.msk [vmem:[#allocation3 + $0x10] sm:$0xf] %vm109_vm15, %v13437_v59  ;;  %111 = vst.msk [vmem:[#allocation3 + $0x20] sm:$0xf] %vm109_vm15, %v13437_v59  ;;  %v2321_v11 = vsel %vm98_vm6, %v9382_v63, %v13438_v6  ;;  %v2518_v52 = vsel %vm2480_vm10, %v2453_v3, %v8954_v55  ;;  %v13453_v3 = vld [vmem:[#allocation105_spill] sm:$0xff] }
 0x267   :  { %112 = vst.msk [vmem:[#allocation3 + $0x30] sm:$0xf] %vm109_vm15, %v13437_v59  ;;  %113 = vst.msk [vmem:[#allocation3 + $0x40] sm:$0xf] %vm109_vm15, %v13437_v59  ;;  %v2386_v26 = vsel %vm2350_vm8, %v2321_v11, %v13439_v12  ;;  %v4062_v55 = vrot.slane %v9541_v58, 4  ;;  %v13449_v11 = vld [vmem:[#allocation157_spill] sm:$0xff] }
 0x268   :  { %v2031_v8 = vpop.permute.xlu0 %2030  ;;  %114 = vst.msk [vmem:[#allocation3 + $0x50] sm:$0xf] %vm109_vm15, %v13437_v59  ;;  %115 = vst.msk [vmem:[#allocation3 + $0x60] sm:$0xf] %vm109_vm15, %v13437_v59 }
 0x269   :  { %v2093_v28 = vpop.permute.xlu1 %2092  ;;  %v2579_v4 = vsel %vm2545_vm11, %v2514_v22, %v2031_v8  ;;  %116 = vst.msk [vmem:[#allocation3 + $0x70] sm:$0xf] %vm109_vm15, %v13437_v59  ;;  %117 = vst.msk [vmem:[#allocation3 + $0x80] sm:$0xf] %vm109_vm15, %v13437_v59  ;;  %v2451_v8 = vsel %vm2415_vm9, %v2386_v26, %v13441_v44  ;;  %v4061_v22 = vrot.slane %v9539_v1, 4 }
 0x26a   :  { %v2642_v54 = vsel %vm2610_vm12, %v2577_v30, %v2093_v28  ;;  %118 = vst.msk [vmem:[#allocation3 + $0x90] sm:$0xf] %vm109_vm15, %v13437_v59  ;;  %119 = vst.msk [vmem:[#allocation3 + $0xa0] sm:$0xf] %vm109_vm15, %v13437_v59  ;;  %v2516_v28 = vsel %vm2480_vm10, %v2451_v8, %v8964_v39  ;;  %v13452_v8 = vld [vmem:[#allocation154_spill] sm:$0xff] }
 0x26b   :  { %120 = vst.msk [vmem:[#allocation3 + $0xb0] sm:$0xf] %vm109_vm15, %v13437_v59  ;;  %121 = vst.msk [vmem:[#allocation3 + $0xc0] sm:$0xf] %vm109_vm15, %v13437_v59 }
 0x26c   :  { %v2095_v25 = vpop.permute.xlu0 %2094  ;;  %122 = vst.msk [vmem:[#allocation3 + $0xd0] sm:$0xf] %vm109_vm15, %v13437_v59  ;;  %123 = vst.msk [vmem:[#allocation3 + $0xe0] sm:$0xf] %vm109_vm15, %v13437_v59 }
 0x26d   :  { %v2157_v62 = vpop.permute.xlu1 %2156  ;;  %v2644_v53 = vsel %vm2610_vm12, %v2579_v4, %v2095_v25  ;;  %124 = vst.msk [vmem:[#allocation3 + $0xf0] sm:$0xf] %vm109_vm15, %v13437_v59  ;;  %125 = vst.msk [vmem:[#allocation3 + $0x100] sm:$0xf] %vm109_vm15, %v13437_v59 }
 0x26e   :  { %v2707_v45 = vsel %vm2675_vm13, %v2642_v54, %v2157_v62  ;;  %126 = vst.msk [vmem:[#allocation3 + $0x130] sm:$0xf] %vm109_vm15, %v13437_v59  ;;  %127 = vst.msk [vmem:[#allocation3 + $0x140] sm:$0xf] %vm109_vm15, %v13437_v59 }
 0x26f   :  { %6335 = vmatmul.mubr.msk.bf16.gmra.mrb[28].mxu0 %vm2767_vm14, %v2707_v45  ;;  %128 = vst.msk [vmem:[#allocation3 + $0x150] sm:$0xf] %vm109_vm15, %v13437_v59  ;;  %129 = vst.msk [vmem:[#allocation3 + $0x160] sm:$0xf] %vm109_vm15, %v13437_v59  ;;  %v13445_v45 = vld [vmem:[#allocation103_spill] sm:$0xff] }
 0x270   :  { %v2159_v61 = vpop.permute.xlu0 %2158  ;;  %130 = vst.msk [vmem:[#allocation3 + $0x170] sm:$0xf] %vm109_vm15, %v13437_v59  ;;  %131 = vst.msk [vmem:[#allocation3 + $0x180] sm:$0xf] %vm109_vm15, %v13437_v59  ;;  %v2249_v4 = vsel %vm21_vm0, %v8290_v5, %v13445_v45  ;;  %v13450_v5 = vld [vmem:[#allocation20_spill] sm:$0xff] }
 0x271   :  { %v9375_v15 = vpop.permute.xlu1 %2032  ;;  %v2709_v0 = vsel %vm2675_vm13, %v2644_v53, %v2159_v61  ;;  %132 = vst.msk [vmem:[#allocation3 + $0x190] sm:$0xf] %vm109_vm15, %v13437_v59  ;;  %133 = vst.msk [vmem:[#allocation3 + $0x1a0] sm:$0xf] %vm109_vm15, %v13437_v59  ;;  %v4063_v53 = vsel %vm1240_vm3, %v4061_v22, %v4062_v55  ;;  %v13446_v61 = vld [vmem:[#allocation26_spill] sm:$0xff]  ;;  %v13458_v55 = vld [vmem:[#allocation24_spill] sm:$0xff] }
 0x272   :  { %6338 = vmatprep.mubr.msk.bf16.mxu0 %vm2767_vm14, %v2709_v0  ;;  %134 = vst.msk [vmem:[#allocation3 + $0x1b0] sm:$0xf] %vm109_vm15, %v13437_v59  ;;  %135 = vst.msk [vmem:[#allocation3 + $0x1c0] sm:$0xf] %vm109_vm15, %v13437_v59  ;;  %v2581_v18 = vsel %vm2545_vm11, %v2516_v28, %v9375_v15  ;;  %v2325_v15 = vsel %vm98_vm6, %v2249_v4, %v13446_v61  ;;  %4497 = vrot.lane.b32.xlu0 %v4063_v53, %s6535_s17  ;;  %v13459_v4 = vld [vmem:[#allocation78_spill] sm:$0xff] }
 0x273   :  { %136 = vst.msk [vmem:[#allocation3 + $0x1d0] sm:$0xf] %vm109_vm15, %v13437_v59  ;;  %137 = vst.msk [vmem:[#allocation3 + $0x1e0] sm:$0xf] %vm109_vm15, %v13437_v59  ;;  %v2390_v16 = vsel %vm2350_vm8, %v2325_v15, %v13447_v14 }
 0x274   :  { %138 = vst.msk [vmem:[#allocation3 + $0x1f0] sm:$0xf] %vm109_vm15, %v13437_v59  ;;  %139 = vst.msk [vmem:[#allocation3 + $0x200] sm:$0xf] %vm109_vm15, %v13437_v59  ;;  %v2035_v60 = vpop.permute.xlu0 %2034 }
 0x275   :  { %140 = vst.msk [vmem:[#allocation3 + $0x210] sm:$0xf] %vm109_vm15, %v13437_v59  ;;  %141 = vst.msk [vmem:[#allocation3 + $0x220] sm:$0xf] %vm109_vm15, %v13437_v59  ;;  %v2097_v43 = vpop.permute.xlu1 %2096  ;;  %v2583_v39 = vsel %vm2545_vm11, %v2518_v52, %v2035_v60  ;;  %v2455_v60 = vsel %vm2415_vm9, %v2390_v16, %v13449_v11 }
 0x276   :  { %143 = vst.msk [vmem:[#allocation3 + $0x18] sm:$0xf0] %vm142_vm1, %v13437_v59  ;;  %144 = vst.msk [vmem:[#allocation3 + $0x28] sm:$0xf0] %vm142_vm1, %v13437_v59  ;;  %v2646_v9 = vsel %vm2610_vm12, %v2581_v18, %v2097_v43  ;;  %v2520_v26 = vsel %vm2480_vm10, %v2455_v60, %v8972_v56  ;;  %v13451_v43 = vld [vmem:[#allocation76_spill] sm:$0xff] }
 0x277   :  { %145 = vst.msk [vmem:[#allocation3 + $0x38] sm:$0xf0] %vm142_vm1, %v13437_v59  ;;  %146 = vst.msk [vmem:[#allocation3 + $0x48] sm:$0xf0] %vm142_vm1, %v13437_v59 }
 0x278   :  { %147 = vst.msk [vmem:[#allocation3 + $0x58] sm:$0xf0] %vm142_vm1, %v13437_v59  ;;  %148 = vst.msk [vmem:[#allocation3 + $0x68] sm:$0xf0] %vm142_vm1, %v13437_v59  ;;  %v2099_v21 = vpop.permute.xlu0 %2098 }
 0x279   :  { %149 = vst.msk [vmem:[#allocation3 + $0x78] sm:$0xf0] %vm142_vm1, %v13437_v59  ;;  %150 = vst.msk [vmem:[#allocation3 + $0x88] sm:$0xf0] %vm142_vm1, %v13437_v59  ;;  %v2161_v19 = vpop.permute.xlu1 %2160  ;;  %v2648_v30 = vsel %vm2610_vm12, %v2583_v39, %v2099_v21 }
 0x27a   :  { %151 = vst.msk [vmem:[#allocation3 + $0x98] sm:$0xf0] %vm142_vm1, %v13437_v59  ;;  %152 = vst.msk [vmem:[#allocation3 + $0xa8] sm:$0xf0] %vm142_vm1, %v13437_v59  ;;  %v2711_v33 = vsel %vm2675_vm13, %v2646_v9, %v2161_v19  ;;  %v2255_v9 = vsel %vm21_vm0, %v8340_v17, %v13453_v3  ;;  %v13454_v19 = vld [vmem:[#allocation28_spill] sm:$0xff]  ;;  %v13468_v3 = vld [vmem:[#allocation158_spill] sm:$0xff] }
 0x27b   :  { %153 = vst.msk [vmem:[#allocation3 + $0xb8] sm:$0xf0] %vm142_vm1, %v13437_v59  ;;  %154 = vst.msk [vmem:[#allocation3 + $0xc8] sm:$0xf0] %vm142_vm1, %v13437_v59  ;;  %6339 = vmatmul.mubr.msk.bf16.gmra.mrb[32].mxu0 %vm2767_vm14, %v2711_v33  ;;  %v13455_v33 = vld [vmem:[#allocation84_spill] sm:$0xff] }
 0x27c   :  { %155 = vst.msk [vmem:[#allocation3 + $0xd8] sm:$0xf0] %vm142_vm1, %v13437_v59  ;;  %156 = vst.msk [vmem:[#allocation3 + $0xe8] sm:$0xf0] %vm142_vm1, %v13437_v59  ;;  %v2163_v25 = vpop.permute.xlu0 %2162 }
 0x27d   :  { %157 = vst.msk [vmem:[#allocation3 + $0xf8] sm:$0xf0] %vm142_vm1, %v13437_v59  ;;  %158 = vst.msk [vmem:[#allocation3 + $0x108] sm:$0xf0] %vm142_vm1, %v13437_v59  ;;  %v2037_v54 = vpop.permute.xlu1 %2036  ;;  %v2713_v62 = vsel %vm2675_vm13, %v2648_v30, %v2163_v25  ;;  %v13456_v25 = vld [vmem:[#allocation106_spill] sm:$0xff] }
 0x27e   :  { %159 = vst.msk [vmem:[#allocation3 + $0x138] sm:$0xf0] %vm142_vm1, %v13437_v59  ;;  %160 = vst.msk [vmem:[#allocation3 + $0x148] sm:$0xf0] %vm142_vm1, %v13437_v59  ;;  %6342 = vmatprep.mubr.msk.bf16.mxu0 %vm2767_vm14, %v2713_v62  ;;  %v2585_v38 = vsel %vm2545_vm11, %v2520_v26, %v2037_v54  ;;  %v2258_v54 = vsel %vm21_vm0, %v13326_v7, %v13456_v25  ;;  %v13457_v62 = vld [vmem:[#allocation159_spill] sm:$0xff] }
 0x27f   :  { %161 = vst.msk [vmem:[#allocation3 + $0x158] sm:$0xf0] %vm142_vm1, %v13437_v59  ;;  %162 = vst.msk [vmem:[#allocation3 + $0x168] sm:$0xf0] %vm142_vm1, %v13437_v59  ;;  %v2331_v45 = vsel %vm98_vm6, %v2258_v54, %v13458_v55  ;;  %v13469_v54 = vld [vmem:[#allocation109_spill] sm:$0xff] }
 0x280   :  { %163 = vst.msk [vmem:[#allocation3 + $0x178] sm:$0xf0] %vm142_vm1, %v13437_v59  ;;  %164 = vst.msk [vmem:[#allocation3 + $0x188] sm:$0xf0] %vm142_vm1, %v13437_v59  ;;  %v2039_v0 = vpop.permute.xlu0 %2038  ;;  %v2396_v53 = vsel %vm2350_vm8, %v2331_v45, %v13459_v4  ;;  %v13471_v45 = vld [vmem:[#allocation140_spill] sm:$0xff] }
 0x281   :  { %165 = vst.msk [vmem:[#allocation3 + $0x198] sm:$0xf0] %vm142_vm1, %v13437_v59  ;;  %166 = vst.msk [vmem:[#allocation3 + $0x1a8] sm:$0xf0] %vm142_vm1, %v13437_v59  ;;  %v2101_v63 = vpop.permute.xlu1 %2100 }
 0x282   :  { %167 = vst.msk [vmem:[#allocation3 + $0x1b8] sm:$0xf0] %vm142_vm1, %v13437_v59  ;;  %168 = vst.msk [vmem:[#allocation3 + $0x1c8] sm:$0xf0] %vm142_vm1, %v13437_v59 }
 0x283   :  { %169 = vst.msk [vmem:[#allocation3 + $0x1d8] sm:$0xf0] %vm142_vm1, %v13437_v59  ;;  %170 = vst.msk [vmem:[#allocation3 + $0x1e8] sm:$0xf0] %vm142_vm1, %v13437_v59 }
 0x284   :  { %171 = vst.msk [vmem:[#allocation3 + $0x1f8] sm:$0xf0] %vm142_vm1, %v13437_v59  ;;  %172 = vst.msk [vmem:[#allocation3 + $0x208] sm:$0xf0] %vm142_vm1, %v13437_v59  ;;  %v2103_v44 = vpop.permute.xlu0 %2102 }
 0x285   :  { %173 = vst.msk [vmem:[#allocation3 + $0x218] sm:$0xf0] %vm142_vm1, %v13437_v59  ;;  %174 = vst.msk [vmem:[#allocation3 + $0x228] sm:$0xf0] %vm142_vm1, %v13437_v59  ;;  %v13448_v59 = vld [vmem:[#allocation104_spill] sm:$0xff]  ;;  %v2165_v37 = vpop.permute.xlu1 %2164 }
 0x286   :  { %v2252_v6 = vsel %vm21_vm0, %v8337_v2, %v13448_v59  ;;  %v2650_v2 = vsel %vm2610_vm12, %v2585_v38, %v2101_v63  ;;  %v13463_v38 = vld [vmem:[#allocation86_spill] sm:$0xff] }
 0x287   :  { %v2327_v12 = vsel %vm98_vm6, %v2252_v6, %v13450_v5  ;;  %v2715_v20 = vsel %vm2675_vm13, %v2650_v2, %v2165_v37  ;;  %v13465_v37 = vld [vmem:[#allocation161_spill] sm:$0xff] }
 0x288   :  { %v2392_v13 = vsel %vm2350_vm8, %v2327_v12, %v13451_v43  ;;  %6343 = vmatmul.mubr.msk.bf16.gmra.mrb[36].mxu0 %vm2767_vm14, %v2715_v20  ;;  %v2167_v18 = vpop.permute.xlu0 %2166  ;;  %v13461_v12 = vld [vmem:[#allocation107_spill] sm:$0xff]  ;;  %v13462_v43 = vld [vmem:[#allocation30_spill] sm:$0xff] }
 0x289   :  { %v2457_v49 = vsel %vm2415_vm9, %v2392_v13, %v13452_v8  ;;  %v2041_v21 = vpop.permute.xlu1 %2040  ;;  %v2261_v26 = vsel %vm21_vm0, %v13338_v50, %v13461_v12  ;;  %v13466_v20 = vld [vmem:[#allocation27_spill] sm:$0xff] }
 0x28a   :  { %v2522_v28 = vsel %vm2480_vm10, %v2457_v49, %v8962_v23  ;;  %v2329_v23 = vsel %vm98_vm6, %v2255_v9, %v13454_v19  ;;  %v13464_v49 = vld [vmem:[#allocation108_spill] sm:$0xff] }
 0x28b   :  { %v2587_v24 = vsel %vm2545_vm11, %v2522_v28, %v2039_v0  ;;  %v2394_v39 = vsel %vm2350_vm8, %v2329_v23, %v13455_v33  ;;  %v13460_v0 = vld [vmem:[#allocation156_spill] sm:$0xff]  ;;  %v2264_v2 = vsel %vm21_vm0, %v13341_v32, %v13464_v49 }
 0x28c   :  { %v2652_v56 = vsel %vm2610_vm12, %v2587_v24, %v2103_v44  ;;  %v2043_v52 = vpop.permute.xlu0 %2042  ;;  %v2459_v22 = vsel %vm2415_vm9, %v2394_v39, %v13457_v62  ;;  %v2461_v14 = vsel %vm2415_vm9, %v2396_v53, %v13460_v0  ;;  %v2335_v24 = vsel %vm98_vm6, %v2264_v2, %v13466_v20  ;;  %v13472_v53 = vld [vmem:[#allocation111_spill] sm:$0xff]  ;;  %v13479_v2 = vld [vmem:[#allocation141_spill] sm:$0xff] }
 0x28d   :  { %v2717_v10 = vsel %vm2675_vm13, %v2652_v56, %v2167_v18  ;;  %v2105_v30 = vpop.permute.xlu1 %2104  ;;  %v2524_v17 = vsel %vm2480_vm10, %v2459_v22, %v8979_v31  ;;  %v2526_v63 = vsel %vm2480_vm10, %v2461_v14, %v8970_v36  ;;  %v2333_v36 = vsel %vm98_vm6, %v2261_v26, %v13462_v43  ;;  %v13467_v56 = vld [vmem:[#allocation80_spill] sm:$0xff]  ;;  %v13474_v14 = vld [vmem:[#allocation29_spill] sm:$0xff] }
 0x28e   :  { %6346 = vmatprep.mubr.msk.bf16.mxu0 %vm2767_vm14, %v2717_v10  ;;  %v2589_v61 = vsel %vm2545_vm11, %v2524_v17, %v2041_v21  ;;  %v2591_v6 = vsel %vm2545_vm11, %v2526_v63, %v2043_v52  ;;  %v2398_v44 = vsel %vm2350_vm8, %v2333_v36, %v13463_v38  ;;  %v2400_v18 = vsel %vm2350_vm8, %v2335_v24, %v13467_v56  ;;  %v13470_v22 = vld [vmem:[#allocation32_spill] sm:$0xff]  ;;  %v13480_v20 = vld [vmem:[#allocation113_spill] sm:$0xff] }
 0x28f   :  { %v2654_v7 = vsel %vm2610_vm12, %v2589_v61, %v2105_v30  ;;  %v2463_v28 = vsel %vm2415_vm9, %v2398_v44, %v13465_v37  ;;  %v2465_v9 = vsel %vm2415_vm9, %v2400_v18, %v13468_v3  ;;  %v2267_v62 = vsel %vm21_vm0, %v13351_v41, %v13469_v54  ;;  %v13477_v38 = vld [vmem:[#allocation112_spill] sm:$0xff]  ;;  %v13482_v18 = vld [vmem:[#allocation31_spill] sm:$0xff] }
 0x290   :  { %v2107_v15 = vpop.permute.xlu0 %2106  ;;  %v2528_v50 = vsel %vm2480_vm10, %v2463_v28, %v8995_v42  ;;  %v2530_v23 = vsel %vm2480_vm10, %v2465_v9, %v8977_v35  ;;  %v2337_v35 = vsel %vm98_vm6, %v2267_v62, %v13470_v22  ;;  %v2270_v61 = vsel %vm21_vm0, %v13354_v46, %v13472_v53  ;;  %v13486_v22 = vld [vmem:[#allocation117_spill] sm:$0xff] }
 0x291   :  { %v2169_v16 = vpop.permute.xlu1 %2168  ;;  %v2656_v31 = vsel %vm2610_vm12, %v2591_v6, %v2107_v15  ;;  %v2402_v17 = vsel %vm2350_vm8, %v2337_v35, %v13471_v45  ;;  %v13473_v15 = vld [vmem:[#allocation163_spill] sm:$0xff]  ;;  %v2273_v44 = vsel %vm21_vm0, %v13364_v29, %v13477_v38  ;;  %v2276_v24 = vsel %vm21_vm0, %v13366_v57, %v13480_v20 }
 0x292   :  { %v2719_v59 = vsel %vm2675_vm13, %v2654_v7, %v2169_v16  ;;  %v2467_v0 = vsel %vm2415_vm9, %v2402_v17, %v13473_v15  ;;  %v2339_v7 = vsel %vm98_vm6, %v2270_v61, %v13474_v14  ;;  %v13475_v16 = vld [vmem:[#allocation82_spill] sm:$0xff]  ;;  %v2279_v35 = vsel %vm21_vm0, %v13375_v27, %v13486_v22  ;;  %v13490_v14 = vld [vmem:[#allocation4_spill] sm:$0xff] }
 0x293   :  { %6347 = vmatmul.mubr.msk.bf16.gmra.mrb[40].mxu0 %vm2767_vm14, %v2719_v59  ;;  %v2532_v41 = vsel %vm2480_vm10, %v2467_v0, %v9003_v40  ;;  %v2404_v63 = vsel %vm2350_vm8, %v2339_v7, %v13475_v16  ;;  %v13489_v15 = vld [vmem:[#allocation166_spill] sm:$0xff] }
 0x294   :  { %v2171_v11 = vpop.permute.xlu0 %2170 }
 0x295   :  { %v2045_v60 = vpop.permute.xlu1 %2044  ;;  %v2721_v5 = vsel %vm2675_vm13, %v2656_v31, %v2171_v11  ;;  %v13476_v31 = vld [vmem:[#allocation160_spill] sm:$0xff] }
 0x296   :  { %6350 = vmatprep.mubr.msk.bf16.mxu0 %vm2767_vm14, %v2721_v5  ;;  %v2593_v21 = vsel %vm2545_vm11, %v2528_v50, %v2045_v60  ;;  %v2469_v11 = vsel %vm2415_vm9, %v2404_v63, %v13476_v31  ;;  %v13481_v50 = vld [vmem:[#allocation165_spill] sm:$0xff] }
 0x297   :  { %v2534_v5 = vsel %vm2480_vm10, %v2469_v11, %v8993_v51  ;;  %v13492_v11 = vld [vmem:[#allocation33_spill] sm:$0xff] }
 0x298   :  { %v2047_v13 = vpop.permute.xlu0 %2046 }
 0x299   :  { %v2109_v8 = vpop.permute.xlu1 %2108  ;;  %v2595_v33 = vsel %vm2545_vm11, %v2530_v23, %v2047_v13 }
 0x29a   :  { %v2658_v32 = vsel %vm2610_vm12, %v2593_v21, %v2109_v8  ;;  %v13478_v8 = vld [vmem:[#allocation34_spill] sm:$0xff]  ;;  %v2343_v21 = vsel %vm98_vm6, %v2276_v24, %v13482_v18 }
 0x29b   :  { %v2341_v51 = vsel %vm98_vm6, %v2273_v44, %v13478_v8 }
 0x29c   :  { %v2111_v10 = vpop.permute.xlu0 %2110  ;;  %v2406_v37 = vsel %vm2350_vm8, %v2341_v51, %v13479_v2  ;;  %v13495_v51 = vld [vmem:[#allocation119_spill] sm:$0xff]  ;;  %v13496_v2 = vld [vmem:[#allocation36_spill] sm:$0xff] }
 0x29d   :  { %v2173_v19 = vpop.permute.xlu1 %2172  ;;  %v2660_v42 = vsel %vm2610_vm12, %v2595_v33, %v2111_v10  ;;  %v2471_v56 = vsel %vm2415_vm9, %v2406_v37, %v13481_v50  ;;  %v13483_v10 = vld [vmem:[#allocation85_spill] sm:$0xff]  ;;  %v13498_v50 = vld [vmem:[#allocation167_spill] sm:$0xff] }
 0x29e   :  { %v2723_v52 = vsel %vm2675_vm13, %v2658_v32, %v2173_v19  ;;  %v2536_v29 = vsel %vm2480_vm10, %v2471_v56, %v9010_v48  ;;  %v2408_v3 = vsel %vm2350_vm8, %v2343_v21, %v13483_v10  ;;  %v13484_v19 = vld [vmem:[#allocation162_spill] sm:$0xff]  ;;  %v13485_v33 = vld [vmem:[#allocation5_spill] sm:$0xff] }
 0x29f   :  { %6351 = vmatmul.mubr.msk.bf16.gmra.mrb[44].mxu0 %vm2767_vm14, %v2723_v52  ;;  %v2473_v23 = vsel %vm2415_vm9, %v2408_v3, %v13484_v19 }
 0x2a0   :  { %v2175_v39 = vpop.permute.xlu0 %2174 }
 0x2a1   :  { %v2049_v30 = vpop.permute.xlu1 %2048  ;;  %v2725_v25 = vsel %vm2675_vm13, %v2660_v42, %v2175_v39  ;;  %v2538_v42 = vsel %vm2480_vm10, %v2473_v23, %v13485_v33 }
 0x2a2   :  { %6354 = vmatprep.mubr.msk.bf16.mxu0 %vm2767_vm14, %v2725_v25  ;;  %v2597_v59 = vsel %vm2545_vm11, %v2532_v41, %v2049_v30 }
 0x2a4   :  { %v2051_v55 = vpop.permute.xlu0 %2050 }
 0x2a5   :  { %v2113_v4 = vpop.permute.xlu1 %2112  ;;  %v2599_v26 = vsel %vm2545_vm11, %v2534_v5, %v2051_v55  ;;  %v13487_v55 = vld [vmem:[#allocation35_spill] sm:$0xff] }
 0x2a6   :  { %v2662_v46 = vsel %vm2610_vm12, %v2597_v59, %v2113_v4  ;;  %v2345_v45 = vsel %vm98_vm6, %v2279_v35, %v13487_v55  ;;  %v13488_v4 = vld [vmem:[#allocation143_spill] sm:$0xff]  ;;  %v13491_v59 = vld [vmem:[#allocation118_spill] sm:$0xff] }
 0x2a7   :  { %v2410_v53 = vsel %vm2350_vm8, %v2345_v45, %v13488_v4 }
 0x2a8   :  { %v2115_v6 = vpop.permute.xlu0 %2114  ;;  %v2475_v0 = vsel %vm2415_vm9, %v2410_v53, %v13489_v15 }
 0x2a9   :  { %v2177_v60 = vpop.permute.xlu1 %2176  ;;  %v2664_v40 = vsel %vm2610_vm12, %v2599_v26, %v2115_v6  ;;  %v2540_v7 = vsel %vm2480_vm10, %v2475_v0, %v13490_v14  ;;  %v2282_v6 = vsel %vm21_vm0, %v13377_v47, %v13491_v59  ;;  %v13494_v26 = vld [vmem:[#allocation164_spill] sm:$0xff] }
 0x2aa   :  { %v2727_v12 = vsel %vm2675_vm13, %v2662_v46, %v2177_v60  ;;  %v2347_v46 = vsel %vm98_vm6, %v2282_v6, %v13492_v11  ;;  %v13493_v60 = vld [vmem:[#allocation39_spill] sm:$0xff] }
 0x2ab   :  { %6355 = vmatmul.mubr.msk.bf16.gmra.mrb[48].mxu0 %vm2767_vm14, %v2727_v12  ;;  %v2412_v5 = vsel %vm2350_vm8, %v2347_v46, %v13493_v60 }
 0x2ac   :  { %v2179_v43 = vpop.permute.xlu0 %2178 }
 0x2ad   :  { %v2053_v36 = vpop.permute.xlu1 %2052  ;;  %v2729_v13 = vsel %vm2675_vm13, %v2664_v40, %v2179_v43  ;;  %v2477_v40 = vsel %vm2415_vm9, %v2412_v5, %v13494_v26 }
 0x2ae   :  { %6358 = vmatprep.mubr.msk.bf16.mxu0 %vm2767_vm14, %v2729_v13  ;;  %v2601_v9 = vsel %vm2545_vm11, %v2536_v29, %v2053_v36 }
 0x2b0   :  { %v2055_v49 = vpop.permute.xlu0 %2054 }
 0x2b1   :  { %v2117_v28 = vpop.permute.xlu1 %2116  ;;  %v2603_v30 = vsel %vm2545_vm11, %v2538_v42, %v2055_v49  ;;  %v2285_v49 = vsel %vm21_vm0, %v13388_v34, %v13495_v51  ;;  %v9745_v34 = vld [vmem:[%s12303_s2] ss:$0 sm:$0xff]  ;;  %vm5297_vm0 = vcmask 326656  }
 0x2b2   :  { %v2666_v57 = vsel %vm2610_vm12, %v2601_v9, %v2117_v28  ;;  %v2349_v37 = vsel %vm98_vm6, %v2285_v49, %v13496_v2  ;;  %v13497_v28 = vld [vmem:[#allocation145_spill] sm:$0xff] }
 0x2b3   :  { %v2414_v20 = vsel %vm2350_vm8, %v2349_v37, %v13497_v28  ;;  %vm5492_vm8 = vcmask 523264  }
 0x2b4   :  { %v2119_v32 = vpop.permute.xlu0 %2118  ;;  %v2479_v56 = vsel %vm2415_vm9, %v2414_v20, %v13498_v50 }
 0x2b5   :  { %v2181_v52 = vpop.permute.xlu1 %2180  ;;  %v2668_v48 = vsel %vm2610_vm12, %v2603_v30, %v2119_v32  ;;  %v12648_v30 = vshll.u32 %v9539_v1, 16 }
 0x2b6   :  { %v2731_v39 = vsel %vm2675_vm13, %v2666_v57, %v2181_v52 }
 0x2b7   :  { %6359 = vmatmul.mubr.msk.bf16.gmra.mrb[52].mxu0 %vm2767_vm14, %v2731_v39  ;;  %v12649_v39 = vshrl.u32 %v9539_v1, 16  ;;  %v3459_v45 = vrot.slane %v12648_v30, 4 }
 0x2b8   :  { %v2183_v25 = vpop.permute.xlu0 %2182 }
 0x2b9   :  { %v2057_v54 = vpop.permute.xlu1 %2056  ;;  %v2733_v62 = vsel %vm2675_vm13, %v2668_v48, %v2183_v25  ;;  %v3456_v55 = vrot.slane %v12649_v39, 3 }
 0x2ba   :  { %6362 = vmatprep.mubr.msk.bf16.mxu0 %vm2767_vm14, %v2733_v62  ;;  %v2605_v41 = vsel %vm2545_vm11, %v2540_v7, %v2057_v54  ;;  %v12647_v54 = vshrl.u32 %v9541_v58, 16  ;;  %v12646_v62 = vshll.u32 %v9541_v58, 16 }
 0x2bb   :  { %v3460_v15 = vor.u32 %v3459_v45, %v3456_v55 }
 0x2bc   :  { %v1995_v17 = vpop.permute.xlu0 %1994  ;;  %v3464_v4 = vrot.slane %v12647_v54, 3  ;;  %v3467_v53 = vrot.slane %v12646_v62, 4 }
 0x2bd   :  { %v2121_v61 = vpop.permute.xlu1 %2120  ;;  %v2542_v36 = vsel %vm2480_vm10, %v2477_v40, %v1995_v17 }
 0x2be   :  { %v2670_v63 = vsel %vm2610_vm12, %v2605_v41, %v2121_v61  ;;  %v3468_v14 = vor.u32 %v3467_v53, %v3464_v4 }
 0x2c0   :  { %v2059_v16 = vpop.permute.xlu0 %2058  ;;  %v9766_v41 = vsel %vm631_vm5, %v3460_v15, %v3468_v14 }
 0x2c1   :  { %v2185_v27 = vpop.permute.xlu1 %2184  ;;  %v2607_v13 = vsel %vm2545_vm11, %v2542_v36, %v2059_v16  ;;  %13499 = vst [vmem:[#allocation87_spill] sm:$0xff] %v9766_v41 }
 0x2c2   :  { %v2735_v31 = vsel %vm2675_vm13, %v2670_v63, %v2185_v27 }
 0x2c3   :  { %6363 = vmatmul.mubr.msk.bf16.gmra.mrb[56].mxu0 %vm2767_vm14, %v2735_v31 }
 0x2c4   :  { %v2123_v12 = vpop.permute.xlu0 %2122 }
 0x2c5   :  { %v1997_v43 = vpop.permute.xlu1 %1996  ;;  %v2672_v47 = vsel %vm2610_vm12, %v2607_v13, %v2123_v12 }
 0x2c6   :  { %v2544_v18 = vsel %vm2480_vm10, %v2479_v56, %v1997_v43  ;;  %vm5600_vm10 = vcmask 588800  }
 0x2c8   :  { %v2187_v38 = vpop.permute.xlu0 %2186 }
 0x2c9   :  { %v2061_v44 = vpop.permute.xlu1 %2060  ;;  %v2737_v8 = vsel %vm2675_vm13, %v2672_v47, %v2187_v38 }
 0x2ca   :  { %6366 = vmatprep.mubr.msk.bf16.mxu0 %vm2767_vm14, %v2737_v8  ;;  %v2609_v21 = vsel %vm2545_vm11, %v2544_v18, %v2061_v44 }
 0x2cd   :  { %v2125_v24 = vpop.permute.xlu1 %2124 }
 0x2ce   :  { %v2674_v29 = vsel %vm2610_vm12, %v2609_v21, %v2125_v24 }
 0x2d1   :  { %v2189_v10 = vpop.permute.xlu1 %2188 }
 0x2d2   :  { %v2739_v3 = vsel %vm2675_vm13, %v2674_v29, %v2189_v10 }
 0x2d3   :  { %6367 = vmatmul.mubr.msk.bf16.gmra.mrb[60].mxu0 %vm2767_vm14, %v2739_v3 }
 0x2ee   :  { %v6308_v9 = vpop.f32.mrb[0].mxu0 }
 0x2ef   :  { %v2879_v32 = vadd.f32 %v6308_v9, %v9745_v34  ;;  %v2870_v19 = vpop.f32.mrb[1].mxu0 }
 0x2f0   :  { %v2871_v23 = vadd.f32 %v9745_v34, %v2870_v19  ;;  %v6309_v57 = vpop.f32.mrb[2].mxu0 }
 0x2f1   :  { %v2882_v52 = vadd.f32 %v6309_v57, %v9745_v34  ;;  %v2873_v33 = vpop.f32.mrb[3].mxu0  ;;  %v3127_v48 = vmax.f32 %v2879_v32, 0.0 }
 0x2f2   :  { %v2874_v42 = vadd.f32 %v9745_v34, %v2873_v33  ;;  %v3125_v22 = vmax.f32 %v2871_v23, 0.0 }
 0x2f3   :  { %v3128_v25 = vmax.f32 %v2882_v52, 0.0 }
 0x2f4   :  { %v3126_v35 = vmax.f32 %v2874_v42, 0.0 }
 0x2f5   :  { %v3190_v17 = vpack.c.bf16 %v3128_v25, %v3127_v48 }
 0x2f6   :  { %v3189_v61 = vpack.c.bf16 %v3126_v35, %v3125_v22 }
 0x2f7   :  { %v3254_v0 = vrot.slane %v3190_v17, 4 }
 0x2f8   :  { %v3253_v7 = vrot.slane %v3189_v61, 4 }
 0x2f9   :  { %3319 = vst.msk [vmem:[#allocation3 + $0x20] sm:$0xf0] %vm142_vm1, %v3254_v0 }
 0x2fa   :  { %3320 = vst.msk [vmem:[#allocation3 + $0x28] sm:$0xf] %vm109_vm15, %v3254_v0  ;;  %3318 = vst.msk [vmem:[#allocation3 + $0x18] sm:$0xf] %vm109_vm15, %v3253_v7  ;;  %v6312_v16 = vpop.f32.mrb[4].mxu0 }
 0x2fb   :  { %3317 = vst.msk [vmem:[#allocation3 + $0x10] sm:$0xf0] %vm142_vm1, %v3253_v7  ;;  %v2895_v63 = vadd.f32 %v6312_v16, %v9745_v34  ;;  %v2886_v27 = vpop.f32.mrb[5].mxu0 }
 0x2fc   :  { %v2887_v59 = vadd.f32 %v9745_v34, %v2886_v27  ;;  %v6313_v6 = vpop.f32.mrb[6].mxu0 }
 0x2fd   :  { %v2898_v31 = vadd.f32 %v6313_v6, %v9745_v34  ;;  %v2889_v11 = vpop.f32.mrb[7].mxu0  ;;  %v3131_v60 = vmax.f32 %v2895_v63, 0.0 }
 0x2fe   :  { %v2890_v46 = vadd.f32 %v9745_v34, %v2889_v11  ;;  %v3129_v12 = vmax.f32 %v2887_v59, 0.0 }
 0x2ff   :  { %v3132_v5 = vmax.f32 %v2898_v31, 0.0 }
 0x300   :  { %v3130_v26 = vmax.f32 %v2890_v46, 0.0  ;;  %v3385_v40 = vld [vmem:[#allocation3 + $0x20] sm:$0xff] }
 0x301   :  { %v3386_v43 = vld [vmem:[#allocation3 + $0x28] sm:$0xff]  ;;  %v3192_v36 = vpack.c.bf16 %v3132_v5, %v3131_v60  ;;  %v4067_v13 = vrot.slane %v3385_v40, 4  ;;  %v9776_v44 = vld [vmem:[#allocation3 + $0x18] sm:$0xff]  ;;  %v3488_v50 = vshrl.u32 %v3385_v40, 16  ;;  %v3491_v29 = vshll.u32 %v3385_v40, 16 }
 0x302   :  { %v4068_v47 = vrot.slane %v3386_v43, 4  ;;  %v9774_v38 = vld [vmem:[#allocation3 + $0x10] sm:$0xff]  ;;  %v3496_v8 = vshrl.u32 %v3386_v43, 16  ;;  %v3191_v51 = vpack.c.bf16 %v3130_v26, %v3129_v12  ;;  %v4065_v2 = vrot.slane %v9776_v44, 4 }
 0x303   :  { %v4064_v49 = vrot.slane %v9774_v38, 4  ;;  %v3499_v37 = vshll.u32 %v3386_v43, 16  ;;  %v3256_v28 = vrot.slane %v3192_v36, 4  ;;  %v3490_v10 = vrot.slane %v3488_v50, 3 }
 0x304   :  { %v9781_v20 = vsel %vm1240_vm3, %v4067_v13, %v4068_v47  ;;  %v3498_v24 = vrot.slane %v3496_v8, 3  ;;  %v3255_v56 = vrot.slane %v3191_v51, 4  ;;  %v3479_v3 = vshrl.u32 %v9776_v44, 16 }
 0x305   :  { %13500 = vst [vmem:[#allocation37_spill] sm:$0xff] %v9781_v20  ;;  %4501 = vrot.lane.b32.xlu0 %v9781_v20, %s6535_s17  ;;  %v9786_v18 = vsel %vm1240_vm3, %v4064_v49, %v4065_v2  ;;  %v3501_v21 = vrot.slane %v3499_v37, 4  ;;  %3323 = vst.msk [vmem:[#allocation3 + $0x40] sm:$0xf0] %vm142_vm1, %v3256_v28  ;;  %v3482_v9 = vshll.u32 %v9776_v44, 16  ;;  %v3471_v32 = vshrl.u32 %v9774_v38, 16 }
 0x306   :  { %3324 = vst.msk [vmem:[#allocation3 + $0x48] sm:$0xf] %vm109_vm15, %v3256_v28  ;;  %4499 = vrot.lane.b32.xlu1 %v9786_v18, %s6535_s17  ;;  %3322 = vst.msk [vmem:[#allocation3 + $0x38] sm:$0xf] %vm109_vm15, %v3255_v56  ;;  %v6316_v19 = vpop.f32.mrb[8].mxu0  ;;  %v3493_v57 = vrot.slane %v3491_v29, 4 }
 0x307   :  { %3321 = vst.msk [vmem:[#allocation3 + $0x30] sm:$0xf0] %vm142_vm1, %v3255_v56  ;;  %v3502_v23 = vor.u32 %v3501_v21, %v3498_v24  ;;  %v3474_v52 = vshll.u32 %v9774_v38, 16  ;;  %v9798_v33 = vrot.slane %v3488_v50, 4  ;;  %v2911_v42 = vadd.f32 %v6316_v19, %v9745_v34  ;;  %v2902_v48 = vpop.f32.mrb[9].mxu0 }
 0x308   :  { %v3481_v25 = vrot.slane %v3479_v3, 3  ;;  %v3484_v22 = vrot.slane %v3482_v9, 4  ;;  %v3473_v35 = vrot.slane %v3471_v32, 3  ;;  %v2903_v55 = vadd.f32 %v9745_v34, %v2902_v48  ;;  %v6317_v45 = vpop.f32.mrb[10].mxu0 }
 0x309   :  { %v3494_v17 = vor.u32 %v3493_v57, %v3490_v10  ;;  %v3476_v4 = vrot.slane %v3474_v52, 4  ;;  %v4172_v53 = vrot.slane %v3491_v29, 5  ;;  %v2914_v61 = vadd.f32 %v6317_v45, %v9745_v34  ;;  %v2905_v15 = vpop.f32.mrb[11].mxu0 }
 0x30a   :  { %v3485_v0 = vor.u32 %v3484_v22, %v3481_v25  ;;  %v2906_v14 = vadd.f32 %v9745_v34, %v2905_v15  ;;  %v3135_v63 = vmax.f32 %v2911_v42, 0.0  ;;  %v3133_v27 = vmax.f32 %v2903_v55, 0.0 }
 0x30b   :  { %v9813_v7 = vsel %vm631_vm5, %v3494_v17, %v3502_v23  ;;  %v3477_v16 = vor.u32 %v3476_v4, %v3473_v35  ;;  %v3136_v59 = vmax.f32 %v2914_v61, 0.0  ;;  %v4174_v6 = vrot.slane %v3496_v8, 4 }
 0x30c   :  { %13501 = vst [vmem:[#allocation142_spill] sm:$0xff] %v9813_v7  ;;  %v3134_v31 = vmax.f32 %v2906_v14, 0.0  ;;  %v3389_v11 = vld [vmem:[#allocation3 + $0x40] sm:$0xff]  ;;  %v4173_v5 = vor.u32 %v4172_v53, %v9798_v33  ;;  %v4175_v12 = vrot.slane %v3499_v37, 5 }
 0x30d   :  { %v9815_v46 = vld [vmem:[#allocation3 + $0x48] sm:$0xff]  ;;  %v9818_v60 = vsel %vm631_vm5, %v3477_v16, %v3485_v0  ;;  %v3194_v26 = vpack.c.bf16 %v3136_v59, %v3135_v63  ;;  %v4073_v40 = vrot.slane %v3389_v11, 4  ;;  %v9824_v13 = vld [vmem:[#allocation3 + $0x38] sm:$0xff]  ;;  %v3522_v50 = vshrl.u32 %v3389_v11, 16 }
 0x30e   :  { %v4074_v43 = vrot.slane %v9815_v46, 4  ;;  %v9822_v36 = vld [vmem:[#allocation3 + $0x30] sm:$0xff]  ;;  %v3530_v47 = vshrl.u32 %v9815_v46, 16  ;;  %v3193_v8 = vpack.c.bf16 %v3134_v31, %v3133_v27  ;;  %v4071_v49 = vrot.slane %v9824_v13, 4 }
 0x30f   :  { %v4070_v51 = vrot.slane %v9822_v36, 4  ;;  %v3533_v2 = vshll.u32 %v9815_v46, 16  ;;  %v3258_v28 = vrot.slane %v3194_v26, 4  ;;  %v3525_v10 = vshll.u32 %v3389_v11, 16 }
 0x310   :  { %v9831_v37 = vsel %vm1240_vm3, %v4073_v40, %v4074_v43  ;;  %v3532_v24 = vrot.slane %v3530_v47, 3  ;;  %v3257_v56 = vrot.slane %v3193_v8, 4  ;;  %v3524_v19 = vrot.slane %v3522_v50, 3 }
 0x311   :  { %13502 = vst [vmem:[#allocation47_spill] sm:$0xff] %v9831_v37  ;;  %4505 = vrot.lane.b32.xlu0 %v9831_v37, %s6535_s17  ;;  %v9836_v21 = vsel %vm1240_vm3, %v4070_v51, %v4071_v49  ;;  %v3535_v29 = vrot.slane %v3533_v2, 4  ;;  %3327 = vst.msk [vmem:[#allocation3 + $0x60] sm:$0xf0] %vm142_vm1, %v3258_v28  ;;  %v12661_v23 = vshrl.u32 %v9822_v36, 16  ;;  %v12660_v57 = vshll.u32 %v9822_v36, 16 }
 0x312   :  { %13503 = vst [vmem:[#allocation41_spill] sm:$0xff] %v9836_v21  ;;  %3328 = vst.msk [vmem:[#allocation3 + $0x68] sm:$0xf] %vm109_vm15, %v3258_v28  ;;  %4503 = vrot.lane.b32.xlu1 %v9836_v21, %s6535_s17  ;;  %v12657_v33 = vshrl.u32 %v9824_v13, 16  ;;  %v6320_v42 = vpop.f32.mrb[12].mxu0  ;;  %v3527_v25 = vrot.slane %v3525_v10, 4  ;;  %v4176_v35 = vor.u32 %v4175_v12, %v4174_v6 }
 0x313   :  { %3325 = vst.msk [vmem:[#allocation3 + $0x50] sm:$0xf0] %vm142_vm1, %v3257_v56  ;;  %v3536_v48 = vor.u32 %v3535_v29, %v3532_v24  ;;  %v12654_v22 = vshll.u32 %v9824_v13, 16  ;;  %v2927_v55 = vadd.f32 %v6320_v42, %v9745_v34  ;;  %v2918_v45 = vpop.f32.mrb[13].mxu0  ;;  %v3507_v17 = vrot.slane %v12661_v23, 3 }
 0x314   :  { %3326 = vst.msk [vmem:[#allocation3 + $0x58] sm:$0xf] %vm109_vm15, %v3257_v56  ;;  %v3510_v4 = vrot.slane %v12660_v57, 4  ;;  %v3515_v53 = vrot.slane %v12657_v33, 3  ;;  %v2919_v61 = vadd.f32 %v9745_v34, %v2918_v45  ;;  %v6321_v15 = vpop.f32.mrb[14].mxu0  ;;  %v3528_v0 = vor.u32 %v3527_v25, %v3524_v19 }
 0x315   :  { %v3518_v14 = vrot.slane %v12654_v22, 4  ;;  %v9859_v16 = vsel %vm1337_vm4, %v4173_v5, %v4176_v35  ;;  %v2930_v63 = vadd.f32 %v6321_v15, %v9745_v34  ;;  %v2921_v27 = vpop.f32.mrb[15].mxu0  ;;  %v9864_v6 = vrot.slane %v3471_v32, 4 }
 0x316   :  { %v3511_v59 = vor.u32 %v3510_v4, %v3507_v17  ;;  %v3139_v31 = vmax.f32 %v2927_v55, 0.0  ;;  %v2922_v11 = vadd.f32 %v9745_v34, %v2921_v27  ;;  %v9868_v46 = vsel %vm631_vm5, %v3528_v0, %v3536_v48 }
 0x317   :  { %13504 = vst [vmem:[#allocation43_spill] sm:$0xff] %v9868_v46  ;;  %v3519_v12 = vor.u32 %v3518_v14, %v3515_v53  ;;  %v3137_v26 = vmax.f32 %v2919_v61, 0.0  ;;  %v3140_v40 = vmax.f32 %v2930_v63, 0.0  ;;  %v9870_v43 = vrot.slane %v3522_v50, 4 }
 0x318   :  { %v9872_v5 = vrot.slane %v3525_v10, 5  ;;  %v3138_v8 = vmax.f32 %v2922_v11, 0.0  ;;  %v3393_v51 = vld [vmem:[#allocation3 + $0x60] sm:$0xff]  ;;  %v4188_v28 = vrot.slane %v3530_v47, 4  ;;  %v4189_v24 = vrot.slane %v3533_v2, 5 }
 0x319   :  { %v9874_v49 = vld [vmem:[#allocation3 + $0x68] sm:$0xff]  ;;  %v9877_v32 = vsel %vm631_vm5, %v3511_v59, %v3519_v12  ;;  %v3196_v56 = vpack.c.bf16 %v3140_v40, %v3139_v31  ;;  %v4079_v29 = vrot.slane %v3393_v51, 4  ;;  %v3556_v17 = vshrl.u32 %v3393_v51, 16 }
 0x31a   :  { %13505 = vst [vmem:[#allocation90_spill] sm:$0xff] %v9877_v32  ;;  %v4080_v19 = vrot.slane %v9874_v49, 4  ;;  %v9880_v42 = vld [vmem:[#allocation3 + $0x50] sm:$0xff]  ;;  %v3564_v50 = vshrl.u32 %v9874_v49, 16  ;;  %v3195_v10 = vpack.c.bf16 %v3138_v8, %v3137_v26  ;;  %v3567_v55 = vshll.u32 %v9874_v49, 16 }
 0x31b   :  { %v9882_v48 = vld [vmem:[#allocation3 + $0x58] sm:$0xff]  ;;  %v4076_v25 = vrot.slane %v9880_v42, 4  ;;  %v3260_v45 = vrot.slane %v3196_v56, 4  ;;  %v3559_v15 = vshll.u32 %v3393_v51, 16  ;;  %v3558_v0 = vrot.slane %v3556_v17, 3 }
 0x31c   :  { %v4077_v35 = vrot.slane %v9882_v48, 4  ;;  %v9889_v47 = vsel %vm1240_vm3, %v4079_v29, %v4080_v19  ;;  %v3566_v2 = vrot.slane %v3564_v50, 3  ;;  %v3259_v4 = vrot.slane %v3195_v10, 4 }
 0x31d   :  { %13506 = vst [vmem:[#allocation17_spill] sm:$0xff] %v9889_v47  ;;  %4509 = vrot.lane.b32.xlu0 %v9889_v47, %s6535_s17  ;;  %v3569_v61 = vrot.slane %v3567_v55, 4  ;;  %3331 = vst.msk [vmem:[#allocation3 + $0x80] sm:$0xf0] %vm142_vm1, %v3260_v45  ;;  %v12653_v14 = vshrl.u32 %v9880_v42, 16  ;;  %v12652_v63 = vshll.u32 %v9880_v42, 16  ;;  %v4187_v26 = vor.u32 %v9872_v5, %v9870_v43 }
 0x31e   :  { %v9894_v53 = vsel %vm1240_vm3, %v4076_v25, %v4077_v35  ;;  %3332 = vst.msk [vmem:[#allocation3 + $0x88] sm:$0xf] %vm109_vm15, %v3260_v45  ;;  %v12651_v27 = vshrl.u32 %v9882_v48, 16  ;;  %3330 = vst.msk [vmem:[#allocation3 + $0x78] sm:$0xf] %vm109_vm15, %v3259_v4  ;;  %v6324_v59 = vpop.f32.mrb[16].mxu0  ;;  %v4190_v43 = vor.u32 %v4189_v24, %v4188_v28 }
 0x31f   :  { %13507 = vst [vmem:[#allocation40_spill] sm:$0xff] %v9894_v53  ;;  %4507 = vrot.lane.b32.xlu1 %v9894_v53, %s6535_s17  ;;  %3329 = vst.msk [vmem:[#allocation3 + $0x70] sm:$0xf0] %vm142_vm1, %v3259_v4  ;;  %v3570_v31 = vor.u32 %v3569_v61, %v3566_v2  ;;  %v3561_v11 = vrot.slane %v3559_v15, 4  ;;  %v12650_v12 = vshll.u32 %v9882_v48, 16  ;;  %v2943_v40 = vadd.f32 %v6324_v59, %v9745_v34  ;;  %v2934_v8 = vpop.f32.mrb[17].mxu0 }
 0x320   :  { %v3541_v51 = vrot.slane %v12653_v14, 3  ;;  %v3544_v49 = vrot.slane %v12652_v63, 4  ;;  %v3549_v56 = vrot.slane %v12651_v27, 3  ;;  %v2935_v29 = vadd.f32 %v9745_v34, %v2934_v8  ;;  %v6325_v19 = vpop.f32.mrb[18].mxu0 }
 0x321   :  { %v3562_v10 = vor.u32 %v3561_v11, %v3558_v0  ;;  %v3552_v25 = vrot.slane %v12650_v12, 4  ;;  %v3143_v5 = vmax.f32 %v2943_v40, 0.0  ;;  %v2946_v35 = vadd.f32 %v6325_v19, %v9745_v34  ;;  %v2937_v45 = vpop.f32.mrb[19].mxu0 }
 0x322   :  { %v3545_v2 = vor.u32 %v3544_v49, %v3541_v51  ;;  %v9921_v4 = vrot.slane %v3474_v52, 5  ;;  %v2938_v61 = vadd.f32 %v9745_v34, %v2937_v45  ;;  %v9927_v0 = vrot.slane %v3556_v17, 4 }
 0x323   :  { %v9925_v59 = vsel %vm631_vm5, %v3562_v10, %v3570_v31  ;;  %v3553_v8 = vor.u32 %v3552_v25, %v3549_v56  ;;  %v3141_v11 = vmax.f32 %v2935_v29, 0.0  ;;  %v3144_v62 = vmax.f32 %v2946_v35, 0.0 }
 0x324   :  { %13508 = vst [vmem:[#allocation120_spill] sm:$0xff] %v9925_v59  ;;  %v9930_v28 = vsel %vm1337_vm4, %v4187_v26, %v4190_v43  ;;  %v9932_v24 = vrot.slane %v3559_v15, 5  ;;  %v3142_v40 = vmax.f32 %v2938_v61, 0.0  ;;  %v9934_v51 = vld [vmem:[#allocation3 + $0x80] sm:$0xff]  ;;  %v9941_v31 = vrot.slane %v3564_v50, 4 }
 0x325   :  { %v9936_v38 = vld [vmem:[#allocation3 + $0x88] sm:$0xff]  ;;  %v9939_v52 = vsel %vm631_vm5, %v3545_v2, %v3553_v8  ;;  %v9943_v49 = vrot.slane %v3567_v55, 5  ;;  %v3198_v17 = vpack.c.bf16 %v3144_v62, %v3143_v5  ;;  %v4085_v56 = vrot.slane %v9934_v51, 4  ;;  %v9949_v15 = vld [vmem:[#allocation3 + $0x78] sm:$0xff] }
 0x326   :  { %13509 = vst [vmem:[#allocation133_spill] sm:$0xff] %v9939_v52  ;;  %v4086_v26 = vrot.slane %v9936_v38, 4  ;;  %v9947_v29 = vld [vmem:[#allocation3 + $0x70] sm:$0xff]  ;;  %v12667_v19 = vshrl.u32 %v9936_v38, 16  ;;  %v3197_v10 = vpack.c.bf16 %v3142_v40, %v3141_v11  ;;  %v4083_v43 = vrot.slane %v9949_v15, 4 }
 0x327   :  { %v4082_v25 = vrot.slane %v9947_v29, 4  ;;  %v12665_v50 = vshll.u32 %v9936_v38, 16  ;;  %v3262_v55 = vrot.slane %v3198_v17, 4  ;;  %v3590_v35 = vshrl.u32 %v9934_v51, 16 }
 0x328   :  { %v9956_v62 = vsel %vm1240_vm3, %v4085_v56, %v4086_v26  ;;  %v3600_v5 = vrot.slane %v12667_v19, 3  ;;  %v3261_v45 = vrot.slane %v3197_v10, 4  ;;  %v12668_v8 = vshll.u32 %v9934_v51, 16  ;;  %v9980_v10 = vld [vmem:[#allocation3 + $0x120] sm:$0xff] }
 0x329   :  { %13510 = vst [vmem:[#allocation89_spill] sm:$0xff] %v9956_v62  ;;  %4513 = vrot.lane.b32.xlu0 %v9956_v62, %s6535_s17  ;;  %v9964_v2 = vsel %vm1240_vm3, %v4082_v25, %v4083_v43  ;;  %v3603_v61 = vrot.slane %v12665_v50, 4  ;;  %3335 = vst.msk [vmem:[#allocation3 + $0xa0] sm:$0xf0] %vm142_vm1, %v3262_v55  ;;  %v3592_v11 = vrot.slane %v3590_v35, 3  ;;  %v12655_v40 = vshrl.u32 %v9947_v29, 16 }
 0x32a   :  { %13511 = vst [vmem:[#allocation147_spill] sm:$0xff] %v9964_v2  ;;  %3336 = vst.msk [vmem:[#allocation3 + $0xa8] sm:$0xf] %vm109_vm15, %v3262_v55  ;;  %4511 = vrot.lane.b32.xlu1 %v9964_v2, %s6535_s17  ;;  %v12656_v17 = vshll.u32 %v9947_v29, 16  ;;  %v12658_v56 = vshrl.u32 %v9949_v15, 16  ;;  %v6328_v26 = vpop.f32.mrb[20].mxu0  ;;  %v4201_v30 = vor.u32 %v9932_v24, %v9927_v0  ;;  %v4204_v0 = vor.u32 %v9943_v49, %v9941_v31 }
 0x32b   :  { %3333 = vst.msk [vmem:[#allocation3 + $0x90] sm:$0xf0] %vm142_vm1, %v3261_v45  ;;  %v9982_v25 = vld [vmem:[#allocation3 + $0x128] sm:$0xff]  ;;  %v3604_v43 = vor.u32 %v3603_v61, %v3600_v5  ;;  %v3595_v55 = vrot.slane %v12668_v8, 4  ;;  %v12659_v54 = vshll.u32 %v9949_v15, 16  ;;  %v2959_v39 = vadd.f32 %v6328_v26, %v9745_v34  ;;  %v2950_v12 = vpop.f32.mrb[21].mxu0 }
 0x32c   :  { %3334 = vst.msk [vmem:[#allocation3 + $0x98] sm:$0xf] %vm109_vm15, %v3261_v45  ;;  %v3575_v45 = vrot.slane %v12655_v40, 3  ;;  %v3578_v27 = vrot.slane %v12656_v17, 4  ;;  %v3583_v5 = vrot.slane %v12658_v56, 3  ;;  %v2951_v61 = vadd.f32 %v9745_v34, %v2950_v12  ;;  %v6329_v63 = vpop.f32.mrb[22].mxu0 }
 0x32d   :  { %v3596_v14 = vor.u32 %v3595_v55, %v3592_v11  ;;  %v3586_v22 = vrot.slane %v12659_v54, 4  ;;  %v2962_v24 = vadd.f32 %v6329_v63, %v9745_v34  ;;  %v2953_v26 = vpop.f32.mrb[23].mxu0  ;;  %v4110_v17 = vrot.slane %v9982_v25, 4 }
 0x32e   :  { %v3579_v33 = vor.u32 %v3578_v27, %v3575_v45  ;;  %v2954_v56 = vadd.f32 %v9745_v34, %v2953_v26  ;;  %v10010_v55 = vrot.slane %v3479_v3, 4  ;;  %v3147_v54 = vmax.f32 %v2959_v39, 0.0 }
 0x32f   :  { %v10006_v12 = vsel %vm631_vm5, %v3596_v14, %v3604_v43  ;;  %v3587_v11 = vor.u32 %v3586_v22, %v3583_v5  ;;  %v3148_v31 = vmax.f32 %v2962_v24, 0.0  ;;  %v10016_v49 = vrot.slane %v3482_v9, 5 }
 0x330   :  { %13512 = vst [vmem:[#allocation42_spill] sm:$0xff] %v10006_v12  ;;  %v3145_v27 = vmax.f32 %v2951_v61, 0.0  ;;  %v3146_v45 = vmax.f32 %v2954_v56, 0.0  ;;  %v10018_v26 = vld [vmem:[#allocation3 + $0xa0] sm:$0xff]  ;;  %v10026_v3 = vsel %vm1337_vm4, %v4201_v30, %v4204_v0 }
 0x331   :  { %v10020_v14 = vld [vmem:[#allocation3 + $0xa8] sm:$0xff]  ;;  %v10023_v22 = vsel %vm631_vm5, %v3579_v33, %v3587_v11  ;;  %v3200_v39 = vpack.c.bf16 %v3148_v31, %v3147_v54  ;;  %v4091_v43 = vrot.slane %v10018_v26, 4  ;;  %v12664_v31 = vshrl.u32 %v10018_v26, 16 }
 0x332   :  { %13513 = vst [vmem:[#allocation46_spill] sm:$0xff] %v10023_v22  ;;  %v4092_v5 = vrot.slane %v10020_v14, 4  ;;  %v10030_v44 = vld [vmem:[#allocation3 + $0x90] sm:$0xff]  ;;  %v12663_v56 = vshrl.u32 %v10020_v14, 16  ;;  %v3199_v61 = vpack.c.bf16 %v3146_v45, %v3145_v27  ;;  %v12662_v11 = vshll.u32 %v10020_v14, 16 }
 0x333   :  { %v10032_v9 = vld [vmem:[#allocation3 + $0x98] sm:$0xff]  ;;  %v4088_v24 = vrot.slane %v10030_v44, 4  ;;  %v3264_v30 = vrot.slane %v3200_v39, 4  ;;  %v12666_v39 = vshll.u32 %v10018_v26, 16 }
 0x334   :  { %v4089_v33 = vrot.slane %v10032_v9, 4  ;;  %v10039_v54 = vsel %vm1240_vm3, %v4091_v43, %v4092_v5  ;;  %v3634_v0 = vrot.slane %v12663_v56, 3  ;;  %v3263_v57 = vrot.slane %v3199_v61, 4 }
 0x335   :  { %13514 = vst [vmem:[#allocation48_spill] sm:$0xff] %v10039_v54  ;;  %4517 = vrot.lane.b32.xlu0 %v10039_v54, %s6535_s17  ;;  %v3637_v45 = vrot.slane %v12662_v11, 4  ;;  %3339 = vst.msk [vmem:[#allocation3 + $0xc0] sm:$0xf0] %vm142_vm1, %v3264_v30  ;;  %v3626_v43 = vrot.slane %v12664_v31, 3  ;;  %v12669_v5 = vshrl.u32 %v10030_v44, 16 }
 0x336   :  { %v10047_v27 = vsel %vm1240_vm3, %v4088_v24, %v4089_v33  ;;  %3340 = vst.msk [vmem:[#allocation3 + $0xc8] sm:$0xf] %vm109_vm15, %v3264_v30  ;;  %v12670_v61 = vshll.u32 %v10030_v44, 16  ;;  %v12671_v24 = vshrl.u32 %v10032_v9, 16  ;;  %3338 = vst.msk [vmem:[#allocation3 + $0xb8] sm:$0xf] %vm109_vm15, %v3263_v57 }
 0x337   :  { %13515 = vst [vmem:[#allocation38_spill] sm:$0xff] %v10047_v27  ;;  %4515 = vrot.lane.b32.xlu1 %v10047_v27, %s6535_s17  ;;  %3337 = vst.msk [vmem:[#allocation3 + $0xb0] sm:$0xf0] %vm142_vm1, %v3263_v57  ;;  %v6332_v33 = vpop.f32.mrb[24].mxu0  ;;  %v3638_v23 = vor.u32 %v3637_v45, %v3634_v0  ;;  %v3629_v30 = vrot.slane %v12666_v39, 4  ;;  %v12674_v11 = vshll.u32 %v10032_v9, 16 }
 0x338   :  { %v10068_v56 = vrot.slane %v3590_v35, 4  ;;  %v2975_v31 = vadd.f32 %v6332_v33, %v9745_v34  ;;  %v2966_v63 = vpop.f32.mrb[25].mxu0  ;;  %v3609_v50 = vrot.slane %v12669_v5, 3  ;;  %v3612_v57 = vrot.slane %v12670_v61, 4 }
 0x339   :  { %v3617_v0 = vrot.slane %v12671_v24, 3  ;;  %v2967_v45 = vadd.f32 %v9745_v34, %v2966_v63  ;;  %v6333_v39 = vpop.f32.mrb[26].mxu0  ;;  %v3630_v19 = vor.u32 %v3629_v30, %v3626_v43  ;;  %v3620_v35 = vrot.slane %v12674_v11, 4 }
 0x33a   :  { %v4169_v33 = vor.u32 %v10016_v49, %v10010_v55  ;;  %v2978_v8 = vadd.f32 %v6333_v39, %v9745_v34  ;;  %v2969_v40 = vpop.f32.mrb[27].mxu0  ;;  %v13516_v5 = vrot.slane %v9980_v10, 4  ;;  %v3613_v41 = vor.u32 %v3612_v57, %v3609_v50 }
 0x33b   :  { %v13517_v24 = vshll.u32 %v9934_v51, 16  ;;  %v3151_v54 = vmax.f32 %v2975_v31, 0.0  ;;  %v2970_v43 = vadd.f32 %v9745_v34, %v2969_v40  ;;  %v10092_v30 = vsel %vm631_vm5, %v3630_v19, %v3638_v23 }
 0x33c   :  { %v10086_v61 = vsel %vm1240_vm3, %v13516_v5, %v4110_v17  ;;  %13518 = vst [vmem:[#allocation144_spill] sm:$0xff] %v10092_v30  ;;  %v3621_v11 = vor.u32 %v3620_v35, %v3617_v0  ;;  %v3149_v55 = vmax.f32 %v2967_v45, 0.0  ;;  %v3152_v49 = vmax.f32 %v2978_v8, 0.0  ;;  %v10097_v5 = vld [vmem:[#allocation3 + $0xc0] sm:$0xff] }
 0x33d   :  { %v4214_v63 = vrot.slane %v13517_v24, 5  ;;  %v13519_v27 = vshrl.u32 %v9936_v38, 16  ;;  %v3150_v17 = vmax.f32 %v2970_v43, 0.0  ;;  %v10099_v50 = vld [vmem:[#allocation3 + $0xc8] sm:$0xff]  ;;  %v13521_v40 = vshll.u32 %v9936_v38, 16  ;;  %v10116_v57 = vld [vmem:[#allocation3 + $0xb8] sm:$0xff] }
 0x33e   :  { %v10102_v51 = vsel %vm631_vm5, %v3613_v41, %v3621_v11  ;;  %v13522_v19 = vor.u32 %v9921_v4, %v9864_v6  ;;  %v4097_v31 = vrot.slane %v10097_v5, 4  ;;  %v10114_v24 = vld [vmem:[#allocation3 + $0xb0] sm:$0xff]  ;;  %v12680_v41 = vshrl.u32 %v10099_v50, 16 }
 0x33f   :  { %v4215_v39 = vor.u32 %v4214_v63, %v10068_v56  ;;  %v4216_v62 = vrot.slane %v13519_v27, 4  ;;  %13520 = vst [vmem:[#allocation69_spill] sm:$0xff] %v10102_v51  ;;  %v4217_v23 = vrot.slane %v13521_v40, 5  ;;  %v3202_v56 = vpack.c.bf16 %v3152_v49, %v3151_v54 }
 0x340   :  { %v10110_v8 = vsel %vm1337_vm4, %v13522_v19, %v4169_v33  ;;  %v4098_v27 = vrot.slane %v10099_v50, 4  ;;  %v3201_v11 = vpack.c.bf16 %v3150_v17, %v3149_v55  ;;  %v4094_v38 = vrot.slane %v10114_v24, 4 }
 0x341   :  { %v4095_v0 = vrot.slane %v10116_v57, 4  ;;  %v12679_v6 = vshll.u32 %v10099_v50, 16  ;;  %v3266_v4 = vrot.slane %v3202_v56, 4  ;;  %v3668_v45 = vrot.slane %v12680_v41, 3 }
 0x342   :  { %v10123_v54 = vsel %vm1240_vm3, %v4097_v31, %v4098_v27  ;;  %v12681_v35 = vshrl.u32 %v10097_v5, 16  ;;  %v3265_v33 = vrot.slane %v3201_v11, 4  ;;  %v12682_v55 = vshll.u32 %v10097_v5, 16  ;;  %v6336_v56 = vpop.f32.mrb[28].mxu0 }
 0x343   :  { %13523 = vst [vmem:[#allocation45_spill] sm:$0xff] %v10123_v54  ;;  %4521 = vrot.lane.b32.xlu0 %v10123_v54, %s6535_s17  ;;  %v10131_v63 = vsel %vm1240_vm3, %v4094_v38, %v4095_v0  ;;  %v3671_v43 = vrot.slane %v12679_v6, 4  ;;  %3343 = vst.msk [vmem:[#allocation3 + $0xe0] sm:$0xf0] %vm142_vm1, %v3266_v4  ;;  %v12683_v17 = vshrl.u32 %v10114_v24, 16  ;;  %v12686_v40 = vshll.u32 %v10114_v24, 16 }
 0x344   :  { %13524 = vst [vmem:[#allocation49_spill] sm:$0xff] %v10131_v63  ;;  %3344 = vst.msk [vmem:[#allocation3 + $0xe8] sm:$0xf] %vm109_vm15, %v3266_v4  ;;  %4519 = vrot.lane.b32.xlu1 %v10131_v63, %s6535_s17  ;;  %v3660_v49 = vrot.slane %v12681_v35, 3  ;;  %v12689_v19 = vshrl.u32 %v10116_v57, 16  ;;  %v3663_v27 = vrot.slane %v12682_v55, 4  ;;  %v4218_v38 = vor.u32 %v4217_v23, %v4216_v62 }
 0x345   :  { %3341 = vst.msk [vmem:[#allocation3 + $0xd0] sm:$0xf0] %vm142_vm1, %v3265_v33  ;;  %v3672_v31 = vor.u32 %v3671_v43, %v3668_v45  ;;  %v12690_v11 = vshll.u32 %v10116_v57, 16  ;;  %v2991_v0 = vadd.f32 %v6336_v56, %v9745_v34  ;;  %v2982_v4 = vpop.f32.mrb[29].mxu0  ;;  %v3643_v6 = vrot.slane %v12683_v17, 3 }
 0x346   :  { %3342 = vst.msk [vmem:[#allocation3 + $0xd8] sm:$0xf] %vm109_vm15, %v3265_v33  ;;  %v3646_v41 = vrot.slane %v12686_v40, 4  ;;  %v3651_v33 = vrot.slane %v12689_v19, 3  ;;  %v2983_v45 = vadd.f32 %v9745_v34, %v2982_v4  ;;  %v6337_v43 = vpop.f32.mrb[30].mxu0  ;;  %v3664_v35 = vor.u32 %v3663_v27, %v3660_v49 }
 0x347   :  { %v3654_v55 = vrot.slane %v12690_v11, 4  ;;  %v10161_v62 = vsel %vm1337_vm4, %v4215_v39, %v4218_v38  ;;  %v3155_v23 = vmax.f32 %v2991_v0, 0.0  ;;  %v2994_v56 = vadd.f32 %v6337_v43, %v9745_v34  ;;  %v2985_v17 = vpop.f32.mrb[31].mxu0 }
 0x348   :  { %v3647_v54 = vor.u32 %v3646_v41, %v3643_v6  ;;  %v13525_v40 = vshrl.u32 %v10018_v26, 16  ;;  %v3153_v19 = vmax.f32 %v2983_v45, 0.0  ;;  %v2986_v4 = vadd.f32 %v9745_v34, %v2985_v17 }
 0x349   :  { %v10170_v49 = vsel %vm631_vm5, %v3664_v35, %v3672_v31  ;;  %v3655_v27 = vor.u32 %v3654_v55, %v3651_v33  ;;  %v3156_v11 = vmax.f32 %v2994_v56, 0.0  ;;  %v13527_v39 = vshll.u32 %v10018_v26, 16 }
 0x34a   :  { %v10166_v63 = vrot.slane %v13525_v40, 4  ;;  %13526 = vst [vmem:[#allocation91_spill] sm:$0xff] %v10170_v49  ;;  %v13528_v0 = vshrl.u32 %v10020_v14, 16  ;;  %v13529_v41 = vshll.u32 %v10020_v14, 16  ;;  %v3154_v40 = vmax.f32 %v2986_v4, 0.0  ;;  %v10184_v45 = vld [vmem:[#allocation3 + $0xe0] sm:$0xff] }
 0x34b   :  { %v10174_v38 = vrot.slane %v13527_v39, 5  ;;  %v10186_v17 = vld [vmem:[#allocation3 + $0xe8] sm:$0xff]  ;;  %v10189_v35 = vsel %vm631_vm5, %v3647_v54, %v3655_v27  ;;  %v13531_v26 = vshrl.u32 %v9822_v36, 16  ;;  %v13532_v31 = vshll.u32 %v9822_v36, 16 }
 0x34c   :  { %v10178_v43 = vrot.slane %v13528_v0, 4  ;;  %v10182_v6 = vrot.slane %v13529_v41, 5  ;;  %13530 = vst [vmem:[#allocation44_spill] sm:$0xff] %v10189_v35  ;;  %v3204_v56 = vpack.c.bf16 %v3156_v11, %v3155_v23  ;;  %v4103_v14 = vrot.slane %v10184_v45, 4  ;;  %v10201_v39 = vld [vmem:[#allocation3 + $0xd0] sm:$0xff] }
 0x34d   :  { %v10193_v55 = vrot.slane %v13531_v26, 4  ;;  %v10197_v33 = vrot.slane %v13532_v31, 5  ;;  %v4104_v4 = vrot.slane %v10186_v17, 4  ;;  %v10203_v0 = vld [vmem:[#allocation3 + $0xd8] sm:$0xff]  ;;  %v12694_v54 = vshrl.u32 %v10186_v17, 16 }
 0x34e   :  { %v3203_v27 = vpack.c.bf16 %v3154_v40, %v3153_v19  ;;  %v4100_v41 = vrot.slane %v10201_v39, 4  ;;  %v4101_v26 = vrot.slane %v10203_v0, 4  ;;  %v12693_v36 = vshll.u32 %v10186_v17, 16 }
 0x34f   :  { %v3268_v31 = vrot.slane %v3204_v56, 4  ;;  %v10210_v11 = vsel %vm1240_vm3, %v4103_v14, %v4104_v4  ;;  %v3702_v23 = vrot.slane %v12694_v54, 3  ;;  %v12695_v49 = vshrl.u32 %v10184_v45, 16 }
 0x350   :  { %13533 = vst [vmem:[#allocation121_spill] sm:$0xff] %v10210_v11  ;;  %v3267_v35 = vrot.slane %v3203_v27, 4  ;;  %4525 = vrot.lane.b32.xlu0 %v10210_v11, %s6535_s17  ;;  %v10218_v19 = vsel %vm1240_vm3, %v4100_v41, %v4101_v26  ;;  %v3705_v40 = vrot.slane %v12693_v36, 4  ;;  %v12701_v56 = vshll.u32 %v10184_v45, 16  ;;  %v6340_v26 = vpop.f32.mrb[32].mxu0 }
 0x351   :  { %13534 = vst [vmem:[#allocation135_spill] sm:$0xff] %v10218_v19  ;;  %3347 = vst.msk [vmem:[#allocation3 + $0x100] sm:$0xf0] %vm142_vm1, %v3268_v31  ;;  %4523 = vrot.lane.b32.xlu1 %v10218_v19, %s6535_s17  ;;  %v3694_v14 = vrot.slane %v12695_v49, 3  ;;  %v4229_v49 = vor.u32 %v10174_v38, %v10166_v63  ;;  %v3007_v4 = vadd.f32 %v6340_v26, %v9745_v34  ;;  %v2998_v11 = vpop.f32.mrb[33].mxu0  ;;  %v13535_v27 = vshrl.u32 %v10201_v39, 16 }
 0x352   :  { %3348 = vst.msk [vmem:[#allocation3 + $0x108] sm:$0xf] %vm109_vm15, %v3268_v31  ;;  %3346 = vst.msk [vmem:[#allocation3 + $0xf8] sm:$0xf] %vm109_vm15, %v3267_v35  ;;  %v3706_v36 = vor.u32 %v3705_v40, %v3702_v23  ;;  %v3697_v31 = vrot.slane %v12701_v56, 4  ;;  %v13536_v19 = vshll.u32 %v10201_v39, 16  ;;  %v2999_v40 = vadd.f32 %v9745_v34, %v2998_v11 }
 0x353   :  { %3345 = vst.msk [vmem:[#allocation3 + $0xf0] sm:$0xf0] %vm142_vm1, %v3267_v35  ;;  %v3677_v41 = vrot.slane %v13535_v27, 3  ;;  %v13537_v35 = vshrl.u32 %v10203_v0, 16  ;;  %v6341_v56 = vpop.f32.mrb[34].mxu0  ;;  %v13538_v63 = vshll.u32 %v10203_v0, 16  ;;  %v4232_v26 = vor.u32 %v10182_v6, %v10178_v43 }
 0x354   :  { %v3680_v30 = vrot.slane %v13536_v19, 4  ;;  %4529 = vrot.lane.b32.xlu0 %v10086_v61, %s6535_s17  ;;  %v3698_v54 = vor.u32 %v3697_v31, %v3694_v14  ;;  %v3159_v27 = vmax.f32 %v3007_v4, 0.0  ;;  %v3010_v51 = vadd.f32 %v6341_v56, %v9745_v34  ;;  %v3001_v19 = vpop.f32.mrb[35].mxu0 }
 0x355   :  { %v3685_v23 = vrot.slane %v13537_v35, 3  ;;  %v3688_v38 = vrot.slane %v13538_v63, 4  ;;  %v4180_v35 = vor.u32 %v10197_v33, %v10193_v55  ;;  %v3157_v11 = vmax.f32 %v2999_v40, 0.0 }
 0x356   :  { %v3681_v12 = vor.u32 %v3680_v30, %v3677_v41  ;;  %v3002_v2 = vadd.f32 %v9745_v34, %v3001_v19  ;;  %v10258_v61 = vsel %vm631_vm5, %v3698_v54, %v3706_v36  ;;  %v3160_v31 = vmax.f32 %v3010_v51, 0.0 }
 0x357   :  { %13539 = vst [vmem:[#allocation93_spill] sm:$0xff] %v10258_v61  ;;  %v3689_v14 = vor.u32 %v3688_v38, %v3685_v23  ;;  %v10261_v63 = vsel %vm1337_vm4, %v4229_v49, %v4232_v26  ;;  %v13540_v43 = vshrl.u32 %v9824_v13, 16  ;;  %v13541_v56 = vshll.u32 %v9824_v13, 16 }
 0x358   :  { %v3158_v4 = vmax.f32 %v3002_v2, 0.0  ;;  %v13543_v33 = vshrl.u32 %v10097_v5, 16  ;;  %v13544_v54 = vshll.u32 %v10097_v5, 16  ;;  %v3206_v51 = vpack.c.bf16 %v3160_v31, %v3159_v27 }
 0x359   :  { %v4181_v6 = vrot.slane %v13540_v43, 4  ;;  %v4182_v30 = vrot.slane %v13541_v56, 5  ;;  %v10268_v55 = vsel %vm631_vm5, %v3681_v12, %v3689_v14  ;;  %v10276_v49 = vld [vmem:[#allocation3 + $0xf8] sm:$0xff]  ;;  %v13545_v38 = vshrl.u32 %v10099_v50, 16 }
 0x35a   :  { %13542 = vst [vmem:[#allocation88_spill] sm:$0xff] %v10268_v55  ;;  %v4241_v41 = vrot.slane %v13543_v33, 4  ;;  %v4242_v36 = vrot.slane %v13544_v54, 5  ;;  %v10274_v23 = vld [vmem:[#allocation3 + $0xf0] sm:$0xff]  ;;  %v13546_v2 = vshll.u32 %v10099_v50, 16  ;;  %v3205_v12 = vpack.c.bf16 %v3158_v4, %v3157_v11 }
 0x35b   :  { %v4183_v40 = vor.u32 %v4182_v30, %v4181_v6  ;;  %v4244_v13 = vrot.slane %v13545_v38, 4  ;;  %v4106_v19 = vrot.slane %v10274_v23, 4  ;;  %v4107_v14 = vrot.slane %v10276_v49, 4 }
 0x35c   :  { %v4245_v26 = vrot.slane %v13546_v2, 5  ;;  %v4243_v43 = vor.u32 %v4242_v36, %v4241_v41  ;;  %v3270_v5 = vrot.slane %v3206_v51, 4  ;;  %v13547_v56 = vshrl.u32 %v9880_v42, 16 }
 0x35d   :  { %v10285_v27 = vsel %vm1337_vm4, %v4180_v35, %v4183_v40  ;;  %v3269_v30 = vrot.slane %v3205_v12, 4  ;;  %v10290_v33 = vsel %vm1240_vm3, %v4106_v19, %v4107_v14  ;;  %v13549_v50 = vshll.u32 %v9880_v42, 16  ;;  %v6344_v40 = vpop.f32.mrb[36].mxu0 }
 0x35e   :  { %v4246_v31 = vor.u32 %v4245_v26, %v4244_v13  ;;  %v4192_v6 = vrot.slane %v13547_v56, 4  ;;  %13548 = vst [vmem:[#allocation53_spill] sm:$0xff] %v10290_v33  ;;  %v13550_v4 = vshrl.u32 %v9882_v48, 16  ;;  %3351 = vst.msk [vmem:[#allocation3 + $0x140] sm:$0xf0] %vm142_vm1, %v3270_v5  ;;  %4527 = vrot.lane.b32.xlu1 %v10290_v33, %s6535_s17  ;;  %v13551_v41 = vshll.u32 %v9882_v48, 16 }
 0x35f   :  { %v4193_v11 = vrot.slane %v13549_v50, 5  ;;  %3352 = vst.msk [vmem:[#allocation3 + $0x148] sm:$0xf] %vm109_vm15, %v3270_v5  ;;  %v12707_v51 = vshrl.u32 %v10274_v23, 16  ;;  %v12706_v42 = vshll.u32 %v10274_v23, 16  ;;  %v12708_v13 = vshrl.u32 %v10276_v49, 16 }
 0x360   :  { %v4195_v54 = vrot.slane %v13550_v4, 4  ;;  %v10301_v35 = vsel %vm1337_vm4, %v4243_v43, %v4246_v31  ;;  %v4196_v36 = vrot.slane %v13551_v41, 5  ;;  %3349 = vst.msk [vmem:[#allocation3 + $0x130] sm:$0xf0] %vm142_vm1, %v3269_v30  ;;  %v12711_v2 = vshll.u32 %v10276_v49, 16  ;;  %v3014_v19 = vpop.f32.mrb[37].mxu0 }
 0x361   :  { %3350 = vst.msk [vmem:[#allocation3 + $0x138] sm:$0xf] %vm109_vm15, %v3269_v30  ;;  %v4194_v38 = vor.u32 %v4193_v11, %v4192_v6  ;;  %v13552_v26 = vshrl.u32 %v10184_v45, 16  ;;  %v3023_v48 = vadd.f32 %v6344_v40, %v9745_v34  ;;  %v3711_v43 = vrot.slane %v12707_v51, 3  ;;  %v10321_v31 = vld [vmem:[%s12303_s2] ss:$0 sm:$0xff] }
 0x362   :  { %v4197_v14 = vor.u32 %v4196_v36, %v4195_v54  ;;  %v3714_v5 = vrot.slane %v12706_v42, 4  ;;  %v3015_v56 = vadd.f32 %v10321_v31, %v3014_v19  ;;  %v6345_v6 = vpop.f32.mrb[38].mxu0  ;;  %v3719_v30 = vrot.slane %v12708_v13, 3 }
 0x363   :  { %v4255_v12 = vrot.slane %v13552_v26, 4  ;;  %v3722_v34 = vrot.slane %v12711_v2, 4  ;;  %v13553_v50 = vshll.u32 %v10184_v45, 16  ;;  %v3163_v4 = vmax.f32 %v3023_v48, 0.0  ;;  %v3017_v41 = vpop.f32.mrb[39].mxu0 }
 0x364   :  { %v3026_v54 = vadd.f32 %v10321_v31, %v6345_v6  ;;  %v10332_v36 = vsel %vm1337_vm4, %v4194_v38, %v4197_v14  ;;  %v3715_v40 = vor.u32 %v3714_v5, %v3711_v43  ;;  %v3161_v26 = vmax.f32 %v3015_v56, 0.0 }
 0x365   :  { %v4256_v11 = vrot.slane %v13553_v50, 5  ;;  %v3018_v19 = vadd.f32 %v10321_v31, %v3017_v41  ;;  %v3723_v42 = vor.u32 %v3722_v34, %v3719_v30  ;;  %v13554_v33 = vshrl.u32 %v10186_v17, 16  ;;  %v10341_v55 = vld [vmem:[#allocation3 + $0x140] sm:$0xff] }
 0x366   :  { %v3164_v13 = vmax.f32 %v3026_v54, 0.0  ;;  %v13555_v45 = vshll.u32 %v10186_v17, 16  ;;  %v13556_v48 = vshrl.u32 %v9947_v29, 16  ;;  %v10343_v38 = vld [vmem:[#allocation3 + $0x148] sm:$0xff]  ;;  %v13559_v5 = vshrl.u32 %v9949_v15, 16 }
 0x367   :  { %v4257_v51 = vor.u32 %v4256_v11, %v4255_v12  ;;  %v4258_v2 = vrot.slane %v13554_v33, 4  ;;  %v3162_v61 = vmax.f32 %v3018_v19, 0.0  ;;  %v10346_v14 = vsel %vm631_vm5, %v3715_v40, %v3723_v42  ;;  %v10354_v34 = vld [vmem:[#allocation3 + $0x130] sm:$0xff] }
 0x368   :  { %v4259_v50 = vrot.slane %v13555_v45, 5  ;;  %v4206_v6 = vrot.slane %v13556_v48, 4  ;;  %13557 = vst [vmem:[#allocation60_spill] sm:$0xff] %v10346_v14  ;;  %v13558_v12 = vshll.u32 %v9947_v29, 16  ;;  %v4209_v33 = vrot.slane %v13559_v5, 4  ;;  %v10356_v11 = vld [vmem:[#allocation3 + $0x138] sm:$0xff] }
 0x369   :  { %v3208_v56 = vpack.c.bf16 %v3164_v13, %v3163_v4  ;;  %v4115_v17 = vrot.slane %v10341_v55, 4  ;;  %v4116_v30 = vrot.slane %v10343_v38, 4  ;;  %v3207_v41 = vpack.c.bf16 %v3162_v61, %v3161_v26 }
 0x36a   :  { %v4207_v43 = vrot.slane %v13558_v12, 5  ;;  %v4260_v54 = vor.u32 %v4259_v50, %v4258_v2  ;;  %v4112_v42 = vrot.slane %v10354_v34, 4  ;;  %v4113_v40 = vrot.slane %v10356_v11, 4 }
 0x36b   :  { %v3272_v19 = vrot.slane %v3208_v56, 4  ;;  %v10361_v45 = vsel %vm1240_vm3, %v4115_v17, %v4116_v30  ;;  %v13561_v4 = vshll.u32 %v9949_v15, 16  ;;  %v3271_v12 = vrot.slane %v3207_v41, 4  ;;  %v6348_v15 = vpop.f32.mrb[40].mxu0 }
 0x36c   :  { %v4208_v29 = vor.u32 %v4207_v43, %v4206_v6  ;;  %13560 = vst [vmem:[#allocation134_spill] sm:$0xff] %v10361_v45  ;;  %v10364_v13 = vsel %vm1337_vm4, %v4257_v51, %v4260_v54  ;;  %4533 = vrot.lane.b32.xlu0 %v10361_v45, %s6535_s17  ;;  %v10371_v61 = vsel %vm1240_vm3, %v4112_v42, %v4113_v40  ;;  %v13563_v51 = vshrl.u32 %v10030_v44, 16  ;;  %v3030_v17 = vpop.f32.mrb[41].mxu0 }
 0x36d   :  { %v4210_v48 = vrot.slane %v13561_v4, 5  ;;  %13562 = vst [vmem:[#allocation146_spill] sm:$0xff] %v10371_v61  ;;  %3355 = vst.msk [vmem:[#allocation3 + $0x160] sm:$0xf0] %vm142_vm1, %v3272_v19  ;;  %4531 = vrot.lane.b32.xlu1 %v10371_v61, %s6535_s17  ;;  %v13564_v50 = vshll.u32 %v10030_v44, 16  ;;  %v13565_v43 = vshrl.u32 %v10032_v9, 16  ;;  %v3039_v56 = vadd.f32 %v10321_v31, %v6348_v15 }
 0x36e   :  { %3356 = vst.msk [vmem:[#allocation3 + $0x168] sm:$0xf] %vm109_vm15, %v3272_v19  ;;  %v4220_v26 = vrot.slane %v13563_v51, 4  ;;  %3354 = vst.msk [vmem:[#allocation3 + $0x158] sm:$0xf] %vm109_vm15, %v3271_v12  ;;  %v3031_v54 = vadd.f32 %v10321_v31, %v3030_v17  ;;  %v6349_v41 = vpop.f32.mrb[42].mxu0 }
 0x36f   :  { %v4211_v2 = vor.u32 %v4210_v48, %v4209_v33  ;;  %3353 = vst.msk [vmem:[#allocation3 + $0x150] sm:$0xf0] %vm142_vm1, %v3271_v12  ;;  %v4221_v6 = vrot.slane %v13564_v50, 5  ;;  %v4223_v5 = vrot.slane %v13565_v43, 4  ;;  %v12719_v33 = vshrl.u32 %v9980_v10, 16  ;;  %v3033_v48 = vpop.f32.mrb[43].mxu0 }
 0x370   :  { %v12717_v42 = vshll.u32 %v9980_v10, 16  ;;  %v13566_v44 = vshll.u32 %v10032_v9, 16  ;;  %v3042_v4 = vadd.f32 %v10321_v31, %v6349_v41  ;;  %v12716_v12 = vshrl.u32 %v9982_v25, 16 }
 0x371   :  { %v10387_v30 = vsel %vm1337_vm4, %v4208_v29, %v4211_v2  ;;  %v4222_v40 = vor.u32 %v4221_v6, %v4220_v26  ;;  %v12718_v51 = vshll.u32 %v9982_v25, 16  ;;  %v3728_v29 = vrot.slane %v12719_v33, 3 }
 0x372   :  { %v4224_v19 = vrot.slane %v13566_v44, 5  ;;  %v3167_v2 = vmax.f32 %v3039_v56, 0.0  ;;  %v3034_v15 = vadd.f32 %v10321_v31, %v3033_v48  ;;  %v3731_v26 = vrot.slane %v12717_v42, 4 }
 0x373   :  { %v3165_v6 = vmax.f32 %v3031_v54, 0.0  ;;  %v3168_v9 = vmax.f32 %v3042_v4, 0.0  ;;  %v3736_v43 = vrot.slane %v12716_v12, 3  ;;  %v3739_v17 = vrot.slane %v12718_v51, 4 }
 0x374   :  { %v4225_v50 = vor.u32 %v4224_v19, %v4223_v5  ;;  %v3166_v41 = vmax.f32 %v3034_v15, 0.0  ;;  %v10406_v44 = vld [vmem:[#allocation3 + $0x160] sm:$0xff]  ;;  %v3732_v5 = vor.u32 %v3731_v26, %v3728_v29  ;;  %v3760_v19 = vshrl.u32 %v10341_v55, 16 }
 0x375   :  { %v10408_v45 = vld [vmem:[#allocation3 + $0x168] sm:$0xff]  ;;  %v3210_v48 = vpack.c.bf16 %v3168_v9, %v3167_v2  ;;  %v4121_v54 = vrot.slane %v10406_v44, 4  ;;  %v10418_v42 = vld [vmem:[#allocation3 + $0x158] sm:$0xff]  ;;  %v3740_v15 = vor.u32 %v3739_v17, %v3736_v43  ;;  %v3768_v26 = vshrl.u32 %v10343_v38, 16 }
 0x376   :  { %v10411_v56 = vsel %vm1337_vm4, %v4222_v40, %v4225_v50  ;;  %v4122_v4 = vrot.slane %v10408_v45, 4  ;;  %v10416_v12 = vld [vmem:[#allocation3 + $0x150] sm:$0xff]  ;;  %v3209_v51 = vpack.c.bf16 %v3166_v41, %v3165_v6  ;;  %v4119_v61 = vrot.slane %v10418_v42, 4 }
 0x377   :  { %v4118_v33 = vrot.slane %v10416_v12, 4  ;;  %v3763_v40 = vshll.u32 %v10341_v55, 16  ;;  %v3274_v29 = vrot.slane %v3210_v48, 4  ;;  %v10427_v2 = vsel %vm631_vm5, %v3732_v5, %v3740_v15 }
 0x378   :  { %v10424_v50 = vsel %vm1240_vm3, %v4121_v54, %v4122_v4  ;;  %13568 = vst [vmem:[#allocation51_spill] sm:$0xff] %v10427_v2  ;;  %v3273_v9 = vrot.slane %v3209_v51, 4  ;;  %v3771_v43 = vshll.u32 %v10343_v38, 16  ;;  %v4283_v17 = vrot.slane %v3760_v19, 4  ;;  %v6352_v38 = vpop.f32.mrb[44].mxu0 }
 0x379   :  { %13567 = vst [vmem:[#allocation125_spill] sm:$0xff] %v10424_v50  ;;  %4537 = vrot.lane.b32.xlu0 %v10424_v50, %s6535_s17  ;;  %v10433_v6 = vsel %vm1240_vm3, %v4118_v33, %v4119_v61  ;;  %3359 = vst.msk [vmem:[#allocation3 + $0x180] sm:$0xf0] %vm142_vm1, %v3274_v29  ;;  %v4284_v55 = vrot.slane %v3763_v40, 5  ;;  %v4286_v41 = vrot.slane %v3768_v26, 4  ;;  %v13570_v51 = vshrl.u32 %v10114_v24, 16 }
 0x37a   :  { %13569 = vst [vmem:[#allocation58_spill] sm:$0xff] %v10433_v6  ;;  %3360 = vst.msk [vmem:[#allocation3 + $0x188] sm:$0xf] %vm109_vm15, %v3274_v29  ;;  %4535 = vrot.lane.b32.xlu1 %v10433_v6, %s6535_s17  ;;  %v13571_v48 = vshll.u32 %v10114_v24, 16  ;;  %v4287_v61 = vrot.slane %v3771_v43, 5  ;;  %v13572_v33 = vshrl.u32 %v10116_v57, 16  ;;  %v3055_v50 = vadd.f32 %v10321_v31, %v6352_v38 }
 0x37b   :  { %v4234_v5 = vrot.slane %v13570_v51, 4  ;;  %3357 = vst.msk [vmem:[#allocation3 + $0x170] sm:$0xf0] %vm142_vm1, %v3273_v9  ;;  %v13573_v15 = vshll.u32 %v10116_v57, 16  ;;  %v3770_v2 = vrot.slane %v3768_v26, 3  ;;  %v3046_v6 = vpop.f32.mrb[45].mxu0  ;;  %v4285_v51 = vor.u32 %v4284_v55, %v4283_v17 }
 0x37c   :  { %v4235_v54 = vrot.slane %v13571_v48, 5  ;;  %3358 = vst.msk [vmem:[#allocation3 + $0x178] sm:$0xf] %vm109_vm15, %v3273_v9  ;;  %v4237_v4 = vrot.slane %v13572_v33, 4  ;;  %v3773_v24 = vrot.slane %v3771_v43, 4  ;;  %v3047_v48 = vadd.f32 %v10321_v31, %v3046_v6  ;;  %v6353_v22 = vpop.f32.mrb[46].mxu0 }
 0x37d   :  { %v4238_v29 = vrot.slane %v13573_v15, 5  ;;  %v4288_v47 = vor.u32 %v4287_v61, %v4286_v41  ;;  %v3762_v59 = vrot.slane %v3760_v19, 3  ;;  %v3058_v53 = vadd.f32 %v10321_v31, %v6353_v22  ;;  %v3049_v52 = vpop.f32.mrb[47].mxu0 }
 0x37e   :  { %v4236_v14 = vor.u32 %v4235_v54, %v4234_v5  ;;  %v3774_v33 = vor.u32 %v3773_v24, %v3770_v2  ;;  %v3765_v37 = vrot.slane %v3763_v40, 4  ;;  %v3050_v57 = vadd.f32 %v10321_v31, %v3049_v52 }
 0x37f   :  { %v4239_v9 = vor.u32 %v4238_v29, %v4237_v4  ;;  %v10455_v26 = vsel %vm1337_vm4, %v4285_v51, %v4288_v47  ;;  %v3171_v43 = vmax.f32 %v3055_v50, 0.0  ;;  %v3172_v55 = vmax.f32 %v3058_v53, 0.0 }
 0x380   :  { %v3766_v6 = vor.u32 %v3765_v37, %v3762_v59  ;;  %v12739_v41 = vshrl.u32 %v10354_v34, 16  ;;  %v3169_v5 = vmax.f32 %v3047_v48, 0.0  ;;  %v3170_v19 = vmax.f32 %v3050_v57, 0.0  ;;  %v10461_v54 = vld [vmem:[#allocation3 + $0x180] sm:$0xff] }
 0x381   :  { %v10458_v17 = vsel %vm1337_vm4, %v4236_v14, %v4239_v9  ;;  %v10463_v22 = vld [vmem:[#allocation3 + $0x188] sm:$0xff]  ;;  %v12737_v40 = vshll.u32 %v10354_v34, 16  ;;  %v12735_v52 = vshrl.u32 %v10356_v11, 16  ;;  %v3212_v47 = vpack.c.bf16 %v3172_v55, %v3171_v43 }
 0x382   :  { %v4127_v2 = vrot.slane %v10461_v54, 4  ;;  %v4128_v14 = vrot.slane %v10463_v22, 4  ;;  %v10469_v50 = vld [vmem:[#allocation3 + $0x170] sm:$0xff]  ;;  %v10474_v53 = vsel %vm631_vm5, %v3766_v6, %v3774_v33  ;;  %v3211_v59 = vpack.c.bf16 %v3170_v19, %v3169_v5  ;;  %v6356_v19 = vpop.f32.mrb[48].mxu0 }
 0x383   :  { %v10471_v37 = vld [vmem:[#allocation3 + $0x178] sm:$0xff]  ;;  %13574 = vst [vmem:[#allocation95_spill] sm:$0xff] %v10474_v53  ;;  %v4124_v38 = vrot.slane %v10469_v50, 4  ;;  %v3745_v4 = vrot.slane %v12739_v41, 3  ;;  %v3276_v15 = vrot.slane %v3212_v47, 4  ;;  %v3748_v51 = vrot.slane %v12737_v40, 4 }
 0x384   :  { %v4125_v61 = vrot.slane %v10471_v37, 4  ;;  %v10481_v29 = vsel %vm1240_vm3, %v4127_v2, %v4128_v14  ;;  %v3753_v24 = vrot.slane %v12735_v52, 3  ;;  %v3275_v48 = vrot.slane %v3211_v59, 4 }
 0x385   :  { %13575 = vst [vmem:[#allocation92_spill] sm:$0xff] %v10481_v29  ;;  %4541 = vrot.lane.b32.xlu0 %v10481_v29, %s6535_s17  ;;  %v12736_v33 = vshll.u32 %v10356_v11, 16  ;;  %v12738_v57 = vshrl.u32 %v10406_v44, 16  ;;  %3363 = vst.msk [vmem:[#allocation3 + $0x1a0] sm:$0xf0] %vm142_vm1, %v3276_v15  ;;  %v3749_v43 = vor.u32 %v3748_v51, %v3745_v4  ;;  %v12742_v55 = vshll.u32 %v10406_v44, 16 }
 0x386   :  { %v10490_v9 = vsel %vm1240_vm3, %v4124_v38, %v4125_v61  ;;  %3364 = vst.msk [vmem:[#allocation3 + $0x1a8] sm:$0xf] %vm109_vm15, %v3276_v15  ;;  %v3802_v6 = vshrl.u32 %v10408_v45, 16  ;;  %v12746_v5 = vshll.u32 %v10408_v45, 16  ;;  %3362 = vst.msk [vmem:[#allocation3 + $0x198] sm:$0xf] %vm109_vm15, %v3275_v48  ;;  %v3071_v4 = vadd.f32 %v10321_v31, %v6356_v19 }
 0x387   :  { %13576 = vst [vmem:[#allocation50_spill] sm:$0xff] %v10490_v9  ;;  %4539 = vrot.lane.b32.xlu1 %v10490_v9, %s6535_s17  ;;  %3361 = vst.msk [vmem:[#allocation3 + $0x190] sm:$0xf0] %vm142_vm1, %v3275_v48  ;;  %v3756_v47 = vrot.slane %v12736_v33, 4  ;;  %v4297_v2 = vrot.slane %v12738_v57, 4  ;;  %v13577_v14 = vshrl.u32 %v10201_v39, 16 }
 0x388   :  { %v13578_v38 = vshll.u32 %v10201_v39, 16  ;;  %v3062_v15 = vpop.f32.mrb[49].mxu0  ;;  %v4298_v51 = vrot.slane %v12742_v55, 5  ;;  %v4300_v48 = vrot.slane %v3802_v6, 4  ;;  %v4301_v52 = vrot.slane %v12746_v5, 5 }
 0x389   :  { %v4248_v59 = vrot.slane %v13577_v14, 4  ;;  %v3063_v33 = vadd.f32 %v10321_v31, %v3062_v15  ;;  %v6357_v40 = vpop.f32.mrb[50].mxu0  ;;  %v13579_v57 = vshrl.u32 %v9539_v1, 16  ;;  %v3757_v14 = vor.u32 %v3756_v47, %v3753_v24 }
 0x38a   :  { %v4249_v61 = vrot.slane %v13578_v38, 5  ;;  %v13580_v39 = vshrl.u32 %v10203_v0, 16  ;;  %v3074_v19 = vadd.f32 %v10321_v31, %v6357_v40  ;;  %v3065_v29 = vpop.f32.mrb[51].mxu0  ;;  %v13581_v55 = vshll.u32 %v9539_v1, 16 }
 0x38b   :  { %v10519_v41 = vrot.slane %v13579_v57, 4  ;;  %v4299_v53 = vor.u32 %v4298_v51, %v4297_v2  ;;  %v4302_v5 = vor.u32 %v4301_v52, %v4300_v48  ;;  %v3066_v15 = vadd.f32 %v10321_v31, %v3065_v29 }
 0x38c   :  { %v4251_v38 = vrot.slane %v13580_v39, 4  ;;  %v10526_v9 = vrot.slane %v13581_v55, 5  ;;  %v10530_v46 = vsel %vm631_vm5, %v3749_v43, %v3757_v14  ;;  %v4250_v57 = vor.u32 %v4249_v61, %v4248_v59  ;;  %v10539_v52 = vld [vmem:[#allocation3 + $0x1a0] sm:$0xff] }
 0x38d   :  { %13582 = vst [vmem:[#allocation137_spill] sm:$0xff] %v10530_v46  ;;  %v13583_v24 = vshll.u32 %v10203_v0, 16  ;;  %v3175_v21 = vmax.f32 %v3071_v4, 0.0  ;;  %v3176_v39 = vmax.f32 %v3074_v19, 0.0  ;;  %v10535_v40 = vsel %vm1337_vm4, %v4299_v53, %v4302_v5  ;;  %v10541_v29 = vld [vmem:[#allocation3 + $0x1a8] sm:$0xff]  ;;  %v10549_v5 = vld [vmem:[#allocation3 + $0x198] sm:$0xff] }
 0x38e   :  { %v13584_v1 = vshrl.u32 %v10274_v23, 16  ;;  %v3173_v32 = vmax.f32 %v3063_v33, 0.0  ;;  %v3174_v2 = vmax.f32 %v3066_v15, 0.0  ;;  %v13585_v59 = vshll.u32 %v10274_v23, 16  ;;  %v10547_v53 = vld [vmem:[#allocation3 + $0x190] sm:$0xff] }
 0x38f   :  { %v4252_v47 = vrot.slane %v13583_v24, 5  ;;  %v3214_v0 = vpack.c.bf16 %v3176_v39, %v3175_v21  ;;  %v4133_v4 = vrot.slane %v10539_v52, 4  ;;  %v4134_v51 = vrot.slane %v10541_v29, 4 }
 0x390   :  { %v4262_v55 = vrot.slane %v13584_v1, 4  ;;  %v4263_v61 = vrot.slane %v13585_v59, 5  ;;  %v13586_v33 = vshrl.u32 %v10276_v49, 16  ;;  %v3213_v14 = vpack.c.bf16 %v3174_v2, %v3173_v32 }
 0x391   :  { %v4253_v43 = vor.u32 %v4252_v47, %v4251_v38  ;;  %v4130_v19 = vrot.slane %v10547_v53, 4  ;;  %v4131_v38 = vrot.slane %v10549_v5, 4  ;;  %v3278_v21 = vrot.slane %v3214_v0, 4 }
 0x392   :  { %v4265_v48 = vrot.slane %v13586_v33, 4  ;;  %v10559_v15 = vsel %vm1240_vm3, %v4133_v4, %v4134_v51  ;;  %v4264_v24 = vor.u32 %v4263_v61, %v4262_v55  ;;  %v13588_v47 = vshll.u32 %v10276_v49, 16 }
 0x393   :  { %v10556_v23 = vsel %vm1337_vm4, %v4250_v57, %v4253_v43  ;;  %13587 = vst [vmem:[#allocation96_spill] sm:$0xff] %v10559_v15  ;;  %v3277_v1 = vrot.slane %v3213_v14, 4  ;;  %4545 = vrot.lane.b32.xlu0 %v10559_v15, %s6535_s17  ;;  %v10566_v32 = vsel %vm1240_vm3, %v4130_v19, %v4131_v38  ;;  %v13590_v2 = vshrl.u32 %v10354_v34, 16  ;;  %3367 = vst.msk [vmem:[#allocation3 + $0x1c0] sm:$0xf0] %vm142_vm1, %v3278_v21 }
 0x394   :  { %v4266_v39 = vrot.slane %v13588_v47, 5  ;;  %13589 = vst [vmem:[#allocation94_spill] sm:$0xff] %v10566_v32  ;;  %v13591_v57 = vshll.u32 %v10354_v34, 16  ;;  %3368 = vst.msk [vmem:[#allocation3 + $0x1c8] sm:$0xf] %vm109_vm15, %v3278_v21  ;;  %4543 = vrot.lane.b32.xlu1 %v10566_v32, %s6535_s17  ;;  %v13592_v55 = vshrl.u32 %v10356_v11, 16 }
 0x395   :  { %v4276_v59 = vrot.slane %v13590_v2, 4  ;;  %v13593_v0 = vshll.u32 %v10356_v11, 16  ;;  %v3804_v51 = vrot.slane %v3802_v6, 3  ;;  %3365 = vst.msk [vmem:[#allocation3 + $0x1b0] sm:$0xf0] %vm142_vm1, %v3277_v1  ;;  %v6360_v34 = vpop.f32.mrb[52].mxu0 }
 0x396   :  { %v4277_v43 = vrot.slane %v13591_v57, 5  ;;  %v4267_v49 = vor.u32 %v4266_v39, %v4265_v48  ;;  %v4279_v61 = vrot.slane %v13592_v55, 4  ;;  %3366 = vst.msk [vmem:[#allocation3 + $0x1b8] sm:$0xf] %vm109_vm15, %v3277_v1  ;;  %v13594_v14 = vshll.u32 %v10408_v45, 16  ;;  %v3078_v11 = vpop.f32.mrb[53].mxu0 }
 0x397   :  { %v4280_v4 = vrot.slane %v13593_v0, 5  ;;  %v13595_v38 = vshrl.u32 %v10406_v44, 16  ;;  %v13596_v48 = vshll.u32 %v10406_v44, 16  ;;  %v3087_v39 = vadd.f32 %v10321_v31, %v6360_v34  ;;  %v6361_v57 = vpop.f32.mrb[54].mxu0 }
 0x398   :  { %v4278_v33 = vor.u32 %v4277_v43, %v4276_v59  ;;  %v3807_v19 = vrot.slane %v13594_v14, 4  ;;  %v10590_v6 = vsel %vm1337_vm4, %v4264_v24, %v4267_v49  ;;  %v3777_v1 = vshrl.u32 %v10416_v12, 16  ;;  %v3081_v44 = vpop.f32.mrb[55].mxu0 }
 0x399   :  { %v3796_v21 = vrot.slane %v13595_v38, 3  ;;  %v3799_v47 = vrot.slane %v13596_v48, 4  ;;  %v4281_v2 = vor.u32 %v4280_v4, %v4279_v61  ;;  %v3079_v59 = vadd.f32 %v10321_v31, %v3078_v11 }
 0x39a   :  { %v3808_v45 = vor.u32 %v3807_v19, %v3804_v51  ;;  %v3780_v55 = vshll.u32 %v10416_v12, 16  ;;  %v3090_v0 = vadd.f32 %v10321_v31, %v6361_v57  ;;  %v13597_v14 = vshrl.u32 %v9541_v58, 16 }
 0x39b   :  { %v3800_v43 = vor.u32 %v3799_v47, %v3796_v21  ;;  %v10601_v24 = vsel %vm1337_vm4, %v4278_v33, %v4281_v2  ;;  %v3779_v49 = vrot.slane %v3777_v1, 3  ;;  %v3082_v61 = vadd.f32 %v10321_v31, %v3081_v44  ;;  %v10613_v2 = vld [vmem:[#allocation3 + $0x1c0] sm:$0xff]  ;;  %v10615_v57 = vld [vmem:[#allocation3 + $0x1c8] sm:$0xff] }
 0x39c   :  { %v10598_v34 = vrot.slane %v13597_v14, 4  ;;  %v13598_v4 = vshll.u32 %v9541_v58, 16  ;;  %v3782_v12 = vrot.slane %v3780_v55, 4  ;;  %v3179_v19 = vmax.f32 %v3087_v39, 0.0 }
 0x39d   :  { %v10609_v51 = vsel %vm631_vm5, %v3800_v43, %v3808_v45  ;;  %v3180_v21 = vmax.f32 %v3090_v0, 0.0  ;;  %v3785_v48 = vshrl.u32 %v10418_v42, 16  ;;  %v3788_v47 = vshll.u32 %v10418_v42, 16  ;;  %v10619_v43 = vld [vmem:[#allocation3 + $0x1b0] sm:$0xff]  ;;  %v10621_v39 = vld [vmem:[#allocation3 + $0x1b8] sm:$0xff] }
 0x39e   :  { %v10606_v38 = vrot.slane %v13598_v4, 5  ;;  %13599 = vst [vmem:[#allocation59_spill] sm:$0xff] %v10609_v51  ;;  %v3177_v11 = vmax.f32 %v3079_v59, 0.0  ;;  %v3178_v33 = vmax.f32 %v3082_v61, 0.0  ;;  %v3783_v44 = vor.u32 %v3782_v12, %v3779_v49 }
 0x39f   :  { %v4290_v58 = vrot.slane %v3777_v1, 4  ;;  %v3216_v14 = vpack.c.bf16 %v3180_v21, %v3179_v19  ;;  %v4139_v4 = vrot.slane %v10613_v2, 4  ;;  %v4140_v45 = vrot.slane %v10615_v57, 4 }
 0x3a0   :  { %v3787_v0 = vrot.slane %v3785_v48, 3  ;;  %v3215_v15 = vpack.c.bf16 %v3178_v33, %v3177_v11  ;;  %v4136_v42 = vrot.slane %v10619_v43, 4  ;;  %v4137_v59 = vrot.slane %v10621_v39, 4 }
 0x3a1   :  { %v3790_v61 = vrot.slane %v3788_v47, 4  ;;  %v3280_v32 = vrot.slane %v3216_v14, 4  ;;  %v10626_v49 = vsel %vm1240_vm3, %v4139_v4, %v4140_v45  ;;  %v4291_v1 = vrot.slane %v3780_v55, 5  ;;  %v6364_v14 = vpop.f32.mrb[56].mxu0 }
 0x3a2   :  { %13600 = vst [vmem:[#allocation57_spill] sm:$0xff] %v10626_v49  ;;  %v4293_v12 = vrot.slane %v3785_v48, 4  ;;  %v3279_v19 = vrot.slane %v3215_v15, 4  ;;  %4549 = vrot.lane.b32.xlu0 %v10626_v49, %s6535_s17  ;;  %v10631_v21 = vsel %vm1240_vm3, %v4136_v42, %v4137_v59  ;;  %v4294_v11 = vrot.slane %v3788_v47, 5 }
 0x3a3   :  { %13601 = vst [vmem:[#allocation136_spill] sm:$0xff] %v10631_v21  ;;  %v3791_v51 = vor.u32 %v3790_v61, %v3787_v0  ;;  %3371 = vst.msk [vmem:[#allocation3 + $0x1e0] sm:$0xf0] %vm142_vm1, %v3280_v32  ;;  %4547 = vrot.lane.b32.xlu1 %v10631_v21, %s6535_s17  ;;  %v4292_v33 = vor.u32 %v4291_v1, %v4290_v58  ;;  %v3811_v55 = vshrl.u32 %v10469_v50, 16  ;;  %v3814_v15 = vshll.u32 %v10469_v50, 16  ;;  %v3094_v0 = vpop.f32.mrb[57].mxu0 }
 0x3a4   :  { %3372 = vst.msk [vmem:[#allocation3 + $0x1e8] sm:$0xf] %vm109_vm15, %v3280_v32  ;;  %v3819_v48 = vshrl.u32 %v10471_v37, 16  ;;  %3370 = vst.msk [vmem:[#allocation3 + $0x1d8] sm:$0xf] %vm109_vm15, %v3279_v19  ;;  %v4295_v4 = vor.u32 %v4294_v11, %v4293_v12  ;;  %v3822_v32 = vshll.u32 %v10471_v37, 16  ;;  %v3103_v58 = vadd.f32 %v10321_v31, %v6364_v14 }
 0x3a5   :  { %3369 = vst.msk [vmem:[#allocation3 + $0x1d0] sm:$0xf0] %vm142_vm1, %v3279_v19  ;;  %v10643_v47 = vsel %vm631_vm5, %v3783_v44, %v3791_v51  ;;  %v12762_v45 = vshrl.u32 %v10463_v22, 16  ;;  %v4304_v42 = vrot.slane %v3811_v55, 4  ;;  %v4305_v50 = vrot.slane %v3814_v15, 5  ;;  %v6365_v1 = vpop.f32.mrb[58].mxu0 }
 0x3a6   :  { %13602 = vst [vmem:[#allocation52_spill] sm:$0xff] %v10643_v47  ;;  %v4307_v59 = vrot.slane %v3819_v48, 4  ;;  %v3095_v61 = vadd.f32 %v10321_v31, %v3094_v0  ;;  %v10652_v51 = vsel %vm1337_vm4, %v4292_v33, %v4295_v4  ;;  %v4308_v44 = vrot.slane %v3822_v32, 5  ;;  %v3097_v12 = vpop.f32.mrb[59].mxu0 }
 0x3a7   :  { %v3106_v37 = vadd.f32 %v10321_v31, %v6365_v1  ;;  %v4306_v11 = vor.u32 %v4305_v50, %v4304_v42  ;;  %v3838_v14 = vrot.slane %v12762_v45, 3  ;;  %v12765_v49 = vshll.u32 %v10463_v22, 16 }
 0x3a8   :  { %v3098_v21 = vadd.f32 %v10321_v31, %v3097_v12  ;;  %v4162_v0 = vor.u32 %v10606_v38, %v10598_v34  ;;  %v4309_v47 = vor.u32 %v4308_v44, %v4307_v59  ;;  %v12767_v19 = vshrl.u32 %v10461_v54, 16 }
 0x3a9   :  { %v3183_v33 = vmax.f32 %v3103_v58, 0.0  ;;  %v3184_v4 = vmax.f32 %v3106_v37, 0.0  ;;  %v3841_v1 = vrot.slane %v12765_v49, 4  ;;  %v3181_v50 = vmax.f32 %v3095_v61, 0.0 }
 0x3aa   :  { %v3182_v46 = vmax.f32 %v3098_v21, 0.0  ;;  %v10665_v45 = vld [vmem:[#allocation3 + $0x1e0] sm:$0xff]  ;;  %v10670_v12 = vsel %vm1337_vm4, %v4306_v11, %v4309_v47  ;;  %v3830_v34 = vrot.slane %v12767_v19, 3  ;;  %v13604_v47 = vshll.u32 %v10461_v54, 16 }
 0x3ab   :  { %v10667_v20 = vld [vmem:[#allocation3 + $0x1e8] sm:$0xff]  ;;  %13603 = vst [vmem:[#allocation61_spill] sm:$0xff] %v10670_v12  ;;  %v3218_v38 = vpack.c.bf16 %v3184_v4, %v3183_v33  ;;  %v4145_v58 = vrot.slane %v10665_v45, 4  ;;  %v10678_v37 = vld [vmem:[#allocation3 + $0x1d8] sm:$0xff]  ;;  %v3842_v21 = vor.u32 %v3841_v1, %v3838_v14  ;;  %v3813_v4 = vrot.slane %v3811_v55, 3 }
 0x3ac   :  { %v4146_v59 = vrot.slane %v10667_v20, 4  ;;  %v10676_v44 = vld [vmem:[#allocation3 + $0x1d0] sm:$0xff]  ;;  %v3217_v61 = vpack.c.bf16 %v3182_v46, %v3181_v50  ;;  %v4143_v42 = vrot.slane %v10678_v37, 4  ;;  %v3833_v11 = vrot.slane %v13604_v47, 4 }
 0x3ad   :  { %v4142_v49 = vrot.slane %v10676_v44, 4  ;;  %v3282_v12 = vrot.slane %v3218_v38, 4  ;;  %v3816_v19 = vrot.slane %v3814_v15, 4  ;;  %v3821_v1 = vrot.slane %v3819_v48, 3 }
 0x3ae   :  { %v10685_v33 = vsel %vm1240_vm3, %v4145_v58, %v4146_v59  ;;  %v3281_v7 = vrot.slane %v3217_v61, 4  ;;  %v3834_v46 = vor.u32 %v3833_v11, %v3830_v34  ;;  %v3824_v38 = vrot.slane %v3822_v32, 4 }
 0x3af   :  { %13605 = vst [vmem:[#allocation65_spill] sm:$0xff] %v10685_v33  ;;  %4553 = vrot.lane.b32.xlu0 %v10685_v33, %s6535_s17  ;;  %v10690_v14 = vsel %vm1240_vm3, %v4142_v49, %v4143_v42  ;;  %3375 = vst.msk [vmem:[#allocation3 + $0x200] sm:$0xf0] %vm142_vm1, %v3282_v12  ;;  %v3817_v50 = vor.u32 %v3816_v19, %v3813_v4  ;;  %v12770_v55 = vshrl.u32 %v10541_v29, 16  ;;  %v12769_v15 = vshll.u32 %v10541_v29, 16 }
 0x3b0   :  { %13606 = vst [vmem:[#allocation97_spill] sm:$0xff] %v10690_v14  ;;  %3376 = vst.msk [vmem:[#allocation3 + $0x208] sm:$0xf] %vm109_vm15, %v3282_v12  ;;  %4551 = vrot.lane.b32.xlu1 %v10690_v14, %s6535_s17  ;;  %v10701_v49 = vsel %vm631_vm5, %v3834_v46, %v3842_v21  ;;  %v12772_v48 = vshrl.u32 %v10539_v52, 16  ;;  %v12771_v42 = vshll.u32 %v10539_v52, 16  ;;  %v12773_v12 = vshrl.u32 %v10547_v53, 16 }
 0x3b1   :  { %3373 = vst.msk [vmem:[#allocation3 + $0x1f0] sm:$0xf0] %vm142_vm1, %v3281_v7  ;;  %13607 = vst [vmem:[#allocation98_spill] sm:$0xff] %v10701_v49  ;;  %v3825_v34 = vor.u32 %v3824_v38, %v3821_v1  ;;  %v3872_v32 = vrot.slane %v12770_v55, 3  ;;  %v3875_v19 = vrot.slane %v12769_v15, 4  ;;  %v12774_v58 = vshll.u32 %v10547_v53, 16 }
 0x3b2   :  { %3374 = vst.msk [vmem:[#allocation3 + $0x1f8] sm:$0xf] %vm109_vm15, %v3281_v7  ;;  %v3864_v7 = vrot.slane %v12772_v48, 3  ;;  %v3867_v59 = vrot.slane %v12771_v42, 4  ;;  %v3847_v21 = vrot.slane %v12773_v12, 3  ;;  %v12776_v61 = vshrl.u32 %v10549_v5, 16 }
 0x3b3   :  { %v10719_v47 = vsel %vm631_vm5, %v3817_v50, %v3825_v34  ;;  %v3876_v11 = vor.u32 %v3875_v19, %v3872_v32  ;;  %v3850_v4 = vrot.slane %v12774_v58, 4  ;;  %v12775_v46 = vshll.u32 %v10549_v5, 16  ;;  %v6368_v1 = vpop.f32.mrb[60].mxu0 }
 0x3b4   :  { %13608 = vst [vmem:[#allocation62_spill] sm:$0xff] %v10719_v47  ;;  %v13609_v38 = vor.u32 %v10526_v9, %v10519_v41  ;;  %v3868_v55 = vor.u32 %v3867_v59, %v3864_v7  ;;  %v12781_v42 = vshrl.u32 %v10615_v57, 16  ;;  %v3119_v48 = vadd.f32 %v10321_v31, %v6368_v1  ;;  %v3110_v12 = vpop.f32.mrb[61].mxu0 }
 0x3b5   :  { %v3855_v50 = vrot.slane %v12776_v61, 3  ;;  %v3858_v34 = vrot.slane %v12775_v46, 4  ;;  %v3111_v19 = vadd.f32 %v10321_v31, %v3110_v12  ;;  %v6369_v58 = vpop.f32.mrb[62].mxu0  ;;  %v3851_v7 = vor.u32 %v3850_v4, %v3847_v21 }
 0x3b6   :  { %v4163_v15 = vsel %vm1337_vm4, %v13609_v38, %v4162_v0  ;;  %v10736_v41 = vld [vmem:[#allocation3 + $0x200] sm:$0xff]  ;;  %v10741_v0 = vsel %vm631_vm5, %v3868_v55, %v3876_v11  ;;  %v3906_v59 = vrot.slane %v12781_v42, 3  ;;  %v3187_v1 = vmax.f32 %v3119_v48, 0.0  ;;  %v3113_v46 = vpop.f32.mrb[63].mxu0 }
 0x3b7   :  { %v10738_v9 = vld [vmem:[#allocation3 + $0x208] sm:$0xff]  ;;  %13610 = vst [vmem:[#allocation138_spill] sm:$0xff] %v10741_v0  ;;  %v3122_v38 = vadd.f32 %v10321_v31, %v6369_v58  ;;  %v4151_v61 = vrot.slane %v10736_v41, 4  ;;  %v3185_v14 = vmax.f32 %v3111_v19, 0.0  ;;  %v3114_v55 = vadd.f32 %v10321_v31, %v3113_v46 }
 0x3b8   :  { %v4152_v12 = vrot.slane %v10738_v9, 4  ;;  %v10748_v32 = vld [vmem:[#allocation3 + $0x1f0] sm:$0xff]  ;;  %v3859_v58 = vor.u32 %v3858_v34, %v3855_v50  ;;  %v13612_v42 = vshll.u32 %v10615_v57, 16  ;;  %v12786_v31 = vshrl.u32 %v10613_v2, 16 }
 0x3b9   :  { %v10750_v33 = vld [vmem:[#allocation3 + $0x1f8] sm:$0xff]  ;;  %v4148_v21 = vrot.slane %v10748_v32, 4  ;;  %v3188_v4 = vmax.f32 %v3122_v38, 0.0  ;;  %v3186_v49 = vmax.f32 %v3114_v55, 0.0  ;;  %v12785_v46 = vshll.u32 %v10613_v2, 16 }
 0x3ba   :  { %v4149_v11 = vrot.slane %v10750_v33, 4  ;;  %v10756_v48 = vsel %vm1240_vm3, %v4151_v61, %v4152_v12  ;;  %v3909_v0 = vrot.slane %v13612_v42, 4  ;;  %v10770_v61 = vsel %vm631_vm5, %v3851_v7, %v3859_v58 }
 0x3bb   :  { %13611 = vst [vmem:[#allocation99_spill] sm:$0xff] %v10756_v48  ;;  %4557 = vrot.lane.b32.xlu0 %v10756_v48, %s6535_s17  ;;  %v3220_v47 = vpack.c.bf16 %v3188_v4, %v3187_v1  ;;  %v12798_v42 = vshrl.u32 %v10619_v43, 16  ;;  %v3219_v34 = vpack.c.bf16 %v3186_v49, %v3185_v14  ;;  %v3898_v38 = vrot.slane %v12786_v31, 3 }
 0x3bc   :  { %v10763_v19 = vsel %vm1240_vm3, %v4148_v21, %v4149_v11  ;;  %v3910_v50 = vor.u32 %v3909_v0, %v3906_v59  ;;  %v3901_v12 = vrot.slane %v12785_v46, 4  ;;  %v12797_v55 = vshll.u32 %v10619_v43, 16 }
 0x3bd   :  { %13613 = vst [vmem:[#allocation66_spill] sm:$0xff] %v10763_v19  ;;  %4555 = vrot.lane.b32.xlu1 %v10763_v19, %s6535_s17  ;;  %v3284_v21 = vrot.slane %v3220_v47, 4  ;;  %v3881_v1 = vrot.slane %v12798_v42, 3  ;;  %v12792_v11 = vshrl.u32 %v10621_v39, 16  ;;  %v12787_v7 = vshll.u32 %v10621_v39, 16 }
 0x3be   :  { %v3283_v0 = vrot.slane %v3219_v34, 4  ;;  %v3902_v14 = vor.u32 %v3901_v12, %v3898_v38  ;;  %v3884_v49 = vrot.slane %v12797_v55, 4  ;;  %v12789_v59 = vshrl.u32 %v10667_v20, 16 }
 0x3bf   :  { %4561 = vrot.lane.b32.xlu0 %v4163_v15, %s6537_s26  ;;  %3379 = vst.msk [vmem:[#allocation3 + $0x220] sm:$0xf0] %vm142_vm1, %v3284_v21  ;;  %v3889_v47 = vrot.slane %v12792_v11, 3  ;;  %v3892_v4 = vrot.slane %v12787_v7, 4  ;;  %v12788_v58 = vshll.u32 %v10667_v20, 16  ;;  %v12790_v15 = vshrl.u32 %v10665_v45, 16 }
 0x3c0   :  { %3380 = vst.msk [vmem:[#allocation3 + $0x228] sm:$0xf] %vm109_vm15, %v3284_v21  ;;  %3378 = vst.msk [vmem:[#allocation3 + $0x218] sm:$0xf] %vm109_vm15, %v3283_v0  ;;  %v10797_v34 = vsel %vm631_vm5, %v3902_v14, %v3910_v50  ;;  %v3885_v38 = vor.u32 %v3884_v49, %v3881_v1  ;;  %v3940_v12 = vrot.slane %v12789_v59, 3  ;;  %v12791_v21 = vshll.u32 %v10665_v45, 16 }
 0x3c1   :  { %3377 = vst.msk [vmem:[#allocation3 + $0x210] sm:$0xf0] %vm142_vm1, %v3283_v0  ;;  %13614 = vst [vmem:[#allocation63_spill] sm:$0xff] %v10797_v34  ;;  %v3893_v46 = vor.u32 %v3892_v4, %v3889_v47  ;;  %v3943_v31 = vrot.slane %v12788_v58, 4  ;;  %v3932_v7 = vrot.slane %v12790_v15, 3  ;;  %v12795_v1 = vshrl.u32 %v10676_v44, 16 }
 0x3c2   :  { %v3935_v50 = vrot.slane %v12791_v21, 4  ;;  %v12793_v0 = vshll.u32 %v10676_v44, 16  ;;  %v12794_v47 = vshrl.u32 %v10678_v37, 16  ;;  %v12796_v4 = vshll.u32 %v10678_v37, 16 }
 0x3c3   :  { %4565 = vrot.lane.b32.xlu0 %v9859_v16, %s6537_s26  ;;  %v10813_v14 = vsel %vm631_vm5, %v3885_v38, %v3893_v46  ;;  %v3944_v49 = vor.u32 %v3943_v31, %v3940_v12  ;;  %v3915_v59 = vrot.slane %v12795_v1, 3  ;;  %v12799_v21 = vshrl.u32 %v10738_v9, 16 }
 0x3c4   :  { %13615 = vst [vmem:[#allocation54_spill] sm:$0xff] %v10813_v14  ;;  %v3936_v58 = vor.u32 %v3935_v50, %v3932_v7  ;;  %v3918_v15 = vrot.slane %v12793_v0, 4  ;;  %v3923_v11 = vrot.slane %v12794_v47, 3  ;;  %v3926_v46 = vrot.slane %v12796_v4, 4 }
 0x3c5   :  { %v12802_v31 = vshll.u32 %v10738_v9, 16  ;;  %v12803_v38 = vshrl.u32 %v10736_v41, 16  ;;  %v3974_v50 = vrot.slane %v12799_v21, 3  ;;  %v12806_v0 = vshll.u32 %v10736_v41, 16 }
 0x3c6   :  { %v10831_v7 = vsel %vm631_vm5, %v3936_v58, %v3944_v49  ;;  %v3919_v12 = vor.u32 %v3918_v15, %v3915_v59  ;;  %v3927_v4 = vor.u32 %v3926_v46, %v3923_v11  ;;  %v12810_v58 = vshrl.u32 %v10748_v32, 16 }
 0x3c7   :  { %4569 = vrot.lane.b32.xlu0 %v9930_v28, %s6537_s26  ;;  %13616 = vst [vmem:[#allocation70_spill] sm:$0xff] %v10831_v7  ;;  %v10838_v1 = vld [vmem:[#allocation3 + $0x218] sm:$0xff]  ;;  %v3977_v55 = vrot.slane %v12802_v31, 4  ;;  %v3966_v42 = vrot.slane %v12803_v38, 3  ;;  %v3969_v49 = vrot.slane %v12806_v0, 4  ;;  %v12808_v21 = vshll.u32 %v10748_v32, 16 }
 0x3c8   :  { %v10836_v47 = vld [vmem:[#allocation3 + $0x210] sm:$0xff]  ;;  %v4155_v15 = vrot.slane %v10838_v1, 4  ;;  %v10851_v48 = vsel %vm631_vm5, %v3919_v12, %v3927_v4  ;;  %v3949_v46 = vrot.slane %v12810_v58, 3  ;;  %v12809_v31 = vshrl.u32 %v10750_v33, 16 }
 0x3c9   :  { %v4154_v59 = vrot.slane %v10836_v47, 4  ;;  %13617 = vst [vmem:[#allocation68_spill] sm:$0xff] %v10851_v48  ;;  %v3978_v11 = vor.u32 %v3977_v55, %v3974_v50  ;;  %v3970_v19 = vor.u32 %v3969_v49, %v3966_v42  ;;  %v3952_v0 = vrot.slane %v12808_v21, 4  ;;  %v13713_v48 = vld [vmem:[#allocation144_spill] sm:$0xff] }
 0x3ca   :  { %v12813_v7 = vshll.u32 %v10750_v33, 16  ;;  %v3957_v55 = vrot.slane %v12809_v31, 3  ;;  %v12811_v4 = vshrl.u32 %v10836_v47, 16  ;;  %v12812_v12 = vshll.u32 %v10836_v47, 16 }
 0x3cb   :  { %4573 = vrot.lane.b32.xlu0 %v10026_v3, %s6537_s26  ;;  %v10859_v38 = vsel %vm1240_vm3, %v4154_v59, %v4155_v15  ;;  %v12814_v50 = vshrl.u32 %v10838_v1, 16  ;;  %v10872_v59 = vsel %vm631_vm5, %v3970_v19, %v3978_v11  ;;  %v3953_v42 = vor.u32 %v3952_v0, %v3949_v46 }
 0x3cc   :  { %13618 = vst [vmem:[#allocation71_spill] sm:$0xff] %v10859_v38  ;;  %4559 = vrot.lane.b32.xlu1 %v10859_v38, %s6535_s17  ;;  %13619 = vst [vmem:[#allocation7_spill] sm:$0xff] %v10872_v59  ;;  %v3960_v15 = vrot.slane %v12813_v7, 4  ;;  %v12818_v49 = vshll.u32 %v10838_v1, 16  ;;  %v3983_v21 = vrot.slane %v12811_v4, 3  ;;  %v3986_v31 = vrot.slane %v12812_v12, 4 }
 0x3cd   :  { %v3991_v58 = vrot.slane %v12814_v50, 3  ;;  %v13621_v12 = vshrl.u32 %v9980_v10, 16  ;;  %v13622_v50 = vshll.u32 %v9980_v10, 16  ;;  %v13623_v59 = vshrl.u32 %v9982_v25, 16 }
 0x3ce   :  { %v3961_v19 = vor.u32 %v3960_v15, %v3957_v55  ;;  %v3994_v0 = vrot.slane %v12818_v49, 4  ;;  %v3987_v11 = vor.u32 %v3986_v31, %v3983_v21  ;;  %v13624_v15 = vshll.u32 %v9982_v25, 16 }
 0x3cf   :  { %4577 = vrot.lane.b32.xlu0 %v10161_v62, %s6537_s26  ;;  %v4269_v7 = vrot.slane %v13621_v12, 4  ;;  %v4270_v38 = vrot.slane %v13622_v50, 5  ;;  %v4272_v55 = vrot.slane %v13623_v59, 4  ;;  %v13626_v31 = vshrl.u32 %v10461_v54, 16 }
 0x3d0   :  { %4563 = vrot.lane.b32.xlu1 %v10110_v8, %s6537_s26  ;;  %v10890_v46 = vsel %vm631_vm5, %v3953_v42, %v3961_v19  ;;  %v3995_v4 = vor.u32 %v3994_v0, %v3991_v58  ;;  %v4273_v49 = vrot.slane %v13624_v15, 5  ;;  %v13627_v10 = vshll.u32 %v10461_v54, 16 }
 0x3d1   :  { %13620 = vst [vmem:[#allocation6_spill] sm:$0xff] %v10890_v46  ;;  %v4311_v58 = vrot.slane %v13626_v31, 4  ;;  %v4271_v50 = vor.u32 %v4270_v38, %v4269_v7  ;;  %v13628_v25 = vshrl.u32 %v10463_v22, 16  ;;  %v13629_v19 = vshll.u32 %v10463_v22, 16 }
 0x3d2   :  { %v10903_v21 = vsel %vm631_vm5, %v3987_v11, %v3995_v4  ;;  %v4312_v12 = vrot.slane %v13627_v10, 5  ;;  %v4274_v59 = vor.u32 %v4273_v49, %v4272_v55  ;;  %v13630_v11 = vshrl.u32 %v10547_v53, 16 }
 0x3d3   :  { %4581 = vrot.lane.b32.xlu0 %v10261_v63, %s6537_s26  ;;  %13625 = vst [vmem:[#allocation123_spill] sm:$0xff] %v10903_v21  ;;  %v4314_v42 = vrot.slane %v13628_v25, 4  ;;  %v4315_v0 = vrot.slane %v13629_v19, 5  ;;  %v13631_v31 = vshll.u32 %v10547_v53, 16  ;;  %v13632_v54 = vshrl.u32 %v10549_v5, 16 }
 0x3d4   :  { %4567 = vrot.lane.b32.xlu1 %v10285_v27, %s6537_s26  ;;  %v4313_v4 = vor.u32 %v4312_v12, %v4311_v58  ;;  %v4318_v15 = vrot.slane %v13630_v11, 4  ;;  %v13633_v22 = vshll.u32 %v10549_v5, 16  ;;  %v13634_v55 = vshrl.u32 %v10539_v52, 16 }
 0x3d5   :  { %v4319_v21 = vrot.slane %v13631_v31, 5  ;;  %v4321_v38 = vrot.slane %v13632_v54, 4  ;;  %v4316_v7 = vor.u32 %v4315_v0, %v4314_v42  ;;  %v13635_v12 = vshll.u32 %v10539_v52, 16 }
 0x3d6   :  { %v4322_v49 = vrot.slane %v13633_v22, 5  ;;  %v4325_v10 = vrot.slane %v13634_v55, 4  ;;  %v13636_v53 = vshrl.u32 %v10541_v29, 16  ;;  %v13637_v11 = vshll.u32 %v10541_v29, 16 }
 0x3d7   :  { %4585 = vrot.lane.b32.xlu0 %v10301_v35, %s6537_s26  ;;  %v4320_v58 = vor.u32 %v4319_v21, %v4318_v15  ;;  %v4326_v25 = vrot.slane %v13635_v12, 5  ;;  %v10936_v54 = vsel %vm1337_vm4, %v4313_v4, %v4316_v7  ;;  %v13638_v5 = vshrl.u32 %v10619_v43, 16 }
 0x3d8   :  { %4571 = vrot.lane.b32.xlu1 %v10332_v36, %s6537_s26  ;;  %v4328_v19 = vrot.slane %v13636_v53, 4  ;;  %v4329_v31 = vrot.slane %v13637_v11, 5  ;;  %v4323_v42 = vor.u32 %v4322_v49, %v4321_v38  ;;  %v13639_v22 = vshll.u32 %v10619_v43, 16 }
 0x3d9   :  { %v4332_v0 = vrot.slane %v13638_v5, 4  ;;  %v4275_v52 = vsel %vm1337_vm4, %v4271_v50, %v4274_v59  ;;  %v4327_v21 = vor.u32 %v4326_v25, %v4325_v10  ;;  %v13640_v29 = vshrl.u32 %v10621_v39, 16 }
 0x3da   :  { %v4333_v55 = vrot.slane %v13639_v22, 5  ;;  %v4330_v15 = vor.u32 %v4329_v31, %v4328_v19  ;;  %v10950_v4 = vsel %vm1337_vm4, %v4320_v58, %v4323_v42  ;;  %v13641_v43 = vshll.u32 %v10621_v39, 16 }
 0x3db   :  { %4589 = vrot.lane.b32.xlu0 %v10364_v13, %s6537_s26  ;;  %v4335_v12 = vrot.slane %v13640_v29, 4  ;;  %v13642_v49 = vshrl.u32 %v10613_v2, 16  ;;  %v13644_v59 = vshll.u32 %v10613_v2, 16  ;;  %v13645_v25 = vshrl.u32 %v10615_v57, 16 }
 0x3dc   :  { %4575 = vrot.lane.b32.xlu1 %v10387_v30, %s6537_s26  ;;  %v4334_v38 = vor.u32 %v4333_v55, %v4332_v0  ;;  %v4336_v7 = vrot.slane %v13641_v43, 5  ;;  %v10957_v50 = vsel %vm1337_vm4, %v4327_v21, %v4330_v15  ;;  %v13646_v11 = vshll.u32 %v10615_v57, 16 }
 0x3dd   :  { %v4339_v53 = vrot.slane %v13642_v49, 4  ;;  %13643 = vst [vmem:[#allocation8_spill] sm:$0xff] %v10957_v50  ;;  %v4340_v10 = vrot.slane %v13644_v59, 5  ;;  %v4342_v19 = vrot.slane %v13645_v25, 4  ;;  %v13647_v42 = vshrl.u32 %v10676_v44, 16  ;;  %v13731_v50 = vld [vmem:[#allocation53_spill] sm:$0xff] }
 0x3de   :  { %v4343_v58 = vrot.slane %v13646_v11, 5  ;;  %v4337_v31 = vor.u32 %v4336_v7, %v4335_v12  ;;  %v13648_v5 = vshll.u32 %v10676_v44, 16  ;;  %v13649_v22 = vshrl.u32 %v10678_v37, 16 }
 0x3df   :  { %v4346_v39 = vrot.slane %v13647_v42, 4  ;;  %4593 = vrot.lane.b32.xlu0 %v4275_v52, %s6537_s26  ;;  %v4341_v2 = vor.u32 %v4340_v10, %v4339_v53  ;;  %v13650_v15 = vshll.u32 %v10678_v37, 16  ;;  %v13651_v57 = vshrl.u32 %v10665_v45, 16 }
 0x3e0   :  { %v4347_v0 = vrot.slane %v13648_v5, 5  ;;  %v4349_v55 = vrot.slane %v13649_v22, 4  ;;  %v4344_v21 = vor.u32 %v4343_v58, %v4342_v19  ;;  %4579 = vrot.lane.b32.xlu1 %v10411_v56, %s6537_s26  ;;  %v10979_v12 = vsel %vm1337_vm4, %v4334_v38, %v4337_v31 }
 0x3e1   :  { %v4350_v29 = vrot.slane %v13650_v15, 5  ;;  %v4353_v43 = vrot.slane %v13651_v57, 4  ;;  %13652 = vst [vmem:[#allocation139_spill] sm:$0xff] %v10979_v12  ;;  %v13653_v7 = vshll.u32 %v10665_v45, 16  ;;  %v13654_v52 = vshrl.u32 %v10667_v20, 16 }
 0x3e2   :  { %v4348_v44 = vor.u32 %v4347_v0, %v4346_v39  ;;  %v10986_v59 = vsel %vm1337_vm4, %v4341_v2, %v4344_v21  ;;  %v13656_v10 = vshll.u32 %v10667_v20, 16  ;;  %v13657_v19 = vshrl.u32 %v10748_v32, 16 }
 0x3e3   :  { %v4354_v49 = vrot.slane %v13653_v7, 5  ;;  %v4356_v53 = vrot.slane %v13654_v52, 4  ;;  %13655 = vst [vmem:[#allocation124_spill] sm:$0xff] %v10986_v59  ;;  %v4351_v37 = vor.u32 %v4350_v29, %v4349_v55  ;;  %v13658_v38 = vshll.u32 %v10748_v32, 16  ;;  %4597 = vrot.lane.b32.xlu0 %v10455_v26, %s6537_s26  ;;  %v13716_v59 = vld [vmem:[#allocation48_spill] sm:$0xff] }
 0x3e4   :  { %v4357_v25 = vrot.slane %v13656_v10, 5  ;;  %v4360_v11 = vrot.slane %v13657_v19, 4  ;;  %v13659_v45 = vshrl.u32 %v10750_v33, 16  ;;  %v13660_v39 = vshll.u32 %v10750_v33, 16  ;;  %4583 = vrot.lane.b32.xlu1 %v10458_v17, %s6537_s26 }
 0x3e5   :  { %v4355_v58 = vor.u32 %v4354_v49, %v4353_v43  ;;  %v4361_v31 = vrot.slane %v13658_v38, 5  ;;  %v11001_v0 = vsel %vm1337_vm4, %v4348_v44, %v4351_v37  ;;  %v13662_v22 = vshrl.u32 %v10736_v41, 16 }
 0x3e6   :  { %v4363_v42 = vrot.slane %v13659_v45, 4  ;;  %v4364_v5 = vrot.slane %v13660_v39, 5  ;;  %13661 = vst [vmem:[#allocation15_spill] sm:$0xff] %v11001_v0  ;;  %v4358_v20 = vor.u32 %v4357_v25, %v4356_v53  ;;  %v13663_v2 = vshll.u32 %v10736_v41, 16  ;;  %v11041_v45 = vpop.permute.xlu0 %4497  ;;  %v6527_v39 = vld [vmem:[%s12304_s3 + $0x8] sm:$0xff]  }
 0x3e7   :  { %v4367_v55 = vrot.slane %v13662_v22, 4  ;;  %v4362_v21 = vor.u32 %v4361_v31, %v4360_v11  ;;  %v13664_v33 = vshrl.u32 %v10738_v9, 16  ;;  %v13666_v44 = vshll.u32 %v10738_v9, 16  ;;  %4601 = vrot.lane.b32.xlu0 %v10535_v40, %s6537_s26 }
 0x3e8   :  { %v4368_v32 = vrot.slane %v13663_v2, 5  ;;  %v4365_v15 = vor.u32 %v4364_v5, %v4363_v42  ;;  %v11012_v57 = vsel %vm1337_vm4, %v4355_v58, %v4358_v20  ;;  %v13667_v49 = vshrl.u32 %v10836_v47, 16  ;;  %4587 = vrot.lane.b32.xlu1 %v10556_v23, %s6537_s26  ;;  %v13674_v5 = vld [vmem:[#allocation142_spill] sm:$0xff]  ;;  %v13675_v20 = vld [vmem:[#allocation61_spill] sm:$0xff]  ;;  %v6529_v2 = vld [vmem:[%s12304_s3 + $0x18] sm:$0xff]  }
 0x3e9   :  { %v4370_v29 = vrot.slane %v13664_v33, 4  ;;  %13665 = vst [vmem:[#allocation56_spill] sm:$0xff] %v11012_v57  ;;  %v4371_v7 = vrot.slane %v13666_v44, 5  ;;  %v13669_v53 = vshll.u32 %v10836_v47, 16  ;;  %v13670_v10 = vshrl.u32 %v10838_v1, 16  ;;  %v11088_v33 = vpop.permute.xlu1 %4499 }
 0x3ea   :  { %v4369_v43 = vor.u32 %v4368_v32, %v4367_v55  ;;  %v4374_v52 = vrot.slane %v13667_v49, 4  ;;  %v11019_v41 = vsel %vm1337_vm4, %v4362_v21, %v4365_v15  ;;  %v13671_v11 = vshll.u32 %v10838_v1, 16  ;;  %v6526_v1 = vld [vmem:[%s12304_s3] sm:$0xff]   ;;  %v11050_v42 = vpop.permute.xlu0 %4501  ;;  %v13676_v55 = vld [vmem:[#allocation37_spill] sm:$0xff] }
 0x3eb   :  { %13668 = vst [vmem:[#allocation126_spill] sm:$0xff] %v11019_v41  ;;  %v4375_v37 = vrot.slane %v13669_v53, 5  ;;  %v4377_v25 = vrot.slane %v13670_v10, 4  ;;  %v4372_v19 = vor.u32 %v4371_v7, %v4370_v29  ;;  %4625 = vrot.lane.b32.xlu0 %v9818_v60, %s6539_s9  ;;  %6370 = vmatprep.subr.bf16.mxu1 %v6526_v1  ;;  %v6530_v21 = vld [vmem:[%s12304_s3 + $0x20] ss:$0 sps:$4 sm:$0xff]   ;;  %v13678_v49 = vld [vmem:[#allocation41_spill] sm:$0xff] }
 0x3ec   :  { %v4378_v9 = vrot.slane %v13671_v11, 5  ;;  %4591 = vrot.lane.b32.xlu1 %v10590_v6, %s6537_s26  ;;  %6371 = vmatpush3.bf16.msra.mxu1 %v6526_v1  ;;  %v5667_v15 = vsel %vm1240_vm3, %v6530_v21, 0  ;;  %v13681_v10 = vld [vmem:[#allocation43_spill] sm:$0xff]  ;;  %v13708_v41 = vld [vmem:[#allocation69_spill] sm:$0xff] }
 0x3ed   :  { %v4376_v58 = vor.u32 %v4375_v37, %v4374_v52  ;;  %v11032_v38 = vsel %vm1337_vm4, %v4369_v43, %v4372_v19  ;;  %6372 = vmatprep.subr.bf16.mxu1 %v6527_v39  ;;  %v13677_v43 = vld [vmem:[#allocation90_spill] sm:$0xff]  ;;  %v11096_v44 = vpop.permute.xlu1 %4503  ;;  %v13682_v19 = vld [vmem:[#allocation47_spill] sm:$0xff] }
 0x3ee   :  { %13672 = vst [vmem:[#allocation67_spill] sm:$0xff] %v11032_v38  ;;  %v4379_v31 = vor.u32 %v4378_v9, %v4377_v25 }
 0x3ef   :  { %4689 = vrot.lane.b32.xlu0 %v9786_v18, %s6541_s1  ;;  %v11059_v18 = vpop.permute.xlu0 %4505 }
 0x3f0   :  { %v11037_v47 = vsel %vm1337_vm4, %v4376_v58, %v4379_v31  ;;  %4595 = vrot.lane.b32.xlu1 %v10601_v24, %s6537_s26  ;;  %6373 = vmatpush3.bf16.msra.mxu1 %v6527_v39  ;;  %v13686_v31 = vld [vmem:[#allocation133_spill] sm:$0xff] }
 0x3f1   :  { %13673 = vst [vmem:[#allocation122_spill] sm:$0xff] %v11037_v47  ;;  %v11104_v52 = vpop.permute.xlu1 %4507 }
 0x3f3   :  { %4753 = vrot.lane.b32.xlu0 %v10110_v8, %s6542_s16  ;;  %v6528_v8 = vld [vmem:[%s12304_s3 + $0x10] sm:$0xff]   ;;  %v11068_v22 = vpop.permute.xlu0 %4509 }
 0x3f4   :  { %4599 = vrot.lane.b32.xlu1 %v10652_v51, %s6537_s26  ;;  %6374 = vmatprep.subr.bf16.mxu1 %v6528_v8 }
 0x3f5   :  { %6375 = vmatpush3.bf16.msra.mxu1 %v6528_v8  ;;  %v13689_v8 = vld [vmem:[#allocation40_spill] sm:$0xff] }
 0x3f6   :  { %6376 = vmatprep.subr.bf16.mxu1 %v6529_v2 }
 0x3f7   :  { %4817 = vrot.lane.b32.xlu0 %v13674_v5, %s6543_s20  ;;  %v11077_v32 = vpop.permute.xlu0 %4513 }
 0x3f8   :  { %4603 = vrot.lane.b32.xlu1 %v13675_v20, %s6537_s26 }
 0x3f9   :  { %6377 = vmatpush3.bf16.msra.mxu1 %v6529_v2 }
 0x3fa   :  { %6445 = vmatprep.subr.msk.bf16.mxu1 %vm1240_vm3, %v6530_v21 }
 0x3fb   :  { %4881 = vrot.lane.b32.xlu0 %v13676_v55, %s6544_s22  ;;  %v11090_v29 = vpop.permute.xlu0 %4517 }
 0x3fc   :  { %4627 = vrot.lane.b32.xlu1 %v13674_v5, %s6539_s9 }
 0x3fd   :  { %6379 = vmatpush3.bf16.msra.mxu1 %v5667_v15  ;;  %v13694_v15 = vld [vmem:[#allocation120_spill] sm:$0xff] }
 0x3ff   :  { %4945 = vrot.lane.b32.xlu0 %v9859_v16, %s6545_s25  ;;  %v11098_v7 = vpop.permute.xlu0 %4521 }
 0x400   :  { %4691 = vrot.lane.b32.xlu1 %v13676_v55, %s6541_s1 }
 0x403   :  { %4629 = vrot.lane.b32.xlu0 %v13677_v43, %s6539_s9  ;;  %v11106_v53 = vpop.permute.xlu0 %4525 }
 0x404   :  { %4755 = vrot.lane.b32.xlu1 %v9859_v16, %s6542_s16  ;;  %13679 = vst [vmem:[#allocation9_spill] sm:$0xff] %v11106_v53  ;;  %v11112_v16 = vpop.permute.xlu1 %4511 }
 0x407   :  { %4693 = vrot.lane.b32.xlu0 %v13678_v49, %s6541_s1  ;;  %v11114_v37 = vpop.permute.xlu0 %4529 }
 0x408   :  { %4819 = vrot.lane.b32.xlu1 %v13677_v43, %s6543_s20  ;;  %13680 = vst [vmem:[#allocation21_spill] sm:$0xff] %v11114_v37  ;;  %v11120_v25 = vpop.permute.xlu1 %4515 }
 0x40b   :  { %4757 = vrot.lane.b32.xlu0 %v10285_v27, %s6542_s16  ;;  %v11126_v11 = vpop.permute.xlu0 %4533 }
 0x40c   :  { %4883 = vrot.lane.b32.xlu1 %v13678_v49, %s6544_s22  ;;  %13683 = vst [vmem:[#allocation73_spill] sm:$0xff] %v11126_v11  ;;  %v11128_v9 = vpop.permute.xlu1 %4519  ;;  %v13710_v11 = vld [vmem:[#allocation38_spill] sm:$0xff] }
 0x40f   :  { %4821 = vrot.lane.b32.xlu0 %v13681_v10, %s6543_s20  ;;  %v11134_v58 = vpop.permute.xlu0 %4537 }
 0x410   :  { %4947 = vrot.lane.b32.xlu1 %v10285_v27, %s6545_s25  ;;  %13684 = vst [vmem:[#allocation14_spill] sm:$0xff] %v11134_v58  ;;  %v11136_v27 = vpop.permute.xlu1 %4523 }
 0x411   :  { %13685 = vst [vmem:[#allocation10_spill] sm:$0xff] %v11136_v27 }
 0x413   :  { %4885 = vrot.lane.b32.xlu0 %v13682_v19, %s6544_s22  ;;  %v11142_v1 = vpop.permute.xlu0 %4541 }
 0x414   :  { %4631 = vrot.lane.b32.xlu1 %v13681_v10, %s6539_s9  ;;  %13687 = vst [vmem:[#allocation13_spill] sm:$0xff] %v11142_v1  ;;  %v11144_v39 = vpop.permute.xlu1 %4527  ;;  %v13701_v1 = vld [vmem:[#allocation46_spill] sm:$0xff] }
 0x415   :  { %13688 = vst [vmem:[#allocation127_spill] sm:$0xff] %v11144_v39 }
 0x417   :  { %4949 = vrot.lane.b32.xlu0 %v9930_v28, %s6545_s25  ;;  %v11150_v55 = vpop.permute.xlu0 %4545 }
 0x418   :  { %4695 = vrot.lane.b32.xlu1 %v13682_v19, %s6541_s1  ;;  %13690 = vst [vmem:[#allocation128_spill] sm:$0xff] %v11150_v55  ;;  %v11152_v2 = vpop.permute.xlu1 %4531  ;;  %v13697_v55 = vld [vmem:[#allocation17_spill] sm:$0xff] }
 0x419   :  { %13691 = vst [vmem:[#allocation55_spill] sm:$0xff] %v11152_v2 }
 0x41b   :  { %4633 = vrot.lane.b32.xlu0 %v13686_v31, %s6539_s9 }
 0x41c   :  { %4759 = vrot.lane.b32.xlu1 %v9930_v28, %s6542_s16  ;;  %v11158_v28 = vpop.permute.xlu0 %4549  ;;  %v11160_v21 = vpop.permute.xlu1 %4535 }
 0x41d   :  { %13692 = vst [vmem:[#allocation72_spill] sm:$0xff] %v11158_v28  ;;  %13693 = vst [vmem:[#allocation129_spill] sm:$0xff] %v11160_v21 }
 0x41f   :  { %4697 = vrot.lane.b32.xlu0 %v13689_v8, %s6541_s1 }
 0x420   :  { %4823 = vrot.lane.b32.xlu1 %v13686_v31, %s6543_s20  ;;  %v11168_v19 = vpop.permute.xlu1 %4539 }
 0x421   :  { %v11166_v49 = vpop.permute.xlu0 %4553  ;;  %13696 = vst [vmem:[#allocation148_spill] sm:$0xff] %v11168_v19 }
 0x422   :  { %13695 = vst [vmem:[#allocation170_spill] sm:$0xff] %v11166_v49 }
 0x423   :  { %4761 = vrot.lane.b32.xlu0 %v10332_v36, %s6542_s16 }
 0x424   :  { %4887 = vrot.lane.b32.xlu1 %v13689_v8, %s6544_s22  ;;  %v11176_v28 = vpop.permute.xlu1 %4543 }
 0x425   :  { %13699 = vst [vmem:[#allocation100_spill] sm:$0xff] %v11176_v28  ;;  %v13703_v28 = vld [vmem:[#allocation147_spill] sm:$0xff] }
 0x427   :  { %4825 = vrot.lane.b32.xlu0 %v13694_v15, %s6543_s20 }
 0x428   :  { %4951 = vrot.lane.b32.xlu1 %v10332_v36, %s6545_s25  ;;  %v11182_v49 = vpop.permute.xlu1 %4547 }
 0x429   :  { %13700 = vst [vmem:[#allocation110_spill] sm:$0xff] %v11182_v49 }
 0x42b   :  { %4889 = vrot.lane.b32.xlu0 %v13697_v55, %s6544_s22 }
 0x42c   :  { %4635 = vrot.lane.b32.xlu1 %v13694_v15, %s6539_s9 }
 0x42d   :  { %v11174_v8 = vpop.permute.xlu0 %4557 }
 0x42e   :  { %13698 = vst [vmem:[#allocation168_spill] sm:$0xff] %v11174_v8  ;;  %v11190_v8 = vpop.permute.xlu1 %4551 }
 0x42f   :  { %4953 = vrot.lane.b32.xlu0 %v10026_v3, %s6545_s25  ;;  %13702 = vst [vmem:[#allocation130_spill] sm:$0xff] %v11190_v8  ;;  %v13706_v8 = vld [vmem:[#allocation42_spill] sm:$0xff] }
 0x430   :  { %4699 = vrot.lane.b32.xlu1 %v13697_v55, %s6541_s1 }
 0x431   :  { %v4562_v36 = vpop.permute.xlu0 %4561 }
 0x432   :  { %v11198_v19 = vpop.permute.xlu1 %4555 }
 0x433   :  { %4637 = vrot.lane.b32.xlu0 %v13701_v1, %s6539_s9  ;;  %13704 = vst [vmem:[#allocation64_spill] sm:$0xff] %v11198_v19  ;;  %v13707_v19 = vld [vmem:[#allocation89_spill] sm:$0xff] }
 0x434   :  { %4763 = vrot.lane.b32.xlu1 %v10026_v3, %s6542_s16 }
 0x435   :  { %v11188_v47 = vpop.permute.xlu0 %4565 }
 0x437   :  { %4701 = vrot.lane.b32.xlu0 %v13703_v28, %s6541_s1 }
 0x438   :  { %4827 = vrot.lane.b32.xlu1 %v13701_v1, %s6543_s20 }
 0x439   :  { %v11196_v55 = vpop.permute.xlu0 %4569 }
 0x43b   :  { %4765 = vrot.lane.b32.xlu0 %v10387_v30, %s6542_s16 }
 0x43c   :  { %4891 = vrot.lane.b32.xlu1 %v13703_v28, %s6544_s22 }
 0x43d   :  { %v11204_v3 = vpop.permute.xlu0 %4573 }
 0x43e   :  { %v11206_v49 = vpop.permute.xlu1 %4559 }
 0x43f   :  { %13705 = vst [vmem:[#allocation101_spill] sm:$0xff] %v11206_v49  ;;  %4829 = vrot.lane.b32.xlu0 %v13706_v8, %s6543_s20 }
 0x440   :  { %4955 = vrot.lane.b32.xlu1 %v10387_v30, %s6545_s25 }
 0x441   :  { %v11212_v38 = vpop.permute.xlu0 %4577 }
 0x442   :  { %v11214_v58 = vpop.permute.xlu1 %4563 }
 0x443   :  { %4893 = vrot.lane.b32.xlu0 %v13707_v19, %s6544_s22 }
 0x444   :  { %4639 = vrot.lane.b32.xlu1 %v13706_v8, %s6539_s9 }
 0x445   :  { %v11220_v28 = vpop.permute.xlu0 %4581 }
 0x446   :  { %v11222_v21 = vpop.permute.xlu1 %4567 }
 0x447   :  { %4957 = vrot.lane.b32.xlu0 %v10161_v62, %s6545_s25 }
 0x448   :  { %4703 = vrot.lane.b32.xlu1 %v13707_v19, %s6541_s1 }
 0x449   :  { %v11228_v30 = vpop.permute.xlu0 %4585 }
 0x44a   :  { %v11230_v49 = vpop.permute.xlu1 %4571 }
 0x44b   :  { %4641 = vrot.lane.b32.xlu0 %v13708_v41, %s6539_s9 }
 0x44c   :  { %4767 = vrot.lane.b32.xlu1 %v10161_v62, %s6542_s16 }
 0x44d   :  { %v11236_v46 = vpop.permute.xlu0 %4589 }
 0x44e   :  { %13709 = vst [vmem:[#allocation114_spill] sm:$0xff] %v11236_v46  ;;  %v11238_v57 = vpop.permute.xlu1 %4575 }
 0x44f   :  { %4705 = vrot.lane.b32.xlu0 %v13710_v11, %s6541_s1 }
 0x450   :  { %4831 = vrot.lane.b32.xlu1 %v13708_v41, %s6543_s20 }
 0x451   :  { %v11244_v19 = vpop.permute.xlu0 %4593 }
 0x452   :  { %13711 = vst [vmem:[#allocation11_spill] sm:$0xff] %v11244_v19  ;;  %v11246_v2 = vpop.permute.xlu1 %4579 }
 0x453   :  { %4769 = vrot.lane.b32.xlu0 %v10411_v56, %s6542_s16 }
 0x454   :  { %4895 = vrot.lane.b32.xlu1 %v13710_v11, %s6544_s22 }
 0x455   :  { %v11252_v62 = vpop.permute.xlu0 %4597 }
 0x456   :  { %13712 = vst [vmem:[#allocation151_spill] sm:$0xff] %v11252_v62  ;;  %v11254_v0 = vpop.permute.xlu1 %4583 }
 0x457   :  { %4833 = vrot.lane.b32.xlu0 %v13713_v48, %s6543_s20 }
 0x458   :  { %4959 = vrot.lane.b32.xlu1 %v10411_v56, %s6545_s25 }
 0x459   :  { %v11260_v37 = vpop.permute.xlu0 %4601 }
 0x45a   :  { %13714 = vst [vmem:[#allocation25_spill] sm:$0xff] %v11260_v37  ;;  %v11262_v19 = vpop.permute.xlu1 %4587  ;;  %v13719_v37 = vld [vmem:[#allocation44_spill] sm:$0xff] }
 0x45b   :  { %13715 = vst [vmem:[#allocation131_spill] sm:$0xff] %v11262_v19  ;;  %4897 = vrot.lane.b32.xlu0 %v13716_v59, %s6544_s22 }
 0x45c   :  { %4643 = vrot.lane.b32.xlu1 %v13713_v48, %s6539_s9 }
 0x45d   :  { %v4626_v11 = vpop.permute.xlu0 %4625 }
 0x45e   :  { %v11268_v62 = vpop.permute.xlu1 %4591 }
 0x45f   :  { %13717 = vst [vmem:[#allocation75_spill] sm:$0xff] %v11268_v62  ;;  %4961 = vrot.lane.b32.xlu0 %v10261_v63, %s6545_s25  ;;  %v13721_v62 = vld [vmem:[#allocation49_spill] sm:$0xff] }
 0x460   :  { %4707 = vrot.lane.b32.xlu1 %v13716_v59, %s6541_s1 }
 0x461   :  { %v4690_v56 = vpop.permute.xlu0 %4689 }
 0x462   :  { %v11274_v39 = vpop.permute.xlu1 %4595 }
 0x463   :  { %13718 = vst [vmem:[#allocation149_spill] sm:$0xff] %v11274_v39  ;;  %4645 = vrot.lane.b32.xlu0 %v13719_v37, %s6539_s9  ;;  %v13723_v39 = vld [vmem:[#allocation87_spill] sm:$0xff] }
 0x464   :  { %4771 = vrot.lane.b32.xlu1 %v10261_v63, %s6542_s16  ;;  %v5011_v14 = vsel %vm98_vm6, %v13723_v39, %v11041_v45  ;;  %v13724_v45 = vld [vmem:[#allocation91_spill] sm:$0xff] }
 0x465   :  { %v4754_v34 = vpop.permute.xlu0 %4753  ;;  %v5106_v63 = vsel %vm2415_vm9, %v5011_v14, %v4562_v36 }
 0x466   :  { %v11280_v12 = vpop.permute.xlu1 %4599 }
 0x467   :  { %13720 = vst [vmem:[#allocation169_spill] sm:$0xff] %v11280_v12  ;;  %4709 = vrot.lane.b32.xlu0 %v13721_v62, %s6541_s1  ;;  %v5170_v12 = vsel %vm2545_vm11, %v5106_v63, %v4626_v11  ;;  %v13725_v11 = vld [vmem:[#allocation45_spill] sm:$0xff] }
 0x468   :  { %4835 = vrot.lane.b32.xlu1 %v13719_v37, %s6543_s20  ;;  %v5234_v19 = vsel %vm2675_vm13, %v5170_v12, %v4690_v56 }
 0x469   :  { %v4818_v46 = vpop.permute.xlu0 %4817  ;;  %v5299_v27 = vsel %vm5297_vm0, %v5234_v19, %v4754_v34  ;;  %v5014_v19 = vsel %vm98_vm6, %v9818_v60, %v11088_v33 }
 0x46a   :  { %v11286_v59 = vpop.permute.xlu1 %4603  ;;  %v5364_v14 = vsel %vm5362_vm2, %v5299_v27, %v4818_v46  ;;  %v13726_v27 = vld [vmem:[#allocation88_spill] sm:$0xff]  ;;  %v5108_v56 = vsel %vm2415_vm9, %v5014_v19, %v11214_v58 }
 0x46b   :  { %13722 = vst [vmem:[#allocation16_spill] sm:$0xff] %v11286_v59  ;;  %4773 = vrot.lane.b32.xlu0 %v10458_v17, %s6542_s16 }
 0x46c   :  { %4899 = vrot.lane.b32.xlu1 %v13721_v62, %s6544_s22 }
 0x46d   :  { %v4882_v53 = vpop.permute.xlu0 %4881 }
 0x46e   :  { %v4628_v59 = vpop.permute.xlu1 %4627  ;;  %v5429_v39 = vsel %vm5427_vm7, %v5364_v14, %v4882_v53 }
 0x46f   :  { %4837 = vrot.lane.b32.xlu0 %v13724_v45, %s6543_s20  ;;  %v5172_v14 = vsel %vm2545_vm11, %v5108_v56, %v4628_v59  ;;  %v5017_v59 = vsel %vm98_vm6, %v13674_v5, %v11050_v42  ;;  %v13728_v5 = vld [vmem:[#allocation93_spill] sm:$0xff] }
 0x470   :  { %4963 = vrot.lane.b32.xlu1 %v10458_v17, %s6545_s25 }
 0x471   :  { %v4946_v36 = vpop.permute.xlu0 %4945 }
 0x472   :  { %v4692_v62 = vpop.permute.xlu1 %4691  ;;  %v5494_v12 = vsel %vm5492_vm8, %v5429_v39, %v4946_v36 }
 0x473   :  { %4901 = vrot.lane.b32.xlu0 %v13725_v11, %s6544_s22  ;;  %6380 = vmatprep.mubr.msk.bf16.mxu1 %vm5600_vm10, %v5494_v12  ;;  %v5236_v36 = vsel %vm2675_vm13, %v5172_v14, %v4692_v62  ;;  %v13727_v12 = vld [vmem:[#allocation135_spill] sm:$0xff] }
 0x474   :  { %4647 = vrot.lane.b32.xlu1 %v13724_v45, %s6539_s9 }
 0x475   :  { %v4630_v34 = vpop.permute.xlu0 %4629 }
 0x476   :  { %v4756_v46 = vpop.permute.xlu1 %4755 }
 0x477   :  { %4965 = vrot.lane.b32.xlu0 %v10301_v35, %s6545_s25 }
 0x478   :  { %4711 = vrot.lane.b32.xlu1 %v13725_v11, %s6541_s1  ;;  %v5301_v11 = vsel %vm5297_vm0, %v5236_v36, %v4756_v46  ;;  %v5110_v46 = vsel %vm2415_vm9, %v5017_v59, %v11188_v47 }
 0x479   :  { %v4694_v17 = vpop.permute.xlu0 %4693 }
 0x47a   :  { %v4820_v53 = vpop.permute.xlu1 %4819 }
 0x47b   :  { %4649 = vrot.lane.b32.xlu0 %v13726_v27, %s6539_s9  ;;  %v5366_v60 = vsel %vm5362_vm2, %v5301_v11, %v4820_v53  ;;  %v5174_v53 = vsel %vm2545_vm11, %v5110_v46, %v4630_v34  ;;  %v13729_v11 = vld [vmem:[#allocation121_spill] sm:$0xff] }
 0x47c   :  { %4775 = vrot.lane.b32.xlu1 %v10301_v35, %s6542_s16  ;;  %v5238_v56 = vsel %vm2675_vm13, %v5174_v53, %v4694_v17  ;;  %v13730_v53 = vld [vmem:[#allocation60_spill] sm:$0xff] }
 0x47d   :  { %v4758_v63 = vpop.permute.xlu0 %4757 }
 0x47e   :  { %v4884_v39 = vpop.permute.xlu1 %4883  ;;  %v5303_v42 = vsel %vm5297_vm0, %v5238_v56, %v4758_v63 }
 0x47f   :  { %4713 = vrot.lane.b32.xlu0 %v13727_v12, %s6541_s1  ;;  %v5431_v33 = vsel %vm5427_vm7, %v5366_v60, %v4884_v39  ;;  %v11359_v60 = vld [vmem:[#allocation3 + $0x100] sm:$0xff] }
 0x480   :  { %4839 = vrot.lane.b32.xlu1 %v13726_v27, %s6543_s20  ;;  %v4385_v59 = vshll.u32 %v11359_v60, 16 }
 0x481   :  { %v4822_v35 = vpop.permute.xlu0 %4821 }
 0x482   :  { %v4948_v58 = vpop.permute.xlu1 %4947  ;;  %v5368_v39 = vsel %vm5362_vm2, %v5303_v42, %v4822_v35 }
 0x483   :  { %v5496_v62 = vsel %vm5492_vm8, %v5431_v33, %v4948_v58  ;;  %4777 = vrot.lane.b32.xlu0 %v10556_v23, %s6542_s16  ;;  %v4382_v33 = vshrl.u32 %v11359_v60, 16 }
 0x484   :  { %4903 = vrot.lane.b32.xlu1 %v13727_v12, %s6544_s22  ;;  %6381 = vmatmul.mubr.msk.bf16.vlgmr.msra.gmra.mrb[0].mxu1 %vm5600_vm10, %v5496_v62 }
 0x485   :  { %v4886_v19 = vpop.permute.xlu0 %4885 }
 0x486   :  { %v4632_v14 = vpop.permute.xlu1 %4631  ;;  %v5433_v47 = vsel %vm5427_vm7, %v5368_v39, %v4886_v19  ;;  %v5020_v19 = vsel %vm98_vm6, %v13677_v43, %v11096_v44  ;;  %v4384_v39 = vrot.slane %v4382_v33, 3 }
 0x487   :  { %4841 = vrot.lane.b32.xlu0 %v13728_v5, %s6543_s20  ;;  %v5112_v56 = vsel %vm2415_vm9, %v5020_v19, %v11222_v21 }
 0x488   :  { %4967 = vrot.lane.b32.xlu1 %v10556_v23, %s6545_s25  ;;  %v3414_v23 = vld [vmem:[#allocation3 + $0x108] sm:$0xff] }
 0x489   :  { %v4950_v36 = vpop.permute.xlu0 %4949  ;;  %v4390_v62 = vshrl.u32 %v3414_v23, 16  ;;  %v4393_v46 = vshll.u32 %v3414_v23, 16 }
 0x48a   :  { %v5498_v12 = vsel %vm5492_vm8, %v5433_v47, %v4950_v36  ;;  %v4696_v34 = vpop.permute.xlu1 %4695  ;;  %v5176_v47 = vsel %vm2545_vm11, %v5112_v56, %v4632_v14 }
 0x48b   :  { %4905 = vrot.lane.b32.xlu0 %v13729_v11, %s6544_s22  ;;  %6384 = vmatprep.mubr.msk.bf16.mxu1 %vm5600_vm10, %v5498_v12  ;;  %v4387_v12 = vrot.slane %v4385_v59, 4  ;;  %v5240_v27 = vsel %vm2675_vm13, %v5176_v47, %v4696_v34  ;;  %v5023_v34 = vsel %vm98_vm6, %v13681_v10, %v11059_v18  ;;  %v4420_v10 = vrot.slane %v3414_v23, 4 }
 0x48c   :  { %4651 = vrot.lane.b32.xlu1 %v13728_v5, %s6539_s9  ;;  %v4395_v5 = vrot.slane %v4393_v46, 4 }
 0x48d   :  { %v4634_v17 = vpop.permute.xlu0 %4633  ;;  %v4388_v19 = vor.u32 %v4387_v12, %v4384_v39  ;;  %v4425_v39 = vrot.slane %v4382_v33, 4  ;;  %v3416_v12 = vld [vmem:[#allocation3 + $0x118] sm:$0xff] }
 0x48e   :  { %v4760_v63 = vpop.permute.xlu1 %4759  ;;  %v4448_v33 = vshrl.u32 %v3416_v12, 16 }
 0x48f   :  { %4969 = vrot.lane.b32.xlu0 %v10364_v13, %s6545_s25  ;;  %v5305_v43 = vsel %vm5297_vm0, %v5240_v27, %v4760_v63  ;;  %v5114_v27 = vsel %vm2415_vm9, %v5023_v34, %v11196_v55  ;;  %v4419_v63 = vrot.slane %v11359_v60, 4 }
 0x490   :  { %4715 = vrot.lane.b32.xlu1 %v13729_v11, %s6541_s1  ;;  %v4392_v11 = vrot.slane %v4390_v62, 3  ;;  %v4450_v34 = vrot.slane %v4448_v33, 3 }
 0x491   :  { %v4698_v35 = vpop.permute.xlu0 %4697 }
 0x492   :  { %v4824_v58 = vpop.permute.xlu1 %4823  ;;  %v4396_v56 = vor.u32 %v4395_v5, %v4392_v11  ;;  %v11397_v5 = vld [vmem:[#allocation3 + $0x110] sm:$0xff] }
 0x493   :  { %4653 = vrot.lane.b32.xlu0 %v13730_v53, %s6539_s9  ;;  %v4440_v60 = vshrl.u32 %v11397_v5, 16  ;;  %v4443_v23 = vshll.u32 %v11397_v5, 16 }
 0x494   :  { %4779 = vrot.lane.b32.xlu1 %v10364_v13, %s6542_s16  ;;  %v5370_v13 = vsel %vm5362_vm2, %v5305_v43, %v4824_v58  ;;  %v5178_v58 = vsel %vm2545_vm11, %v5114_v27, %v4634_v17  ;;  %v4397_v55 = vsel %vm631_vm5, %v4388_v19, %v4396_v56 }
 0x495   :  { %v4762_v42 = vpop.permute.xlu0 %4761  ;;  %v5242_v11 = vsel %vm2675_vm13, %v5178_v58, %v4698_v35  ;;  %v4451_v35 = vshll.u32 %v3416_v12, 16 }
 0x496   :  { %v4888_v36 = vpop.permute.xlu1 %4887 }
 0x497   :  { %4717 = vrot.lane.b32.xlu0 %v13731_v50, %s6541_s1  ;;  %v5435_v21 = vsel %vm5427_vm7, %v5370_v13, %v4888_v36  ;;  %v4426_v36 = vrot.slane %v4385_v59, 5  ;;  %v4428_v13 = vrot.slane %v4390_v62, 4 }
 0x498   :  { %4843 = vrot.lane.b32.xlu1 %v13730_v53, %s6543_s20 }
 0x499   :  { %v4826_v44 = vpop.permute.xlu0 %4825  ;;  %v4427_v19 = vor.u32 %v4426_v36, %v4425_v39 }
 0x49a   :  { %v4952_v14 = vpop.permute.xlu1 %4951 }
 0x49b   :  { %v5500_v47 = vsel %vm5492_vm8, %v5435_v21, %v4952_v14  ;;  %4781 = vrot.lane.b32.xlu0 %v10590_v6, %s6542_s16  ;;  %v5307_v21 = vsel %vm5297_vm0, %v5242_v11, %v4762_v42  ;;  %v4421_v42 = vsel %vm1240_vm3, %v4419_v63, %v4420_v10  ;;  %v5026_v11 = vsel %vm98_vm6, %v13686_v31, %v11104_v52 }
 0x49c   :  { %4907 = vrot.lane.b32.xlu1 %v13731_v50, %s6544_s22  ;;  %6385 = vmatmul.mubr.msk.bf16.gmra.mrb[4].mxu1 %vm5600_vm10, %v5500_v47  ;;  %v4429_v50 = vrot.slane %v4393_v46, 5  ;;  %v5372_v17 = vsel %vm5362_vm2, %v5307_v21, %v4826_v44  ;;  %v4445_v44 = vrot.slane %v4443_v23, 4  ;;  %v4453_v47 = vrot.slane %v4451_v35, 4 }
 0x49d   :  { %v4890_v18 = vpop.permute.xlu0 %4889  ;;  %v4478_v21 = vrot.slane %v3416_v12, 4 }
 0x49e   :  { %v4636_v43 = vpop.permute.xlu1 %4635  ;;  %v5437_v59 = vsel %vm5427_vm7, %v5372_v17, %v4890_v18  ;;  %v4430_v56 = vor.u32 %v4429_v50, %v4428_v13  ;;  %v4454_v10 = vor.u32 %v4453_v47, %v4450_v34  ;;  %v4477_v50 = vrot.slane %v11397_v5, 4 }
 0x49f   :  { %4845 = vrot.lane.b32.xlu0 %v4397_v55, %s6543_s20  ;;  %v4483_v17 = vrot.slane %v4440_v60, 4 }
 0x4a0   :  { %4971 = vrot.lane.b32.xlu1 %v10590_v6, %s6545_s25  ;;  %v4442_v6 = vrot.slane %v4440_v60, 3  ;;  %v4431_v18 = vsel %vm1337_vm4, %v4427_v19, %v4430_v56  ;;  %v4487_v19 = vrot.slane %v4451_v35, 5  ;;  %v5029_v35 = vsel %vm98_vm6, %v13694_v15, %v11068_v22 }
 0x4a1   :  { %v4954_v14 = vpop.permute.xlu0 %4953  ;;  %v5118_v34 = vsel %vm2415_vm9, %v5029_v35, %v11204_v3 }
 0x4a2   :  { %v5502_v62 = vsel %vm5492_vm8, %v5437_v59, %v4954_v14  ;;  %v4700_v46 = vpop.permute.xlu1 %4699  ;;  %v4446_v63 = vor.u32 %v4445_v44, %v4442_v6  ;;  %v5116_v59 = vsel %vm2415_vm9, %v5026_v11, %v11230_v49  ;;  %v13733_v6 = vld [vmem:[#allocation146_spill] sm:$0xff]  ;;  %v4479_v49 = vsel %vm1240_vm3, %v4477_v50, %v4478_v21 }
 0x4a3   :  { %4909 = vrot.lane.b32.xlu0 %v4421_v42, %s6544_s22  ;;  %6388 = vmatprep.mubr.msk.bf16.mxu1 %vm5600_vm10, %v5502_v62  ;;  %v4484_v62 = vrot.slane %v4443_v23, 5  ;;  %v5180_v52 = vsel %vm2545_vm11, %v5116_v59, %v4636_v43  ;;  %v13736_v59 = vld [vmem:[#allocation52_spill] sm:$0xff] }
 0x4a4   :  { %4655 = vrot.lane.b32.xlu1 %v4397_v55, %s6539_s9  ;;  %v13732_v55 = vld [vmem:[#allocation137_spill] sm:$0xff]  ;;  %v4455_v13 = vsel %vm631_vm5, %v4446_v63, %v4454_v10  ;;  %v5244_v56 = vsel %vm2675_vm13, %v5180_v52, %v4700_v46  ;;  %v13734_v10 = vld [vmem:[#allocation95_spill] sm:$0xff] }
 0x4a5   :  { %v4638_v27 = vpop.permute.xlu0 %4637  ;;  %v4485_v60 = vor.u32 %v4484_v62, %v4483_v17 }
 0x4a6   :  { %v4764_v58 = vpop.permute.xlu1 %4763  ;;  %v5182_v47 = vsel %vm2545_vm11, %v5118_v34, %v4638_v27 }
 0x4a7   :  { %4973 = vrot.lane.b32.xlu0 %v4431_v18, %s6545_s25  ;;  %v5309_v44 = vsel %vm5297_vm0, %v5244_v56, %v4764_v58  ;;  %v13737_v56 = vld [vmem:[#allocation58_spill] sm:$0xff] }
 0x4a8   :  { %4719 = vrot.lane.b32.xlu1 %v4421_v42, %s6541_s1  ;;  %v4486_v42 = vrot.slane %v4448_v33, 4 }
 0x4a9   :  { %v4702_v39 = vpop.permute.xlu0 %4701 }
 0x4aa   :  { %v4828_v36 = vpop.permute.xlu1 %4827  ;;  %v4488_v23 = vor.u32 %v4487_v19, %v4486_v42  ;;  %v5246_v63 = vsel %vm2675_vm13, %v5182_v47, %v4702_v39  ;;  %v13739_v47 = vld [vmem:[#allocation125_spill] sm:$0xff] }
 0x4ab   :  { %4657 = vrot.lane.b32.xlu0 %v13732_v55, %s6539_s9  ;;  %v5374_v5 = vsel %vm5362_vm2, %v5309_v44, %v4828_v36  ;;  %v5035_v44 = vsel %vm98_vm6, %v13706_v8, %v11077_v32  ;;  %v13738_v8 = vld [vmem:[#allocation59_spill] sm:$0xff] }
 0x4ac   :  { %4783 = vrot.lane.b32.xlu1 %v4431_v18, %s6542_s16  ;;  %v4489_v18 = vsel %vm1337_vm4, %v4485_v60, %v4488_v23 }
 0x4ad   :  { %v4766_v14 = vpop.permute.xlu0 %4765 }
 0x4ae   :  { %v4892_v31 = vpop.permute.xlu1 %4891  ;;  %v5311_v15 = vsel %vm5297_vm0, %v5246_v63, %v4766_v14  ;;  %v5032_v14 = vsel %vm98_vm6, %v13701_v1, %v11112_v16 }
 0x4af   :  { %4721 = vrot.lane.b32.xlu0 %v13733_v6, %s6541_s1  ;;  %v5439_v33 = vsel %vm5427_vm7, %v5374_v5, %v4892_v31  ;;  %v5120_v62 = vsel %vm2415_vm9, %v5032_v14, %v11238_v57 }
 0x4b0   :  { %4847 = vrot.lane.b32.xlu1 %v4455_v13, %s6543_s20  ;;  %v13735_v13 = vld [vmem:[#allocation134_spill] sm:$0xff] }
 0x4b1   :  { %v4830_v12 = vpop.permute.xlu0 %4829 }
 0x4b2   :  { %v4956_v43 = vpop.permute.xlu1 %4955 }
 0x4b3   :  { %v5504_v46 = vsel %vm5492_vm8, %v5439_v33, %v4956_v43  ;;  %4785 = vrot.lane.b32.xlu0 %v10601_v24, %s6542_s16  ;;  %v5376_v24 = vsel %vm5362_vm2, %v5311_v15, %v4830_v12  ;;  %v5122_v12 = vsel %vm2415_vm9, %v5035_v44, %v11212_v38  ;;  %v5038_v15 = vsel %vm98_vm6, %v13708_v41, %v11120_v25 }
 0x4b4   :  { %4911 = vrot.lane.b32.xlu1 %v4479_v49, %s6544_s22  ;;  %6389 = vmatmul.mubr.msk.bf16.gmra.mrb[8].mxu1 %vm5600_vm10, %v5504_v46  ;;  %v5044_v44 = vsel %vm98_vm6, %v13719_v37, %v11128_v9 }
 0x4b5   :  { %v4894_v58 = vpop.permute.xlu0 %4893 }
 0x4b6   :  { %v4640_v22 = vpop.permute.xlu1 %4639  ;;  %v5441_v3 = vsel %vm5427_vm7, %v5376_v24, %v4894_v58  ;;  %v5124_v24 = vsel %vm2415_vm9, %v5038_v15, %v11246_v2  ;;  %v13745_v15 = vld [vmem:[#allocation138_spill] sm:$0xff] }
 0x4b7   :  { %4849 = vrot.lane.b32.xlu0 %v13734_v10, %s6543_s20  ;;  %v5184_v19 = vsel %vm2545_vm11, %v5120_v62, %v4640_v22  ;;  %v13740_v22 = vld [vmem:[#allocation62_spill] sm:$0xff] }
 0x4b8   :  { %4975 = vrot.lane.b32.xlu1 %v4489_v18, %s6545_s25 }
 0x4b9   :  { %v4958_v36 = vpop.permute.xlu0 %4957 }
 0x4ba   :  { %v5506_v27 = vsel %vm5492_vm8, %v5441_v3, %v4958_v36  ;;  %v4704_v11 = vpop.permute.xlu1 %4703 }
 0x4bb   :  { %4913 = vrot.lane.b32.xlu0 %v13735_v13, %s6544_s22  ;;  %6392 = vmatprep.mubr.msk.bf16.mxu1 %vm5600_vm10, %v5506_v27  ;;  %v5248_v31 = vsel %vm2675_vm13, %v5184_v19, %v4704_v11 }
 0x4bc   :  { %4659 = vrot.lane.b32.xlu1 %v13734_v10, %s6539_s9 }
 0x4bd   :  { %v4642_v39 = vpop.permute.xlu0 %4641 }
 0x4be   :  { %v4768_v50 = vpop.permute.xlu1 %4767  ;;  %v5186_v49 = vsel %vm2545_vm11, %v5122_v12, %v4642_v39 }
 0x4bf   :  { %4977 = vrot.lane.b32.xlu0 %v10455_v26, %s6545_s25  ;;  %v5313_v6 = vsel %vm5297_vm0, %v5248_v31, %v4768_v50  ;;  %v5041_v50 = vsel %vm98_vm6, %v13713_v48, %v11090_v29  ;;  %v13742_v29 = vld [vmem:[#allocation98_spill] sm:$0xff] }
 0x4c0   :  { %4723 = vrot.lane.b32.xlu1 %v13735_v13, %s6541_s1  ;;  %v13741_v13 = vld [vmem:[#allocation50_spill] sm:$0xff] }
 0x4c1   :  { %v4706_v21 = vpop.permute.xlu0 %4705 }
 0x4c2   :  { %v4832_v17 = vpop.permute.xlu1 %4831  ;;  %v5250_v23 = vsel %vm2675_vm13, %v5186_v49, %v4706_v21 }
 0x4c3   :  { %4661 = vrot.lane.b32.xlu0 %v13736_v59, %s6539_s9  ;;  %v5378_v16 = vsel %vm5362_vm2, %v5313_v6, %v4832_v17  ;;  %v5126_v17 = vsel %vm2415_vm9, %v5041_v50, %v11220_v28 }
 0x4c4   :  { %4787 = vrot.lane.b32.xlu1 %v10455_v26, %s6542_s16 }
 0x4c5   :  { %v4770_v42 = vpop.permute.xlu0 %4769 }
 0x4c6   :  { %v4896_v52 = vpop.permute.xlu1 %4895  ;;  %v5315_v32 = vsel %vm5297_vm0, %v5250_v23, %v4770_v42 }
 0x4c7   :  { %4725 = vrot.lane.b32.xlu0 %v13737_v56, %s6541_s1  ;;  %v5443_v1 = vsel %vm5427_vm7, %v5378_v16, %v4896_v52  ;;  %v13743_v16 = vld [vmem:[#allocation92_spill] sm:$0xff] }
 0x4c8   :  { %4851 = vrot.lane.b32.xlu1 %v13736_v59, %s6543_s20 }
 0x4c9   :  { %v4834_v26 = vpop.permute.xlu0 %4833 }
 0x4ca   :  { %v4960_v57 = vpop.permute.xlu1 %4959  ;;  %v5380_v43 = vsel %vm5362_vm2, %v5315_v32, %v4834_v26  ;;  %v5047_v32 = vsel %vm98_vm6, %v13724_v45, %v11098_v7 }
 0x4cb   :  { %v5508_v5 = vsel %vm5492_vm8, %v5443_v1, %v4960_v57  ;;  %4789 = vrot.lane.b32.xlu0 %v10652_v51, %s6542_s16 }
 0x4cc   :  { %4915 = vrot.lane.b32.xlu1 %v13737_v56, %s6544_s22  ;;  %6393 = vmatmul.mubr.msk.bf16.gmra.mrb[12].mxu1 %vm5600_vm10, %v5508_v5  ;;  %v5128_v5 = vsel %vm2415_vm9, %v5044_v44, %v11254_v0 }
 0x4cd   :  { %v4898_v60 = vpop.permute.xlu0 %4897 }
 0x4ce   :  { %v4644_v33 = vpop.permute.xlu1 %4643  ;;  %v5445_v38 = vsel %vm5427_vm7, %v5380_v43, %v4898_v60 }
 0x4cf   :  { %4853 = vrot.lane.b32.xlu0 %v13738_v8, %s6543_s20  ;;  %v5188_v36 = vsel %vm2545_vm11, %v5124_v24, %v4644_v33 }
 0x4d0   :  { %4979 = vrot.lane.b32.xlu1 %v10652_v51, %s6545_s25 }
 0x4d1   :  { %v4962_v35 = vpop.permute.xlu0 %4961 }
 0x4d2   :  { %v5510_v46 = vsel %vm5492_vm8, %v5445_v38, %v4962_v35  ;;  %v4708_v34 = vpop.permute.xlu1 %4707  ;;  %v13744_v38 = vld [vmem:[#allocation94_spill] sm:$0xff]  ;;  %v5130_v35 = vsel %vm2415_vm9, %v5047_v32, %v11228_v30  ;;  %v13757_v32 = vld [vmem:[#allocation63_spill] sm:$0xff] }
 0x4d3   :  { %4917 = vrot.lane.b32.xlu0 %v13739_v47, %s6544_s22  ;;  %6396 = vmatprep.mubr.msk.bf16.mxu1 %vm5600_vm10, %v5510_v46  ;;  %v5252_v11 = vsel %vm2675_vm13, %v5188_v36, %v4708_v34  ;;  %v13746_v36 = vld [vmem:[#allocation96_spill] sm:$0xff] }
 0x4d4   :  { %4663 = vrot.lane.b32.xlu1 %v13738_v8, %s6539_s9 }
 0x4d5   :  { %v4646_v58 = vpop.permute.xlu0 %4645 }
 0x4d6   :  { %v4772_v18 = vpop.permute.xlu1 %4771  ;;  %v5190_v14 = vsel %vm2545_vm11, %v5126_v17, %v4646_v58 }
 0x4d7   :  { %4981 = vrot.lane.b32.xlu0 %v10535_v40, %s6545_s25  ;;  %v5317_v39 = vsel %vm5297_vm0, %v5252_v11, %v4772_v18 }
 0x4d8   :  { %4727 = vrot.lane.b32.xlu1 %v13739_v47, %s6541_s1 }
 0x4d9   :  { %v4710_v51 = vpop.permute.xlu0 %4709 }
 0x4da   :  { %v4836_v63 = vpop.permute.xlu1 %4835  ;;  %v5254_v42 = vsel %vm2675_vm13, %v5190_v14, %v4710_v51 }
 0x4db   :  { %4665 = vrot.lane.b32.xlu0 %v13740_v22, %s6539_s9  ;;  %v5382_v41 = vsel %vm5362_vm2, %v5317_v39, %v4836_v63  ;;  %v13748_v39 = vld [vmem:[#allocation10_spill] sm:$0xff] }
 0x4dc   :  { %4791 = vrot.lane.b32.xlu1 %v10535_v40, %s6542_s16 }
 0x4dd   :  { %v4774_v3 = vpop.permute.xlu0 %4773 }
 0x4de   :  { %v4900_v27 = vpop.permute.xlu1 %4899  ;;  %v5319_v48 = vsel %vm5297_vm0, %v5254_v42, %v4774_v3 }
 0x4df   :  { %4729 = vrot.lane.b32.xlu0 %v13741_v13, %s6541_s1  ;;  %v5447_v25 = vsel %vm5427_vm7, %v5382_v41, %v4900_v27  ;;  %v13749_v41 = vld [vmem:[#allocation88_spill] sm:$0xff] }
 0x4e0   :  { %4855 = vrot.lane.b32.xlu1 %v13740_v22, %s6543_s20 }
 0x4e1   :  { %v4838_v40 = vpop.permute.xlu0 %4837 }
 0x4e2   :  { %v4964_v2 = vpop.permute.xlu1 %4963  ;;  %v5384_v52 = vsel %vm5362_vm2, %v5319_v48, %v4838_v40  ;;  %v5050_v40 = vsel %vm98_vm6, %v13749_v41, %v13748_v39  ;;  %v13764_v41 = vld [vmem:[#allocation11_spill] sm:$0xff] }
 0x4e3   :  { %v5512_v21 = vsel %vm5492_vm8, %v5447_v25, %v4964_v2  ;;  %4793 = vrot.lane.b32.xlu0 %v13675_v20, %s6542_s16 }
 0x4e4   :  { %4919 = vrot.lane.b32.xlu1 %v13741_v13, %s6544_s22  ;;  %6397 = vmatmul.mubr.msk.bf16.gmra.mrb[16].mxu1 %vm5600_vm10, %v5512_v21  ;;  %v13747_v13 = vld [vmem:[#allocation8_spill] sm:$0xff] }
 0x4e5   :  { %v4902_v62 = vpop.permute.xlu0 %4901 }
 0x4e6   :  { %v4648_v19 = vpop.permute.xlu1 %4647  ;;  %v5449_v28 = vsel %vm5427_vm7, %v5384_v52, %v4902_v62  ;;  %v13751_v52 = vld [vmem:[#allocation9_spill] sm:$0xff] }
 0x4e7   :  { %4857 = vrot.lane.b32.xlu0 %v13742_v29, %s6543_s20  ;;  %v5192_v49 = vsel %vm2545_vm11, %v5128_v5, %v4648_v19 }
 0x4e8   :  { %4983 = vrot.lane.b32.xlu1 %v13675_v20, %s6545_s25 }
 0x4e9   :  { %v4966_v31 = vpop.permute.xlu0 %4965 }
 0x4ea   :  { %v5514_v56 = vsel %vm5492_vm8, %v5449_v28, %v4966_v31  ;;  %v4712_v6 = vpop.permute.xlu1 %4711  ;;  %v13752_v28 = vld [vmem:[#allocation93_spill] sm:$0xff] }
 0x4eb   :  { %4921 = vrot.lane.b32.xlu0 %v13743_v16, %s6544_s22  ;;  %6400 = vmatprep.mubr.msk.bf16.mxu1 %vm5600_vm10, %v5514_v56  ;;  %v5256_v23 = vsel %vm2675_vm13, %v5192_v49, %v4712_v6  ;;  %v5053_v31 = vsel %vm98_vm6, %v13752_v28, %v13751_v52  ;;  %v13753_v6 = vld [vmem:[#allocation54_spill] sm:$0xff]  ;;  %v13766_v52 = vld [vmem:[#allocation97_spill] sm:$0xff] }
 0x4ec   :  { %4667 = vrot.lane.b32.xlu1 %v13742_v29, %s6539_s9 }
 0x4ed   :  { %v4650_v26 = vpop.permute.xlu0 %4649 }
 0x4ee   :  { %v4776_v1 = vpop.permute.xlu1 %4775  ;;  %v5194_v46 = vsel %vm2545_vm11, %v5130_v35, %v4650_v26  ;;  %v13758_v35 = vld [vmem:[#allocation57_spill] sm:$0xff] }
 0x4ef   :  { %4985 = vrot.lane.b32.xlu0 %v10936_v54, %s6545_s25  ;;  %v5321_v33 = vsel %vm5297_vm0, %v5256_v23, %v4776_v1 }
 0x4f0   :  { %4731 = vrot.lane.b32.xlu1 %v13743_v16, %s6541_s1  ;;  %v13754_v16 = vld [vmem:[#allocation114_spill] sm:$0xff] }
 0x4f1   :  { %v4714_v20 = vpop.permute.xlu0 %4713  ;;  %v5134_v26 = vsel %vm2415_vm9, %v5053_v31, %v13754_v16 }
 0x4f2   :  { %v4840_v57 = vpop.permute.xlu1 %4839  ;;  %v5258_v47 = vsel %vm2675_vm13, %v5194_v46, %v4714_v20  ;;  %v13759_v46 = vld [vmem:[#allocation127_spill] sm:$0xff] }
 0x4f3   :  { %4605 = vrot.lane.b32.xlu0 %v10936_v54, %s6537_s26  ;;  %v5386_v37 = vsel %vm5362_vm2, %v5321_v33, %v4840_v57 }
 0x4f4   :  { %4795 = vrot.lane.b32.xlu1 %v10936_v54, %s6542_s16 }
 0x4f5   :  { %v4778_v12 = vpop.permute.xlu0 %4777 }
 0x4f6   :  { %v4904_v60 = vpop.permute.xlu1 %4903  ;;  %v5323_v7 = vsel %vm5297_vm0, %v5258_v47, %v4778_v12  ;;  %v13755_v12 = vld [vmem:[#allocation136_spill] sm:$0xff]  ;;  %v13760_v47 = vld [vmem:[#allocation75_spill] sm:$0xff] }
 0x4f7   :  { %4669 = vrot.lane.b32.xlu0 %v10770_v61, %s6539_s9  ;;  %v5451_v9 = vsel %vm5427_vm7, %v5386_v37, %v4904_v60 }
 0x4f8   :  { %4859 = vrot.lane.b32.xlu1 %v10770_v61, %s6543_s20 }
 0x4f9   :  { %v4842_v54 = vpop.permute.xlu0 %4841 }
 0x4fa   :  { %v4968_v0 = vpop.permute.xlu1 %4967  ;;  %v5388_v45 = vsel %vm5362_vm2, %v5323_v7, %v4842_v54  ;;  %v13756_v54 = vld [vmem:[#allocation139_spill] sm:$0xff] }
 0x4fb   :  { %v5516_v43 = vsel %vm5492_vm8, %v5451_v9, %v4968_v0  ;;  %4733 = vrot.lane.b32.xlu0 %v13744_v38, %s6541_s1 }
 0x4fc   :  { %4923 = vrot.lane.b32.xlu1 %v13744_v38, %s6544_s22  ;;  %6401 = vmatmul.mubr.msk.bf16.gmra.mrb[20].mxu1 %vm5600_vm10, %v5516_v43 }
 0x4fd   :  { %v4906_v34 = vpop.permute.xlu0 %4905 }
 0x4fe   :  { %v4652_v58 = vpop.permute.xlu1 %4651  ;;  %v5453_v30 = vsel %vm5427_vm7, %v5388_v45, %v4906_v34  ;;  %v5056_v34 = vsel %vm98_vm6, %v13730_v53, %v13759_v46  ;;  %v13773_v46 = vld [vmem:[#allocation56_spill] sm:$0xff] }
 0x4ff   :  { %4797 = vrot.lane.b32.xlu0 %v10950_v4, %s6542_s16 }
 0x500   :  { %4987 = vrot.lane.b32.xlu1 %v10950_v4, %s6545_s25 }
 0x501   :  { %v4970_v18 = vpop.permute.xlu0 %4969 }
 0x502   :  { %v5518_v51 = vsel %vm5492_vm8, %v5453_v30, %v4970_v18  ;;  %v4716_v63 = vpop.permute.xlu1 %4715 }
 0x503   :  { %4861 = vrot.lane.b32.xlu0 %v13745_v15, %s6543_s20  ;;  %6404 = vmatprep.mubr.msk.bf16.mxu1 %vm5600_vm10, %v5518_v51  ;;  %v13761_v51 = vld [vmem:[#allocation124_spill] sm:$0xff] }
 0x504   :  { %4607 = vrot.lane.b32.xlu1 %v10950_v4, %s6537_s26  ;;  %v13750_v4 = vld [vmem:[#allocation131_spill] sm:$0xff] }
 0x505   :  { %v4654_v24 = vpop.permute.xlu0 %4653  ;;  %v5132_v25 = vsel %vm2415_vm9, %v5050_v40, %v13750_v4 }
 0x506   :  { %v4780_v3 = vpop.permute.xlu1 %4779  ;;  %v5196_v50 = vsel %vm2545_vm11, %v5132_v25, %v4652_v58  ;;  %v5198_v1 = vsel %vm2545_vm11, %v5134_v26, %v4654_v24  ;;  %v5136_v58 = vsel %vm2415_vm9, %v5056_v34, %v13760_v47  ;;  %v13774_v34 = vld [vmem:[#allocation151_spill] sm:$0xff] }
 0x507   :  { %4925 = vrot.lane.b32.xlu0 %v13746_v36, %s6544_s22  ;;  %v5260_v17 = vsel %vm2675_vm13, %v5196_v50, %v4716_v63 }
 0x508   :  { %4671 = vrot.lane.b32.xlu1 %v13745_v15, %s6539_s9  ;;  %v5325_v14 = vsel %vm5297_vm0, %v5260_v17, %v4780_v3  ;;  %v13765_v17 = vld [vmem:[#allocation68_spill] sm:$0xff] }
 0x509   :  { %v4718_v27 = vpop.permute.xlu0 %4717 }
 0x50a   :  { %v4844_v11 = vpop.permute.xlu1 %4843  ;;  %v5262_v57 = vsel %vm2675_vm13, %v5198_v1, %v4718_v27  ;;  %v13762_v27 = vld [vmem:[#allocation21_spill] sm:$0xff]  ;;  %v13768_v1 = vld [vmem:[#allocation70_spill] sm:$0xff] }
 0x50b   :  { %4989 = vrot.lane.b32.xlu0 %v13747_v13, %s6545_s25  ;;  %v5390_v62 = vsel %vm5362_vm2, %v5325_v14, %v4844_v11  ;;  %v13763_v11 = vld [vmem:[#allocation51_spill] sm:$0xff] }
 0x50c   :  { %4735 = vrot.lane.b32.xlu1 %v13746_v36, %s6541_s1 }
 0x50d   :  { %v4782_v2 = vpop.permute.xlu0 %4781 }
 0x50e   :  { %v4908_v21 = vpop.permute.xlu1 %4907  ;;  %v5327_v5 = vsel %vm5297_vm0, %v5262_v57, %v4782_v2 }
 0x50f   :  { %4609 = vrot.lane.b32.xlu0 %v13747_v13, %s6537_s26  ;;  %v5455_v19 = vsel %vm5427_vm7, %v5390_v62, %v4908_v21 }
 0x510   :  { %4799 = vrot.lane.b32.xlu1 %v13747_v13, %s6542_s16  ;;  %v5059_v13 = vsel %vm98_vm6, %v13763_v11, %v13762_v27  ;;  %v13776_v11 = vld [vmem:[#allocation66_spill] sm:$0xff] }
 0x511   :  { %v4846_v42 = vpop.permute.xlu0 %4845  ;;  %v5138_v40 = vsel %vm2415_vm9, %v5059_v13, %v13764_v41  ;;  %v13777_v41 = vld [vmem:[#allocation126_spill] sm:$0xff] }
 0x512   :  { %v4972_v48 = vpop.permute.xlu1 %4971  ;;  %v5392_v49 = vsel %vm5362_vm2, %v5327_v5, %v4846_v42 }
 0x513   :  { %v5520_v56 = vsel %vm5492_vm8, %v5455_v19, %v4972_v48  ;;  %4673 = vrot.lane.b32.xlu0 %v13753_v6, %s6539_s9 }
 0x514   :  { %4863 = vrot.lane.b32.xlu1 %v13753_v6, %s6543_s20  ;;  %6405 = vmatmul.mubr.msk.bf16.gmra.mrb[24].mxu1 %vm5600_vm10, %v5520_v56  ;;  %v13767_v56 = vld [vmem:[#allocation15_spill] sm:$0xff] }
 0x515   :  { %v4910_v20 = vpop.permute.xlu0 %4909 }
 0x516   :  { %v4656_v44 = vpop.permute.xlu1 %4655  ;;  %v5457_v60 = vsel %vm5427_vm7, %v5392_v49, %v4910_v20  ;;  %v13769_v20 = vld [vmem:[#allocation55_spill] sm:$0xff] }
 0x517   :  { %4737 = vrot.lane.b32.xlu0 %v13755_v12, %s6541_s1  ;;  %v5200_v45 = vsel %vm2545_vm11, %v5136_v58, %v4656_v44  ;;  %v5062_v57 = vsel %vm98_vm6, %v13732_v55, %v13769_v20  ;;  %v13770_v44 = vld [vmem:[#allocation149_spill] sm:$0xff] }
 0x518   :  { %4927 = vrot.lane.b32.xlu1 %v13755_v12, %s6544_s22  ;;  %v5140_v5 = vsel %vm2415_vm9, %v5062_v57, %v13770_v44 }
 0x519   :  { %v4974_v23 = vpop.permute.xlu0 %4973 }
 0x51a   :  { %v5522_v33 = vsel %vm5492_vm8, %v5457_v60, %v4974_v23  ;;  %v4720_v37 = vpop.permute.xlu1 %4719 }
 0x51b   :  { %4801 = vrot.lane.b32.xlu0 %v13756_v54, %s6542_s16  ;;  %6408 = vmatprep.mubr.msk.bf16.mxu1 %vm5600_vm10, %v5522_v33  ;;  %v5264_v18 = vsel %vm2675_vm13, %v5200_v45, %v4720_v37  ;;  %v13771_v33 = vld [vmem:[#allocation65_spill] sm:$0xff] }
 0x51c   :  { %4991 = vrot.lane.b32.xlu1 %v13756_v54, %s6545_s25 }
 0x51d   :  { %v4658_v9 = vpop.permute.xlu0 %4657 }
 0x51e   :  { %v4784_v0 = vpop.permute.xlu1 %4783  ;;  %v5202_v4 = vsel %vm2545_vm11, %v5138_v40, %v4658_v9  ;;  %v13778_v40 = vld [vmem:[#allocation129_spill] sm:$0xff] }
 0x51f   :  { %4865 = vrot.lane.b32.xlu0 %v13757_v32, %s6543_s20  ;;  %v5329_v63 = vsel %vm5297_vm0, %v5264_v18, %v4784_v0 }
 0x520   :  { %4611 = vrot.lane.b32.xlu1 %v13756_v54, %s6537_s26 }
 0x521   :  { %v4722_v43 = vpop.permute.xlu0 %4721 }
 0x522   :  { %v4848_v38 = vpop.permute.xlu1 %4847  ;;  %v5266_v2 = vsel %vm2675_vm13, %v5202_v4, %v4722_v43  ;;  %v13772_v43 = vld [vmem:[#allocation73_spill] sm:$0xff]  ;;  %v5068_v4 = vsel %vm98_vm6, %v13736_v59, %v13778_v40 }
 0x523   :  { %4929 = vrot.lane.b32.xlu0 %v13758_v35, %s6544_s22  ;;  %v5394_v53 = vsel %vm5362_vm2, %v5329_v63, %v4848_v38  ;;  %v5065_v38 = vsel %vm98_vm6, %v13734_v10, %v13772_v43 }
 0x524   :  { %4675 = vrot.lane.b32.xlu1 %v13757_v32, %s6539_s9  ;;  %v5142_v47 = vsel %vm2415_vm9, %v5065_v38, %v13774_v34 }
 0x525   :  { %v4786_v7 = vpop.permute.xlu0 %4785 }
 0x526   :  { %v4912_v30 = vpop.permute.xlu1 %4911  ;;  %v5331_v21 = vsel %vm5297_vm0, %v5266_v2, %v4786_v7 }
 0x527   :  { %4993 = vrot.lane.b32.xlu0 %v13761_v51, %s6545_s25  ;;  %v5459_v3 = vsel %vm5427_vm7, %v5394_v53, %v4912_v30 }
 0x528   :  { %4739 = vrot.lane.b32.xlu1 %v13758_v35, %s6541_s1 }
 0x529   :  { %v4850_v24 = vpop.permute.xlu0 %4849 }
 0x52a   :  { %v4976_v36 = vpop.permute.xlu1 %4975  ;;  %v5396_v14 = vsel %vm5362_vm2, %v5331_v21, %v4850_v24  ;;  %v11766_v21 = vld [vmem:[%s12305_s4] ss:$0 sm:$0xff] }
 0x52b   :  { %v5524_v39 = vsel %vm5492_vm8, %v5459_v3, %v4976_v36  ;;  %4613 = vrot.lane.b32.xlu0 %v13761_v51, %s6537_s26  ;;  %v13775_v3 = vld [vmem:[#allocation6_spill] sm:$0xff] }
 0x52c   :  { %4803 = vrot.lane.b32.xlu1 %v13761_v51, %s6542_s16  ;;  %6409 = vmatmul.mubr.msk.bf16.gmra.mrb[28].mxu1 %vm5600_vm10, %v5524_v39 }
 0x52d   :  { %v4914_v25 = vpop.permute.xlu0 %4913 }
 0x52e   :  { %v4660_v50 = vpop.permute.xlu1 %4659  ;;  %v5461_v62 = vsel %vm5427_vm7, %v5396_v14, %v4914_v25  ;;  %v13779_v25 = vld [vmem:[#allocation169_spill] sm:$0xff] }
 0x52f   :  { %4677 = vrot.lane.b32.xlu0 %v13765_v17, %s6539_s9  ;;  %v5204_v49 = vsel %vm2545_vm11, %v5140_v5, %v4660_v50  ;;  %v5144_v2 = vsel %vm2415_vm9, %v5068_v4, %v13779_v25 }
 0x530   :  { %4867 = vrot.lane.b32.xlu1 %v13765_v17, %s6543_s20 }
 0x531   :  { %v4978_v42 = vpop.permute.xlu0 %4977 }
 0x532   :  { %v5526_v19 = vsel %vm5492_vm8, %v5461_v62, %v4978_v42  ;;  %v4724_v48 = vpop.permute.xlu1 %4723 }
 0x533   :  { %4741 = vrot.lane.b32.xlu0 %v13766_v52, %s6541_s1  ;;  %6412 = vmatprep.mubr.msk.bf16.mxu1 %vm5600_vm10, %v5526_v19  ;;  %v5268_v23 = vsel %vm2675_vm13, %v5204_v49, %v4724_v48  ;;  %v13780_v19 = vld [vmem:[#allocation7_spill] sm:$0xff]  ;;  %v13781_v49 = vld [vmem:[#allocation14_spill] sm:$0xff] }
 0x534   :  { %4931 = vrot.lane.b32.xlu1 %v13766_v52, %s6544_s22 }
 0x535   :  { %v4662_v28 = vpop.permute.xlu0 %4661 }
 0x536   :  { %v4788_v31 = vpop.permute.xlu1 %4787  ;;  %v5206_v58 = vsel %vm2545_vm11, %v5142_v47, %v4662_v28  ;;  %v13784_v47 = vld [vmem:[#allocation67_spill] sm:$0xff] }
 0x537   :  { %4805 = vrot.lane.b32.xlu0 %v13767_v56, %s6542_s16  ;;  %v5333_v37 = vsel %vm5297_vm0, %v5268_v23, %v4788_v31 }
 0x538   :  { %4995 = vrot.lane.b32.xlu1 %v13767_v56, %s6545_s25 }
 0x539   :  { %v4726_v16 = vpop.permute.xlu0 %4725 }
 0x53a   :  { %v4852_v26 = vpop.permute.xlu1 %4851  ;;  %v5270_v45 = vsel %vm2675_vm13, %v5206_v58, %v4726_v16 }
 0x53b   :  { %4869 = vrot.lane.b32.xlu0 %v13768_v1, %s6543_s20  ;;  %v5398_v55 = vsel %vm5362_vm2, %v5333_v37, %v4852_v26 }
 0x53c   :  { %4615 = vrot.lane.b32.xlu1 %v13767_v56, %s6537_s26 }
 0x53d   :  { %v4790_v12 = vpop.permute.xlu0 %4789 }
 0x53e   :  { %v4916_v60 = vpop.permute.xlu1 %4915  ;;  %v5335_v10 = vsel %vm5297_vm0, %v5270_v45, %v4790_v12 }
 0x53f   :  { %4933 = vrot.lane.b32.xlu0 %v13771_v33, %s6544_s22  ;;  %v5463_v9 = vsel %vm5427_vm7, %v5398_v55, %v4916_v60  ;;  %v5071_v60 = vsel %vm98_vm6, %v13738_v8, %v13781_v49  ;;  %v13782_v55 = vld [vmem:[#allocation99_spill] sm:$0xff] }
 0x540   :  { %4679 = vrot.lane.b32.xlu1 %v13768_v1, %s6539_s9 }
 0x541   :  { %v4854_v54 = vpop.permute.xlu0 %4853 }
 0x542   :  { %v4980_v0 = vpop.permute.xlu1 %4979  ;;  %v5400_v18 = vsel %vm5362_vm2, %v5335_v10, %v4854_v54  ;;  %v13783_v54 = vld [vmem:[#allocation25_spill] sm:$0xff] }
 0x543   :  { %v5528_v35 = vsel %vm5492_vm8, %v5463_v9, %v4980_v0  ;;  %4997 = vrot.lane.b32.xlu0 %v13773_v46, %s6545_s25  ;;  %v5146_v9 = vsel %vm2415_vm9, %v5071_v60, %v13783_v54 }
 0x544   :  { %4743 = vrot.lane.b32.xlu1 %v13771_v33, %s6541_s1  ;;  %6413 = vmatmul.mubr.msk.bf16.gmra.mrb[32].mxu1 %vm5600_vm10, %v5528_v35 }
 0x545   :  { %v4918_v7 = vpop.permute.xlu0 %4917 }
 0x546   :  { %v4664_v30 = vpop.permute.xlu1 %4663  ;;  %v5465_v51 = vsel %vm5427_vm7, %v5400_v18, %v4918_v7  ;;  %v11821_v18 = vld [vmem:[#allocation3 + $0x220] sm:$0xff] }
 0x547   :  { %4617 = vrot.lane.b32.xlu0 %v13773_v46, %s6537_s26  ;;  %v5208_v14 = vsel %vm2545_vm11, %v5144_v2, %v4664_v30 }
 0x548   :  { %4807 = vrot.lane.b32.xlu1 %v13773_v46, %s6542_s16 }
 0x549   :  { %v4982_v63 = vpop.permute.xlu0 %4981 }
 0x54a   :  { %v5530_v53 = vsel %vm5492_vm8, %v5465_v51, %v4982_v63  ;;  %v4728_v24 = vpop.permute.xlu1 %4727  ;;  %v11823_v51 = vld [vmem:[#allocation3 + $0x228] sm:$0xff] }
 0x54b   :  { %4681 = vrot.lane.b32.xlu0 %v13775_v3, %s6539_s9  ;;  %6416 = vmatprep.mubr.msk.bf16.mxu1 %vm5600_vm10, %v5530_v53  ;;  %v5272_v42 = vsel %vm2675_vm13, %v5208_v14, %v4728_v24  ;;  %v4399_v24 = vshrl.u32 %v11821_v18, 16  ;;  %v13787_v14 = vld [vmem:[#allocation148_spill] sm:$0xff] }
 0x54c   :  { %4871 = vrot.lane.b32.xlu1 %v13775_v3, %s6543_s20 }
 0x54d   :  { %v4666_v36 = vpop.permute.xlu0 %4665  ;;  %v4401_v40 = vrot.slane %v4399_v24, 3  ;;  %v4432_v49 = vrot.slane %v4399_v24, 4 }
 0x54e   :  { %v4792_v27 = vpop.permute.xlu1 %4791  ;;  %v5210_v8 = vsel %vm2545_vm11, %v5146_v9, %v4666_v36  ;;  %v4402_v36 = vshll.u32 %v11821_v18, 16 }
 0x54f   :  { %4745 = vrot.lane.b32.xlu0 %v13776_v11, %s6541_s1  ;;  %v5337_v48 = vsel %vm5297_vm0, %v5272_v42, %v4792_v27  ;;  %v4407_v27 = vshrl.u32 %v11823_v51, 16  ;;  %v13788_v42 = vld [vmem:[#allocation16_spill] sm:$0xff] }
 0x550   :  { %4935 = vrot.lane.b32.xlu1 %v13776_v11, %s6544_s22  ;;  %v4410_v11 = vshll.u32 %v11823_v51, 16  ;;  %v4404_v4 = vrot.slane %v4402_v36, 4  ;;  %v4433_v60 = vrot.slane %v4402_v36, 5 }
 0x551   :  { %v4730_v13 = vpop.permute.xlu0 %4729  ;;  %v4409_v25 = vrot.slane %v4407_v27, 3  ;;  %v4435_v9 = vrot.slane %v4407_v27, 4 }
 0x552   :  { %v4856_v39 = vpop.permute.xlu1 %4855  ;;  %v5274_v35 = vsel %vm2675_vm13, %v5210_v8, %v4730_v13  ;;  %v13785_v13 = vld [vmem:[#allocation123_spill] sm:$0xff]  ;;  %v4412_v2 = vrot.slane %v4410_v11, 4 }
 0x553   :  { %4809 = vrot.lane.b32.xlu0 %v13777_v41, %s6542_s16  ;;  %v5402_v31 = vsel %vm5362_vm2, %v5337_v48, %v4856_v39  ;;  %v11862_v8 = vld [vmem:[#allocation3 + $0x238] sm:$0xff] }
 0x554   :  { %4999 = vrot.lane.b32.xlu1 %v13777_v41, %s6545_s25 }
 0x555   :  { %v4794_v50 = vpop.permute.xlu0 %4793 }
 0x556   :  { %v4920_v62 = vpop.permute.xlu1 %4919  ;;  %v5339_v34 = vsel %vm5297_vm0, %v5274_v35, %v4794_v50  ;;  %v13786_v50 = vld [vmem:[#allocation71_spill] sm:$0xff] }
 0x557   :  { %4873 = vrot.lane.b32.xlu0 %v13780_v19, %s6543_s20  ;;  %v6382_v59 = vpop.f32.mrb[0].mxu1  ;;  %v5467_v20 = vsel %vm5427_vm7, %v5402_v31, %v4920_v62  ;;  %v5074_v62 = vsel %vm98_vm6, %v13740_v22, %v13787_v14  ;;  %v4405_v31 = vor.u32 %v4404_v4, %v4401_v40  ;;  %v4422_v22 = vrot.slane %v11821_v18, 4  ;;  %v13790_v4 = vld [vmem:[#allocation13_spill] sm:$0xff] }
 0x558   :  { %v5712_v52 = vadd.f32 %v6382_v59, %v11766_v21  ;;  %4619 = vrot.lane.b32.xlu1 %v13777_v41, %s6537_s26  ;;  %v5703_v28 = vpop.f32.mrb[1].mxu1  ;;  %v5148_v59 = vsel %vm2415_vm9, %v5074_v62, %v13788_v42 }
 0x559   :  { %v5704_v56 = vadd.f32 %v11766_v21, %v5703_v28  ;;  %v4858_v16 = vpop.permute.xlu0 %4857  ;;  %v6383_v26 = vpop.f32.mrb[2].mxu1 }
 0x55a   :  { %v5960_v57 = vmax.f32 %v5712_v52, 0.0  ;;  %v5715_v44 = vadd.f32 %v6383_v26, %v11766_v21  ;;  %v4984_v5 = vpop.permute.xlu1 %4983  ;;  %v5706_v12 = vpop.f32.mrb[3].mxu1  ;;  %v5404_v58 = vsel %vm5362_vm2, %v5339_v34, %v4858_v16  ;;  %v13789_v26 = vld [vmem:[#allocation122_spill] sm:$0xff] }
 0x55b   :  { %v5958_v23 = vmax.f32 %v5704_v56, 0.0  ;;  %v5532_v33 = vsel %vm5492_vm8, %v5467_v20, %v4984_v5  ;;  %v5707_v37 = vadd.f32 %v11766_v21, %v5706_v12  ;;  %4937 = vrot.lane.b32.xlu0 %v13782_v55, %s6544_s22  ;;  %v4413_v56 = vor.u32 %v4412_v2, %v4409_v25 }
 0x55c   :  { %6024 = vst.msk [vmem:[%s12306_s5 + $0x10] sm:$0xff] %vm98_vm6, %v5960_v57  ;;  %v5961_v0 = vmax.f32 %v5715_v44, 0.0  ;;  %4683 = vrot.lane.b32.xlu1 %v13780_v19, %s6539_s9  ;;  %6417 = vmatmul.mubr.msk.bf16.gmra.mrb[36].mxu1 %vm5600_vm10, %v5532_v33  ;;  %v4423_v57 = vrot.slane %v11823_v51, 4  ;;  %v4465_v51 = vshrl.u32 %v11862_v8, 16  ;;  %v5077_v25 = vsel %vm98_vm6, %v13742_v29, %v13790_v4 }
 0x55d   :  { %6022 = vst.msk [vmem:[%s12306_s5] sm:$0xff] %vm98_vm6, %v5958_v23  ;;  %v5959_v43 = vmax.f32 %v5707_v37, 0.0  ;;  %v4922_v38 = vpop.permute.xlu0 %4921  ;;  %v11858_v23 = vld [vmem:[#allocation3 + $0x230] sm:$0xff] }
 0x55e   :  { %6025 = vst.msk [vmem:[%s12306_s5 + $0x18] sm:$0xff] %vm98_vm6, %v5961_v0  ;;  %v4668_v46 = vpop.permute.xlu1 %4667  ;;  %v5469_v7 = vsel %vm5427_vm7, %v5404_v58, %v4922_v38  ;;  %v4436_v0 = vrot.slane %v4410_v11, 5  ;;  %v4460_v18 = vshll.u32 %v11858_v23, 16  ;;  %v4424_v11 = vsel %vm1240_vm3, %v4422_v22, %v4423_v57 }
 0x55f   :  { %6023 = vst.msk [vmem:[%s12306_s5 + $0x8] sm:$0xff] %vm98_vm6, %v5959_v43  ;;  %5001 = vrot.lane.b32.xlu0 %v13784_v47, %s6545_s25  ;;  %v5212_v52 = vsel %vm2545_vm11, %v5148_v59, %v4668_v46  ;;  %v4467_v62 = vrot.slane %v4465_v51, 3 }
 0x560   :  { %4747 = vrot.lane.b32.xlu1 %v13782_v55, %s6541_s1  ;;  %v4437_v40 = vor.u32 %v4436_v0, %v4435_v9  ;;  %v4462_v14 = vrot.slane %v4460_v18, 4 }
 0x561   :  { %v4986_v45 = vpop.permute.xlu0 %4985 }
 0x562   :  { %v5534_v30 = vsel %vm5492_vm8, %v5469_v7, %v4986_v45  ;;  %v4732_v10 = vpop.permute.xlu1 %4731 }
 0x563   :  { %4621 = vrot.lane.b32.xlu0 %v13784_v47, %s6537_s26  ;;  %6420 = vmatprep.mubr.msk.bf16.mxu1 %vm5600_vm10, %v5534_v30  ;;  %v5276_v16 = vsel %vm2675_vm13, %v5212_v52, %v4732_v10  ;;  %v4457_v30 = vshrl.u32 %v11858_v23, 16 }
 0x564   :  { %4811 = vrot.lane.b32.xlu1 %v13784_v47, %s6542_s16  ;;  %v4414_v47 = vsel %vm631_vm5, %v4405_v31, %v4413_v56 }
 0x565   :  { %v11827_v63 = vpop.permute.xlu0 %4605  ;;  %v4459_v2 = vrot.slane %v4457_v30, 3 }
 0x566   :  { %v4796_v53 = vpop.permute.xlu1 %4795 }
 0x567   :  { %4685 = vrot.lane.b32.xlu0 %v13785_v13, %s6539_s9  ;;  %v5341_v44 = vsel %vm5297_vm0, %v5276_v16, %v4796_v53  ;;  %v4468_v53 = vshll.u32 %v11862_v8, 16  ;;  %v4463_v16 = vor.u32 %v4462_v14, %v4459_v2 }
 0x568   :  { %4875 = vrot.lane.b32.xlu1 %v13785_v13, %s6543_s20 }
 0x569   :  { %v11837_v39 = vpop.permute.xlu0 %4669  ;;  %v4470_v42 = vrot.slane %v4468_v53, 4 }
 0x56a   :  { %v4860_v41 = vpop.permute.xlu1 %4859 }
 0x56b   :  { %4749 = vrot.lane.b32.xlu0 %v13786_v50, %s6541_s1  ;;  %v5406_v33 = vsel %vm5362_vm2, %v5341_v44, %v4860_v41  ;;  %v4434_v41 = vor.u32 %v4433_v60, %v4432_v49  ;;  %v4480_v44 = vrot.slane %v11858_v23, 4  ;;  %v4490_v49 = vrot.slane %v4457_v30, 4 }
 0x56c   :  { %4939 = vrot.lane.b32.xlu1 %v13786_v50, %s6544_s22  ;;  %v5150_v50 = vsel %vm2415_vm9, %v5077_v25, %v11827_v63  ;;  %v4491_v60 = vrot.slane %v4460_v18, 5 }
 0x56d   :  { %v4734_v48 = vpop.permute.xlu0 %4733  ;;  %v5214_v59 = vsel %vm2545_vm11, %v5150_v50, %v11837_v39  ;;  %v4438_v31 = vsel %vm1337_vm4, %v4434_v41, %v4437_v40 }
 0x56e   :  { %v4924_v28 = vpop.permute.xlu1 %4923  ;;  %v5278_v52 = vsel %vm2675_vm13, %v5214_v59, %v4734_v48  ;;  %v4492_v0 = vor.u32 %v4491_v60, %v4490_v49  ;;  %v13792_v59 = vld [vmem:[#allocation128_spill] sm:$0xff] }
 0x56f   :  { %4813 = vrot.lane.b32.xlu0 %v13789_v26, %s6542_s16  ;;  %v6386_v20 = vpop.f32.mrb[4].mxu1  ;;  %v5471_v43 = vsel %vm5427_vm7, %v5406_v33, %v4924_v28  ;;  %v4493_v33 = vrot.slane %v4465_v51, 4 }
 0x570   :  { %v5728_v5 = vadd.f32 %v6386_v20, %v11766_v21  ;;  %5003 = vrot.lane.b32.xlu1 %v13789_v26, %s6545_s25  ;;  %v5719_v12 = vpop.f32.mrb[5].mxu1 }
 0x571   :  { %v5720_v37 = vadd.f32 %v11766_v21, %v5719_v12  ;;  %v4798_v55 = vpop.permute.xlu0 %4797  ;;  %v6387_v54 = vpop.f32.mrb[6].mxu1 }
 0x572   :  { %v5964_v38 = vmax.f32 %v5728_v5, 0.0  ;;  %v5731_v35 = vadd.f32 %v6387_v54, %v11766_v21  ;;  %v4988_v46 = vpop.permute.xlu1 %4987  ;;  %v5722_v34 = vpop.f32.mrb[7].mxu1  ;;  %v5343_v56 = vsel %vm5297_vm0, %v5278_v52, %v4798_v55  ;;  %v4481_v5 = vrot.slane %v11862_v8, 4 }
 0x573   :  { %v5962_v58 = vmax.f32 %v5720_v37, 0.0  ;;  %v5536_v7 = vsel %vm5492_vm8, %v5471_v43, %v4988_v46  ;;  %v5723_v45 = vadd.f32 %v11766_v21, %v5722_v34  ;;  %4877 = vrot.lane.b32.xlu0 %v4414_v47, %s6543_s20  ;;  %v4494_v37 = vrot.slane %v4468_v53, 5  ;;  %v13791_v46 = vld [vmem:[#allocation100_spill] sm:$0xff] }
 0x574   :  { %6028 = vst.msk [vmem:[%s12306_s5 + $0x30] sm:$0xff] %vm98_vm6, %v5964_v38  ;;  %v5965_v10 = vmax.f32 %v5731_v35, 0.0  ;;  %4623 = vrot.lane.b32.xlu1 %v13789_v26, %s6537_s26  ;;  %6421 = vmatmul.mubr.msk.bf16.gmra.mrb[40].mxu1 %vm5600_vm10, %v5536_v7  ;;  %v4471_v26 = vor.u32 %v4470_v42, %v4467_v62  ;;  %v4482_v9 = vsel %vm1240_vm3, %v4480_v44, %v4481_v5 }
 0x575   :  { %6026 = vst.msk [vmem:[%s12306_s5 + $0x20] sm:$0xff] %vm98_vm6, %v5962_v58  ;;  %v5963_v24 = vmax.f32 %v5723_v45, 0.0  ;;  %v4862_v36 = vpop.permute.xlu0 %4861  ;;  %v4495_v43 = vor.u32 %v4494_v37, %v4493_v33  ;;  %v5080_v23 = vsel %vm98_vm6, %v10770_v61, %v13791_v46 }
 0x576   :  { %6029 = vst.msk [vmem:[%s12306_s5 + $0x38] sm:$0xff] %vm98_vm6, %v5965_v10  ;;  %v4608_v27 = vpop.permute.xlu1 %4607  ;;  %v5408_v63 = vsel %vm5362_vm2, %v5343_v56, %v4862_v36  ;;  %v4472_v48 = vsel %vm631_vm5, %v4463_v16, %v4471_v26 }
 0x577   :  { %6027 = vst.msk [vmem:[%s12306_s5 + $0x28] sm:$0xff] %vm98_vm6, %v5963_v24  ;;  %4941 = vrot.lane.b32.xlu0 %v4424_v11, %s6544_s22  ;;  %v4496_v30 = vsel %vm1337_vm4, %v4492_v0, %v4495_v43 }
 0x578   :  { %4687 = vrot.lane.b32.xlu1 %v4414_v47, %s6539_s9  ;;  %v5152_v47 = vsel %vm2415_vm9, %v5080_v23, %v4608_v27 }
 0x579   :  { %v4926_v29 = vpop.permute.xlu0 %4925 }
 0x57a   :  { %v4672_v28 = vpop.permute.xlu1 %4671  ;;  %v5473_v20 = vsel %vm5427_vm7, %v5408_v63, %v4926_v29  ;;  %v5083_v29 = vsel %vm98_vm6, %v13745_v15, %v13792_v59 }
 0x57b   :  { %5005 = vrot.lane.b32.xlu0 %v4438_v31, %s6545_s25  ;;  %v5216_v10 = vsel %vm2545_vm11, %v5152_v47, %v4672_v28 }
 0x57c   :  { %4751 = vrot.lane.b32.xlu1 %v4424_v11, %s6541_s1 }
 0x57d   :  { %v4990_v22 = vpop.permute.xlu0 %4989 }
 0x57e   :  { %v5538_v39 = vsel %vm5492_vm8, %v5473_v20, %v4990_v22  ;;  %v4736_v57 = vpop.permute.xlu1 %4735 }
 0x57f   :  { %6424 = vmatprep.mubr.msk.bf16.mxu1 %vm5600_vm10, %v5538_v39  ;;  %v5280_v24 = vsel %vm2675_vm13, %v5216_v10, %v4736_v57 }
 0x580   :  { %4815 = vrot.lane.b32.xlu1 %v4438_v31, %s6542_s16 }
 0x581   :  { %v4610_v12 = vpop.permute.xlu0 %4609 }
 0x582   :  { %v4800_v55 = vpop.permute.xlu1 %4799  ;;  %v5154_v52 = vsel %vm2415_vm9, %v5083_v29, %v4610_v12 }
 0x583   :  { %v5345_v27 = vsel %vm5297_vm0, %v5280_v24, %v4800_v55  ;;  %v13794_v24 = vld [vmem:[#allocation72_spill] sm:$0xff] }
 0x584   :  { %4879 = vrot.lane.b32.xlu1 %v4472_v48, %s6543_s20 }
 0x585   :  { %v4674_v54 = vpop.permute.xlu0 %4673 }
 0x586   :  { %v4864_v38 = vpop.permute.xlu1 %4863  ;;  %v5218_v28 = vsel %vm2545_vm11, %v5154_v52, %v4674_v54 }
 0x587   :  { %v6390_v35 = vpop.f32.mrb[8].mxu1  ;;  %v5410_v40 = vsel %vm5362_vm2, %v5345_v27, %v4864_v38  ;;  %v13793_v38 = vld [vmem:[#allocation110_spill] sm:$0xff] }
 0x588   :  { %v5744_v8 = vadd.f32 %v6390_v35, %v11766_v21  ;;  %4943 = vrot.lane.b32.xlu1 %v4482_v9, %s6544_s22  ;;  %v5735_v34 = vpop.f32.mrb[9].mxu1  ;;  %v5086_v35 = vsel %vm98_vm6, %v13753_v6, %v13793_v38 }
 0x589   :  { %v5736_v58 = vadd.f32 %v11766_v21, %v5735_v34  ;;  %v4738_v7 = vpop.permute.xlu0 %4737  ;;  %v6391_v45 = vpop.f32.mrb[10].mxu1 }
 0x58a   :  { %v5968_v18 = vmax.f32 %v5744_v8, 0.0  ;;  %v5747_v51 = vadd.f32 %v6391_v45, %v11766_v21  ;;  %v4928_v53 = vpop.permute.xlu1 %4927  ;;  %v5738_v61 = vpop.f32.mrb[11].mxu1  ;;  %v5282_v56 = vsel %vm2675_vm13, %v5218_v28, %v4738_v7 }
 0x58b   :  { %v5966_v36 = vmax.f32 %v5736_v58, 0.0  ;;  %v5739_v11 = vadd.f32 %v11766_v21, %v5738_v61  ;;  %v5475_v2 = vsel %vm5427_vm7, %v5410_v40, %v4928_v53 }
 0x58c   :  { %6032 = vst.msk [vmem:[%s12306_s5 + $0x50] sm:$0xff] %vm98_vm6, %v5968_v18  ;;  %v5969_v41 = vmax.f32 %v5747_v51, 0.0  ;;  %5007 = vrot.lane.b32.xlu1 %v4496_v30, %s6545_s25 }
 0x58d   :  { %6030 = vst.msk [vmem:[%s12306_s5 + $0x40] sm:$0xff] %vm98_vm6, %v5966_v36  ;;  %v5967_v4 = vmax.f32 %v5739_v11, 0.0  ;;  %v4802_v25 = vpop.permute.xlu0 %4801  ;;  %v5089_v36 = vsel %vm98_vm6, %v13757_v32, %v13794_v24 }
 0x58e   :  { %6033 = vst.msk [vmem:[%s12306_s5 + $0x58] sm:$0xff] %vm98_vm6, %v5969_v41  ;;  %v4992_v50 = vpop.permute.xlu1 %4991  ;;  %v5347_v16 = vsel %vm5297_vm0, %v5282_v56, %v4802_v25 }
 0x58f   :  { %6031 = vst.msk [vmem:[%s12306_s5 + $0x48] sm:$0xff] %vm98_vm6, %v5967_v4  ;;  %v5540_v14 = vsel %vm5492_vm8, %v5475_v2, %v4992_v50 }
 0x590   :  { %6425 = vmatmul.mubr.msk.bf16.gmra.mrb[44].mxu1 %vm5600_vm10, %v5540_v14 }
 0x591   :  { %v4866_v62 = vpop.permute.xlu0 %4865 }
 0x592   :  { %v4612_v42 = vpop.permute.xlu1 %4611  ;;  %v5412_v26 = vsel %vm5362_vm2, %v5347_v16, %v4866_v62 }
 0x593   :  { %v5156_v23 = vsel %vm2415_vm9, %v5086_v35, %v4612_v42 }
 0x595   :  { %v4930_v31 = vpop.permute.xlu0 %4929 }
 0x596   :  { %v4676_v63 = vpop.permute.xlu1 %4675  ;;  %v5477_v20 = vsel %vm5427_vm7, %v5412_v26, %v4930_v31 }
 0x597   :  { %v5220_v47 = vsel %vm2545_vm11, %v5156_v23, %v4676_v63 }
 0x599   :  { %v4994_v22 = vpop.permute.xlu0 %4993 }
 0x59a   :  { %v5542_v39 = vsel %vm5492_vm8, %v5477_v20, %v4994_v22  ;;  %v4740_v57 = vpop.permute.xlu1 %4739 }
 0x59b   :  { %6428 = vmatprep.mubr.msk.bf16.mxu1 %vm5600_vm10, %v5542_v39  ;;  %v5284_v58 = vsel %vm2675_vm13, %v5220_v47, %v4740_v57 }
 0x59d   :  { %v4614_v15 = vpop.permute.xlu0 %4613 }
 0x59e   :  { %v4804_v48 = vpop.permute.xlu1 %4803  ;;  %v5158_v11 = vsel %vm2415_vm9, %v5089_v36, %v4614_v15 }
 0x59f   :  { %v6394_v44 = vpop.f32.mrb[12].mxu1  ;;  %v5349_v7 = vsel %vm5297_vm0, %v5284_v58, %v4804_v48 }
 0x5a0   :  { %v5760_v5 = vadd.f32 %v6394_v44, %v11766_v21  ;;  %v5751_v12 = vpop.f32.mrb[13].mxu1  ;;  %v13795_v44 = vld [vmem:[#allocation130_spill] sm:$0xff] }
 0x5a1   :  { %v5752_v49 = vadd.f32 %v11766_v21, %v5751_v12  ;;  %v4678_v60 = vpop.permute.xlu0 %4677  ;;  %v6395_v33 = vpop.f32.mrb[14].mxu1 }
 0x5a2   :  { %v5972_v37 = vmax.f32 %v5760_v5, 0.0  ;;  %v5763_v55 = vadd.f32 %v6395_v33, %v11766_v21  ;;  %v4868_v54 = vpop.permute.xlu1 %4867  ;;  %v5754_v9 = vpop.f32.mrb[15].mxu1  ;;  %v5222_v27 = vsel %vm2545_vm11, %v5158_v11, %v4678_v60  ;;  %v5092_v5 = vsel %vm98_vm6, %v13765_v17, %v13795_v44 }
 0x5a3   :  { %v5970_v0 = vmax.f32 %v5752_v49, 0.0  ;;  %v5755_v43 = vadd.f32 %v11766_v21, %v5754_v9  ;;  %v5414_v45 = vsel %vm5362_vm2, %v5349_v7, %v4868_v54 }
 0x5a4   :  { %6036 = vst.msk [vmem:[%s12306_s5 + $0x70] sm:$0xff] %vm98_vm6, %v5972_v37  ;;  %v5973_v46 = vmax.f32 %v5763_v55, 0.0 }
 0x5a5   :  { %6034 = vst.msk [vmem:[%s12306_s5 + $0x60] sm:$0xff] %vm98_vm6, %v5970_v0  ;;  %v5971_v8 = vmax.f32 %v5755_v43, 0.0  ;;  %v4742_v34 = vpop.permute.xlu0 %4741 }
 0x5a6   :  { %6037 = vst.msk [vmem:[%s12306_s5 + $0x78] sm:$0xff] %vm98_vm6, %v5973_v46  ;;  %v4932_v6 = vpop.permute.xlu1 %4931  ;;  %v5286_v40 = vsel %vm2675_vm13, %v5222_v27, %v4742_v34  ;;  %v13796_v46 = vld [vmem:[#allocation170_spill] sm:$0xff] }
 0x5a7   :  { %6035 = vst.msk [vmem:[%s12306_s5 + $0x68] sm:$0xff] %vm98_vm6, %v5971_v8  ;;  %v5479_v10 = vsel %vm5427_vm7, %v5414_v45, %v4932_v6  ;;  %v5095_v23 = vsel %vm98_vm6, %v13768_v1, %v13796_v46 }
 0x5a9   :  { %v4806_v30 = vpop.permute.xlu0 %4805 }
 0x5aa   :  { %v4996_v18 = vpop.permute.xlu1 %4995  ;;  %v5351_v25 = vsel %vm5297_vm0, %v5286_v40, %v4806_v30 }
 0x5ab   :  { %v5544_v51 = vsel %vm5492_vm8, %v5479_v10, %v4996_v18 }
 0x5ac   :  { %6429 = vmatmul.mubr.msk.bf16.gmra.mrb[48].mxu1 %vm5600_vm10, %v5544_v51 }
 0x5ad   :  { %v4870_v53 = vpop.permute.xlu0 %4869 }
 0x5ae   :  { %v4616_v61 = vpop.permute.xlu1 %4615  ;;  %v5416_v2 = vsel %vm5362_vm2, %v5351_v25, %v4870_v53 }
 0x5af   :  { %v5160_v12 = vsel %vm2415_vm9, %v5092_v5, %v4616_v61 }
 0x5b1   :  { %v4934_v41 = vpop.permute.xlu0 %4933 }
 0x5b2   :  { %v4680_v4 = vpop.permute.xlu1 %4679  ;;  %v5481_v50 = vsel %vm5427_vm7, %v5416_v2, %v4934_v41 }
 0x5b3   :  { %v5224_v60 = vsel %vm2545_vm11, %v5160_v12, %v4680_v4 }
 0x5b5   :  { %v4998_v14 = vpop.permute.xlu0 %4997 }
 0x5b6   :  { %v5546_v62 = vsel %vm5492_vm8, %v5481_v50, %v4998_v14  ;;  %v4744_v42 = vpop.permute.xlu1 %4743 }
 0x5b7   :  { %v6398_v59 = vpop.f32.mrb[16].mxu1  ;;  %6432 = vmatprep.mubr.msk.bf16.mxu1 %vm5600_vm10, %v5546_v62  ;;  %v5288_v37 = vsel %vm2675_vm13, %v5224_v60, %v4744_v42 }
 0x5b8   :  { %v5776_v32 = vadd.f32 %v6398_v59, %v11766_v21  ;;  %v5767_v29 = vpop.f32.mrb[17].mxu1  ;;  %v13797_v59 = vld [vmem:[#allocation64_spill] sm:$0xff] }
 0x5b9   :  { %v5768_v52 = vadd.f32 %v11766_v21, %v5767_v29  ;;  %v4618_v28 = vpop.permute.xlu0 %4617  ;;  %v6399_v31 = vpop.f32.mrb[18].mxu1 }
 0x5ba   :  { %v5976_v56 = vmax.f32 %v5776_v32, 0.0  ;;  %v5779_v63 = vadd.f32 %v6399_v31, %v11766_v21  ;;  %v4808_v16 = vpop.permute.xlu1 %4807  ;;  %v5770_v26 = vpop.f32.mrb[19].mxu1  ;;  %v5162_v8 = vsel %vm2415_vm9, %v5095_v23, %v4618_v28  ;;  %v5098_v32 = vsel %vm98_vm6, %v13775_v3, %v13797_v59 }
 0x5bb   :  { %v5974_v20 = vmax.f32 %v5768_v52, 0.0  ;;  %v5771_v22 = vadd.f32 %v11766_v21, %v5770_v26  ;;  %v5353_v55 = vsel %vm5297_vm0, %v5288_v37, %v4808_v16 }
 0x5bc   :  { %6040 = vst.msk [vmem:[%s12306_s5 + $0x90] sm:$0xff] %vm98_vm6, %v5976_v56  ;;  %v5977_v39 = vmax.f32 %v5779_v63, 0.0 }
 0x5bd   :  { %6038 = vst.msk [vmem:[%s12306_s5 + $0x80] sm:$0xff] %vm98_vm6, %v5974_v20  ;;  %v5975_v57 = vmax.f32 %v5771_v22, 0.0  ;;  %v4682_v15 = vpop.permute.xlu0 %4681 }
 0x5be   :  { %6041 = vst.msk [vmem:[%s12306_s5 + $0x98] sm:$0xff] %vm98_vm6, %v5977_v39  ;;  %v4872_v48 = vpop.permute.xlu1 %4871  ;;  %v5226_v34 = vsel %vm2545_vm11, %v5162_v8, %v4682_v15  ;;  %v13798_v15 = vld [vmem:[#allocation168_spill] sm:$0xff] }
 0x5bf   :  { %6039 = vst.msk [vmem:[%s12306_s5 + $0x88] sm:$0xff] %vm98_vm6, %v5975_v57  ;;  %v5418_v54 = vsel %vm5362_vm2, %v5353_v55, %v4872_v48  ;;  %v5101_v48 = vsel %vm98_vm6, %v13780_v19, %v13798_v15 }
 0x5c1   :  { %v4746_v49 = vpop.permute.xlu0 %4745 }
 0x5c2   :  { %v4936_v33 = vpop.permute.xlu1 %4935  ;;  %v5290_v6 = vsel %vm2675_vm13, %v5226_v34, %v4746_v49 }
 0x5c3   :  { %v5483_v0 = vsel %vm5427_vm7, %v5418_v54, %v4936_v33 }
 0x5c5   :  { %v4810_v9 = vpop.permute.xlu0 %4809 }
 0x5c6   :  { %v5000_v43 = vpop.permute.xlu1 %4999  ;;  %v5355_v7 = vsel %vm5297_vm0, %v5290_v6, %v4810_v9 }
 0x5c7   :  { %v5548_v38 = vsel %vm5492_vm8, %v5483_v0, %v5000_v43 }
 0x5c8   :  { %6433 = vmatmul.mubr.msk.bf16.gmra.mrb[52].mxu1 %vm5600_vm10, %v5548_v38 }
 0x5c9   :  { %v4874_v17 = vpop.permute.xlu0 %4873 }
 0x5ca   :  { %v4620_v35 = vpop.permute.xlu1 %4619  ;;  %v5420_v30 = vsel %vm5362_vm2, %v5355_v7, %v4874_v17 }
 0x5cb   :  { %v5164_v29 = vsel %vm2415_vm9, %v5098_v32, %v4620_v35 }
 0x5cd   :  { %v4938_v47 = vpop.permute.xlu0 %4937 }
 0x5ce   :  { %v4684_v58 = vpop.permute.xlu1 %4683  ;;  %v5485_v51 = vsel %vm5427_vm7, %v5420_v30, %v4938_v47  ;;  %v13799_v30 = vld [vmem:[#allocation101_spill] sm:$0xff] }
 0x5cf   :  { %v6402_v45 = vpop.f32.mrb[20].mxu1  ;;  %v5228_v28 = vsel %vm2545_vm11, %v5164_v29, %v4684_v58 }
 0x5d0   :  { %v5792_v10 = vadd.f32 %v6402_v45, %v11766_v21  ;;  %v5783_v18 = vpop.f32.mrb[21].mxu1 }
 0x5d1   :  { %v5784_v1 = vadd.f32 %v11766_v21, %v5783_v18  ;;  %v5002_v53 = vpop.permute.xlu0 %5001  ;;  %v6403_v61 = vpop.f32.mrb[22].mxu1 }
 0x5d2   :  { %v5980_v24 = vmax.f32 %v5792_v10, 0.0  ;;  %v5550_v36 = vsel %vm5492_vm8, %v5485_v51, %v5002_v53  ;;  %v5795_v11 = vadd.f32 %v6403_v61, %v11766_v21  ;;  %v4748_v27 = vpop.permute.xlu1 %4747  ;;  %v5786_v41 = vpop.f32.mrb[23].mxu1  ;;  %v5104_v10 = vsel %vm98_vm6, %v13785_v13, %v13799_v30 }
 0x5d3   :  { %v5978_v40 = vmax.f32 %v5784_v1, 0.0  ;;  %v5787_v4 = vadd.f32 %v11766_v21, %v5786_v41  ;;  %6436 = vmatprep.mubr.msk.bf16.mxu1 %vm5600_vm10, %v5550_v36  ;;  %v5292_v56 = vsel %vm2675_vm13, %v5228_v28, %v4748_v27 }
 0x5d4   :  { %6044 = vst.msk [vmem:[%s12306_s5 + $0xb0] sm:$0xff] %vm98_vm6, %v5980_v24  ;;  %v5981_v25 = vmax.f32 %v5795_v11, 0.0 }
 0x5d5   :  { %6042 = vst.msk [vmem:[%s12306_s5 + $0xa0] sm:$0xff] %vm98_vm6, %v5978_v40  ;;  %v5979_v2 = vmax.f32 %v5787_v4, 0.0  ;;  %v4622_v50 = vpop.permute.xlu0 %4621 }
 0x5d6   :  { %6045 = vst.msk [vmem:[%s12306_s5 + $0xb8] sm:$0xff] %vm98_vm6, %v5981_v25  ;;  %v4812_v14 = vpop.permute.xlu1 %4811  ;;  %v5166_v5 = vsel %vm2415_vm9, %v5101_v48, %v4622_v50 }
 0x5d7   :  { %6043 = vst.msk [vmem:[%s12306_s5 + $0xa8] sm:$0xff] %vm98_vm6, %v5979_v2  ;;  %v5357_v63 = vsel %vm5297_vm0, %v5292_v56, %v4812_v14 }
 0x5d9   :  { %v4686_v62 = vpop.permute.xlu0 %4685 }
 0x5da   :  { %v4876_v42 = vpop.permute.xlu1 %4875  ;;  %v5230_v60 = vsel %vm2545_vm11, %v5166_v5, %v4686_v62 }
 0x5db   :  { %v5422_v16 = vsel %vm5362_vm2, %v5357_v63, %v4876_v42 }
 0x5dd   :  { %v4750_v52 = vpop.permute.xlu0 %4749 }
 0x5de   :  { %v4940_v31 = vpop.permute.xlu1 %4939  ;;  %v5294_v54 = vsel %vm2675_vm13, %v5230_v60, %v4750_v52 }
 0x5df   :  { %v5487_v20 = vsel %vm5427_vm7, %v5422_v16, %v4940_v31 }
 0x5e1   :  { %v4814_v26 = vpop.permute.xlu0 %4813 }
 0x5e2   :  { %v5004_v22 = vpop.permute.xlu1 %5003  ;;  %v5359_v19 = vsel %vm5297_vm0, %v5294_v54, %v4814_v26 }
 0x5e3   :  { %v5552_v39 = vsel %vm5492_vm8, %v5487_v20, %v5004_v22 }
 0x5e4   :  { %6437 = vmatmul.mubr.msk.bf16.gmra.mrb[56].mxu1 %vm5600_vm10, %v5552_v39 }
 0x5e5   :  { %v4878_v3 = vpop.permute.xlu0 %4877 }
 0x5e6   :  { %v4624_v57 = vpop.permute.xlu1 %4623  ;;  %v5424_v46 = vsel %vm5362_vm2, %v5359_v19, %v4878_v3 }
 0x5e7   :  { %v6406_v44 = vpop.f32.mrb[24].mxu1  ;;  %v5168_v18 = vsel %vm2415_vm9, %v5104_v10, %v4624_v57 }
 0x5e8   :  { %v5808_v12 = vadd.f32 %v6406_v44, %v11766_v21  ;;  %v5799_v49 = vpop.f32.mrb[25].mxu1 }
 0x5e9   :  { %v5800_v33 = vadd.f32 %v11766_v21, %v5799_v49  ;;  %v4942_v37 = vpop.permute.xlu0 %4941  ;;  %v6407_v55 = vpop.f32.mrb[26].mxu1 }
 0x5ea   :  { %v5984_v9 = vmax.f32 %v5808_v12, 0.0  ;;  %v5811_v0 = vadd.f32 %v6407_v55, %v11766_v21  ;;  %v4688_v43 = vpop.permute.xlu1 %4687  ;;  %v5802_v38 = vpop.f32.mrb[27].mxu1  ;;  %v5489_v8 = vsel %vm5427_vm7, %v5424_v46, %v4942_v37 }
 0x5eb   :  { %v5982_v17 = vmax.f32 %v5800_v33, 0.0  ;;  %v5803_v35 = vadd.f32 %v11766_v21, %v5802_v38  ;;  %v5232_v51 = vsel %vm2545_vm11, %v5168_v18, %v4688_v43 }
 0x5ec   :  { %6048 = vst.msk [vmem:[%s12306_s5 + $0xd0] sm:$0xff] %vm98_vm6, %v5984_v9  ;;  %v5985_v23 = vmax.f32 %v5811_v0, 0.0 }
 0x5ed   :  { %6046 = vst.msk [vmem:[%s12306_s5 + $0xc0] sm:$0xff] %vm98_vm6, %v5982_v17  ;;  %v5983_v34 = vmax.f32 %v5803_v35, 0.0  ;;  %v5006_v47 = vpop.permute.xlu0 %5005 }
 0x5ee   :  { %6049 = vst.msk [vmem:[%s12306_s5 + $0xd8] sm:$0xff] %vm98_vm6, %v5985_v23  ;;  %v5554_v6 = vsel %vm5492_vm8, %v5489_v8, %v5006_v47  ;;  %v4752_v58 = vpop.permute.xlu1 %4751 }
 0x5ef   :  { %6047 = vst.msk [vmem:[%s12306_s5 + $0xc8] sm:$0xff] %vm98_vm6, %v5983_v34  ;;  %6440 = vmatprep.mubr.msk.bf16.mxu1 %vm5600_vm10, %v5554_v6  ;;  %v5296_v53 = vsel %vm2675_vm13, %v5232_v51, %v4752_v58 }
 0x5f2   :  { %v4816_v7 = vpop.permute.xlu1 %4815 }
 0x5f3   :  { %v5361_v61 = vsel %vm5297_vm0, %v5296_v53, %v4816_v7 }
 0x5f6   :  { %v4880_v45 = vpop.permute.xlu1 %4879 }
 0x5f7   :  { %v5426_v24 = vsel %vm5362_vm2, %v5361_v61, %v4880_v45 }
 0x5fa   :  { %v4944_v1 = vpop.permute.xlu1 %4943 }
 0x5fb   :  { %v5491_v36 = vsel %vm5427_vm7, %v5426_v24, %v4944_v1 }
 0x5fe   :  { %v5008_v11 = vpop.permute.xlu1 %5007 }
 0x5ff   :  { %v5556_v27 = vsel %vm5492_vm8, %v5491_v36, %v5008_v11  ;;  %v6410_v41 = vpop.f32.mrb[28].mxu1 }
 0x600   :  { %v5824_v40 = vadd.f32 %v6410_v41, %v11766_v21  ;;  %v5815_v13 = vpop.f32.mrb[29].mxu1  ;;  %6441 = vmatmul.mubr.msk.bf16.gmra.mrb[60].mxu1 %vm5600_vm10, %v5556_v27 }
 0x601   :  { %v5816_v4 = vadd.f32 %v11766_v21, %v5815_v13  ;;  %v6411_v25 = vpop.f32.mrb[30].mxu1 }
 0x602   :  { %v5988_v2 = vmax.f32 %v5824_v40, 0.0  ;;  %v5827_v50 = vadd.f32 %v6411_v25, %v11766_v21  ;;  %v5818_v14 = vpop.f32.mrb[31].mxu1 }
 0x603   :  { %v5986_v62 = vmax.f32 %v5816_v4, 0.0  ;;  %v5819_v42 = vadd.f32 %v11766_v21, %v5818_v14 }
 0x604   :  { %6052 = vst.msk [vmem:[%s12306_s5 + $0xf0] sm:$0xff] %vm98_vm6, %v5988_v2  ;;  %v5989_v59 = vmax.f32 %v5827_v50, 0.0 }
 0x605   :  { %6050 = vst.msk [vmem:[%s12306_s5 + $0xe0] sm:$0xff] %vm98_vm6, %v5986_v62  ;;  %v5987_v32 = vmax.f32 %v5819_v42, 0.0 }
 0x606   :  { %6053 = vst.msk [vmem:[%s12306_s5 + $0xf8] sm:$0xff] %vm98_vm6, %v5989_v59 }
 0x607   :  { %6051 = vst.msk [vmem:[%s12306_s5 + $0xe8] sm:$0xff] %vm98_vm6, %v5987_v32 }
 0x617   :  { %v6414_v29 = vpop.f32.mrb[32].mxu1 }
 0x618   :  { %v5840_v52 = vadd.f32 %v6414_v29, %v11766_v21  ;;  %v5831_v28 = vpop.f32.mrb[33].mxu1 }
 0x619   :  { %v5832_v31 = vadd.f32 %v11766_v21, %v5831_v28  ;;  %v6415_v56 = vpop.f32.mrb[34].mxu1 }
 0x61a   :  { %v5992_v63 = vmax.f32 %v5840_v52, 0.0  ;;  %v5843_v16 = vadd.f32 %v6415_v56, %v11766_v21  ;;  %v5834_v26 = vpop.f32.mrb[35].mxu1 }
 0x61b   :  { %v5990_v20 = vmax.f32 %v5832_v31, 0.0  ;;  %v5835_v22 = vadd.f32 %v11766_v21, %v5834_v26 }
 0x61c   :  { %6056 = vst.msk [vmem:[%s12306_s5 + $0x110] sm:$0xff] %vm98_vm6, %v5992_v63  ;;  %v5993_v39 = vmax.f32 %v5843_v16, 0.0 }
 0x61d   :  { %6054 = vst.msk [vmem:[%s12306_s5 + $0x100] sm:$0xff] %vm98_vm6, %v5990_v20  ;;  %v5991_v3 = vmax.f32 %v5835_v22, 0.0 }
 0x61e   :  { %6057 = vst.msk [vmem:[%s12306_s5 + $0x118] sm:$0xff] %vm98_vm6, %v5993_v39 }
 0x61f   :  { %6055 = vst.msk [vmem:[%s12306_s5 + $0x108] sm:$0xff] %vm98_vm6, %v5991_v3 }
 0x62f   :  { %v6418_v57 = vpop.f32.mrb[36].mxu1 }
 0x630   :  { %v5856_v15 = vadd.f32 %v6418_v57, %v11766_v21  ;;  %v5847_v48 = vpop.f32.mrb[37].mxu1 }
 0x631   :  { %v5848_v44 = vadd.f32 %v11766_v21, %v5847_v48  ;;  %v6419_v5 = vpop.f32.mrb[38].mxu1 }
 0x632   :  { %v5996_v12 = vmax.f32 %v5856_v15, 0.0  ;;  %v5859_v49 = vadd.f32 %v6419_v5, %v11766_v21  ;;  %v5850_v60 = vpop.f32.mrb[39].mxu1 }
 0x633   :  { %v5994_v33 = vmax.f32 %v5848_v44, 0.0  ;;  %v5851_v37 = vadd.f32 %v11766_v21, %v5850_v60 }
 0x634   :  { %6060 = vst.msk [vmem:[%s12306_s5 + $0x130] sm:$0xff] %vm98_vm6, %v5996_v12  ;;  %v5997_v55 = vmax.f32 %v5859_v49, 0.0 }
 0x635   :  { %6058 = vst.msk [vmem:[%s12306_s5 + $0x120] sm:$0xff] %vm98_vm6, %v5994_v33  ;;  %v5995_v54 = vmax.f32 %v5851_v37, 0.0 }
 0x636   :  { %6061 = vst.msk [vmem:[%s12306_s5 + $0x138] sm:$0xff] %vm98_vm6, %v5997_v55 }
 0x637   :  { %6059 = vst.msk [vmem:[%s12306_s5 + $0x128] sm:$0xff] %vm98_vm6, %v5995_v54 }
 0x647   :  { %v6422_v9 = vpop.f32.mrb[40].mxu1 }
 0x648   :  { %v5872_v0 = vadd.f32 %v6422_v9, %v11766_v21  ;;  %v5863_v43 = vpop.f32.mrb[41].mxu1 }
 0x649   :  { %v5864_v38 = vadd.f32 %v11766_v21, %v5863_v43  ;;  %v6423_v19 = vpop.f32.mrb[42].mxu1 }
 0x64a   :  { %v6000_v17 = vmax.f32 %v5872_v0, 0.0  ;;  %v5875_v35 = vadd.f32 %v6423_v19, %v11766_v21  ;;  %v5866_v46 = vpop.f32.mrb[43].mxu1 }
 0x64b   :  { %v5998_v23 = vmax.f32 %v5864_v38, 0.0  ;;  %v5867_v8 = vadd.f32 %v11766_v21, %v5866_v46  ;;  %v6532_v38 = vld [vmem:[%s12305_s4] ss:$0 sm:$0xff] }
 0x64c   :  { %6064 = vst.msk [vmem:[%s12306_s5 + $0x150] sm:$0xff] %vm98_vm6, %v6000_v17  ;;  %v6001_v34 = vmax.f32 %v5875_v35, 0.0 }
 0x64d   :  { %6062 = vst.msk [vmem:[%s12306_s5 + $0x140] sm:$0xff] %vm98_vm6, %v5998_v23  ;;  %v5999_v47 = vmax.f32 %v5867_v8, 0.0 }
 0x64e   :  { %6065 = vst.msk [vmem:[%s12306_s5 + $0x158] sm:$0xff] %vm98_vm6, %v6001_v34 }
 0x64f   :  { %6063 = vst.msk [vmem:[%s12306_s5 + $0x148] sm:$0xff] %vm98_vm6, %v5999_v47 }
 0x663   :  { %v6426_v6 = vpop.f32.mrb[44].mxu1 }
 0x664   :  { %v5888_v58 = vadd.f32 %v6426_v6, %v11766_v21  ;;  %v5879_v7 = vpop.f32.mrb[45].mxu1 }
 0x665   :  { %v5880_v45 = vadd.f32 %v11766_v21, %v5879_v7  ;;  %v6427_v30 = vpop.f32.mrb[46].mxu1 }
 0x666   :  { %v6004_v10 = vmax.f32 %v5888_v58, 0.0  ;;  %v5891_v18 = vadd.f32 %v6427_v30, %v11766_v21  ;;  %v5882_v51 = vpop.f32.mrb[47].mxu1 }
 0x667   :  { %v6002_v1 = vmax.f32 %v5880_v45, 0.0  ;;  %v5883_v53 = vadd.f32 %v11766_v21, %v5882_v51 }
 0x668   :  { %6068 = vst.msk [vmem:[%s12306_s5 + $0x170] sm:$0xff] %vm98_vm6, %v6004_v10  ;;  %v6005_v61 = vmax.f32 %v5891_v18, 0.0 }
 0x669   :  { %6066 = vst.msk [vmem:[%s12306_s5 + $0x160] sm:$0xff] %vm98_vm6, %v6002_v1  ;;  %v6003_v24 = vmax.f32 %v5883_v53, 0.0 }
 0x66a   :  { %6069 = vst.msk [vmem:[%s12306_s5 + $0x178] sm:$0xff] %vm98_vm6, %v6005_v61 }
 0x66b   :  { %6067 = vst.msk [vmem:[%s12306_s5 + $0x168] sm:$0xff] %vm98_vm6, %v6003_v24 }
 0x67f   :  { %v6430_v36 = vpop.f32.mrb[48].mxu1 }
 0x680   :  { %v5904_v11 = vadd.f32 %v6430_v36, %v11766_v21  ;;  %v5895_v27 = vpop.f32.mrb[49].mxu1 }
 0x681   :  { %v5896_v41 = vadd.f32 %v11766_v21, %v5895_v27  ;;  %v6431_v40 = vpop.f32.mrb[50].mxu1 }
 0x682   :  { %v6008_v13 = vmax.f32 %v5904_v11, 0.0  ;;  %v5907_v4 = vadd.f32 %v6431_v40, %v11766_v21  ;;  %v5898_v25 = vpop.f32.mrb[51].mxu1 }
 0x683   :  { %v6006_v2 = vmax.f32 %v5896_v41, 0.0  ;;  %v5899_v50 = vadd.f32 %v11766_v21, %v5898_v25 }
 0x684   :  { %6072 = vst.msk [vmem:[%s12306_s5 + $0x190] sm:$0xff] %vm98_vm6, %v6008_v13  ;;  %v6009_v14 = vmax.f32 %v5907_v4, 0.0 }
 0x685   :  { %6070 = vst.msk [vmem:[%s12306_s5 + $0x180] sm:$0xff] %vm98_vm6, %v6006_v2  ;;  %v6007_v62 = vmax.f32 %v5899_v50, 0.0 }
 0x686   :  { %6073 = vst.msk [vmem:[%s12306_s5 + $0x198] sm:$0xff] %vm98_vm6, %v6009_v14 }
 0x687   :  { %6071 = vst.msk [vmem:[%s12306_s5 + $0x188] sm:$0xff] %vm98_vm6, %v6007_v62 }
 0x69b   :  { %v6434_v42 = vpop.f32.mrb[52].mxu1 }
 0x69c   :  { %v5920_v59 = vadd.f32 %v6434_v42, %v11766_v21  ;;  %v5911_v32 = vpop.f32.mrb[53].mxu1 }
 0x69d   :  { %v5912_v29 = vadd.f32 %v11766_v21, %v5911_v32  ;;  %v6435_v52 = vpop.f32.mrb[54].mxu1 }
 0x69e   :  { %v6012_v28 = vmax.f32 %v5920_v59, 0.0  ;;  %v5923_v31 = vadd.f32 %v6435_v52, %v11766_v21  ;;  %v5914_v56 = vpop.f32.mrb[55].mxu1 }
 0x69f   :  { %v6010_v63 = vmax.f32 %v5912_v29, 0.0  ;;  %v5915_v16 = vadd.f32 %v11766_v21, %v5914_v56 }
 0x6a0   :  { %6076 = vst.msk [vmem:[%s12306_s5 + $0x1b0] sm:$0xff] %vm98_vm6, %v6012_v28  ;;  %v6013_v26 = vmax.f32 %v5923_v31, 0.0 }
 0x6a1   :  { %6074 = vst.msk [vmem:[%s12306_s5 + $0x1a0] sm:$0xff] %vm98_vm6, %v6010_v63  ;;  %v6011_v20 = vmax.f32 %v5915_v16, 0.0 }
 0x6a2   :  { %6077 = vst.msk [vmem:[%s12306_s5 + $0x1b8] sm:$0xff] %vm98_vm6, %v6013_v26 }
 0x6a3   :  { %6075 = vst.msk [vmem:[%s12306_s5 + $0x1a8] sm:$0xff] %vm98_vm6, %v6011_v20 }
 0x6b7   :  { %v6438_v22 = vpop.f32.mrb[56].mxu1 }
 0x6b8   :  { %v5936_v39 = vadd.f32 %v6438_v22, %v11766_v21  ;;  %v5927_v3 = vpop.f32.mrb[57].mxu1 }
 0x6b9   :  { %v5928_v57 = vadd.f32 %v11766_v21, %v5927_v3  ;;  %v6439_v15 = vpop.f32.mrb[58].mxu1 }
 0x6ba   :  { %v6016_v48 = vmax.f32 %v5936_v39, 0.0  ;;  %v5939_v44 = vadd.f32 %v6439_v15, %v11766_v21  ;;  %v5930_v5 = vpop.f32.mrb[59].mxu1 }
 0x6bb   :  { %v6014_v12 = vmax.f32 %v5928_v57, 0.0  ;;  %v5931_v49 = vadd.f32 %v11766_v21, %v5930_v5 }
 0x6bc   :  { %6080 = vst.msk [vmem:[%s12306_s5 + $0x1d0] sm:$0xff] %vm98_vm6, %v6016_v48  ;;  %v6017_v60 = vmax.f32 %v5939_v44, 0.0 }
 0x6bd   :  { %6078 = vst.msk [vmem:[%s12306_s5 + $0x1c0] sm:$0xff] %vm98_vm6, %v6014_v12  ;;  %v6015_v33 = vmax.f32 %v5931_v49, 0.0 }
 0x6be   :  { %6081 = vst.msk [vmem:[%s12306_s5 + $0x1d8] sm:$0xff] %vm98_vm6, %v6017_v60 }
 0x6bf   :  { %6079 = vst.msk [vmem:[%s12306_s5 + $0x1c8] sm:$0xff] %vm98_vm6, %v6015_v33 }
 0x6d3   :  { %v6442_v37 = vpop.f32.mrb[60].mxu1 }
 0x6d4   :  { %v5952_v55 = vadd.f32 %v6442_v37, %v11766_v21  ;;  %v5943_v54 = vpop.f32.mrb[61].mxu1 }
 0x6d5   :  { %v5944_v9 = vadd.f32 %v11766_v21, %v5943_v54  ;;  %v6443_v0 = vpop.f32.mrb[62].mxu1 }
 0x6d6   :  { %v6020_v43 = vmax.f32 %v5952_v55, 0.0  ;;  %v5955_v19 = vadd.f32 %v6532_v38, %v6443_v0  ;;  %v5946_v17 = vpop.f32.mrb[63].mxu1 }
 0x6d7   :  { %v6018_v35 = vmax.f32 %v5944_v9, 0.0  ;;  %v5947_v46 = vadd.f32 %v6532_v38, %v5946_v17 }
 0x6d8   :  { %6084 = vst.msk [vmem:[%s12306_s5 + $0x1f0] sm:$0xff] %vm98_vm6, %v6020_v43  ;;  %v6021_v23 = vmax.f32 %v5955_v19, 0.0 }
 0x6d9   :  { %6082 = vst.msk [vmem:[%s12306_s5 + $0x1e0] sm:$0xff] %vm98_vm6, %v6018_v35  ;;  %v6019_v21 = vmax.f32 %v5947_v46, 0.0 }
 0x6da   :  { %6085 = vst.msk [vmem:[%s12306_s5 + $0x1f8] sm:$0xff] %vm98_vm6, %v6021_v23 }
 0x6db   :  { %6083 = vst.msk [vmem:[%s12306_s5 + $0x1e8] sm:$0xff] %vm98_vm6, %v6019_v21 }

</bundles_post_ra>
